<compile_context>
chip_gen: v5e
topology: v5e:2x2
jax: 0.10.0
libtpu: 0.0.40
codegen_flags: <defaults>
</compile_context>

<pallas_src>
import functools
import math

import jax
import jax.numpy as jnp
from jax.experimental import pallas as pl
from jax.experimental.pallas import tpu as pltpu


# ----------------------------- PolyActive family -----------------------------
def _poly(fname, x):
    if fname == 'fr':
        return jnp.maximum(x, 0.0)
    if fname == 'fr6':
        return jnp.clip(x, 0.0, 6.0)
    if fname == 'fs':
        return x + jax.nn.sigmoid(x)
    if fname == 'fe':
        return -1.0 + 2.0 * x + jnp.exp(-x)
    if fname == 'fg':
        return 1.0 / (1.0 - x) - 1.0
    if fname == 'fx':
        return x
    if fname == 'f3':
        return x - x * x + x * x * x
    raise ValueError(f'unknown PolyActive fname: {fname}')


# ------------------- row-batched im2col 3x3 conv (stride 1) -------------------
def _conv3x3_flat(x, w, H, W, C):
    """3x3 / stride-1 / pad-1 conv as ONE im2col MXU matmul over the whole map.

    x: (H*W, C) bf16, row-major flattened (h-major).  w: (9*C, Cout) bf16 value
    (tap-major ky,kx then cin, matching HWIO.reshape(9*Cin, Cout)).
    Returns (H*W, Cout) f32.  Taps are sublane shifts of the flat activation with
    iota column masks, so no halo scratch / zero fill is needed and M = H*W.
    """
    HW = H * W
    pad = W + 1
    zp = jnp.zeros((pad, C), jnp.bfloat16)
    xp = jnp.concatenate([zp, x, zp], axis=0)                          # (HW+2W+2, C)
    col = jax.lax.broadcasted_iota(jnp.int32, (HW, C), 0) & (W - 1)    # w-in-row (W pow2)
    taps = []
    for dy in (-1, 0, 1):
        for dx in (-1, 0, 1):
            off = pad + dy * W + dx
            t = xp[off:off + HW, :]
            if dx == -1:
                t = jnp.where(col > 0, t, 0.0)
            elif dx == 1:
                t = jnp.where(col < W - 1, t, 0.0)
            taps.append(t)
    im2col = jnp.concatenate(taps, axis=1)                             # (HW, 9*C)
    return jnp.dot(im2col, w, preferred_element_type=jnp.float32)


# ----------------------------- ResPlain block ----------------------------------
def _res_plain_block(x, brefs, sel, H, W, cin, cout, stride, btype, downsample, fname):
    """One ResPlain block, fully resident in VMEM.  x: (H*W, cin) f32."""
    sa, ba, wa, sb, bb, wb = brefs
    act_a = jnp.maximum(x * sa[...] + ba[...], 0.0)                    # bn_a + relu_a
    skip = _poly(fname, act_a if btype == 'both_preact' else x)        # active() on skip
    ca = _conv3x3_flat(act_a.astype(jnp.bfloat16), wa[...], H, W, cin)  # conv_a (full res)
    if stride == 2:
        # stride-2 output == every other row/col of the stride-1 result, selected
        # in-kernel with a tiny 0/1 matrix on the MXU (no HBM round trip).
        ca = jnp.dot(sel, ca, preferred_element_type=jnp.float32)
        H, W = H // 2, W // 2
    act_b = jnp.maximum(ca * sb[...] + bb[...], 0.0)                   # bn_b + relu_b
    cb = _conv3x3_flat(act_b.astype(jnp.bfloat16), wb[...], H, W, cout)  # conv_b
    if downsample:
        # TODO(synk): DownsampleA not in the provided source; assumed the standard
        # AvgPool2d(kernel=1, stride) spatial subsample + torch.cat((x, x*0), dim=1).
        if stride == 2:
            skip = jnp.dot(sel, skip, preferred_element_type=jnp.float32)
        if cout > cin:
            skip = jnp.concatenate(
                [skip, jnp.zeros((H * W, cout - cin), jnp.float32)], axis=1)
    return _poly(fname, skip + cb), H, W


# ----------------------------- fused network kernel ----------------------------
def _xresnet_kernel(*refs, hw, stem_cin, block_cfgs, nsel, fname):
    it = iter(refs)
    x_ref = next(it)
    stem_w = next(it)
    block_refs = [tuple(next(it) for _ in range(6)) for _ in block_cfgs]
    sel_refs = [next(it) for _ in range(nsel)]
    sq_s = next(it)
    sq_b = next(it)
    fc_w = next(it)
    fc_b = next(it)
    o_ref = next(it)

    H, W = hw
    # --- PreProc stem ---
    # TODO(synk): PreProc not in the provided source; assumed CIFAR stem =
    # Conv2d(3, inplanes, kernel_size=3, stride=1, padding=1, bias=False).
    h = _conv3x3_flat(x_ref[0].astype(jnp.bfloat16), stem_w[...], H, W, stem_cin)

    # --- stage_1 .. stage_3 (ResPlain blocks) ---
    si = 0
    for cfg, brefs in zip(block_cfgs, block_refs):
        cin, cout, stride, btype, downsample = cfg
        sel = None
        if stride == 2:
            sel = sel_refs[si][...]
            si += 1
        h, H, W = _res_plain_block(h, brefs, sel, H, W, cin, cout, stride, btype,
                                   downsample, fname)

    # --- stage_4 = ReturnX() (identity on CIFAR) ---
    # TODO(synk): ReturnX not in the provided source; assumed identity.
    # --- squeeze (BN + ReLU + AdaAvgPool + ViewLayer) + classifier ---
    # TODO(synk): AdaAvgPool / ViewLayer not in the provided source; assumed
    # AdaptiveAvgPool2d(1) + flatten.
    y = jnp.maximum(h * sq_s[...] + sq_b[...], 0.0)                    # (H*W, C)
    pooled = jnp.sum(y, axis=0, keepdims=True) * (1.0 / (H * W))       # (1, C)
    o_ref[0] = (jnp.dot(pooled, fc_w[...], preferred_element_type=jnp.float32)
                + fc_b[...])


# ----------------------------- wrapper ------------------------------------------
def _subsample_matrix(H, W):
    """0/1 matrix S with (S @ flat(x))[i*Wo + j] = flat(x)[(2i)*W + 2j]."""
    Ho, Wo = H // 2, W // 2
    rows = jnp.arange(Ho * Wo)
    src = (rows // Wo) * (2 * W) + (rows % Wo) * 2
    return jnp.zeros((Ho * Wo, H * W), jnp.float32).at[rows, src].set(1.0)


def xresnet_forward(params, x_nchw, fname='fx'):
    x = jnp.transpose(x_nchw, (0, 2, 3, 1)).astype(jnp.float32)        # NCHW -> NHWC
    N, H, W, C0 = x.shape
    assert W & (W - 1) == 0, 'kernel assumes W is a power of two'
    x_flat = x.reshape(N, H * W, C0)

    cfgs = params['block_cfgs']
    sels = []
    hh, ww = H, W
    for (cin, cout, stride, btype, ds) in cfgs:
        if stride == 2:
            sels.append(_subsample_matrix(hh, ww))
            hh, ww = hh // 2, ww // 2

    inputs = [x_flat, params['stem_w']]
    for brefs in params['blocks']:
        inputs.extend(brefs)
    inputs.extend(sels)
    inputs.extend([params['sq_scale'], params['sq_bias'],
                   params['fc_w'], params['fc_b']])

    def _bcast_spec(a):
        return pl.BlockSpec(a.shape, lambda n, _nd=a.ndim: (0,) * _nd)

    in_specs = [pl.BlockSpec((1, H * W, C0), lambda n: (n, 0, 0))]
    in_specs += [_bcast_spec(a) for a in inputs[1:]]

    nlabels = params['nlabels']
    kernel = functools.partial(
        _xresnet_kernel, hw=(H, W), stem_cin=C0, block_cfgs=tuple(cfgs),
        nsel=len(sels), fname=fname)

    # advisory cost estimate
    flops = 2 * H * W * 9 * C0 * cfgs[0][0]
    hh, ww = H, W
    for (cin, cout, stride, btype, ds) in cfgs:
        flops += 2 * hh * ww * 9 * cin * cout
        if stride == 2:
            ho, wo = hh // 2, ww // 2
            flops += 2 * ho * wo * hh * ww * (cout + cin)
            hh, ww = ho, wo
        flops += 2 * hh * ww * 9 * cout * cout
    flops *= N
    bytes_accessed = (x_flat.size * 4 + N * nlabels * 4
                      + sum(int(a.size) * a.dtype.itemsize for a in inputs[1:]))

    out = pl.pallas_call(
        kernel,
        out_shape=jax.ShapeDtypeStruct((N, 1, nlabels), jnp.float32),
        grid=(N,),
        in_specs=in_specs,
        out_specs=pl.BlockSpec((1, 1, nlabels), lambda n: (n, 0, 0)),
        compiler_params=pltpu.CompilerParams(dimension_semantics=("parallel",)),
        cost_estimate=pl.CostEstimate(flops=int(flops), transcendentals=0,
                                      bytes_accessed=int(bytes_accessed)),
    )(*inputs)
    return out[:, 0, :]


# ----------------------------- parameters ---------------------------------------
def _kaiming_normal(key, shape):
    fan_in = shape[0] * shape[1] * shape[2]        # PyTorch default fan_in (kh*kw*Cin)
    std = math.sqrt(2.0 / fan_in)
    return std * jax.random.normal(key, shape, jnp.float32)


def _bn_affine(c, eps=1e-5):
    # Eval-mode BatchNorm folded to a per-channel affine; XResNet._init_params sets
    # gamma=1 / beta=0, fresh running stats are mean=0 / var=1.
    # TODO(synk): training-mode batch statistics are not modeled.
    gamma = jnp.ones((c,), jnp.float32)
    beta = jnp.zeros((c,), jnp.float32)
    mean = jnp.zeros((c,), jnp.float32)
    var = jnp.ones((c,), jnp.float32)
    scale = gamma / jnp.sqrt(var + eps)
    bias = beta - mean * scale
    return scale.reshape(1, c), bias.reshape(1, c)


def _flatten_conv_w(w_hwio):
    kh, kw, ci, co = w_hwio.shape
    return w_hwio.reshape(kh * kw * ci, co).astype(jnp.bfloat16)


def build_xresnet_params(key, inplanes=8, nblocks=(1, 1, 1), nlabels=10):
    nplanes = [inplanes, 2 * inplanes, 4 * inplanes]
    kit = iter(jax.random.split(key, 64))
    params = {}
    params['stem_w'] = _flatten_conv_w(_kaiming_normal(next(kit), (3, 3, 3, inplanes)))

    blocks, cfgs = [], []
    cur = inplanes
    for planes, nb, stride0 in zip(nplanes, nblocks, (1, 2, 2)):
        for bi in range(nb):
            stride = stride0 if bi == 0 else 1
            btype = 'both_preact' if bi == 0 else 'normal'
            downsample = (bi == 0) and (stride != 1 or cur != planes)
            sa, ba = _bn_affine(cur)
            sb, bb = _bn_affine(planes)
            wa = _flatten_conv_w(_kaiming_normal(next(kit), (3, 3, cur, planes)))
            wb = _flatten_conv_w(_kaiming_normal(next(kit), (3, 3, planes, planes)))
            blocks.append((sa, ba, wa, sb, bb, wb))
            cfgs.append((cur, planes, stride, btype, downsample))
            cur = planes
    params['blocks'] = blocks
    params['block_cfgs'] = cfgs

    sq_s, sq_b = _bn_affine(cur)
    params['sq_scale'], params['sq_bias'] = sq_s, sq_b
    bound = 1.0 / math.sqrt(cur)
    params['fc_w'] = jax.random.uniform(next(kit), (cur, nlabels), jnp.float32,
                                        -bound, bound)
    params['fc_b'] = jnp.zeros((1, nlabels), jnp.float32)   # zeroed by _init_params
    params['nlabels'] = nlabels
    return params


# ----------------------------- main ----------------------------------------------
if __name__ == "__main__":
    key = jax.random.PRNGKey(0)
    kp, kx = jax.random.split(key)
    # small XResNet: block='P', nblocks=(1,1,1), inplanes=8, bottle=1, active='fx',
    # dataset='cifar10' (10 labels); input batch=2, 3x16x16 (NCHW like PyTorch).
    params = build_xresnet_params(kp, inplanes=8, nblocks=(1, 1, 1), nlabels=10)
    x = jax.random.normal(kx, (2, 3, 16, 16), jnp.float32)

    fwd = jax.jit(lambda inp: xresnet_forward(params, inp, fname='fx'))
    logits = jax.block_until_ready(fwd(x))
    assert logits.shape == (2, 10) and logits.dtype == jnp.float32
    assert bool(jnp.all(jnp.isfinite(logits)))
    print("KERNEL_OK")
</pallas_src>

<mosaic_0001>
module attributes {stable_mosaic.version = 11 : i64} {
  func.func @_xresnet_kernel(%arg0: i32, %arg1: memref<1x256x3xf32, #tpu.memory_space<vmem>>, %arg2: memref<27x8xbf16, #tpu.memory_space<vmem>>, %arg3: memref<1x8xf32, #tpu.memory_space<vmem>>, %arg4: memref<1x8xf32, #tpu.memory_space<vmem>>, %arg5: memref<72x8xbf16, #tpu.memory_space<vmem>>, %arg6: memref<1x8xf32, #tpu.memory_space<vmem>>, %arg7: memref<1x8xf32, #tpu.memory_space<vmem>>, %arg8: memref<72x8xbf16, #tpu.memory_space<vmem>>, %arg9: memref<1x8xf32, #tpu.memory_space<vmem>>, %arg10: memref<1x8xf32, #tpu.memory_space<vmem>>, %arg11: memref<72x16xbf16, #tpu.memory_space<vmem>>, %arg12: memref<1x16xf32, #tpu.memory_space<vmem>>, %arg13: memref<1x16xf32, #tpu.memory_space<vmem>>, %arg14: memref<144x16xbf16, #tpu.memory_space<vmem>>, %arg15: memref<1x16xf32, #tpu.memory_space<vmem>>, %arg16: memref<1x16xf32, #tpu.memory_space<vmem>>, %arg17: memref<144x32xbf16, #tpu.memory_space<vmem>>, %arg18: memref<1x32xf32, #tpu.memory_space<vmem>>, %arg19: memref<1x32xf32, #tpu.memory_space<vmem>>, %arg20: memref<288x32xbf16, #tpu.memory_space<vmem>>, %arg21: memref<64x256xf32, #tpu.memory_space<vmem>>, %arg22: memref<16x64xf32, #tpu.memory_space<vmem>>, %arg23: memref<1x32xf32, #tpu.memory_space<vmem>>, %arg24: memref<1x32xf32, #tpu.memory_space<vmem>>, %arg25: memref<32x10xf32, #tpu.memory_space<vmem>>, %arg26: memref<1x10xf32, #tpu.memory_space<vmem>>, %arg27: memref<1x1x10xf32, #tpu.memory_space<vmem>>) attributes {dimension_semantics = [#tpu.dimension_semantics<parallel>], iteration_bounds = array<i64: 2>, scalar_prefetch = 0 : i64, scratch_operands = 0 : i64, tpu.core_type = #tpu.core_type<tc>, window_params = [{transform_indices = @transform_0, window_bounds = array<i64: 1, 256, 3>}, {pipeline_mode = #tpu.pipeline_mode<synchronous>, transform_indices = @transform_1, window_bounds = array<i64: 27, 8>}, {pipeline_mode = #tpu.pipeline_mode<synchronous>, transform_indices = @transform_2, window_bounds = array<i64: 1, 8>}, {pipeline_mode = #tpu.pipeline_mode<synchronous>, transform_indices = @transform_3, window_bounds = array<i64: 1, 8>}, {pipeline_mode = #tpu.pipeline_mode<synchronous>, transform_indices = @transform_4, window_bounds = array<i64: 72, 8>}, {pipeline_mode = #tpu.pipeline_mode<synchronous>, transform_indices = @transform_5, window_bounds = array<i64: 1, 8>}, {pipeline_mode = #tpu.pipeline_mode<synchronous>, transform_indices = @transform_6, window_bounds = array<i64: 1, 8>}, {pipeline_mode = #tpu.pipeline_mode<synchronous>, transform_indices = @transform_7, window_bounds = array<i64: 72, 8>}, {pipeline_mode = #tpu.pipeline_mode<synchronous>, transform_indices = @transform_8, window_bounds = array<i64: 1, 8>}, {pipeline_mode = #tpu.pipeline_mode<synchronous>, transform_indices = @transform_9, window_bounds = array<i64: 1, 8>}, {pipeline_mode = #tpu.pipeline_mode<synchronous>, transform_indices = @transform_10, window_bounds = array<i64: 72, 16>}, {pipeline_mode = #tpu.pipeline_mode<synchronous>, transform_indices = @transform_11, window_bounds = array<i64: 1, 16>}, {pipeline_mode = #tpu.pipeline_mode<synchronous>, transform_indices = @transform_12, window_bounds = array<i64: 1, 16>}, {pipeline_mode = #tpu.pipeline_mode<synchronous>, transform_indices = @transform_13, window_bounds = array<i64: 144, 16>}, {pipeline_mode = #tpu.pipeline_mode<synchronous>, transform_indices = @transform_14, window_bounds = array<i64: 1, 16>}, {pipeline_mode = #tpu.pipeline_mode<synchronous>, transform_indices = @transform_15, window_bounds = array<i64: 1, 16>}, {pipeline_mode = #tpu.pipeline_mode<synchronous>, transform_indices = @transform_16, window_bounds = array<i64: 144, 32>}, {pipeline_mode = #tpu.pipeline_mode<synchronous>, transform_indices = @transform_17, window_bounds = array<i64: 1, 32>}, {pipeline_mode = #tpu.pipeline_mode<synchronous>, transform_indices = @transform_18, window_bounds = array<i64: 1, 32>}, {pipeline_mode = #tpu.pipeline_mode<synchronous>, transform_indices = @transform_19, window_bounds = array<i64: 288, 32>}, {pipeline_mode = #tpu.pipeline_mode<synchronous>, transform_indices = @transform_20, window_bounds = array<i64: 64, 256>}, {pipeline_mode = #tpu.pipeline_mode<synchronous>, transform_indices = @transform_21, window_bounds = array<i64: 16, 64>}, {pipeline_mode = #tpu.pipeline_mode<synchronous>, transform_indices = @transform_22, window_bounds = array<i64: 1, 32>}, {pipeline_mode = #tpu.pipeline_mode<synchronous>, transform_indices = @transform_23, window_bounds = array<i64: 1, 32>}, {pipeline_mode = #tpu.pipeline_mode<synchronous>, transform_indices = @transform_24, window_bounds = array<i64: 32, 10>}, {pipeline_mode = #tpu.pipeline_mode<synchronous>, transform_indices = @transform_25, window_bounds = array<i64: 1, 10>}, {transform_indices = @transform_26, window_bounds = array<i64: 1, 1, 10>}]} {
    %c0 = arith.constant 0 : index
    %c0_0 = arith.constant 0 : index
    %c0_1 = arith.constant 0 : index
    %0 = vector.load %arg1[%c0, %c0_0, %c0_1] : memref<1x256x3xf32, #tpu.memory_space<vmem>>, vector<1x256x3xf32>
    %1 = vector.shape_cast %0 : vector<1x256x3xf32> to vector<256x3xf32>
    %2 = arith.truncf %1 : vector<256x3xf32> to vector<256x3xbf16>
    %c0_2 = arith.constant 0 : index
    %c0_3 = arith.constant 0 : index
    %3 = vector.load %arg2[%c0_2, %c0_3] : memref<27x8xbf16, #tpu.memory_space<vmem>>, vector<27x8xbf16>
    %cst = arith.constant 0.000000e+00 : bf16
    %4 = vector.broadcast %cst : bf16 to vector<17x3xbf16>
    %5 = tpu.concatenate %4, %2, %4 in 0 : vector<17x3xbf16>, vector<256x3xbf16>, vector<17x3xbf16> -> vector<290x3xbf16>
    %6 = tpu.iota {dimensions = array<i32: 0>} : vector<256x3xi32>
    %c15_i32 = arith.constant 15 : i32
    %7 = vector.broadcast %c15_i32 : i32 to vector<256x3xi32>
    %8 = arith.andi %6, %7 : vector<256x3xi32>
    %9 = vector.extract_strided_slice %5 {offsets = [0, 0], sizes = [256, 3], strides = [1, 1]} : vector<290x3xbf16> to vector<256x3xbf16>
    %c0_i32 = arith.constant 0 : i32
    %10 = vector.broadcast %c0_i32 : i32 to vector<256x3xi32>
    %11 = arith.cmpi sgt, %8, %10 : vector<256x3xi32>
    %cst_4 = arith.constant 0.000000e+00 : f32
    %12 = arith.truncf %cst_4 : f32 to bf16
    %13 = vector.broadcast %12 : bf16 to vector<256x3xbf16>
    %14 = arith.select %11, %9, %13 : vector<256x3xi1>, vector<256x3xbf16>
    %15 = vector.extract_strided_slice %5 {offsets = [1, 0], sizes = [256, 3], strides = [1, 1]} : vector<290x3xbf16> to vector<256x3xbf16>
    %16 = vector.extract_strided_slice %5 {offsets = [2, 0], sizes = [256, 3], strides = [1, 1]} : vector<290x3xbf16> to vector<256x3xbf16>
    %c15_i32_5 = arith.constant 15 : i32
    %17 = vector.broadcast %c15_i32_5 : i32 to vector<256x3xi32>
    %18 = arith.cmpi slt, %8, %17 : vector<256x3xi32>
    %cst_6 = arith.constant 0.000000e+00 : f32
    %19 = arith.truncf %cst_6 : f32 to bf16
    %20 = vector.broadcast %19 : bf16 to vector<256x3xbf16>
    %21 = arith.select %18, %16, %20 : vector<256x3xi1>, vector<256x3xbf16>
    %22 = vector.extract_strided_slice %5 {offsets = [16, 0], sizes = [256, 3], strides = [1, 1]} : vector<290x3xbf16> to vector<256x3xbf16>
    %c0_i32_7 = arith.constant 0 : i32
    %23 = vector.broadcast %c0_i32_7 : i32 to vector<256x3xi32>
    %24 = arith.cmpi sgt, %8, %23 : vector<256x3xi32>
    %cst_8 = arith.constant 0.000000e+00 : f32
    %25 = arith.truncf %cst_8 : f32 to bf16
    %26 = vector.broadcast %25 : bf16 to vector<256x3xbf16>
    %27 = arith.select %24, %22, %26 : vector<256x3xi1>, vector<256x3xbf16>
    %28 = vector.extract_strided_slice %5 {offsets = [17, 0], sizes = [256, 3], strides = [1, 1]} : vector<290x3xbf16> to vector<256x3xbf16>
    %29 = vector.extract_strided_slice %5 {offsets = [18, 0], sizes = [256, 3], strides = [1, 1]} : vector<290x3xbf16> to vector<256x3xbf16>
    %c15_i32_9 = arith.constant 15 : i32
    %30 = vector.broadcast %c15_i32_9 : i32 to vector<256x3xi32>
    %31 = arith.cmpi slt, %8, %30 : vector<256x3xi32>
    %cst_10 = arith.constant 0.000000e+00 : f32
    %32 = arith.truncf %cst_10 : f32 to bf16
    %33 = vector.broadcast %32 : bf16 to vector<256x3xbf16>
    %34 = arith.select %31, %29, %33 : vector<256x3xi1>, vector<256x3xbf16>
    %35 = vector.extract_strided_slice %5 {offsets = [32, 0], sizes = [256, 3], strides = [1, 1]} : vector<290x3xbf16> to vector<256x3xbf16>
    %c0_i32_11 = arith.constant 0 : i32
    %36 = vector.broadcast %c0_i32_11 : i32 to vector<256x3xi32>
    %37 = arith.cmpi sgt, %8, %36 : vector<256x3xi32>
    %cst_12 = arith.constant 0.000000e+00 : f32
    %38 = arith.truncf %cst_12 : f32 to bf16
    %39 = vector.broadcast %38 : bf16 to vector<256x3xbf16>
    %40 = arith.select %37, %35, %39 : vector<256x3xi1>, vector<256x3xbf16>
    %41 = vector.extract_strided_slice %5 {offsets = [33, 0], sizes = [256, 3], strides = [1, 1]} : vector<290x3xbf16> to vector<256x3xbf16>
    %42 = vector.extract_strided_slice %5 {offsets = [34, 0], sizes = [256, 3], strides = [1, 1]} : vector<290x3xbf16> to vector<256x3xbf16>
    %c15_i32_13 = arith.constant 15 : i32
    %43 = vector.broadcast %c15_i32_13 : i32 to vector<256x3xi32>
    %44 = arith.cmpi slt, %8, %43 : vector<256x3xi32>
    %cst_14 = arith.constant 0.000000e+00 : f32
    %45 = arith.truncf %cst_14 : f32 to bf16
    %46 = vector.broadcast %45 : bf16 to vector<256x3xbf16>
    %47 = arith.select %44, %42, %46 : vector<256x3xi1>, vector<256x3xbf16>
    %48 = tpu.concatenate %14, %15, %21, %27, %28, %34, %40, %41, %47 in 1 : vector<256x3xbf16>, vector<256x3xbf16>, vector<256x3xbf16>, vector<256x3xbf16>, vector<256x3xbf16>, vector<256x3xbf16>, vector<256x3xbf16>, vector<256x3xbf16>, vector<256x3xbf16> -> vector<256x27xbf16>
    %cst_15 = arith.constant dense<0.000000e+00> : vector<256x8xf32>
    %49 = tpu.matmul %48, %3, %cst_15 {dimension_numbers = #tpu.dot_dimension_numbers<[1], [0], [0], [1], [0, 0, 1, 1], [], []>} : vector<256x27xbf16>, vector<27x8xbf16>, vector<256x8xf32> -> vector<256x8xf32>
    %c0_16 = arith.constant 0 : index
    %c0_17 = arith.constant 0 : index
    %50 = vector.load %arg3[%c0_16, %c0_17] : memref<1x8xf32, #tpu.memory_space<vmem>>, vector<1x8xf32>
    %51 = vector.broadcast %50 : vector<1x8xf32> to vector<256x8xf32>
    %52 = arith.mulf %49, %51 : vector<256x8xf32>
    %c0_18 = arith.constant 0 : index
    %c0_19 = arith.constant 0 : index
    %53 = vector.load %arg4[%c0_18, %c0_19] : memref<1x8xf32, #tpu.memory_space<vmem>>, vector<1x8xf32>
    %54 = vector.broadcast %53 : vector<1x8xf32> to vector<256x8xf32>
    %55 = arith.addf %52, %54 : vector<256x8xf32>
    %cst_20 = arith.constant 0.000000e+00 : f32
    %56 = vector.broadcast %cst_20 : f32 to vector<256x8xf32>
    %57 = arith.maximumf %55, %56 : vector<256x8xf32>
    %58 = arith.truncf %57 : vector<256x8xf32> to vector<256x8xbf16>
    %c0_21 = arith.constant 0 : index
    %c0_22 = arith.constant 0 : index
    %59 = vector.load %arg5[%c0_21, %c0_22] : memref<72x8xbf16, #tpu.memory_space<vmem>>, vector<72x8xbf16>
    %cst_23 = arith.constant 0.000000e+00 : bf16
    %60 = vector.broadcast %cst_23 : bf16 to vector<17x8xbf16>
    %61 = tpu.concatenate %60, %58, %60 in 0 : vector<17x8xbf16>, vector<256x8xbf16>, vector<17x8xbf16> -> vector<290x8xbf16>
    %62 = tpu.iota {dimensions = array<i32: 0>} : vector<256x8xi32>
    %c15_i32_24 = arith.constant 15 : i32
    %63 = vector.broadcast %c15_i32_24 : i32 to vector<256x8xi32>
    %64 = arith.andi %62, %63 : vector<256x8xi32>
    %65 = vector.extract_strided_slice %61 {offsets = [0, 0], sizes = [256, 8], strides = [1, 1]} : vector<290x8xbf16> to vector<256x8xbf16>
    %c0_i32_25 = arith.constant 0 : i32
    %66 = vector.broadcast %c0_i32_25 : i32 to vector<256x8xi32>
    %67 = arith.cmpi sgt, %64, %66 : vector<256x8xi32>
    %cst_26 = arith.constant 0.000000e+00 : f32
    %68 = arith.truncf %cst_26 : f32 to bf16
    %69 = vector.broadcast %68 : bf16 to vector<256x8xbf16>
    %70 = arith.select %67, %65, %69 : vector<256x8xi1>, vector<256x8xbf16>
    %71 = vector.extract_strided_slice %61 {offsets = [1, 0], sizes = [256, 8], strides = [1, 1]} : vector<290x8xbf16> to vector<256x8xbf16>
    %72 = vector.extract_strided_slice %61 {offsets = [2, 0], sizes = [256, 8], strides = [1, 1]} : vector<290x8xbf16> to vector<256x8xbf16>
    %c15_i32_27 = arith.constant 15 : i32
    %73 = vector.broadcast %c15_i32_27 : i32 to vector<256x8xi32>
    %74 = arith.cmpi slt, %64, %73 : vector<256x8xi32>
    %cst_28 = arith.constant 0.000000e+00 : f32
    %75 = arith.truncf %cst_28 : f32 to bf16
    %76 = vector.broadcast %75 : bf16 to vector<256x8xbf16>
    %77 = arith.select %74, %72, %76 : vector<256x8xi1>, vector<256x8xbf16>
    %78 = vector.extract_strided_slice %61 {offsets = [16, 0], sizes = [256, 8], strides = [1, 1]} : vector<290x8xbf16> to vector<256x8xbf16>
    %c0_i32_29 = arith.constant 0 : i32
    %79 = vector.broadcast %c0_i32_29 : i32 to vector<256x8xi32>
    %80 = arith.cmpi sgt, %64, %79 : vector<256x8xi32>
    %cst_30 = arith.constant 0.000000e+00 : f32
    %81 = arith.truncf %cst_30 : f32 to bf16
    %82 = vector.broadcast %81 : bf16 to vector<256x8xbf16>
    %83 = arith.select %80, %78, %82 : vector<256x8xi1>, vector<256x8xbf16>
    %84 = vector.extract_strided_slice %61 {offsets = [17, 0], sizes = [256, 8], strides = [1, 1]} : vector<290x8xbf16> to vector<256x8xbf16>
    %85 = vector.extract_strided_slice %61 {offsets = [18, 0], sizes = [256, 8], strides = [1, 1]} : vector<290x8xbf16> to vector<256x8xbf16>
    %c15_i32_31 = arith.constant 15 : i32
    %86 = vector.broadcast %c15_i32_31 : i32 to vector<256x8xi32>
    %87 = arith.cmpi slt, %64, %86 : vector<256x8xi32>
    %cst_32 = arith.constant 0.000000e+00 : f32
    %88 = arith.truncf %cst_32 : f32 to bf16
    %89 = vector.broadcast %88 : bf16 to vector<256x8xbf16>
    %90 = arith.select %87, %85, %89 : vector<256x8xi1>, vector<256x8xbf16>
    %91 = vector.extract_strided_slice %61 {offsets = [32, 0], sizes = [256, 8], strides = [1, 1]} : vector<290x8xbf16> to vector<256x8xbf16>
    %c0_i32_33 = arith.constant 0 : i32
    %92 = vector.broadcast %c0_i32_33 : i32 to vector<256x8xi32>
    %93 = arith.cmpi sgt, %64, %92 : vector<256x8xi32>
    %cst_34 = arith.constant 0.000000e+00 : f32
    %94 = arith.truncf %cst_34 : f32 to bf16
    %95 = vector.broadcast %94 : bf16 to vector<256x8xbf16>
    %96 = arith.select %93, %91, %95 : vector<256x8xi1>, vector<256x8xbf16>
    %97 = vector.extract_strided_slice %61 {offsets = [33, 0], sizes = [256, 8], strides = [1, 1]} : vector<290x8xbf16> to vector<256x8xbf16>
    %98 = vector.extract_strided_slice %61 {offsets = [34, 0], sizes = [256, 8], strides = [1, 1]} : vector<290x8xbf16> to vector<256x8xbf16>
    %c15_i32_35 = arith.constant 15 : i32
    %99 = vector.broadcast %c15_i32_35 : i32 to vector<256x8xi32>
    %100 = arith.cmpi slt, %64, %99 : vector<256x8xi32>
    %cst_36 = arith.constant 0.000000e+00 : f32
    %101 = arith.truncf %cst_36 : f32 to bf16
    %102 = vector.broadcast %101 : bf16 to vector<256x8xbf16>
    %103 = arith.select %100, %98, %102 : vector<256x8xi1>, vector<256x8xbf16>
    %104 = tpu.concatenate %70, %71, %77, %83, %84, %90, %96, %97, %103 in 1 : vector<256x8xbf16>, vector<256x8xbf16>, vector<256x8xbf16>, vector<256x8xbf16>, vector<256x8xbf16>, vector<256x8xbf16>, vector<256x8xbf16>, vector<256x8xbf16>, vector<256x8xbf16> -> vector<256x72xbf16>
    %cst_37 = arith.constant dense<0.000000e+00> : vector<256x8xf32>
    %105 = tpu.matmul %104, %59, %cst_37 {dimension_numbers = #tpu.dot_dimension_numbers<[1], [0], [0], [1], [0, 0, 1, 1], [], []>} : vector<256x72xbf16>, vector<72x8xbf16>, vector<256x8xf32> -> vector<256x8xf32>
    %c0_38 = arith.constant 0 : index
    %c0_39 = arith.constant 0 : index
    %106 = vector.load %arg6[%c0_38, %c0_39] : memref<1x8xf32, #tpu.memory_space<vmem>>, vector<1x8xf32>
    %107 = vector.broadcast %106 : vector<1x8xf32> to vector<256x8xf32>
    %108 = arith.mulf %105, %107 : vector<256x8xf32>
    %c0_40 = arith.constant 0 : index
    %c0_41 = arith.constant 0 : index
    %109 = vector.load %arg7[%c0_40, %c0_41] : memref<1x8xf32, #tpu.memory_space<vmem>>, vector<1x8xf32>
    %110 = vector.broadcast %109 : vector<1x8xf32> to vector<256x8xf32>
    %111 = arith.addf %108, %110 : vector<256x8xf32>
    %cst_42 = arith.constant 0.000000e+00 : f32
    %112 = vector.broadcast %cst_42 : f32 to vector<256x8xf32>
    %113 = arith.maximumf %111, %112 : vector<256x8xf32>
    %114 = arith.truncf %113 : vector<256x8xf32> to vector<256x8xbf16>
    %c0_43 = arith.constant 0 : index
    %c0_44 = arith.constant 0 : index
    %115 = vector.load %arg8[%c0_43, %c0_44] : memref<72x8xbf16, #tpu.memory_space<vmem>>, vector<72x8xbf16>
    %cst_45 = arith.constant 0.000000e+00 : bf16
    %116 = vector.broadcast %cst_45 : bf16 to vector<17x8xbf16>
    %117 = tpu.concatenate %116, %114, %116 in 0 : vector<17x8xbf16>, vector<256x8xbf16>, vector<17x8xbf16> -> vector<290x8xbf16>
    %118 = tpu.iota {dimensions = array<i32: 0>} : vector<256x8xi32>
    %c15_i32_46 = arith.constant 15 : i32
    %119 = vector.broadcast %c15_i32_46 : i32 to vector<256x8xi32>
    %120 = arith.andi %118, %119 : vector<256x8xi32>
    %121 = vector.extract_strided_slice %117 {offsets = [0, 0], sizes = [256, 8], strides = [1, 1]} : vector<290x8xbf16> to vector<256x8xbf16>
    %c0_i32_47 = arith.constant 0 : i32
    %122 = vector.broadcast %c0_i32_47 : i32 to vector<256x8xi32>
    %123 = arith.cmpi sgt, %120, %122 : vector<256x8xi32>
    %cst_48 = arith.constant 0.000000e+00 : f32
    %124 = arith.truncf %cst_48 : f32 to bf16
    %125 = vector.broadcast %124 : bf16 to vector<256x8xbf16>
    %126 = arith.select %123, %121, %125 : vector<256x8xi1>, vector<256x8xbf16>
    %127 = vector.extract_strided_slice %117 {offsets = [1, 0], sizes = [256, 8], strides = [1, 1]} : vector<290x8xbf16> to vector<256x8xbf16>
    %128 = vector.extract_strided_slice %117 {offsets = [2, 0], sizes = [256, 8], strides = [1, 1]} : vector<290x8xbf16> to vector<256x8xbf16>
    %c15_i32_49 = arith.constant 15 : i32
    %129 = vector.broadcast %c15_i32_49 : i32 to vector<256x8xi32>
    %130 = arith.cmpi slt, %120, %129 : vector<256x8xi32>
    %cst_50 = arith.constant 0.000000e+00 : f32
    %131 = arith.truncf %cst_50 : f32 to bf16
    %132 = vector.broadcast %131 : bf16 to vector<256x8xbf16>
    %133 = arith.select %130, %128, %132 : vector<256x8xi1>, vector<256x8xbf16>
    %134 = vector.extract_strided_slice %117 {offsets = [16, 0], sizes = [256, 8], strides = [1, 1]} : vector<290x8xbf16> to vector<256x8xbf16>
    %c0_i32_51 = arith.constant 0 : i32
    %135 = vector.broadcast %c0_i32_51 : i32 to vector<256x8xi32>
    %136 = arith.cmpi sgt, %120, %135 : vector<256x8xi32>
    %cst_52 = arith.constant 0.000000e+00 : f32
    %137 = arith.truncf %cst_52 : f32 to bf16
    %138 = vector.broadcast %137 : bf16 to vector<256x8xbf16>
    %139 = arith.select %136, %134, %138 : vector<256x8xi1>, vector<256x8xbf16>
    %140 = vector.extract_strided_slice %117 {offsets = [17, 0], sizes = [256, 8], strides = [1, 1]} : vector<290x8xbf16> to vector<256x8xbf16>
    %141 = vector.extract_strided_slice %117 {offsets = [18, 0], sizes = [256, 8], strides = [1, 1]} : vector<290x8xbf16> to vector<256x8xbf16>
    %c15_i32_53 = arith.constant 15 : i32
    %142 = vector.broadcast %c15_i32_53 : i32 to vector<256x8xi32>
    %143 = arith.cmpi slt, %120, %142 : vector<256x8xi32>
    %cst_54 = arith.constant 0.000000e+00 : f32
    %144 = arith.truncf %cst_54 : f32 to bf16
    %145 = vector.broadcast %144 : bf16 to vector<256x8xbf16>
    %146 = arith.select %143, %141, %145 : vector<256x8xi1>, vector<256x8xbf16>
    %147 = vector.extract_strided_slice %117 {offsets = [32, 0], sizes = [256, 8], strides = [1, 1]} : vector<290x8xbf16> to vector<256x8xbf16>
    %c0_i32_55 = arith.constant 0 : i32
    %148 = vector.broadcast %c0_i32_55 : i32 to vector<256x8xi32>
    %149 = arith.cmpi sgt, %120, %148 : vector<256x8xi32>
    %cst_56 = arith.constant 0.000000e+00 : f32
    %150 = arith.truncf %cst_56 : f32 to bf16
    %151 = vector.broadcast %150 : bf16 to vector<256x8xbf16>
    %152 = arith.select %149, %147, %151 : vector<256x8xi1>, vector<256x8xbf16>
    %153 = vector.extract_strided_slice %117 {offsets = [33, 0], sizes = [256, 8], strides = [1, 1]} : vector<290x8xbf16> to vector<256x8xbf16>
    %154 = vector.extract_strided_slice %117 {offsets = [34, 0], sizes = [256, 8], strides = [1, 1]} : vector<290x8xbf16> to vector<256x8xbf16>
    %c15_i32_57 = arith.constant 15 : i32
    %155 = vector.broadcast %c15_i32_57 : i32 to vector<256x8xi32>
    %156 = arith.cmpi slt, %120, %155 : vector<256x8xi32>
    %cst_58 = arith.constant 0.000000e+00 : f32
    %157 = arith.truncf %cst_58 : f32 to bf16
    %158 = vector.broadcast %157 : bf16 to vector<256x8xbf16>
    %159 = arith.select %156, %154, %158 : vector<256x8xi1>, vector<256x8xbf16>
    %160 = tpu.concatenate %126, %127, %133, %139, %140, %146, %152, %153, %159 in 1 : vector<256x8xbf16>, vector<256x8xbf16>, vector<256x8xbf16>, vector<256x8xbf16>, vector<256x8xbf16>, vector<256x8xbf16>, vector<256x8xbf16>, vector<256x8xbf16>, vector<256x8xbf16> -> vector<256x72xbf16>
    %cst_59 = arith.constant dense<0.000000e+00> : vector<256x8xf32>
    %161 = tpu.matmul %160, %115, %cst_59 {dimension_numbers = #tpu.dot_dimension_numbers<[1], [0], [0], [1], [0, 0, 1, 1], [], []>} : vector<256x72xbf16>, vector<72x8xbf16>, vector<256x8xf32> -> vector<256x8xf32>
    %162 = arith.addf %57, %161 : vector<256x8xf32>
    %c0_60 = arith.constant 0 : index
    %c0_61 = arith.constant 0 : index
    %163 = vector.load %arg21[%c0_60, %c0_61] : memref<64x256xf32, #tpu.memory_space<vmem>>, vector<64x256xf32>
    %c0_62 = arith.constant 0 : index
    %c0_63 = arith.constant 0 : index
    %164 = vector.load %arg9[%c0_62, %c0_63] : memref<1x8xf32, #tpu.memory_space<vmem>>, vector<1x8xf32>
    %165 = vector.broadcast %164 : vector<1x8xf32> to vector<256x8xf32>
    %166 = arith.mulf %162, %165 : vector<256x8xf32>
    %c0_64 = arith.constant 0 : index
    %c0_65 = arith.constant 0 : index
    %167 = vector.load %arg10[%c0_64, %c0_65] : memref<1x8xf32, #tpu.memory_space<vmem>>, vector<1x8xf32>
    %168 = vector.broadcast %167 : vector<1x8xf32> to vector<256x8xf32>
    %169 = arith.addf %166, %168 : vector<256x8xf32>
    %cst_66 = arith.constant 0.000000e+00 : f32
    %170 = vector.broadcast %cst_66 : f32 to vector<256x8xf32>
    %171 = arith.maximumf %169, %170 : vector<256x8xf32>
    %172 = arith.truncf %171 : vector<256x8xf32> to vector<256x8xbf16>
    %c0_67 = arith.constant 0 : index
    %c0_68 = arith.constant 0 : index
    %173 = vector.load %arg11[%c0_67, %c0_68] : memref<72x16xbf16, #tpu.memory_space<vmem>>, vector<72x16xbf16>
    %cst_69 = arith.constant 0.000000e+00 : bf16
    %174 = vector.broadcast %cst_69 : bf16 to vector<17x8xbf16>
    %175 = tpu.concatenate %174, %172, %174 in 0 : vector<17x8xbf16>, vector<256x8xbf16>, vector<17x8xbf16> -> vector<290x8xbf16>
    %176 = tpu.iota {dimensions = array<i32: 0>} : vector<256x8xi32>
    %c15_i32_70 = arith.constant 15 : i32
    %177 = vector.broadcast %c15_i32_70 : i32 to vector<256x8xi32>
    %178 = arith.andi %176, %177 : vector<256x8xi32>
    %179 = vector.extract_strided_slice %175 {offsets = [0, 0], sizes = [256, 8], strides = [1, 1]} : vector<290x8xbf16> to vector<256x8xbf16>
    %c0_i32_71 = arith.constant 0 : i32
    %180 = vector.broadcast %c0_i32_71 : i32 to vector<256x8xi32>
    %181 = arith.cmpi sgt, %178, %180 : vector<256x8xi32>
    %cst_72 = arith.constant 0.000000e+00 : f32
    %182 = arith.truncf %cst_72 : f32 to bf16
    %183 = vector.broadcast %182 : bf16 to vector<256x8xbf16>
    %184 = arith.select %181, %179, %183 : vector<256x8xi1>, vector<256x8xbf16>
    %185 = vector.extract_strided_slice %175 {offsets = [1, 0], sizes = [256, 8], strides = [1, 1]} : vector<290x8xbf16> to vector<256x8xbf16>
    %186 = vector.extract_strided_slice %175 {offsets = [2, 0], sizes = [256, 8], strides = [1, 1]} : vector<290x8xbf16> to vector<256x8xbf16>
    %c15_i32_73 = arith.constant 15 : i32
    %187 = vector.broadcast %c15_i32_73 : i32 to vector<256x8xi32>
    %188 = arith.cmpi slt, %178, %187 : vector<256x8xi32>
    %cst_74 = arith.constant 0.000000e+00 : f32
    %189 = arith.truncf %cst_74 : f32 to bf16
    %190 = vector.broadcast %189 : bf16 to vector<256x8xbf16>
    %191 = arith.select %188, %186, %190 : vector<256x8xi1>, vector<256x8xbf16>
    %192 = vector.extract_strided_slice %175 {offsets = [16, 0], sizes = [256, 8], strides = [1, 1]} : vector<290x8xbf16> to vector<256x8xbf16>
    %c0_i32_75 = arith.constant 0 : i32
    %193 = vector.broadcast %c0_i32_75 : i32 to vector<256x8xi32>
    %194 = arith.cmpi sgt, %178, %193 : vector<256x8xi32>
    %cst_76 = arith.constant 0.000000e+00 : f32
    %195 = arith.truncf %cst_76 : f32 to bf16
    %196 = vector.broadcast %195 : bf16 to vector<256x8xbf16>
    %197 = arith.select %194, %192, %196 : vector<256x8xi1>, vector<256x8xbf16>
    %198 = vector.extract_strided_slice %175 {offsets = [17, 0], sizes = [256, 8], strides = [1, 1]} : vector<290x8xbf16> to vector<256x8xbf16>
    %199 = vector.extract_strided_slice %175 {offsets = [18, 0], sizes = [256, 8], strides = [1, 1]} : vector<290x8xbf16> to vector<256x8xbf16>
    %c15_i32_77 = arith.constant 15 : i32
    %200 = vector.broadcast %c15_i32_77 : i32 to vector<256x8xi32>
    %201 = arith.cmpi slt, %178, %200 : vector<256x8xi32>
    %cst_78 = arith.constant 0.000000e+00 : f32
    %202 = arith.truncf %cst_78 : f32 to bf16
    %203 = vector.broadcast %202 : bf16 to vector<256x8xbf16>
    %204 = arith.select %201, %199, %203 : vector<256x8xi1>, vector<256x8xbf16>
    %205 = vector.extract_strided_slice %175 {offsets = [32, 0], sizes = [256, 8], strides = [1, 1]} : vector<290x8xbf16> to vector<256x8xbf16>
    %c0_i32_79 = arith.constant 0 : i32
    %206 = vector.broadcast %c0_i32_79 : i32 to vector<256x8xi32>
    %207 = arith.cmpi sgt, %178, %206 : vector<256x8xi32>
    %cst_80 = arith.constant 0.000000e+00 : f32
    %208 = arith.truncf %cst_80 : f32 to bf16
    %209 = vector.broadcast %208 : bf16 to vector<256x8xbf16>
    %210 = arith.select %207, %205, %209 : vector<256x8xi1>, vector<256x8xbf16>
    %211 = vector.extract_strided_slice %175 {offsets = [33, 0], sizes = [256, 8], strides = [1, 1]} : vector<290x8xbf16> to vector<256x8xbf16>
    %212 = vector.extract_strided_slice %175 {offsets = [34, 0], sizes = [256, 8], strides = [1, 1]} : vector<290x8xbf16> to vector<256x8xbf16>
    %c15_i32_81 = arith.constant 15 : i32
    %213 = vector.broadcast %c15_i32_81 : i32 to vector<256x8xi32>
    %214 = arith.cmpi slt, %178, %213 : vector<256x8xi32>
    %cst_82 = arith.constant 0.000000e+00 : f32
    %215 = arith.truncf %cst_82 : f32 to bf16
    %216 = vector.broadcast %215 : bf16 to vector<256x8xbf16>
    %217 = arith.select %214, %212, %216 : vector<256x8xi1>, vector<256x8xbf16>
    %218 = tpu.concatenate %184, %185, %191, %197, %198, %204, %210, %211, %217 in 1 : vector<256x8xbf16>, vector<256x8xbf16>, vector<256x8xbf16>, vector<256x8xbf16>, vector<256x8xbf16>, vector<256x8xbf16>, vector<256x8xbf16>, vector<256x8xbf16>, vector<256x8xbf16> -> vector<256x72xbf16>
    %cst_83 = arith.constant dense<0.000000e+00> : vector<256x16xf32>
    %219 = tpu.matmul %218, %173, %cst_83 {dimension_numbers = #tpu.dot_dimension_numbers<[1], [0], [0], [1], [0, 0, 1, 1], [], []>} : vector<256x72xbf16>, vector<72x16xbf16>, vector<256x16xf32> -> vector<256x16xf32>
    %cst_84 = arith.constant dense<0.000000e+00> : vector<64x16xf32>
    %220 = tpu.matmul %163, %219, %cst_84 {dimension_numbers = #tpu.dot_dimension_numbers<[1], [0], [0], [1], [0, 0, 1, 1], [], []>} : vector<64x256xf32>, vector<256x16xf32>, vector<64x16xf32> -> vector<64x16xf32>
    %c0_85 = arith.constant 0 : index
    %c0_86 = arith.constant 0 : index
    %221 = vector.load %arg12[%c0_85, %c0_86] : memref<1x16xf32, #tpu.memory_space<vmem>>, vector<1x16xf32>
    %222 = vector.broadcast %221 : vector<1x16xf32> to vector<64x16xf32>
    %223 = arith.mulf %220, %222 : vector<64x16xf32>
    %c0_87 = arith.constant 0 : index
    %c0_88 = arith.constant 0 : index
    %224 = vector.load %arg13[%c0_87, %c0_88] : memref<1x16xf32, #tpu.memory_space<vmem>>, vector<1x16xf32>
    %225 = vector.broadcast %224 : vector<1x16xf32> to vector<64x16xf32>
    %226 = arith.addf %223, %225 : vector<64x16xf32>
    %cst_89 = arith.constant 0.000000e+00 : f32
    %227 = vector.broadcast %cst_89 : f32 to vector<64x16xf32>
    %228 = arith.maximumf %226, %227 : vector<64x16xf32>
    %229 = arith.truncf %228 : vector<64x16xf32> to vector<64x16xbf16>
    %c0_90 = arith.constant 0 : index
    %c0_91 = arith.constant 0 : index
    %230 = vector.load %arg14[%c0_90, %c0_91] : memref<144x16xbf16, #tpu.memory_space<vmem>>, vector<144x16xbf16>
    %cst_92 = arith.constant 0.000000e+00 : bf16
    %231 = vector.broadcast %cst_92 : bf16 to vector<9x16xbf16>
    %232 = tpu.concatenate %231, %229, %231 in 0 : vector<9x16xbf16>, vector<64x16xbf16>, vector<9x16xbf16> -> vector<82x16xbf16>
    %233 = tpu.iota {dimensions = array<i32: 0>} : vector<64x16xi32>
    %c7_i32 = arith.constant 7 : i32
    %234 = vector.broadcast %c7_i32 : i32 to vector<64x16xi32>
    %235 = arith.andi %233, %234 : vector<64x16xi32>
    %236 = vector.extract_strided_slice %232 {offsets = [0, 0], sizes = [64, 16], strides = [1, 1]} : vector<82x16xbf16> to vector<64x16xbf16>
    %c0_i32_93 = arith.constant 0 : i32
    %237 = vector.broadcast %c0_i32_93 : i32 to vector<64x16xi32>
    %238 = arith.cmpi sgt, %235, %237 : vector<64x16xi32>
    %cst_94 = arith.constant 0.000000e+00 : f32
    %239 = arith.truncf %cst_94 : f32 to bf16
    %240 = vector.broadcast %239 : bf16 to vector<64x16xbf16>
    %241 = arith.select %238, %236, %240 : vector<64x16xi1>, vector<64x16xbf16>
    %242 = vector.extract_strided_slice %232 {offsets = [1, 0], sizes = [64, 16], strides = [1, 1]} : vector<82x16xbf16> to vector<64x16xbf16>
    %243 = vector.extract_strided_slice %232 {offsets = [2, 0], sizes = [64, 16], strides = [1, 1]} : vector<82x16xbf16> to vector<64x16xbf16>
    %c7_i32_95 = arith.constant 7 : i32
    %244 = vector.broadcast %c7_i32_95 : i32 to vector<64x16xi32>
    %245 = arith.cmpi slt, %235, %244 : vector<64x16xi32>
    %cst_96 = arith.constant 0.000000e+00 : f32
    %246 = arith.truncf %cst_96 : f32 to bf16
    %247 = vector.broadcast %246 : bf16 to vector<64x16xbf16>
    %248 = arith.select %245, %243, %247 : vector<64x16xi1>, vector<64x16xbf16>
    %249 = vector.extract_strided_slice %232 {offsets = [8, 0], sizes = [64, 16], strides = [1, 1]} : vector<82x16xbf16> to vector<64x16xbf16>
    %c0_i32_97 = arith.constant 0 : i32
    %250 = vector.broadcast %c0_i32_97 : i32 to vector<64x16xi32>
    %251 = arith.cmpi sgt, %235, %250 : vector<64x16xi32>
    %cst_98 = arith.constant 0.000000e+00 : f32
    %252 = arith.truncf %cst_98 : f32 to bf16
    %253 = vector.broadcast %252 : bf16 to vector<64x16xbf16>
    %254 = arith.select %251, %249, %253 : vector<64x16xi1>, vector<64x16xbf16>
    %255 = vector.extract_strided_slice %232 {offsets = [9, 0], sizes = [64, 16], strides = [1, 1]} : vector<82x16xbf16> to vector<64x16xbf16>
    %256 = vector.extract_strided_slice %232 {offsets = [10, 0], sizes = [64, 16], strides = [1, 1]} : vector<82x16xbf16> to vector<64x16xbf16>
    %c7_i32_99 = arith.constant 7 : i32
    %257 = vector.broadcast %c7_i32_99 : i32 to vector<64x16xi32>
    %258 = arith.cmpi slt, %235, %257 : vector<64x16xi32>
    %cst_100 = arith.constant 0.000000e+00 : f32
    %259 = arith.truncf %cst_100 : f32 to bf16
    %260 = vector.broadcast %259 : bf16 to vector<64x16xbf16>
    %261 = arith.select %258, %256, %260 : vector<64x16xi1>, vector<64x16xbf16>
    %262 = vector.extract_strided_slice %232 {offsets = [16, 0], sizes = [64, 16], strides = [1, 1]} : vector<82x16xbf16> to vector<64x16xbf16>
    %c0_i32_101 = arith.constant 0 : i32
    %263 = vector.broadcast %c0_i32_101 : i32 to vector<64x16xi32>
    %264 = arith.cmpi sgt, %235, %263 : vector<64x16xi32>
    %cst_102 = arith.constant 0.000000e+00 : f32
    %265 = arith.truncf %cst_102 : f32 to bf16
    %266 = vector.broadcast %265 : bf16 to vector<64x16xbf16>
    %267 = arith.select %264, %262, %266 : vector<64x16xi1>, vector<64x16xbf16>
    %268 = vector.extract_strided_slice %232 {offsets = [17, 0], sizes = [64, 16], strides = [1, 1]} : vector<82x16xbf16> to vector<64x16xbf16>
    %269 = vector.extract_strided_slice %232 {offsets = [18, 0], sizes = [64, 16], strides = [1, 1]} : vector<82x16xbf16> to vector<64x16xbf16>
    %c7_i32_103 = arith.constant 7 : i32
    %270 = vector.broadcast %c7_i32_103 : i32 to vector<64x16xi32>
    %271 = arith.cmpi slt, %235, %270 : vector<64x16xi32>
    %cst_104 = arith.constant 0.000000e+00 : f32
    %272 = arith.truncf %cst_104 : f32 to bf16
    %273 = vector.broadcast %272 : bf16 to vector<64x16xbf16>
    %274 = arith.select %271, %269, %273 : vector<64x16xi1>, vector<64x16xbf16>
    %275 = tpu.concatenate %241, %242, %248, %254, %255, %261, %267, %268, %274 in 1 : vector<64x16xbf16>, vector<64x16xbf16>, vector<64x16xbf16>, vector<64x16xbf16>, vector<64x16xbf16>, vector<64x16xbf16>, vector<64x16xbf16>, vector<64x16xbf16>, vector<64x16xbf16> -> vector<64x144xbf16>
    %cst_105 = arith.constant dense<0.000000e+00> : vector<64x16xf32>
    %276 = tpu.matmul %275, %230, %cst_105 {dimension_numbers = #tpu.dot_dimension_numbers<[1], [0], [0], [1], [0, 0, 1, 1], [], []>} : vector<64x144xbf16>, vector<144x16xbf16>, vector<64x16xf32> -> vector<64x16xf32>
    %cst_106 = arith.constant dense<0.000000e+00> : vector<64x8xf32>
    %277 = tpu.matmul %163, %171, %cst_106 {dimension_numbers = #tpu.dot_dimension_numbers<[1], [0], [0], [1], [0, 0, 1, 1], [], []>} : vector<64x256xf32>, vector<256x8xf32>, vector<64x8xf32> -> vector<64x8xf32>
    %cst_107 = arith.constant 0.000000e+00 : f32
    %278 = vector.broadcast %cst_107 : f32 to vector<64x8xf32>
    %279 = tpu.concatenate %277, %278 in 1 : vector<64x8xf32>, vector<64x8xf32> -> vector<64x16xf32>
    %280 = arith.addf %279, %276 : vector<64x16xf32>
    %c0_108 = arith.constant 0 : index
    %c0_109 = arith.constant 0 : index
    %281 = vector.load %arg22[%c0_108, %c0_109] : memref<16x64xf32, #tpu.memory_space<vmem>>, vector<16x64xf32>
    %c0_110 = arith.constant 0 : index
    %c0_111 = arith.constant 0 : index
    %282 = vector.load %arg15[%c0_110, %c0_111] : memref<1x16xf32, #tpu.memory_space<vmem>>, vector<1x16xf32>
    %283 = vector.broadcast %282 : vector<1x16xf32> to vector<64x16xf32>
    %284 = arith.mulf %280, %283 : vector<64x16xf32>
    %c0_112 = arith.constant 0 : index
    %c0_113 = arith.constant 0 : index
    %285 = vector.load %arg16[%c0_112, %c0_113] : memref<1x16xf32, #tpu.memory_space<vmem>>, vector<1x16xf32>
    %286 = vector.broadcast %285 : vector<1x16xf32> to vector<64x16xf32>
    %287 = arith.addf %284, %286 : vector<64x16xf32>
    %cst_114 = arith.constant 0.000000e+00 : f32
    %288 = vector.broadcast %cst_114 : f32 to vector<64x16xf32>
    %289 = arith.maximumf %287, %288 : vector<64x16xf32>
    %290 = arith.truncf %289 : vector<64x16xf32> to vector<64x16xbf16>
    %c0_115 = arith.constant 0 : index
    %c0_116 = arith.constant 0 : index
    %291 = vector.load %arg17[%c0_115, %c0_116] : memref<144x32xbf16, #tpu.memory_space<vmem>>, vector<144x32xbf16>
    %cst_117 = arith.constant 0.000000e+00 : bf16
    %292 = vector.broadcast %cst_117 : bf16 to vector<9x16xbf16>
    %293 = tpu.concatenate %292, %290, %292 in 0 : vector<9x16xbf16>, vector<64x16xbf16>, vector<9x16xbf16> -> vector<82x16xbf16>
    %294 = tpu.iota {dimensions = array<i32: 0>} : vector<64x16xi32>
    %c7_i32_118 = arith.constant 7 : i32
    %295 = vector.broadcast %c7_i32_118 : i32 to vector<64x16xi32>
    %296 = arith.andi %294, %295 : vector<64x16xi32>
    %297 = vector.extract_strided_slice %293 {offsets = [0, 0], sizes = [64, 16], strides = [1, 1]} : vector<82x16xbf16> to vector<64x16xbf16>
    %c0_i32_119 = arith.constant 0 : i32
    %298 = vector.broadcast %c0_i32_119 : i32 to vector<64x16xi32>
    %299 = arith.cmpi sgt, %296, %298 : vector<64x16xi32>
    %cst_120 = arith.constant 0.000000e+00 : f32
    %300 = arith.truncf %cst_120 : f32 to bf16
    %301 = vector.broadcast %300 : bf16 to vector<64x16xbf16>
    %302 = arith.select %299, %297, %301 : vector<64x16xi1>, vector<64x16xbf16>
    %303 = vector.extract_strided_slice %293 {offsets = [1, 0], sizes = [64, 16], strides = [1, 1]} : vector<82x16xbf16> to vector<64x16xbf16>
    %304 = vector.extract_strided_slice %293 {offsets = [2, 0], sizes = [64, 16], strides = [1, 1]} : vector<82x16xbf16> to vector<64x16xbf16>
    %c7_i32_121 = arith.constant 7 : i32
    %305 = vector.broadcast %c7_i32_121 : i32 to vector<64x16xi32>
    %306 = arith.cmpi slt, %296, %305 : vector<64x16xi32>
    %cst_122 = arith.constant 0.000000e+00 : f32
    %307 = arith.truncf %cst_122 : f32 to bf16
    %308 = vector.broadcast %307 : bf16 to vector<64x16xbf16>
    %309 = arith.select %306, %304, %308 : vector<64x16xi1>, vector<64x16xbf16>
    %310 = vector.extract_strided_slice %293 {offsets = [8, 0], sizes = [64, 16], strides = [1, 1]} : vector<82x16xbf16> to vector<64x16xbf16>
    %c0_i32_123 = arith.constant 0 : i32
    %311 = vector.broadcast %c0_i32_123 : i32 to vector<64x16xi32>
    %312 = arith.cmpi sgt, %296, %311 : vector<64x16xi32>
    %cst_124 = arith.constant 0.000000e+00 : f32
    %313 = arith.truncf %cst_124 : f32 to bf16
    %314 = vector.broadcast %313 : bf16 to vector<64x16xbf16>
    %315 = arith.select %312, %310, %314 : vector<64x16xi1>, vector<64x16xbf16>
    %316 = vector.extract_strided_slice %293 {offsets = [9, 0], sizes = [64, 16], strides = [1, 1]} : vector<82x16xbf16> to vector<64x16xbf16>
    %317 = vector.extract_strided_slice %293 {offsets = [10, 0], sizes = [64, 16], strides = [1, 1]} : vector<82x16xbf16> to vector<64x16xbf16>
    %c7_i32_125 = arith.constant 7 : i32
    %318 = vector.broadcast %c7_i32_125 : i32 to vector<64x16xi32>
    %319 = arith.cmpi slt, %296, %318 : vector<64x16xi32>
    %cst_126 = arith.constant 0.000000e+00 : f32
    %320 = arith.truncf %cst_126 : f32 to bf16
    %321 = vector.broadcast %320 : bf16 to vector<64x16xbf16>
    %322 = arith.select %319, %317, %321 : vector<64x16xi1>, vector<64x16xbf16>
    %323 = vector.extract_strided_slice %293 {offsets = [16, 0], sizes = [64, 16], strides = [1, 1]} : vector<82x16xbf16> to vector<64x16xbf16>
    %c0_i32_127 = arith.constant 0 : i32
    %324 = vector.broadcast %c0_i32_127 : i32 to vector<64x16xi32>
    %325 = arith.cmpi sgt, %296, %324 : vector<64x16xi32>
    %cst_128 = arith.constant 0.000000e+00 : f32
    %326 = arith.truncf %cst_128 : f32 to bf16
    %327 = vector.broadcast %326 : bf16 to vector<64x16xbf16>
    %328 = arith.select %325, %323, %327 : vector<64x16xi1>, vector<64x16xbf16>
    %329 = vector.extract_strided_slice %293 {offsets = [17, 0], sizes = [64, 16], strides = [1, 1]} : vector<82x16xbf16> to vector<64x16xbf16>
    %330 = vector.extract_strided_slice %293 {offsets = [18, 0], sizes = [64, 16], strides = [1, 1]} : vector<82x16xbf16> to vector<64x16xbf16>
    %c7_i32_129 = arith.constant 7 : i32
    %331 = vector.broadcast %c7_i32_129 : i32 to vector<64x16xi32>
    %332 = arith.cmpi slt, %296, %331 : vector<64x16xi32>
    %cst_130 = arith.constant 0.000000e+00 : f32
    %333 = arith.truncf %cst_130 : f32 to bf16
    %334 = vector.broadcast %333 : bf16 to vector<64x16xbf16>
    %335 = arith.select %332, %330, %334 : vector<64x16xi1>, vector<64x16xbf16>
    %336 = tpu.concatenate %302, %303, %309, %315, %316, %322, %328, %329, %335 in 1 : vector<64x16xbf16>, vector<64x16xbf16>, vector<64x16xbf16>, vector<64x16xbf16>, vector<64x16xbf16>, vector<64x16xbf16>, vector<64x16xbf16>, vector<64x16xbf16>, vector<64x16xbf16> -> vector<64x144xbf16>
    %cst_131 = arith.constant dense<0.000000e+00> : vector<64x32xf32>
    %337 = tpu.matmul %336, %291, %cst_131 {dimension_numbers = #tpu.dot_dimension_numbers<[1], [0], [0], [1], [0, 0, 1, 1], [], []>} : vector<64x144xbf16>, vector<144x32xbf16>, vector<64x32xf32> -> vector<64x32xf32>
    %cst_132 = arith.constant dense<0.000000e+00> : vector<16x32xf32>
    %338 = tpu.matmul %281, %337, %cst_132 {dimension_numbers = #tpu.dot_dimension_numbers<[1], [0], [0], [1], [0, 0, 1, 1], [], []>} : vector<16x64xf32>, vector<64x32xf32>, vector<16x32xf32> -> vector<16x32xf32>
    %c0_133 = arith.constant 0 : index
    %c0_134 = arith.constant 0 : index
    %339 = vector.load %arg18[%c0_133, %c0_134] : memref<1x32xf32, #tpu.memory_space<vmem>>, vector<1x32xf32>
    %340 = vector.broadcast %339 : vector<1x32xf32> to vector<16x32xf32>
    %341 = arith.mulf %338, %340 : vector<16x32xf32>
    %c0_135 = arith.constant 0 : index
    %c0_136 = arith.constant 0 : index
    %342 = vector.load %arg19[%c0_135, %c0_136] : memref<1x32xf32, #tpu.memory_space<vmem>>, vector<1x32xf32>
    %343 = vector.broadcast %342 : vector<1x32xf32> to vector<16x32xf32>
    %344 = arith.addf %341, %343 : vector<16x32xf32>
    %cst_137 = arith.constant 0.000000e+00 : f32
    %345 = vector.broadcast %cst_137 : f32 to vector<16x32xf32>
    %346 = arith.maximumf %344, %345 : vector<16x32xf32>
    %347 = arith.truncf %346 : vector<16x32xf32> to vector<16x32xbf16>
    %c0_138 = arith.constant 0 : index
    %c0_139 = arith.constant 0 : index
    %348 = vector.load %arg20[%c0_138, %c0_139] : memref<288x32xbf16, #tpu.memory_space<vmem>>, vector<288x32xbf16>
    %cst_140 = arith.constant 0.000000e+00 : bf16
    %349 = vector.broadcast %cst_140 : bf16 to vector<5x32xbf16>
    %350 = tpu.concatenate %349, %347, %349 in 0 : vector<5x32xbf16>, vector<16x32xbf16>, vector<5x32xbf16> -> vector<26x32xbf16>
    %351 = tpu.iota {dimensions = array<i32: 0>} : vector<16x32xi32>
    %c3_i32 = arith.constant 3 : i32
    %352 = vector.broadcast %c3_i32 : i32 to vector<16x32xi32>
    %353 = arith.andi %351, %352 : vector<16x32xi32>
    %354 = vector.extract_strided_slice %350 {offsets = [0, 0], sizes = [16, 32], strides = [1, 1]} : vector<26x32xbf16> to vector<16x32xbf16>
    %c0_i32_141 = arith.constant 0 : i32
    %355 = vector.broadcast %c0_i32_141 : i32 to vector<16x32xi32>
    %356 = arith.cmpi sgt, %353, %355 : vector<16x32xi32>
    %cst_142 = arith.constant 0.000000e+00 : f32
    %357 = arith.truncf %cst_142 : f32 to bf16
    %358 = vector.broadcast %357 : bf16 to vector<16x32xbf16>
    %359 = arith.select %356, %354, %358 : vector<16x32xi1>, vector<16x32xbf16>
    %360 = vector.extract_strided_slice %350 {offsets = [1, 0], sizes = [16, 32], strides = [1, 1]} : vector<26x32xbf16> to vector<16x32xbf16>
    %361 = vector.extract_strided_slice %350 {offsets = [2, 0], sizes = [16, 32], strides = [1, 1]} : vector<26x32xbf16> to vector<16x32xbf16>
    %c3_i32_143 = arith.constant 3 : i32
    %362 = vector.broadcast %c3_i32_143 : i32 to vector<16x32xi32>
    %363 = arith.cmpi slt, %353, %362 : vector<16x32xi32>
    %cst_144 = arith.constant 0.000000e+00 : f32
    %364 = arith.truncf %cst_144 : f32 to bf16
    %365 = vector.broadcast %364 : bf16 to vector<16x32xbf16>
    %366 = arith.select %363, %361, %365 : vector<16x32xi1>, vector<16x32xbf16>
    %367 = vector.extract_strided_slice %350 {offsets = [4, 0], sizes = [16, 32], strides = [1, 1]} : vector<26x32xbf16> to vector<16x32xbf16>
    %c0_i32_145 = arith.constant 0 : i32
    %368 = vector.broadcast %c0_i32_145 : i32 to vector<16x32xi32>
    %369 = arith.cmpi sgt, %353, %368 : vector<16x32xi32>
    %cst_146 = arith.constant 0.000000e+00 : f32
    %370 = arith.truncf %cst_146 : f32 to bf16
    %371 = vector.broadcast %370 : bf16 to vector<16x32xbf16>
    %372 = arith.select %369, %367, %371 : vector<16x32xi1>, vector<16x32xbf16>
    %373 = vector.extract_strided_slice %350 {offsets = [5, 0], sizes = [16, 32], strides = [1, 1]} : vector<26x32xbf16> to vector<16x32xbf16>
    %374 = vector.extract_strided_slice %350 {offsets = [6, 0], sizes = [16, 32], strides = [1, 1]} : vector<26x32xbf16> to vector<16x32xbf16>
    %c3_i32_147 = arith.constant 3 : i32
    %375 = vector.broadcast %c3_i32_147 : i32 to vector<16x32xi32>
    %376 = arith.cmpi slt, %353, %375 : vector<16x32xi32>
    %cst_148 = arith.constant 0.000000e+00 : f32
    %377 = arith.truncf %cst_148 : f32 to bf16
    %378 = vector.broadcast %377 : bf16 to vector<16x32xbf16>
    %379 = arith.select %376, %374, %378 : vector<16x32xi1>, vector<16x32xbf16>
    %380 = vector.extract_strided_slice %350 {offsets = [8, 0], sizes = [16, 32], strides = [1, 1]} : vector<26x32xbf16> to vector<16x32xbf16>
    %c0_i32_149 = arith.constant 0 : i32
    %381 = vector.broadcast %c0_i32_149 : i32 to vector<16x32xi32>
    %382 = arith.cmpi sgt, %353, %381 : vector<16x32xi32>
    %cst_150 = arith.constant 0.000000e+00 : f32
    %383 = arith.truncf %cst_150 : f32 to bf16
    %384 = vector.broadcast %383 : bf16 to vector<16x32xbf16>
    %385 = arith.select %382, %380, %384 : vector<16x32xi1>, vector<16x32xbf16>
    %386 = vector.extract_strided_slice %350 {offsets = [9, 0], sizes = [16, 32], strides = [1, 1]} : vector<26x32xbf16> to vector<16x32xbf16>
    %387 = vector.extract_strided_slice %350 {offsets = [10, 0], sizes = [16, 32], strides = [1, 1]} : vector<26x32xbf16> to vector<16x32xbf16>
    %c3_i32_151 = arith.constant 3 : i32
    %388 = vector.broadcast %c3_i32_151 : i32 to vector<16x32xi32>
    %389 = arith.cmpi slt, %353, %388 : vector<16x32xi32>
    %cst_152 = arith.constant 0.000000e+00 : f32
    %390 = arith.truncf %cst_152 : f32 to bf16
    %391 = vector.broadcast %390 : bf16 to vector<16x32xbf16>
    %392 = arith.select %389, %387, %391 : vector<16x32xi1>, vector<16x32xbf16>
    %393 = tpu.concatenate %359, %360, %366, %372, %373, %379, %385, %386, %392 in 1 : vector<16x32xbf16>, vector<16x32xbf16>, vector<16x32xbf16>, vector<16x32xbf16>, vector<16x32xbf16>, vector<16x32xbf16>, vector<16x32xbf16>, vector<16x32xbf16>, vector<16x32xbf16> -> vector<16x288xbf16>
    %cst_153 = arith.constant dense<0.000000e+00> : vector<16x32xf32>
    %394 = tpu.matmul %393, %348, %cst_153 {dimension_numbers = #tpu.dot_dimension_numbers<[1], [0], [0], [1], [0, 0, 1, 1], [], []>} : vector<16x288xbf16>, vector<288x32xbf16>, vector<16x32xf32> -> vector<16x32xf32>
    %cst_154 = arith.constant dense<0.000000e+00> : vector<16x16xf32>
    %395 = tpu.matmul %281, %289, %cst_154 {dimension_numbers = #tpu.dot_dimension_numbers<[1], [0], [0], [1], [0, 0, 1, 1], [], []>} : vector<16x64xf32>, vector<64x16xf32>, vector<16x16xf32> -> vector<16x16xf32>
    %cst_155 = arith.constant 0.000000e+00 : f32
    %396 = vector.broadcast %cst_155 : f32 to vector<16x16xf32>
    %397 = tpu.concatenate %395, %396 in 1 : vector<16x16xf32>, vector<16x16xf32> -> vector<16x32xf32>
    %398 = arith.addf %397, %394 : vector<16x32xf32>
    %c0_156 = arith.constant 0 : index
    %c0_157 = arith.constant 0 : index
    %399 = vector.load %arg23[%c0_156, %c0_157] : memref<1x32xf32, #tpu.memory_space<vmem>>, vector<1x32xf32>
    %400 = vector.broadcast %399 : vector<1x32xf32> to vector<16x32xf32>
    %401 = arith.mulf %398, %400 : vector<16x32xf32>
    %c0_158 = arith.constant 0 : index
    %c0_159 = arith.constant 0 : index
    %402 = vector.load %arg24[%c0_158, %c0_159] : memref<1x32xf32, #tpu.memory_space<vmem>>, vector<1x32xf32>
    %403 = vector.broadcast %402 : vector<1x32xf32> to vector<16x32xf32>
    %404 = arith.addf %401, %403 : vector<16x32xf32>
    %cst_160 = arith.constant 0.000000e+00 : f32
    %405 = vector.broadcast %cst_160 : f32 to vector<16x32xf32>
    %406 = arith.maximumf %404, %405 : vector<16x32xf32>
    %cst_161 = arith.constant dense<0.000000e+00> : vector<32xf32>
    %407 = vector.multi_reduction <add>, %406, %cst_161 [0] : vector<16x32xf32> to vector<32xf32>
    %408 = vector.shape_cast %407 : vector<32xf32> to vector<1x32xf32>
    %cst_162 = arith.constant 6.250000e-02 : f32
    %409 = vector.broadcast %cst_162 : f32 to vector<1x32xf32>
    %410 = arith.mulf %408, %409 : vector<1x32xf32>
    %c0_163 = arith.constant 0 : index
    %c0_164 = arith.constant 0 : index
    %411 = vector.load %arg25[%c0_163, %c0_164] : memref<32x10xf32, #tpu.memory_space<vmem>>, vector<32x10xf32>
    %cst_165 = arith.constant dense<0.000000e+00> : vector<1x10xf32>
    %412 = tpu.matmul %410, %411, %cst_165 {dimension_numbers = #tpu.dot_dimension_numbers<[1], [0], [0], [1], [0, 0, 1, 1], [], []>} : vector<1x32xf32>, vector<32x10xf32>, vector<1x10xf32> -> vector<1x10xf32>
    %c0_166 = arith.constant 0 : index
    %c0_167 = arith.constant 0 : index
    %413 = vector.load %arg26[%c0_166, %c0_167] : memref<1x10xf32, #tpu.memory_space<vmem>>, vector<1x10xf32>
    %414 = arith.addf %412, %413 : vector<1x10xf32>
    %c0_168 = arith.constant 0 : index
    %c0_169 = arith.constant 0 : index
    %c0_170 = arith.constant 0 : index
    %415 = vector.load %arg27[%c0_168, %c0_169, %c0_170] : memref<1x1x10xf32, #tpu.memory_space<vmem>>, vector<1x1x10xf32>
    %416 = vector.shape_cast %415 : vector<1x1x10xf32> to vector<1x10xf32>
    %417 = vector.shape_cast %414 : vector<1x10xf32> to vector<1x1x10xf32>
    tpu.vector_store %arg27[%c0_168, %c0_169, %c0_170], %417 {strides = array<i32>} : memref<1x1x10xf32, #tpu.memory_space<vmem>>, vector<1x1x10xf32>,
    return
  }
  func.func @transform_0(%arg0: i32) -> (i32, i32, i32) {
    %c0_i32 = arith.constant 0 : i32
    %c0_i32_0 = arith.constant 0 : i32
    %c0_i32_1 = arith.constant 0 : i32
    return %arg0, %c0_i32, %c0_i32_0 : i32, i32, i32
  }
  func.func @transform_1(%arg0: i32) -> (i32, i32) {
    %c0_i32 = arith.constant 0 : i32
    %c0_i32_0 = arith.constant 0 : i32
    %c0_i32_1 = arith.constant 0 : i32
    return %c0_i32, %c0_i32_0 : i32, i32
  }
  func.func @transform_2(%arg0: i32) -> (i32, i32) {
    %c0_i32 = arith.constant 0 : i32
    %c0_i32_0 = arith.constant 0 : i32
    %c0_i32_1 = arith.constant 0 : i32
    return %c0_i32, %c0_i32_0 : i32, i32
  }
  func.func @transform_3(%arg0: i32) -> (i32, i32) {
    %c0_i32 = arith.constant 0 : i32
    %c0_i32_0 = arith.constant 0 : i32
    %c0_i32_1 = arith.constant 0 : i32
    return %c0_i32, %c0_i32_0 : i32, i32
  }
  func.func @transform_4(%arg0: i32) -> (i32, i32) {
    %c0_i32 = arith.constant 0 : i32
    %c0_i32_0 = arith.constant 0 : i32
    %c0_i32_1 = arith.constant 0 : i32
    return %c0_i32, %c0_i32_0 : i32, i32
  }
  func.func @transform_5(%arg0: i32) -> (i32, i32) {
    %c0_i32 = arith.constant 0 : i32
    %c0_i32_0 = arith.constant 0 : i32
    %c0_i32_1 = arith.constant 0 : i32
    return %c0_i32, %c0_i32_0 : i32, i32
  }
  func.func @transform_6(%arg0: i32) -> (i32, i32) {
    %c0_i32 = arith.constant 0 : i32
    %c0_i32_0 = arith.constant 0 : i32
    %c0_i32_1 = arith.constant 0 : i32
    return %c0_i32, %c0_i32_0 : i32, i32
  }
  func.func @transform_7(%arg0: i32) -> (i32, i32) {
    %c0_i32 = arith.constant 0 : i32
    %c0_i32_0 = arith.constant 0 : i32
    %c0_i32_1 = arith.constant 0 : i32
    return %c0_i32, %c0_i32_0 : i32, i32
  }
  func.func @transform_8(%arg0: i32) -> (i32, i32) {
    %c0_i32 = arith.constant 0 : i32
    %c0_i32_0 = arith.constant 0 : i32
    %c0_i32_1 = arith.constant 0 : i32
    return %c0_i32, %c0_i32_0 : i32, i32
  }
  func.func @transform_9(%arg0: i32) -> (i32, i32) {
    %c0_i32 = arith.constant 0 : i32
    %c0_i32_0 = arith.constant 0 : i32
    %c0_i32_1 = arith.constant 0 : i32
    return %c0_i32, %c0_i32_0 : i32, i32
  }
  func.func @transform_10(%arg0: i32) -> (i32, i32) {
    %c0_i32 = arith.constant 0 : i32
    %c0_i32_0 = arith.constant 0 : i32
    %c0_i32_1 = arith.constant 0 : i32
    return %c0_i32, %c0_i32_0 : i32, i32
  }
  func.func @transform_11(%arg0: i32) -> (i32, i32) {
    %c0_i32 = arith.constant 0 : i32
    %c0_i32_0 = arith.constant 0 : i32
    %c0_i32_1 = arith.constant 0 : i32
    return %c0_i32, %c0_i32_0 : i32, i32
  }
  func.func @transform_12(%arg0: i32) -> (i32, i32) {
    %c0_i32 = arith.constant 0 : i32
    %c0_i32_0 = arith.constant 0 : i32
    %c0_i32_1 = arith.constant 0 : i32
    return %c0_i32, %c0_i32_0 : i32, i32
  }
  func.func @transform_13(%arg0: i32) -> (i32, i32) {
    %c0_i32 = arith.constant 0 : i32
    %c0_i32_0 = arith.constant 0 : i32
    %c0_i32_1 = arith.constant 0 : i32
    return %c0_i32, %c0_i32_0 : i32, i32
  }
  func.func @transform_14(%arg0: i32) -> (i32, i32) {
    %c0_i32 = arith.constant 0 : i32
    %c0_i32_0 = arith.constant 0 : i32
    %c0_i32_1 = arith.constant 0 : i32
    return %c0_i32, %c0_i32_0 : i32, i32
  }
  func.func @transform_15(%arg0: i32) -> (i32, i32) {
    %c0_i32 = arith.constant 0 : i32
    %c0_i32_0 = arith.constant 0 : i32
    %c0_i32_1 = arith.constant 0 : i32
    return %c0_i32, %c0_i32_0 : i32, i32
  }
  func.func @transform_16(%arg0: i32) -> (i32, i32) {
    %c0_i32 = arith.constant 0 : i32
    %c0_i32_0 = arith.constant 0 : i32
    %c0_i32_1 = arith.constant 0 : i32
    return %c0_i32, %c0_i32_0 : i32, i32
  }
  func.func @transform_17(%arg0: i32) -> (i32, i32) {
    %c0_i32 = arith.constant 0 : i32
    %c0_i32_0 = arith.constant 0 : i32
    %c0_i32_1 = arith.constant 0 : i32
    return %c0_i32, %c0_i32_0 : i32, i32
  }
  func.func @transform_18(%arg0: i32) -> (i32, i32) {
    %c0_i32 = arith.constant 0 : i32
    %c0_i32_0 = arith.constant 0 : i32
    %c0_i32_1 = arith.constant 0 : i32
    return %c0_i32, %c0_i32_0 : i32, i32
  }
  func.func @transform_19(%arg0: i32) -> (i32, i32) {
    %c0_i32 = arith.constant 0 : i32
    %c0_i32_0 = arith.constant 0 : i32
    %c0_i32_1 = arith.constant 0 : i32
    return %c0_i32, %c0_i32_0 : i32, i32
  }
  func.func @transform_20(%arg0: i32) -> (i32, i32) {
    %c0_i32 = arith.constant 0 : i32
    %c0_i32_0 = arith.constant 0 : i32
    %c0_i32_1 = arith.constant 0 : i32
    return %c0_i32, %c0_i32_0 : i32, i32
  }
  func.func @transform_21(%arg0: i32) -> (i32, i32) {
    %c0_i32 = arith.constant 0 : i32
    %c0_i32_0 = arith.constant 0 : i32
    %c0_i32_1 = arith.constant 0 : i32
    return %c0_i32, %c0_i32_0 : i32, i32
  }
  func.func @transform_22(%arg0: i32) -> (i32, i32) {
    %c0_i32 = arith.constant 0 : i32
    %c0_i32_0 = arith.constant 0 : i32
    %c0_i32_1 = arith.constant 0 : i32
    return %c0_i32, %c0_i32_0 : i32, i32
  }
  func.func @transform_23(%arg0: i32) -> (i32, i32) {
    %c0_i32 = arith.constant 0 : i32
    %c0_i32_0 = arith.constant 0 : i32
    %c0_i32_1 = arith.constant 0 : i32
    return %c0_i32, %c0_i32_0 : i32, i32
  }
  func.func @transform_24(%arg0: i32) -> (i32, i32) {
    %c0_i32 = arith.constant 0 : i32
    %c0_i32_0 = arith.constant 0 : i32
    %c0_i32_1 = arith.constant 0 : i32
    return %c0_i32, %c0_i32_0 : i32, i32
  }
  func.func @transform_25(%arg0: i32) -> (i32, i32) {
    %c0_i32 = arith.constant 0 : i32
    %c0_i32_0 = arith.constant 0 : i32
    %c0_i32_1 = arith.constant 0 : i32
    return %c0_i32, %c0_i32_0 : i32, i32
  }
  func.func @transform_26(%arg0: i32) -> (i32, i32, i32) {
    %c0_i32 = arith.constant 0 : i32
    %c0_i32_0 = arith.constant 0 : i32
    %c0_i32_1 = arith.constant 0 : i32
    return %arg0, %c0_i32, %c0_i32_0 : i32, i32, i32
  }
}

</mosaic_0001>

<bundles_post_ra>
// kernel: _lambda_.1
= control target key start
LH: loop header
LB: loop body
LE: loop exit
PB: predicated region body
PF: predicated region fallthrough
CT: control target
= control target key end

     0   :  { %s17358_s0 = inlined_call_operand.vmem [shape: f32[2,256,3], index: 0, kind: input, shape index: {}]   ;;  %s17359_s1 = inlined_call_operand.vmem [shape: bf16[27,8], index: 1, kind: input, shape index: {}]   ;;  %s17360_s2 = inlined_call_operand.vmem [shape: f32[1,8], index: 2, kind: input, shape index: {}, may-alias: {2,5,8}]   ;;  %s17361_s3 = inlined_call_operand.vmem [shape: f32[1,8], index: 3, kind: input, shape index: {}, may-alias: {3,6,9}]   ;;  %s17362_s4 = inlined_call_operand.vmem [shape: bf16[72,8], index: 4, kind: input, shape index: {}]   ;;  %s17363_s5 = inlined_call_operand.vmem [shape: f32[1,8], index: 5, kind: input, shape index: {}, may-alias: {2,5,8}]   ;;  %s17364_s6 = inlined_call_operand.vmem [shape: f32[1,8], index: 6, kind: input, shape index: {}, may-alias: {3,6,9}]   ;;  %s17365_s7 = inlined_call_operand.vmem [shape: bf16[72,8], index: 7, kind: input, shape index: {}]   ;;  %s17366_s8 = inlined_call_operand.vmem [shape: f32[1,8], index: 8, kind: input, shape index: {}, may-alias: {2,5,8}]   ;;  %s17367_s9 = inlined_call_operand.vmem [shape: f32[1,8], index: 9, kind: input, shape index: {}, may-alias: {3,6,9}]   ;;  %s17368_s10 = inlined_call_operand.vmem [shape: bf16[72,16], index: 10, kind: input, shape index: {}]   ;;  %s17369_s11 = inlined_call_operand.vmem [shape: f32[1,16], index: 11, kind: input, shape index: {}, may-alias: {11,14}]   ;;  %s17370_s12 = inlined_call_operand.vmem [shape: f32[1,16], index: 12, kind: input, shape index: {}, may-alias: {12,15}]   ;;  %s17371_s13 = inlined_call_operand.vmem [shape: bf16[144,16], index: 13, kind: input, shape index: {}]   ;;  %s17372_s14 = inlined_call_operand.vmem [shape: f32[1,16], index: 14, kind: input, shape index: {}, may-alias: {11,14}]   ;;  %s17373_s15 = inlined_call_operand.vmem [shape: f32[1,16], index: 15, kind: input, shape index: {}, may-alias: {12,15}]   ;;  %s17374_s16 = inlined_call_operand.vmem [shape: bf16[144,32], index: 16, kind: input, shape index: {}]   ;;  %s17375_s17 = inlined_call_operand.vmem [shape: f32[1,32], index: 17, kind: input, shape index: {}, may-alias: {17,22}]   ;;  %s17376_s18 = inlined_call_operand.vmem [shape: f32[1,32], index: 18, kind: input, shape index: {}, may-alias: {18,23}]   ;;  %s17377_s19 = inlined_call_operand.vmem [shape: bf16[288,32], index: 19, kind: input, shape index: {}]   ;;  %s17378_s20 = inlined_call_operand.vmem [shape: f32[64,256], index: 20, kind: input, shape index: {}]   ;;  %s17379_s21 = inlined_call_operand.vmem [shape: f32[16,64], index: 21, kind: input, shape index: {}]   ;;  %s17380_s22 = inlined_call_operand.vmem [shape: f32[1,32], index: 22, kind: input, shape index: {}, may-alias: {17,22}]   ;;  %s17381_s23 = inlined_call_operand.vmem [shape: f32[1,32], index: 23, kind: input, shape index: {}, may-alias: {18,23}]   ;;  %s17382_s24 = inlined_call_operand.vmem [shape: f32[32,10], index: 24, kind: input, shape index: {}]   ;;  %s17383_s25 = inlined_call_operand.vmem [shape: f32[1,10], index: 25, kind: input, shape index: {}]   ;;  %s17384_s26 = inlined_call_operand.hbm [shape: f32[2,1,10], index: 26, kind: output, shape index: {}]  }
   0x1   :  { %17760 = sst [smem:[#allocation74_spill]] %s17358_s0 }
   0x2   :  { %17761 = sst [smem:[#allocation75_spill]] %s17359_s1 }
   0x3   :  { %17762 = sst [smem:[#allocation76_spill]] %s17360_s2 }
   0x4   :  { %17763 = sst [smem:[#allocation77_spill]] %s17361_s3 }
   0x5   :  { %17764 = sst [smem:[#allocation78_spill]] %s17362_s4 }
   0x6   :  { %17765 = sst [smem:[#allocation79_spill]] %s17363_s5 }
   0x7   :  { %17766 = sst [smem:[#allocation80_spill]] %s17364_s6 }
   0x8   :  { %17767 = sst [smem:[#allocation81_spill]] %s17365_s7 }
   0x9   :  { %17768 = sst [smem:[#allocation82_spill]] %s17366_s8 }
   0xa   :  { %17769 = sst [smem:[#allocation83_spill]] %s17367_s9 }
   0xb   :  { %17770 = sst [smem:[#allocation84_spill]] %s17368_s10 }
   0xc   :  { %17771 = sst [smem:[#allocation85_spill]] %s17369_s11 }
   0xd   :  { %17772 = sst [smem:[#allocation86_spill]] %s17383_s25 }
   0xe   :  { %17773 = sst [smem:[#allocation87_spill]] %s17384_s26 }
   0xf   :  { %31 = vsyncpa [#allocation3], 0 }
  0x10   :  { %33 = vsyncpa [#allocation3 + $0x1], 0  ;;  %s9940_s27 = smov 0   ;;  %s9942_s3 = smov 0  }
  0x11   :  { %s9944_s7 = smov 0   ;;  %s9946_s28 = smov 0  }
  0x12 LB: > { %17774 = sst [smem:[#allocation5_spill]] %s9770_s27  ;;  %s9961_s8 = sadd.s32 4294967295, %s9782_s28   ;;  %s9782_s28 = sphi %s9946_s28, %s19350_s28   ;;  %s9778_s7 = sphi %s9944_s7, %s19352_s7   ;;  %s9774_s3 = sphi %s9942_s3, %s19354_s3   ;;  %s9770_s27 = sphi %s9940_s27, %s19353_s27  }
  0x13   : > { %17775 = sst [smem:[#allocation6_spill]] %s9778_s7  ;;  %s9247_s4 = sadd.s32 4294967294, %s9782_s28  }
  0x14   : > { %17776 = sst [smem:[#allocation7_spill]] %s9782_s28  ;;  %s9965_s29 = sadd.s32 1, %s9782_s28  }
  0x15   : > { %17777 = sst [smem:[#allocation8_spill]] %s9965_s29  ;;  %s597_s0 = sadd.s32 1, %s9778_s7 }
  0x16   : > { %s594_s9 = ssub.s32 %s9782_s28, %s9965_s29  ;;  %p607_p0 = scmp.ne.s32.totalorder %s9778_s7, %s9774_s3 }
  0x17   : > { %p595_p1 = scmp.eq.s32.totalorder %s594_s9, 0  ;;  %p608_p2 = scmp.eq.s32.totalorder %s9961_s8, 1 }
  0x18   : > { %p613_p3 = scmp.ne.s32.totalorder %s9774_s3, %s9770_s27  ;;  %p614_p4 = scmp.eq.s32.totalorder %s9247_s4, 1 }
  0x19   : > { %s9976_s30 = scalar_select %p595_p1, %s9778_s7, %s597_s0  }
  0x1a   : > { %p9978_p5 = por %p608_p2, %p607_p0  ;;  %p9982_p6 = por %p614_p4, %p613_p3 }
  0x1b   : > { %17778 = sst [smem:[#allocation9_spill]] %s9976_s30  ;;  %p9250_p7 = scmp.ge.s32.totalorder %s9782_s28, 1 }
  0x1c   : > { %s17779_s2 = scalar_select %p9978_p5, 1, 0 }
  0x1d   : > { %s17781_s5 = scalar_select %p9982_p6, 1, 0 }
  0x1e   : > { %17780 = sst [smem:[#allocation10_spill]] %s17779_s2  ;;  %p715_p8 = scmp.lt.s32.totalorder %s9782_s28, 3 }
  0x1f   : > { %17782 = sst [smem:[#allocation11_spill]] %s17781_s5 }
  0x20   : > { %p716_p9 = pnand %p9250_p7, %p715_p8 }
  0x22   : > { %719 = sbr.rel (%p716_p9) target bundleno = 3132 (0xc3c), region = 124 }
  0x27   : > { %p784_p10 = scmp.lt.s32.totalorder %s9961_s8, 1  ;;  %v1089_v0 = vlaneseq  ;;  %vm9784_vm0 = vmmov 1   ;;  %v17443_v2 = vmov 0   ;;  %vm17401_vm2 = vsmask.f32 256  ;;  %s17788_s0 = sld [smem:[#allocation74_spill]] }
  0x28   : > { %vm1187_vm1 = vmpackc.low %vm9784_vm0, %vm9784_vm0  ;;  %v9996_v5 = vunpack.c.h.b16 %v17443_v2  ;;  %vm17402_vm3 = vcmask 1040384   ;;  %v10021_v15 = vunpack.c.l.b16 %v17443_v2  ;;  %vm17411_vm14 = vsmask.f32 7424  ;;  %s17403_s1 = smov 3   ;;  %s17407_s4 = smov 15  }
  0x29   : > { %s785_s10 = scalar_select %p784_p10, %s9961_s8, 1  ;;  %v9990_v1 = vshrl.u32 %v1089_v0, 7  ;;  %v1217_v3 = vsel %vm1187_vm1, 65537, %v17443_v2  ;;  %vm10049_vm15 = vmand %vm17402_vm3, %vm17401_vm2  ;;  %v17795_v51 = vmov 0  ;;  %v17798_v58 = vmov 0 }
  0x2a   : > { %v9993_v4 = vunpack.c.l.b16 %v1217_v3  ;;  %17784 = vst [vmem:[#allocation13_spill] sm:$0xff] %v9996_v5  ;;  %v17796_v51 = vsel %vm10049_vm15, 4294967295, %v17795_v51  ;;  %v10069_v60 = vrot.slane %v17443_v2, 1  ;;  %s17840_s30 = smov 15   ;;  %s17841_s7 = smov 18  }
  0x2b   : > { %17783 = vst [vmem:[#allocation12_spill] sm:$0xff] %v9990_v1  ;;  %s9589_s6 = sshll.u32 %s785_s10, 8  ;;  %v1122_v6 = vand.u32 15, %v9990_v1  ;;  %v10000_v7 = vadd.s32 8, %v9990_v1  ;;  %v10003_v8 = vadd.s32 24, %v9990_v1  ;;  %v10006_v9 = vadd.s32 40, %v9990_v1 }
  0x2c   : > { %v9254_v10 = vunpack.i.l.s16 %v9993_v4  ;;  %v10015_v11 = vadd.s32 16, %v9990_v1  ;;  %17790 = vst [vmem:[#allocation18_spill] sm:$0xff] %v10021_v15  ;;  %s17395_s10 = smov 9   ;;  %s17854_s29 = smov 21  }
  0x2d   : > { %17785 = vst [vmem:[#allocation14_spill] sm:$0xff] %v10000_v7  ;;  %s10011_s9 = scalar_lea.vmem %s17788_s0, %s9589_s6  ;;  %vm1154_vm4 = vcmp.gt.s32.totalorder %v1122_v6, 0  ;;  %v1123_v16 = vand.u32 15, %v10000_v7  ;;  %v1125_v17 = vand.u32 15, %v10003_v8  ;;  %v1127_v25 = vand.u32 15, %v10006_v9  ;;  %s17413_s6 = smov 18  }
  0x2e   : > { %17786 = vst [vmem:[#allocation15_spill] sm:$0xff] %v10003_v8  ;;  %v792_v12 = vld [vmem:[%s10011_s9] sm:$0xff]  ;;  %v793_v13 = vld [vmem:[%s10011_s9 + $0x8] sm:$0xff]  ;;  %v794_v14 = vld [vmem:[%s10011_s9 + $0x10] sm:$0xff]  ;;  %vm10027_vm5 = vcmp.ne.s32.totalorder %v9254_v10, %v9996_v5  ;;  %v1124_v38 = vand.u32 15, %v10015_v11  ;;  %s17405_s0 = smov 6  }
  0x2f   : > { %17787 = vst [vmem:[#allocation16_spill] sm:$0xff] %v10006_v9  ;;  %v795_v18 = vld [vmem:[%s10011_s9 + $0x18] sm:$0xff]  ;;  %v824_v19 = vpack.c.bf16 %v792_v12, %v792_v12  ;;  %v825_v20 = vpack.c.bf16 %v793_v13, %v793_v13  ;;  %v826_v21 = vpack.c.bf16 %v794_v14, %v794_v14  ;;  %vm1714_vm6 = vmpackc.low %vm1154_vm4, %vm1154_vm4  ;;  %vm1412_vm7 = vcmp.lt.s32.totalorder %v1123_v16, 15  ;;  %v796_v26 = vld [vmem:[%s10011_s9 + $0x20] sm:$0xff]  ;;  %s17864_s28 = sld [smem:[#allocation75_spill]]  ;;  %s17656_s27 = smov 16  }
  0x30   : > { %17789 = vst [vmem:[#allocation17_spill] sm:$0xff] %v10015_v11  ;;  %v827_v23 = vpack.c.bf16 %v795_v18, %v795_v18  ;;  %v1716_v24 = vsel %vm1714_vm6, 65537, %v17443_v2  ;;  %v797_v27 = vld [vmem:[%s10011_s9 + $0x28] sm:$0xff]  ;;  %vm1444_vm8 = vmpackc.low %vm1412_vm7, %vm1412_vm7  ;;  %vm1414_vm9 = vcmp.lt.s32.totalorder %v1125_v17, 15  ;;  %vm10035_vm10 = vcmp.lt.s32.totalorder %v1127_v25, 15  ;;  %v798_v16 = vld [vmem:[%s10011_s9 + $0x30] sm:$0xff] }
  0x31   : > { %v892_v28 = vunpack.c.l.b16 %v824_v19  ;;  %v893_v29 = vunpack.c.l.b16 %v825_v20  ;;  %v894_v30 = vunpack.c.l.b16 %v826_v21  ;;  %v1718_v31 = vunpack.c.l.b16 %v1716_v24  ;;  %vm1446_vm11 = vmpackc.low %vm1414_vm9, %vm1414_vm9  ;;  %17797 = vst [vmem:[#allocation19_spill] sm:$0xff] %v17796_v51  ;;  %s18059_s5 = sld [smem:[#allocation76_spill]]  ;;  %s17545_s25 = smov 48  }
  0x32   : > { %v895_v32 = vunpack.c.l.b16 %v827_v23  ;;  %v1476_v34 = vsel %vm1444_vm8, 65537, %v17443_v2  ;;  %vm1448_vm12 = vmpackc.low %vm10035_vm10, %vm10035_vm10  ;;  %v1478_v40 = vsel %vm1446_vm11, 65537, %v17443_v2  ;;  %v828_v41 = vpack.c.bf16 %v796_v26, %v796_v26  ;;  %s18068_s26 = sld [smem:[#allocation77_spill]] }
  0x33   : > { %v924_v35 = vpack.c.b16 %v893_v29, %v892_v28  ;;  %v9283_v36 = vunpack.i.l.s16 %v1718_v31  ;;  %v1508_v37 = vunpack.c.l.b16 %v1476_v34  ;;  %v829_v42 = vpack.c.bf16 %v797_v27, %v797_v27  ;;  %s19069_s11 = sld [smem:[#allocation85_spill]] }
  0x34   : > { %v925_v39 = vpack.c.b16 %v895_v32, %v894_v30  ;;  %v1480_v45 = vsel %vm1448_vm12, 65537, %v17443_v2  ;;  %v1510_v48 = vunpack.c.l.b16 %v1478_v40  ;;  %vm1156_vm0 = vcmp.gt.s32.totalorder %v1124_v38, 0 }
  0x35   : > { %v942_v43 = vshrl.u32 %v924_v35, 16  ;;  %vm1725_vm13 = vcmp.ne.s32.totalorder %v9283_v36, %v10021_v15  ;;  %v945_v44 = vshll.u32 %v924_v35, 16  ;;  %v1512_v49 = vunpack.c.l.b16 %v1480_v45  ;;  %vm1186_vm1 = vmpackc.low %vm1156_vm0, %vm1156_vm0  ;;  %s17865_s2 = smov %s17864_s28 }
  0x36   : > { %v949_v46 = vshrl.u32 %v925_v39, 16  ;;  %v952_v47 = vshll.u32 %v925_v39, 16  ;;  %v1539_v52 = vpack.c.b16 %v1508_v37, %v9993_v4  ;;  %v896_v53 = vunpack.c.l.b16 %v828_v41  ;;  %vm10064_vm4 = vmpackc.low %vm10027_vm5, %vm1725_vm13 }
  0x37   : > { %v944_v50 = vrot.slane %v942_v43, 7  ;;  %v1540_v55 = vpack.c.b16 %v1510_v48, %v9993_v4  ;;  %v10058_v56 = vpack.c.b16 %v1512_v49, %v9993_v4  ;;  %v897_v57 = vunpack.c.l.b16 %v829_v42 }
  0x38   : > { %v10054_v54 = vrot.slane %v949_v46, 7  ;;  %v17799_v58 = vsel %vm10064_vm4, 4294967295, %v17798_v58  ;;  %v1555_v61 = vrot.slane %v1539_v52, 7  ;;  %v1216_v62 = vsel %vm1186_vm1, 65537, %v17443_v2 }
  0x39   : > { %17800 = vst [vmem:[#allocation20_spill] sm:$0xff] %v17799_v58  ;;  %v947_v59 = vor.u32 %v945_v44, %v944_v50  ;;  %v1556_v0 = vrot.slane %v1540_v55, 7  ;;  %v1558_v3 = vrot.slane %v10058_v56, 7  ;;  %vm17412_vm6 = vcmask 1046528  }
  0x3a   : > { %v954_v63 = vor.u32 %v952_v47, %v10054_v54  ;;  %v1246_v6 = vunpack.c.l.b16 %v1216_v62  ;;  %v1744_v12 = vunpack.c.l.b16 %v1555_v61  ;;  %v1745_v13 = vunpack.c.h.b16 %v1555_v61  ;;  %v799_v47 = vld [vmem:[%s10011_s9 + $0x38] sm:$0xff] }
  0x3b   : > { %v10076_v10 = vsel %vm10049_vm15, 0, %v947_v59  ;;  %v926_v14 = vpack.c.b16 %v897_v57, %v896_v53  ;;  %v1557_v20 = vsel %vm17402_vm3, %v1555_v61, %v1556_v0  ;;  %v1559_v23 = vsel %vm17402_vm3, %v1556_v0, %v1558_v3 }
  0x3c   : > { %v10080_v17 = vsel %vm17401_vm2, %v944_v50, %v954_v63  ;;  %v1728_v18 = vsel %vm10064_vm4, %v10076_v10, 0  ;;  %v1809_v19 = vshll.u32 %v10076_v10, 16  ;;  %v1586_v24 = vunpack.c.l.b16 %v1557_v20 }
  0x3d   : > { %v1768_v21 = vsel %vm10064_vm4, %v10080_v17, 0  ;;  %2064 = vrot.lane.b32.xlu1 %v1728_v18, %s17395_s10  ;;  %v1587_v25 = vunpack.c.h.b16 %v1557_v20  ;;  %v1593_v27 = vunpack.c.l.b16 %v1559_v23  ;;  %vm1748_vm7 = vcmp.ne.s32.totalorder %v1744_v12, %v10021_v15 }
  0x3e   : > { %2234 = vrot.lane.b32.xlu2 %v1768_v21, %s17413_s6  ;;  %v1811_v26 = vrot.slane %v1809_v19, 1  ;;  %v830_v28 = vpack.c.bf16 %v798_v16, %v798_v16  ;;  %vm1590_vm8 = vcmp.ne.s32.totalorder %v1586_v24, %v10021_v15  ;;  %vm1749_vm10 = vcmp.ne.s32.totalorder %v1745_v13, %v9996_v5 }
  0x3f   : > { %vm1591_vm9 = vcmp.ne.s32.totalorder %v1587_v25, %v9996_v5  ;;  %v9253_v29 = vunpack.i.l.s16 %v1246_v6  ;;  %v17801_v31 = vmov 0  ;;  %v1594_v32 = vunpack.c.h.b16 %v1559_v23  ;;  %vm10107_vm12 = vmpackc.low %vm1749_vm10, %vm1748_vm7 }
  0x40   : > { %v1812_v30 = vsel %vm17411_vm14, %v10069_v60, %v1811_v26  ;;  %vm10101_vm11 = vmpackc.low %vm1591_vm9, %vm1590_vm8  ;;  %v1813_v33 = vshrl.u32 %v10076_v10, 16  ;;  %v957_v34 = vshrl.u32 %v926_v14, 16  ;;  %v17803_v35 = vmov 0 }
  0x41   : > { %v17802_v31 = vsel %vm10101_vm11, 4294967295, %v17801_v31  ;;  %1933 = vrot.lane.b32.xlu0 %v1812_v30, %s17403_s1  ;;  %v17804_v35 = vsel %vm10107_vm12, 4294967295, %v17803_v35  ;;  %v1752_v36 = vsel %vm10101_vm11, %v10080_v17, 0  ;;  %vm1295_vm13 = vcmp.ne.s32.totalorder %v9253_v29, %v10021_v15 }
  0x42   : > { %17805 = vst [vmem:[#allocation21_spill] sm:$0xff] %v17804_v35  ;;  %v1698_v37 = vsel %vm10101_vm11, %v10076_v10, 0  ;;  %v960_v38 = vshll.u32 %v926_v14, 16  ;;  %v1751_v39 = vsel %vm10107_vm12, %v10076_v10, 0  ;;  %v10121_v40 = vrot.slane %v1752_v36, 1  ;;  %vm10125_vm0 = vmpackc.low %vm10027_vm5, %vm1295_vm13 }
  0x43   : > { %v17806_v41 = vmov 0  ;;  %v1984_v42 = vrot.slane %v1698_v37, 1  ;;  %v1817_v43 = vshll.u32 %v10080_v17, 16  ;;  %v2153_v44 = vrot.slane %v1751_v39, 1 }
  0x44   : > { %v17807_v41 = vsel %vm10125_vm0, 4294967295, %v17806_v41  ;;  %v1729_v45 = vsel %vm10125_vm0, %v10080_v17, 0  ;;  %v959_v46 = vrot.slane %v957_v34, 7  ;;  %v1784_v48 = vsel %vm10107_vm12, %v10080_v17, 0 }
  0x45   : > { %vm1597_vm1 = vcmp.ne.s32.totalorder %v1593_v27, %v10021_v15  ;;  %vm1598_vm7 = vcmp.ne.s32.totalorder %v1594_v32, %v9996_v5  ;;  %v2155_v49 = vsel %vm17412_vm6, %v2153_v44, %v10121_v40  ;;  %2066 = vrot.lane.b32.xlu1 %v1729_v45, %s17395_s10  ;;  %v1815_v50 = vor.u32 %v1813_v33, %v1811_v26  ;;  %v800_v27 = vld [vmem:[%s10011_s9 + $0x40] sm:$0xff]  ;;  %s17397_s10 = smov 24  }
  0x46   : > { %v962_v52 = vor.u32 %v960_v38, %v959_v46  ;;  %vm10142_vm8 = vmpackc.low %vm1598_vm7, %vm1597_vm1  ;;  %v17808_v53 = vmov 0  ;;  %2186 = vrot.lane.b32.xlu2 %v2155_v49, %s17407_s4  ;;  %v1985_v55 = vsel %vm17412_vm6, %v10069_v60, %v1984_v42  ;;  %v1819_v57 = vrot.slane %v1817_v43, 1 }
  0x47   : > { %v17809_v53 = vsel %vm10142_vm8, 4294967295, %v17808_v53  ;;  %v831_v59 = vpack.c.bf16 %v799_v47, %v799_v47  ;;  %v898_v61 = vunpack.c.l.b16 %v830_v28  ;;  %v2318_v63 = vrot.slane %v1784_v48, 1  ;;  %v801_v28 = vld [vmem:[%s10011_s9 + $0x48] sm:$0xff] }
  0x48   : > { %v10151_v62 = vsel %vm17401_vm2, %v10054_v54, %v962_v52  ;;  %v1699_v0 = vsel %vm10142_vm8, %v10080_v17, 0  ;;  %v10157_v6 = vadd.s32 56, %v9990_v1  ;;  %v1821_v16 = vshrl.u32 %v10080_v17, 16 }
  0x49   : > { %v1785_v12 = vsel %vm10101_vm11, %v10151_v62, 0  ;;  %v899_v13 = vunpack.c.l.b16 %v831_v59  ;;  %2016 = vrot.lane.b32.xlu0 %v1985_v55, %s17405_s0  ;;  %v10165_v14 = vrot.slane %v1699_v0, 1  ;;  %v1820_v20 = vsel %vm17411_vm14, %v1815_v50, %v1819_v57 }
  0x4a   : > { %17810 = vst [vmem:[#allocation22_spill] sm:$0xff] %v10157_v6  ;;  %v10163_v54 = vrot.slane %v1785_v12, 1  ;;  %v1129_v19 = vand.u32 15, %v10157_v6  ;;  %v1825_v23 = vshll.u32 %v10151_v62, 16  ;;  %v10174_v26 = vadd.s32 32, %v9990_v1 }
  0x4b   : > { %v927_v18 = vpack.c.b16 %v899_v13, %v898_v61  ;;  %v1987_v29 = vsel %vm17412_vm6, %v1984_v42, %v10165_v14  ;;  %v1823_v30 = vor.u32 %v1821_v16, %v1819_v57  ;;  %v1099_v33 = vadd.s32 72, %v9990_v1 }
  0x4c   : > { %v2320_v21 = vsel %vm17412_vm6, %v2318_v63, %v10163_v54  ;;  %17811 = vst [vmem:[#allocation23_spill] sm:$0xff] %v10174_v26  ;;  %vm1418_vm9 = vcmp.lt.s32.totalorder %v1129_v19, 15  ;;  %v1827_v34 = vrot.slane %v1825_v23, 1  ;;  %v832_v37 = vpack.c.bf16 %v800_v27, %v800_v27 }
  0x4d   : > { %v965_v24 = vshrl.u32 %v927_v18, 16  ;;  %v968_v25 = vshll.u32 %v927_v18, 16  ;;  %2350 = vrot.lane.b32.xlu1 %v2320_v21, %s17397_s10  ;;  %vm1450_vm10 = vmpackc.low %vm1418_vm9, %vm1418_vm9  ;;  %v833_v38 = vpack.c.bf16 %v801_v28, %v801_v28  ;;  %v1126_v44 = vand.u32 15, %v10174_v26  ;;  %s17399_s10 = smov 12  }
  0x4e   : > { %1935 = vrot.lane.b32.xlu2 %v1820_v20, %s17403_s1  ;;  %v1482_v36 = vsel %vm1450_vm10, 65537, %v17443_v2  ;;  %v1829_v45 = vshrl.u32 %v10151_v62, 16  ;;  %v1131_v48 = vand.u32 15, %v1099_v33  ;;  %v1828_v49 = vsel %vm17411_vm14, %v1823_v30, %v1827_v34 }
  0x4f   : > { %v10182_v32 = vrot.slane %v965_v24, 7  ;;  %v1514_v43 = vunpack.c.l.b16 %v1482_v36  ;;  %v900_v52 = vunpack.c.l.b16 %v832_v37  ;;  %v901_v55 = vunpack.c.l.b16 %v833_v38 }
  0x50   : > { %vm10196_vm13 = vcmp.gt.s32.totalorder %v1126_v44, 0  ;;  %v1753_v61 = vsel %vm10142_vm8, %v10151_v62, 0  ;;  %vm1420_vm1 = vcmp.lt.s32.totalorder %v1131_v48, 15  ;;  %v17814_v19 = vmov 0 }
  0x51   : > { %v970_v39 = vor.u32 %v968_v25, %v10182_v32  ;;  %2018 = vrot.lane.b32.xlu0 %v1987_v29, %s17405_s0  ;;  %v1542_v47 = vpack.c.b16 %v1514_v43, %v9993_v4  ;;  %vm1188_vm7 = vmpackc.low %vm10196_vm13, %vm10196_vm13  ;;  %v928_v16 = vpack.c.b16 %v901_v55, %v900_v52  ;;  %v2156_v18 = vrot.slane %v1753_v61, 1  ;;  %v802_v52 = vld [vmem:[%s10011_s9 + $0x50] sm:$0xff]  ;;  %v803_v55 = vld [vmem:[%s10011_s9 + $0x58] sm:$0xff] }
  0x52   : > { %vm1452_vm9 = vmpackc.low %vm1420_vm1, %vm1420_vm1  ;;  %v1218_v23 = vsel %vm1188_vm7, 65537, %v17443_v2  ;;  %v10233_v27 = vadd.s32 48, %v9990_v1  ;;  %vm17819_vm13 = vcmask 1040384   ;;  %vm17820_vm7 = vsmask.f32 256 }
  0x53   : > { %v10190_v42 = vsel %vm17401_vm2, %v959_v46, %v970_v39  ;;  %v1560_v57 = vrot.slane %v1542_v47, 7  ;;  %v1831_v46 = vor.u32 %v1829_v45, %v1827_v34  ;;  %v1484_v56 = vsel %vm1452_vm9, 65537, %v17443_v2 }
  0x54   : > { %v1833_v50 = vshll.u32 %v10190_v42, 16  ;;  %v973_v24 = vshrl.u32 %v928_v16, 16  ;;  %17816 = vst [vmem:[#allocation24_spill] sm:$0xff] %v10233_v27  ;;  %v2157_v29 = vsel %vm17412_vm6, %v10121_v40, %v2156_v18  ;;  %v1248_v30 = vunpack.c.l.b16 %v1218_v23 }
  0x55   : > { %2104 = vrot.lane.b32.xlu1 %v1820_v20, %s17399_s10  ;;  %v1561_v63 = vsel %vm17402_vm3, %v1558_v3, %v1560_v57  ;;  %v1769_v3 = vsel %vm10125_vm0, %v10151_v62, 0  ;;  %v1516_v20 = vunpack.c.l.b16 %v1484_v56  ;;  %v1786_v34 = vsel %vm10142_vm8, %v10190_v42, 0 }
  0x56   : > { %2106 = vrot.lane.b32.xlu2 %v1828_v49, %s17399_s10  ;;  %v10208_v0 = vrot.slane %v1833_v50, 1  ;;  %v1600_v12 = vunpack.c.l.b16 %v1561_v63  ;;  %v1601_v13 = vunpack.c.h.b16 %v1561_v63  ;;  %s17409_s10 = smov 21   ;;  %v10248_v36 = vrot.slane %v973_v24, 7 }
  0x57   : > { %v10237_v28 = vpack.c.b16 %v1516_v20, %v9993_v4  ;;  %v976_v37 = vshll.u32 %v928_v16, 16  ;;  %v1128_v38 = vand.u32 15, %v10233_v27  ;;  %v2321_v43 = vrot.slane %v1786_v34, 1 }
  0x58   : > { %vm1604_vm10 = vcmp.ne.s32.totalorder %v1600_v12, %v10021_v15  ;;  %vm1605_vm2 = vcmp.ne.s32.totalorder %v1601_v13, %v9996_v5  ;;  %v10226_v21 = vsel %vm17411_vm14, %v1831_v46, %v10208_v0  ;;  %v9255_v44 = vunpack.i.l.s16 %v1248_v30 }
  0x59   : > { %2270 = vrot.lane.b32.xlu0 %v1828_v49, %s17409_s10  ;;  %vm10220_vm3 = vmpackc.low %vm1605_vm2, %vm1604_vm10  ;;  %v1562_v39 = vrot.slane %v10237_v28, 7  ;;  %v978_v45 = vor.u32 %v976_v37, %v10248_v36  ;;  %vm10260_vm2 = vcmp.gt.s32.totalorder %v1128_v38, 0  ;;  %v2322_v59 = vsel %vm17412_vm6, %v10163_v54, %v2321_v43 }
  0x5a   : > { %v17815_v19 = vsel %vm10220_vm3, 4294967295, %v17814_v19  ;;  %v1700_v25 = vsel %vm10220_vm3, %v10151_v62, 0  ;;  %v1754_v47 = vsel %vm10220_vm3, %v10190_v42, 0  ;;  %vm1302_vm1 = vcmp.ne.s32.totalorder %v9255_v44, %v10021_v15  ;;  %vm1190_vm9 = vmpackc.low %vm10260_vm2, %vm10260_vm2 }
  0x5b   : > { %v10243_v33 = vrot.slane %v1700_v25, 1  ;;  %v1563_v50 = vsel %vm17819_vm13, %v1560_v57, %v1562_v39  ;;  %v10274_v46 = vrot.slane %v1754_v47, 1  ;;  %v834_v63 = vpack.c.bf16 %v802_v52, %v802_v52  ;;  %vm10292_vm10 = vmpackc.low %vm10027_vm5, %vm1302_vm1 }
  0x5c   : > { %v1607_v57 = vunpack.c.l.b16 %v1563_v50  ;;  %v1608_v61 = vunpack.c.h.b16 %v1563_v50  ;;  %v835_v12 = vpack.c.bf16 %v803_v55, %v803_v55  ;;  %v1837_v54 = vshrl.u32 %v10190_v42, 16 }
  0x5d   : > { %2236 = vrot.lane.b32.xlu1 %v1769_v3, %s17413_s6  ;;  %v1989_v40 = vsel %vm17412_vm6, %v10165_v14, %v10243_v33  ;;  %v1101_v14 = vadd.s32 88, %v9990_v1  ;;  %v1220_v56 = vsel %vm1190_vm9, 65537, %v17443_v2  ;;  %v17822_v3 = vmov 0 }
  0x5e   : > { %2272 = vrot.lane.b32.xlu2 %v10226_v21, %s17409_s10  ;;  %v17823_v3 = vsel %vm10292_vm10, 4294967295, %v17822_v3  ;;  %vm1611_vm2 = vcmp.ne.s32.totalorder %v1607_v57, %v10021_v15  ;;  %vm1612_vm13 = vcmp.ne.s32.totalorder %v1608_v61, %v9996_v5  ;;  %v902_v23 = vunpack.c.l.b16 %v834_v63 }
  0x5f   : > { %v1133_v13 = vand.u32 15, %v1101_v14  ;;  %v903_v24 = vunpack.c.l.b16 %v835_v12  ;;  %v1839_v30 = vor.u32 %v1837_v54, %v10208_v0  ;;  %vm10316_vm1 = vmpackc.low %vm1612_vm13, %vm1611_vm2  ;;  %v17827_v38 = vmov 0  ;;  %v804_v14 = vld [vmem:[%s10011_s9 + $0x60] sm:$0xff] }
  0x60   : > { %v17828_v38 = vsel %vm10316_vm1, 4294967295, %v17827_v38  ;;  %v1103_v0 = vadd.s32 104, %v9990_v1  ;;  %v1701_v48 = vsel %vm10316_vm1, %v10190_v42, 0  ;;  %v1098_v50 = vadd.s32 64, %v9990_v1 }
  0x61   : > { %2188 = vrot.lane.b32.xlu0 %v2157_v29, %s17407_s4  ;;  %v1730_v29 = vsel %vm10292_vm10, %v10151_v62, 0  ;;  %17829 = vst [vmem:[#allocation25_spill] sm:$0xff] %v17828_v38  ;;  %v10345_v61 = vrot.slane %v1701_v48, 1  ;;  %vm17889_vm12 = vsmask.f32 256  ;;  %vm17891_vm4 = vcmask 1046528  }
  0x62   : > { %v1135_v57 = vand.u32 15, %v1103_v0  ;;  %v1130_v12 = vand.u32 15, %v1098_v50  ;;  %v1111_v38 = vadd.s32 168, %v9990_v1 }
  0x65   : > { %1937 = vrot.lane.b32.xlu1 %v1828_v49, %s17403_s1  ;;  %v10279_v49 = vsel %vm17820_vm7, %v10182_v32, %v978_v45  ;;  %s17821_s1 = smov 24   ;;  %v2159_v32 = vsel %vm17412_vm6, %v2156_v18, %v10274_v46  ;;  %v1250_v18 = vunpack.c.l.b16 %v1220_v56  ;;  %vm10303_vm7 = vcmp.lt.s32.totalorder %v1133_v13, 15 }
  0x66   : > { %2020 = vrot.lane.b32.xlu2 %v1989_v40, %s17405_s0  ;;  %v1841_v16 = vshll.u32 %v10279_v49, 16  ;;  %v1787_v20 = vsel %vm10220_vm3, %v10279_v49, 0  ;;  %s17824_s0 = smov 12   ;;  %v929_v40 = vpack.c.b16 %v903_v24, %v902_v23  ;;  %vm1454_vm9 = vmpackc.low %vm10303_vm7, %vm10303_vm7  ;;  %v17831_v13 = vmov 0 }
  0x67   : > { %v10314_v37 = vrot.slane %v1787_v20, 1  ;;  %v9257_v44 = vunpack.i.l.s16 %v1250_v18  ;;  %v1486_v52 = vsel %vm1454_vm9, 65537, %v17443_v2  ;;  %v836_v56 = vpack.c.bf16 %v804_v14, %v804_v14 }
  0x68   : > { %v10312_v34 = vrot.slane %v1841_v16, 1  ;;  %v981_v55 = vshrl.u32 %v929_v40, 16  ;;  %v1518_v63 = vunpack.c.l.b16 %v1486_v52  ;;  %v984_v16 = vshll.u32 %v929_v40, 16 }
  0x69   : > { %2352 = vrot.lane.b32.xlu0 %v2322_v59, %s17821_s1  ;;  %v2324_v47 = vsel %vm17412_vm6, %v2321_v43, %v10314_v37  ;;  %vm1309_vm2 = vcmp.ne.s32.totalorder %v9257_v44, %v10021_v15  ;;  %v805_v59 = vld [vmem:[%s10011_s9 + $0x68] sm:$0xff]  ;;  %v1770_v43 = vsel %vm10292_vm10, %v10190_v42, 0  ;;  %vm10356_vm7 = vcmp.lt.s32.totalorder %v1135_v57, 15 }
  0x6a   : > { %v10327_v45 = vsel %vm17411_vm14, %v1839_v30, %v10312_v34  ;;  %vm10349_vm13 = vmpackc.low %vm10027_vm5, %vm1309_vm2  ;;  %v10353_v54 = vrot.slane %v981_v55, 7  ;;  %v1991_v23 = vsel %vm17412_vm6, %v10243_v33, %v10345_v61  ;;  %v1544_v24 = vpack.c.b16 %v1518_v63, %v9993_v4 }
  0x6b   : > { %v17832_v13 = vsel %vm10349_vm13, 4294967295, %v17831_v13  ;;  %v1731_v18 = vsel %vm10349_vm13, %v10190_v42, 0  ;;  %v1755_v25 = vsel %vm10316_vm1, %v10279_v49, 0  ;;  %vm1162_vm9 = vcmp.gt.s32.totalorder %v1130_v12, 0  ;;  %vm1456_vm2 = vmpackc.low %vm10356_vm7, %vm10356_vm7 }
  0x6c   : > { %v904_v30 = vunpack.c.l.b16 %v836_v56  ;;  %v10376_v33 = vrot.slane %v1755_v25, 1  ;;  %vm1192_vm14 = vmpackc.low %vm1162_vm9, %vm1162_vm9  ;;  %v1564_v44 = vrot.slane %v1544_v24, 7  ;;  %v1488_v0 = vsel %vm1456_vm2, 65537, %v17443_v2 }
  0x6d   : > { %2108 = vrot.lane.b32.xlu1 %v10226_v21, %s17824_s0  ;;  %vm17836_vm6 = vsmask.f32 256  ;;  %v1222_v50 = vsel %vm1192_vm14, 65537, %v17443_v2  ;;  %vm17838_vm7 = vcmask 1046528   ;;  %vm17839_vm9 = vcmask 1040384  }
  0x6e   : > { %2190 = vrot.lane.b32.xlu2 %v2159_v32, %s17407_s4  ;;  %s17830_s4 = smov 9   ;;  %v837_v32 = vpack.c.bf16 %v805_v59, %v805_v59  ;;  %v2161_v52 = vsel %vm17838_vm7, %v10274_v46, %v10376_v33  ;;  %v1565_v55 = vsel %vm17839_vm9, %v1562_v39, %v1564_v44  ;;  %v1520_v14 = vunpack.c.l.b16 %v1488_v0  ;;  %vm17842_vm2 = vmmov %vm17838_vm7  ;;  %v807_v0 = vld [vmem:[%s10011_s9 + $0x78] sm:$0xff] }
  0x6f   : > { %v1615_v63 = vunpack.c.h.b16 %v1565_v55  ;;  %v1845_v39 = vshrl.u32 %v10279_v49, 16  ;;  %v1105_v20 = vadd.s32 120, %v9990_v1  ;;  %vm17855_vm3 = vcmask 1046528  }
  0x70   : > { %v905_v40 = vunpack.c.l.b16 %v837_v32  ;;  %v10405_v12 = vpack.c.b16 %v1520_v14, %v9993_v4  ;;  %v839_v14 = vpack.c.bf16 %v807_v0, %v807_v0 }
  0x71   : > { %2068 = vrot.lane.b32.xlu0 %v1730_v29, %s17830_s4  ;;  %v986_v29 = vor.u32 %v984_v16, %v10353_v54  ;;  %v1847_v24 = vor.u32 %v1845_v39, %v10312_v34 }
  0x72   : > { %v930_v48 = vpack.c.b16 %v905_v40, %v904_v30  ;;  %v1566_v25 = vrot.slane %v10405_v12, 7  ;;  %v806_v40 = vld [vmem:[%s10011_s9 + $0x70] sm:$0xff] }
  0x74   : > { %v989_v57 = vshrl.u32 %v930_v48, 16  ;;  %v992_v32 = vshll.u32 %v930_v48, 16  ;;  %v1137_v48 = vand.u32 15, %v1105_v20 }
  0x75   : > { %2274 = vrot.lane.b32.xlu1 %v10327_v45, %s17409_s10  ;;  %s17835_s10 = smov 6  }
  0x76   : > { %2354 = vrot.lane.b32.xlu2 %v2324_v47, %s17821_s1  ;;  %v10381_v47 = vsel %vm17836_vm6, %v10248_v36, %v986_v29  ;;  %v1771_v36 = vsel %vm10349_vm13, %v10279_v49, 0  ;;  %v10407_v56 = vrot.slane %v989_v57, 7  ;;  %vm1619_vm6 = vcmp.ne.s32.totalorder %v1615_v63, %v9996_v5 }
  0x77   : > { %v1788_v59 = vsel %vm10316_vm1, %v10381_v47, 0  ;;  %v1849_v46 = vshll.u32 %v10381_v47, 16  ;;  %v17843_v29 = vmov 0  ;;  %vm17847_vm1 = vcmask 1040384  }
  0x78   : > { %v10400_v28 = vrot.slane %v1788_v59, 1  ;;  %v994_v30 = vor.u32 %v992_v32, %v10407_v56  ;;  %v1853_v39 = vshrl.u32 %v10381_v47, 16 }
  0x79   : > { %2238 = vrot.lane.b32.xlu0 %v1770_v43, %s17413_s6  ;;  %s17837_s6 = smov 3   ;;  %v1614_v43 = vunpack.c.l.b16 %v1565_v55 }
  0x7b   : > { %vm1618_vm14 = vcmp.ne.s32.totalorder %v1614_v43, %v10021_v15 }
  0x7c   : > { %vm10420_vm9 = vmpackc.low %vm1619_vm6, %vm1618_vm14  ;;  %vm17851_vm6 = vsmask.f32 256 }
  0x7d   : > { %2022 = vrot.lane.b32.xlu1 %v1991_v23, %s17835_s10  ;;  %v2326_v23 = vsel %vm17842_vm2, %v10314_v37, %v10400_v28  ;;  %v17844_v29 = vsel %vm10420_vm9, 4294967295, %v17843_v29  ;;  %vm17846_vm2 = vsmask.f32 7424  ;;  %v1567_v37 = vsel %vm17847_vm1, %v1564_v44, %v1566_v25 }
  0x7e   : > { %2070 = vrot.lane.b32.xlu2 %v1731_v18, %s17830_s4  ;;  %v1851_v18 = vrot.slane %v1849_v46, 1  ;;  %17845 = vst [vmem:[#allocation26_spill] sm:$0xff] %v17844_v29  ;;  %v1702_v55 = vsel %vm10420_vm9, %v10279_v49, 0  ;;  %v1621_v59 = vunpack.c.l.b16 %v1567_v37 }
  0x7f   : > { %v1992_v43 = vrot.slane %v1702_v55, 1 }
  0x80   : > { %v10431_v34 = vsel %vm17846_vm2, %v1847_v24, %v1851_v18  ;;  %vm10450_vm2 = vcmp.lt.s32.totalorder %v1137_v48, 15  ;;  %v1855_v24 = vor.u32 %v1853_v39, %v1851_v18 }
  0x81   : > { %1939 = vrot.lane.b32.xlu0 %v10226_v21, %s17837_s6  ;;  %v1252_v21 = vunpack.c.l.b16 %v1222_v50  ;;  %v1100_v50 = vadd.s32 80, %v9990_v1  ;;  %vm1458_vm1 = vmpackc.low %vm10450_vm2, %vm10450_vm2  ;;  %v1993_v32 = vsel %vm17855_vm3, %v10345_v61, %v1992_v43 }
  0x83   : > { %v9259_v16 = vunpack.i.l.s16 %v1252_v21  ;;  %v1622_v21 = vunpack.c.h.b16 %v1567_v37  ;;  %v1132_v63 = vand.u32 15, %v1100_v50  ;;  %v17858_v37 = vmov 0 }
  0x85   : > { %2192 = vrot.lane.b32.xlu1 %v2161_v52, %s17840_s30  ;;  %vm1316_vm7 = vcmp.ne.s32.totalorder %v9259_v16, %v10021_v15  ;;  %v17848_v52 = vmov 0  ;;  %v907_v16 = vunpack.c.l.b16 %v839_v14  ;;  %vm10471_vm8 = vcmp.gt.s32.totalorder %v1132_v63, 0 }
  0x86   : > { %2240 = vrot.lane.b32.xlu2 %v1771_v36, %s17841_s7  ;;  %vm10439_vm14 = vmpackc.low %vm10027_vm5, %vm1316_vm7  ;;  %v10448_v36 = vsel %vm17851_vm6, %v10353_v54, %v994_v30  ;;  %vm1625_vm7 = vcmp.ne.s32.totalorder %v1621_v59, %v10021_v15  ;;  %vm1626_vm6 = vcmp.ne.s32.totalorder %v1622_v21, %v9996_v5  ;;  %v1102_v59 = vadd.s32 96, %v9990_v1 }
  0x87   : > { %v17849_v52 = vsel %vm10439_vm14, 4294967295, %v17848_v52  ;;  %v1732_v57 = vsel %vm10439_vm14, %v10279_v49, 0  ;;  %v1857_v54 = vshll.u32 %v10448_v36, 16  ;;  %vm10483_vm2 = vmpackc.low %vm1626_vm6, %vm1625_vm7  ;;  %v1772_v18 = vsel %vm10439_vm14, %v10381_v47, 0 }
  0x88   : > { %17850 = vst [vmem:[#allocation27_spill] sm:$0xff] %v17849_v52  ;;  %v17859_v37 = vsel %vm10483_vm2, 4294967295, %v17858_v37  ;;  %vm1194_vm3 = vmpackc.low %vm10471_vm8, %vm10471_vm8  ;;  %vm17862_vm8 = vcmask 1046528   ;;  %v1789_v39 = vsel %vm10420_vm9, %v10448_v36, 0  ;;  %v1134_v20 = vand.u32 15, %v1102_v59  ;;  %v809_v59 = vld [vmem:[%s10011_s9 + $0x88] sm:$0xff] }
  0x89   : > { %2110 = vrot.lane.b32.xlu0 %v10327_v45, %s17824_s0  ;;  %v10476_v30 = vrot.slane %v1857_v54, 1  ;;  %17860 = vst [vmem:[#allocation28_spill] sm:$0xff] %v17859_v37  ;;  %v1224_v44 = vsel %vm1194_vm3, 65537, %v17443_v2  ;;  %vm17863_vm7 = vmmov %vm17862_vm8  ;;  %vm17433_vm6 = vcmask 1044480  }
  0x8a   : > { %v1254_v54 = vunpack.c.l.b16 %v1224_v44  ;;  %vm10536_vm3 = vcmp.gt.s32.totalorder %v1134_v20, 0  ;;  %v808_v44 = vld [vmem:[%s10011_s9 + $0x80] sm:$0xff] }
  0x8d   : > { %2356 = vrot.lane.b32.xlu1 %v2326_v23, %s17821_s1  ;;  %v1490_v23 = vsel %vm1458_vm1, 65537, %v17443_v2  ;;  %vm17861_vm1 = vsmask.f32 7424 }
  0x8e   : > { %1941 = vrot.lane.b32.xlu2 %v10327_v45, %s17837_s6  ;;  %v838_v45 = vpack.c.bf16 %v806_v40, %v806_v40  ;;  %v1756_v40 = vsel %vm10420_vm9, %v10381_v47, 0  ;;  %v1522_v61 = vunpack.c.l.b16 %v1490_v23  ;;  %v10496_v55 = vsel %vm17861_vm1, %v1855_v24, %v10476_v30 }
  0x8f   : > { %v2162_v50 = vrot.slane %v1756_v40, 1  ;;  %v10524_v24 = vrot.slane %v1789_v39, 1  ;;  %v1757_v40 = vsel %vm10483_vm2, %v10448_v36, 0  ;;  %vm17432_vm1 = vcmask 1045504  }
  0x90   : > { %v906_v46 = vunpack.c.l.b16 %v838_v45  ;;  %v1703_v45 = vsel %vm10483_vm2, %v10381_v47, 0  ;;  %v10505_v21 = vpack.c.b16 %v1522_v61, %v9993_v4  ;;  %v9261_v61 = vunpack.i.l.s16 %v1254_v54 }
  0x91   : > { %2276 = vrot.lane.b32.xlu0 %v10431_v34, %s17854_s29  ;;  %v10511_v63 = vrot.slane %v1703_v45, 1  ;;  %v9591_v45 = vld [vmem:[%s17865_s2 + $0x8] sm:$0x30]  ;;  %v9794_v39 = vmov 65535   ;;  %v10554_v20 = vrot.slane %v1757_v40, 1 }
  0x92   : > { %v931_v0 = vpack.c.b16 %v907_v16, %v906_v46  ;;  %v17436_v23 = vrot.slane %v10505_v21, 7  ;;  %v2707_v54 = vsel %vm17433_vm6, 4294967295, %v9794_v39  ;;  %vm17869_vm9 = vsmask.f32 256 }
  0x94   : > { %v997_v14 = vshrl.u32 %v931_v0, 16  ;;  %v1000_v16 = vshll.u32 %v931_v0, 16 }
  0x95   : > { %2072 = vrot.lane.b32.xlu1 %v1732_v57, %s17830_s4  ;;  %v2163_v57 = vsel %vm17862_vm8, %v10376_v33, %v2162_v50  ;;  %v1995_v33 = vsel %vm17863_vm7, %v1992_v43, %v10511_v63  ;;  %vm17868_vm8 = vcmask 1040384   ;;  %v1861_v43 = vshrl.u32 %v10448_v36, 16 }
  0x96   : > { %2112 = vrot.lane.b32.xlu2 %v10431_v34, %s17824_s0  ;;  %v10516_v46 = vrot.slane %v997_v14, 7 }
  0x98   : > { %v10481_v48 = vpop.permute.xlu2 %2234  ;;  %v1002_v0 = vor.u32 %v1000_v16, %v10516_v46  ;;  %v2328_v16 = vsel %vm17863_vm7, %v10400_v28, %v10524_v24  ;;  %vm1323_vm7 = vcmp.ne.s32.totalorder %v9261_v61, %v10021_v15  ;;  %v17871_v61 = vmov 0 }
  0x99   : > { %2024 = vrot.lane.b32.xlu0 %v1993_v32, %s17835_s10 }
  0x9a   : > { %v10560_v12 = vsel %vm17869_vm9, %v10407_v56, %v1002_v0  ;;  %v9590_v56 = vld [vmem:[%s17865_s2] sm:$0xff]  ;;  %vm17870_vm9 = vcmask 1046528   ;;  %s17749_s2 = smov 96  }
  0x9d   : > { %2242 = vrot.lane.b32.xlu1 %v1772_v18, %s17841_s7  ;;  %v9291_v18 = vld [vmem:[%s17864_s28 + $0x8] sm:$0xf]  ;;  %s17658_s28 = smov 8  }
  0x9e   : > { %2278 = vrot.lane.b32.xlu2 %v10496_v55, %s17854_s29  ;;  %v9292_v14 = vor.u32 %v9591_v45, %v9291_v18  ;;  %v2708_v18 = vsel %vm17432_vm1, %v2707_v54, 0  ;;  %v841_v45 = vpack.c.bf16 %v809_v59, %v809_v59  ;;  %v2165_v59 = vsel %vm17870_vm9, %v2162_v50, %v10554_v20 }
  0xa0   : > { %v10518_v32 = vpop.permute.xlu2 %2186  ;;  %v909_v54 = vunpack.c.l.b16 %v841_v45 }
  0xa1   : > { %2194 = vrot.lane.b32.xlu0 %v2163_v57, %s17840_s30  ;;  %v1569_v57 = vsel %vm17868_vm8, %v1566_v25, %v17436_v23  ;;  %vm1196_vm8 = vmpackc.low %vm10536_vm3, %vm10536_vm3  ;;  %v2710_v25 = vand.u32 %v9292_v14, %v2708_v18  ;;  %v1865_v14 = vshll.u32 %v10560_v12, 16  ;;  %v810_v18 = vld [vmem:[%s10011_s9 + $0x90] sm:$0xff] }
  0xa2   : > { %v1628_v28 = vunpack.c.l.b16 %v1569_v57  ;;  %v1629_v40 = vunpack.c.h.b16 %v1569_v57  ;;  %vm10579_vm3 = vmpackc.low %vm10027_vm5, %vm1323_vm7 }
  0xa3   : > { %2718 = vmatpush.bf16.msra.mxu0 %v2710_v25  ;;  %v17872_v61 = vsel %vm10579_vm3, 4294967295, %v17871_v61  ;;  %v1863_v25 = vor.u32 %v1861_v43, %v10476_v30  ;;  %v1109_v43 = vadd.s32 152, %v9990_v1 }
  0xa4   : > { %17873 = vst [vmem:[#allocation29_spill] sm:$0xff] %v17872_v61  ;;  %vm1632_vm1 = vcmp.ne.s32.totalorder %v1628_v28, %v10021_v15  ;;  %vm1633_vm6 = vcmp.ne.s32.totalorder %v1629_v40, %v9996_v5  ;;  %v17876_v40 = vmov 0 }
  0xa5   : > { %1943 = vrot.lane.b32.xlu1 %v10431_v34, %s17837_s6  ;;  %v1107_v34 = vadd.s32 136, %v9990_v1  ;;  %vm10605_vm7 = vmpackc.low %vm1633_vm6, %vm1632_vm1  ;;  %vm17880_vm6 = vcmask 1046528  }
  0xa6   : > { %2026 = vrot.lane.b32.xlu2 %v1995_v33, %s17835_s10  ;;  %v840_v33 = vpack.c.bf16 %v808_v44, %v808_v44  ;;  %v1226_v44 = vsel %vm1196_vm8, 65537, %v17443_v2  ;;  %v17877_v40 = vsel %vm10605_vm7, 4294967295, %v17876_v40 }
  0xa7   : > { %v1139_v0 = vand.u32 15, %v1107_v34  ;;  %v1256_v50 = vunpack.c.l.b16 %v1226_v44  ;;  %2719 = vmatpush.bf16.msra.mxu0 %v9590_v56  ;;  %v1733_v34 = vsel %vm10579_vm3, %v10381_v47, 0  ;;  %17878 = vst [vmem:[#allocation30_spill] sm:$0xff] %v17877_v40  ;;  %v1104_v44 = vadd.s32 112, %v9990_v1 }
  0xa8   : > { %v10565_v39 = vpop.permute.xlu2 %1935  ;;  %v908_v57 = vunpack.c.l.b16 %v840_v33  ;;  %v10599_v33 = vrot.slane %v1865_v14, 1 }
  0xa9   : > { %2358 = vrot.lane.b32.xlu0 %v2328_v16, %s17821_s1  ;;  %v1790_v16 = vsel %vm10483_vm2, %v10560_v12, 0  ;;  %vm10590_vm8 = vcmp.lt.s32.totalorder %v1139_v0, 15  ;;  %v9263_v30 = vunpack.i.l.s16 %v1256_v50  ;;  %vm17879_vm2 = vsmask.f32 7424 }
  0xaa   : > { %v10603_v28 = vrot.slane %v1790_v16, 1  ;;  %v932_v56 = vpack.c.b16 %v909_v54, %v908_v57  ;;  %vm1460_vm9 = vmpackc.low %vm10590_vm8, %vm10590_vm8  ;;  %v10618_v14 = vsel %vm17879_vm2, %v1863_v25, %v10599_v33  ;;  %v1704_v54 = vsel %vm10605_vm7, %v10448_v36, 0 }
  0xab   : > { %v1492_v50 = vsel %vm1460_vm9, 65537, %v17443_v2  ;;  %vm1330_vm2 = vcmp.ne.s32.totalorder %v9263_v30, %v10021_v15  ;;  %v1141_v25 = vand.u32 15, %v1109_v43  ;;  %v10637_v23 = vrot.slane %v1704_v54, 1  ;;  %vm17886_vm9 = vmmov %vm17880_vm6 }
  0xac   : > { %v2330_v57 = vsel %vm17880_vm6, %v10524_v24, %v10603_v28  ;;  %v1005_v16 = vshrl.u32 %v932_v56, 16  ;;  %v1773_v24 = vsel %vm10579_vm3, %v10448_v36, 0  ;;  %v1136_v6 = vand.u32 15, %v1104_v44  ;;  %vm10647_vm1 = vmpackc.low %vm10027_vm5, %vm1330_vm2 }
  0xad   : > { %2114 = vrot.lane.b32.xlu1 %v10496_v55, %s17824_s0  ;;  %v1524_v27 = vunpack.c.l.b16 %v1492_v50  ;;  %v1008_v26 = vshll.u32 %v932_v56, 16  ;;  %v17881_v30 = vmov 0  ;;  %v842_v43 = vpack.c.bf16 %v810_v18, %v810_v18 }
  0xae   : > { %2196 = vrot.lane.b32.xlu2 %v2165_v59, %s17840_s30  ;;  %v10641_v2 = vrot.slane %v1005_v16, 7  ;;  %v17882_v30 = vsel %vm10647_vm1, 4294967295, %v17881_v30  ;;  %vm10652_vm8 = vcmp.lt.s32.totalorder %v1141_v25, 15  ;;  %v1997_v56 = vsel %vm17886_vm9, %v10511_v63, %v10637_v23 }
  0xaf   : > { %v10601_v45 = vpop.permute.xlu1 %2064  ;;  %17883 = vst [vmem:[#allocation31_spill] sm:$0xff] %v17882_v30  ;;  %vm10659_vm6 = vcmp.gt.s32.totalorder %v1136_v6, 0  ;;  %v10664_v16 = vpack.c.b16 %v1524_v27, %v9993_v4  ;;  %v1734_v18 = vsel %vm10647_vm1, %v10448_v36, 0  ;;  %vm1462_vm2 = vmpackc.low %vm10652_vm8, %vm10652_vm8  ;;  %vm17460_vm8 = vcmask 23552  }
  0xb0   : > { %v10609_v0 = vpop.permute.xlu2 %2106  ;;  %v1010_v25 = vor.u32 %v1008_v26, %v10641_v2  ;;  %vm1198_vm9 = vmpackc.low %vm10659_vm6, %vm10659_vm6  ;;  %vm17459_vm6 = vcmask 48128  }
  0xb1   : > { %2074 = vrot.lane.b32.xlu0 %v1733_v34, %s17830_s4  ;;  %v811_v34 = vld [vmem:[%s10011_s9 + $0x98] sm:$0xff]  ;;  %v17458_v27 = vrot.slane %v10664_v16, 7 }
  0xb2   : > { %v10688_v26 = vsel %vm17889_vm12, %v10516_v46, %v1010_v25  ;;  %vm17893_vm12 = vcmask 1040384  }
  0xb3   : > { %v1934_v59 = vpop.permute.xlu0 %1933  ;;  %v1791_v46 = vsel %vm10605_vm7, %v10688_v26, 0 }
  0xb5   : > { %2280 = vrot.lane.b32.xlu1 %v10618_v14, %s17854_s29 }
  0xb6   : > { %2360 = vrot.lane.b32.xlu2 %v2330_v57, %s17821_s1  ;;  %v843_v57 = vpack.c.bf16 %v811_v34, %v811_v34  ;;  %v1758_v34 = vsel %vm10605_vm7, %v10560_v12, 0 }
  0xb7   : > { %v10639_v9 = vpop.permute.xlu1 %2066  ;;  %v10681_v6 = vrot.slane %v1758_v34, 1  ;;  %v17892_v34 = vrot.slane %v10505_v21, 7 }
  0xb8   : > { %v10643_v8 = vpop.permute.xlu2 %2272  ;;  %v911_v63 = vunpack.c.l.b16 %v843_v57 }
  0xb9   : > { %2244 = vrot.lane.b32.xlu0 %v1773_v24, %s17841_s7  ;;  %v910_v24 = vunpack.c.l.b16 %v842_v43  ;;  %v17890_v43 = vmov 0   ;;  %v1571_v25 = vsel %vm17893_vm12, %v17892_v34, %v17458_v27  ;;  %vm17472_vm12 = vcmask 146432  }
  0xba   : > { %v1494_v57 = vsel %vm1462_vm2, 65537, %v17890_v43  ;;  %vm17466_vm2 = vcmask 97280   ;;  %v1635_v34 = vunpack.c.l.b16 %v1571_v25  ;;  %v1873_v27 = vshll.u32 %v10688_v26, 16 }
  0xbb   : > { %v2017_v50 = vpop.permute.xlu0 %2016  ;;  %v933_v54 = vpack.c.b16 %v911_v63, %v910_v24  ;;  %v1526_v7 = vunpack.c.l.b16 %v1494_v57  ;;  %v1396_v24 = vsel %vm10125_vm0, %v10076_v10, 0  ;;  %v10716_v57 = vrot.slane %v1791_v46, 1 }
  0xbc   : > { %v1636_v10 = vunpack.c.h.b16 %v1571_v25 }
  0xbd   : > { %2028 = vrot.lane.b32.xlu1 %v1997_v56, %s17835_s10  ;;  %v1228_v56 = vsel %vm1198_vm9, 65537, %v17890_v43  ;;  %v1013_v21 = vshrl.u32 %v933_v54, 16  ;;  %vm17467_vm9 = vcmask 121856   ;;  %v1016_v29 = vshll.u32 %v933_v54, 16 }
  0xbe   : > { %2076 = vrot.lane.b32.xlu2 %v1734_v18, %s17830_s4  ;;  %v2167_v18 = vsel %vm17891_vm4, %v10554_v20, %v10681_v6  ;;  %v1774_v20 = vsel %vm10647_vm1, %v10560_v12, 0  ;;  %v1258_v40 = vunpack.c.l.b16 %v1228_v56  ;;  %vm17465_vm4 = vcmask 72704  }
  0xbf   : > { %v10684_v11 = vpop.permute.xlu1 %2350  ;;  %v10722_v56 = vpack.c.b16 %v1526_v7, %v9993_v4  ;;  %v1875_v54 = vrot.slane %v1873_v27, 1  ;;  %v813_v27 = vld [vmem:[%s10011_s9 + $0xa8] sm:$0xff] }
  0xc0   : > { %v10691_v44 = vpop.permute.xlu2 %2020 }
  0xc1   : > { %1945 = vrot.lane.b32.xlu0 %v10496_v55, %s17837_s6  ;;  %v2384_v55 = vsel %vm17460_vm8, 0, %v1934_v59  ;;  %v1869_v59 = vshrl.u32 %v10560_v12, 16  ;;  %vm1639_vm8 = vcmp.ne.s32.totalorder %v1635_v34, %v10021_v15  ;;  %v17897_v34 = vmov 0 }
  0xc2   : > { %v2432_v37 = vsel %vm17459_vm6, %v2384_v55, %v2017_v50  ;;  %vm17473_vm6 = vcmask 220160  }
  0xc3   : > { %v2019_v63 = vpop.permute.xlu0 %2018  ;;  %v2465_v55 = vsel %vm17465_vm4, %v2432_v37, %v10601_v45  ;;  %vm17894_vm4 = vcmask 1046528  }
  0xc4   : > { %v2332_v37 = vsel %vm17894_vm4, %v10603_v28, %v10716_v57  ;;  %vm17896_vm4 = vcmask 171008  }
  0xc5   : > { %2198 = vrot.lane.b32.xlu1 %v2167_v18, %s17840_s30  ;;  %v9265_v18 = vunpack.i.l.s16 %v1258_v40  ;;  %v1871_v40 = vor.u32 %v1869_v59, %v10599_v33  ;;  %v812_v33 = vld [vmem:[%s10011_s9 + $0xa0] sm:$0xff]  ;;  %v1106_v59 = vadd.s32 128, %v9990_v1 }
  0xc6   : > { %2246 = vrot.lane.b32.xlu2 %v1774_v20, %s17841_s7  ;;  %v10729_v20 = vrot.slane %v1013_v21, 7 }
  0xc7   : > { %v2105_v50 = vpop.permute.xlu1 %2104  ;;  %vm1337_vm7 = vcmp.ne.s32.totalorder %v9265_v18, %v10021_v15 }
  0xc8   : > { %v10726_v46 = vpop.permute.xlu2 %2190  ;;  %v2498_v25 = vsel %vm17466_vm2, %v2465_v55, %v2105_v50  ;;  %vm1640_vm2 = vcmp.ne.s32.totalorder %v1636_v10, %v9996_v5  ;;  %v1143_v55 = vand.u32 15, %v1111_v38 }
  0xc9   : > { %v2531_v7 = vsel %vm17467_vm9, %v2498_v25, %v10518_v32  ;;  %2116 = vrot.lane.b32.xlu0 %v10618_v14, %s17824_s0  ;;  %v1572_v32 = vrot.slane %v10722_v56, 7  ;;  %vm17895_vm9 = vcmask 23552   ;;  %vm10749_vm0 = vmpackc.low %vm1640_vm2, %vm1639_vm8  ;;  %vm17902_vm8 = vsmask.f32 7424 }
  0xca   : > { %v2564_v45 = vsel %vm17472_vm12, %v2531_v7, %v10481_v48  ;;  %v2387_v21 = vsel %vm17895_vm9, %v1396_v24, %v10565_v39  ;;  %v17898_v34 = vsel %vm10749_vm0, 4294967295, %v17897_v34  ;;  %v1018_v48 = vor.u32 %v1016_v29, %v10729_v20 }
  0xcb   : > { %v2271_v50 = vpop.permute.xlu0 %2270  ;;  %17899 = vst [vmem:[#allocation32_spill] sm:$0xff] %v17898_v34  ;;  %vm17900_vm12 = vcmask 195584   ;;  %vm17901_vm9 = vcmask 48128   ;;  %v10764_v38 = vsel %vm17902_vm8, %v1871_v40, %v1875_v54  ;;  %v17903_v29 = vrot.slane %v10664_v16, 7 }
  0xcc   : > { %v2597_v28 = vsel %vm17896_vm4, %v2564_v45, %v2271_v50  ;;  %v2434_v24 = vsel %vm17901_vm9, %v2387_v21, %v2019_v63  ;;  %vm17904_vm2 = vcmask 1040384   ;;  %v844_v63 = vpack.c.bf16 %v812_v33, %v812_v33 }
  0xcd   : > { %2362 = vrot.lane.b32.xlu1 %v2332_v37, %s17821_s1  ;;  %v2630_v39 = vsel %vm17900_vm12, %v2597_v28, %v10684_v11  ;;  %v1573_v10 = vsel %vm17904_vm2, %v17903_v29, %v1572_v32  ;;  %vm10774_vm12 = vmpackc.low %vm10027_vm5, %vm1337_vm7  ;;  %v17905_v11 = vmov 0  ;;  %v845_v25 = vpack.c.bf16 %v813_v27, %v813_v27 }
  0xce   : > { %1947 = vrot.lane.b32.xlu2 %v10618_v14, %s17837_s6  ;;  %9293 = vmatmul.msk.bf16.vlgmr.msra.gmra.mxu0 %vm17473_vm6, %v2630_v39  ;;  %v17906_v11 = vsel %vm10774_vm12, 4294967295, %v17905_v11  ;;  %v1705_v14 = vsel %vm10749_vm0, %v10560_v12, 0  ;;  %vm10781_vm4 = vcmp.lt.s32.totalorder %v1143_v55, 15  ;;  %vm17910_vm9 = vsmask.f32 256 }
  0xcf   : > { %v2237_v18 = vpop.permute.xlu1 %2236  ;;  %17907 = vst [vmem:[#allocation33_spill] sm:$0xff] %v17906_v11  ;;  %v10789_v37 = vsel %vm17910_vm9, %v10641_v2, %v1018_v48  ;;  %vm17911_vm7 = vcmask 72704   ;;  %v1642_v40 = vunpack.c.l.b16 %v1573_v10  ;;  %v1643_v21 = vunpack.c.h.b16 %v1573_v10  ;;  %vm1464_vm8 = vmpackc.low %vm10781_vm4, %vm10781_vm4 }
  0xd0   : > { %v10785_v16 = vpop.permute.xlu2 %2354  ;;  %v2467_v45 = vsel %vm17911_vm7, %v2434_v24, %v10639_v9  ;;  %v1735_v50 = vsel %vm10774_vm12, %v10560_v12, 0  ;;  %v1998_v55 = vrot.slane %v1705_v14, 1  ;;  %v1138_v28 = vand.u32 15, %v1106_v59 }
  0xd1   : > { %2282 = vrot.lane.b32.xlu0 %v10764_v38, %s17854_s29  ;;  %v1877_v48 = vshrl.u32 %v10688_v26, 16  ;;  %v1881_v9 = vshll.u32 %v10789_v37, 16  ;;  %v912_v33 = vunpack.c.l.b16 %v844_v63  ;;  %v913_v27 = vunpack.c.l.b16 %v845_v25 }
  0xd2   : > { %vm17912_vm2 = vcmask 97280   ;;  %vm17913_vm9 = vcmask 121856   ;;  %vm1646_vm7 = vcmp.ne.s32.totalorder %v1642_v40, %v10021_v15  ;;  %vm1647_vm6 = vcmp.ne.s32.totalorder %v1643_v21, %v9996_v5 }
  0xd3   : > { %v2189_v2 = vpop.permute.xlu0 %2188  ;;  %v2500_v39 = vsel %vm17912_vm2, %v2467_v45, %v10609_v0  ;;  %v1496_v29 = vsel %vm1464_vm8, 65537, %v17890_v43  ;;  %vm17914_vm4 = vcmask 1046528   ;;  %vm10814_vm11 = vcmp.gt.s32.totalorder %v1138_v28, 0  ;;  %vm10826_vm2 = vmpackc.low %vm1647_vm6, %vm1646_vm7 }
  0xd4   : > { %v2533_v24 = vsel %vm17913_vm9, %v2500_v39, %v2189_v2  ;;  %v1999_v10 = vsel %vm17914_vm4, %v10637_v23, %v1998_v55  ;;  %v1879_v14 = vor.u32 %v1877_v48, %v1875_v54  ;;  %v10818_v63 = vrot.slane %v1881_v9, 1  ;;  %vm1200_vm9 = vmpackc.low %vm10814_vm11, %vm10814_vm11 }
  0xd5   : > { %2078 = vrot.lane.b32.xlu1 %v1735_v50, %s17830_s4  ;;  %v1759_v25 = vsel %vm10749_vm0, %v10688_v26, 0  ;;  %v934_v7 = vpack.c.b16 %v913_v27, %v912_v33  ;;  %vm17917_vm8 = vcmask 146432   ;;  %v17918_v21 = vmov 0 }
  0xd6   : > { %2118 = vrot.lane.b32.xlu2 %v10764_v38, %s17824_s0  ;;  %v2566_v45 = vsel %vm17917_vm8, %v2533_v24, %v2237_v18  ;;  %v17919_v21 = vsel %vm10826_vm2, 4294967295, %v17918_v21  ;;  %v1528_v23 = vunpack.c.l.b16 %v1496_v29  ;;  %v1775_v54 = vsel %vm10774_vm12, %v10688_v26, 0 }
  0xd7   : > { %v1938_v0 = vpop.permute.xlu1 %1937  ;;  %17920 = vst [vmem:[#allocation34_spill] sm:$0xff] %v17919_v21  ;;  %v2168_v50 = vrot.slane %v1759_v25, 1  ;;  %vm17921_vm4 = vsmask.f32 7424  ;;  %vm17922_vm6 = vcmask 171008   ;;  %v1706_v48 = vsel %vm10826_vm2, %v10688_v26, 0 }
  0xd8   : > { %v10824_v40 = vpop.permute.xlu2 %2070  ;;  %v10839_v18 = vsel %vm17921_vm4, %v1879_v14, %v10818_v63  ;;  %v2599_v2 = vsel %vm17922_vm6, %v2566_v45, %v10643_v8  ;;  %v1021_v9 = vshrl.u32 %v934_v7, 16  ;;  %vm17923_vm7 = vcmask 195584  }
  0xd9   : > { %2030 = vrot.lane.b32.xlu0 %v1999_v10, %s17835_s10  ;;  %v1230_v27 = vsel %vm1200_vm9, 65537, %v17890_v43  ;;  %v1108_v39 = vadd.s32 144, %v9990_v1  ;;  %v10850_v24 = vpack.c.b16 %v1528_v23, %v9993_v4  ;;  %v1397_v8 = vsel %vm10292_vm10, %v10080_v17, 0 }
  0xda   : > { %vm17924_vm11 = vcmask 220160   ;;  %vm17925_vm8 = vcmask 1046528   ;;  %v10861_v10 = vrot.slane %v1706_v48, 1  ;;  %v1792_v14 = vsel %vm10749_vm0, %v10789_v37, 0 }
  0xdb   : > { %v2353_v28 = vpop.permute.xlu0 %2352  ;;  %v2169_v29 = vsel %vm17925_vm8, %v10681_v6, %v2168_v50  ;;  %v1260_v25 = vunpack.c.l.b16 %v1230_v27  ;;  %v10866_v45 = vrot.slane %v1021_v9, 7  ;;  %v1024_v23 = vshll.u32 %v934_v7, 16  ;;  %vm17927_vm4 = vmmov %vm17925_vm8 }
  0xdc   : > { %v2632_v33 = vsel %vm17923_vm7, %v2599_v2, %v2353_v28  ;;  %v17476_v28 = vrot.slane %v10850_v24, 7  ;;  %vm17926_vm9 = vcmask 23552   ;;  %v10873_v2 = vrot.slane %v1792_v14, 1 }
  0xdd   : > { %2248 = vrot.lane.b32.xlu1 %v1775_v54, %s17841_s7  ;;  %v1140_v54 = vand.u32 15, %v1108_v39  ;;  %v2390_v6 = vsel %vm17926_vm9, %v1397_v8, %v1938_v0  ;;  %v9267_v9 = vunpack.i.l.s16 %v1260_v25  ;;  %v1026_v7 = vor.u32 %v1024_v23, %v10866_v45  ;;  %vm17933_vm9 = vmmov %vm17927_vm4 }
  0xde   : > { %2284 = vrot.lane.b32.xlu2 %v10839_v18, %s17854_s29  ;;  %9294 = vmatmul.msk.bf16.gmra.mxu0 %vm17924_vm11, %v2632_v33  ;;  %v2001_v33 = vsel %vm17927_vm4, %v1998_v55, %v10861_v10  ;;  %vm17928_vm6 = vcmask 48128   ;;  %v1760_v39 = vsel %vm10826_vm2, %v10789_v37, 0  ;;  %vm17931_vm11 = vcmask 1040384  }
  0xdf   : > { %v2109_v59 = vpop.permute.xlu1 %2108  ;;  %v2436_v27 = vsel %vm17928_vm6, %v2390_v6, %v10691_v44  ;;  %vm10883_vm7 = vcmp.gt.s32.totalorder %v1140_v54, 0  ;;  %v1575_v55 = vsel %vm17931_vm11, %v1572_v32, %v17476_v28  ;;  %vm17932_vm8 = vcmask 72704   ;;  %v814_v44 = vld [vmem:[%s10011_s9 + $0xb0] sm:$0xff] }
  0xe0   : > { %v10868_v17 = vpop.permute.xlu2 %2240  ;;  %v1113_v14 = vadd.s32 184, %v9990_v1  ;;  %v2334_v25 = vsel %vm17933_vm9, %v10716_v57, %v10873_v2  ;;  %v10902_v54 = vrot.slane %v1760_v39, 1  ;;  %vm1344_vm4 = vcmp.ne.s32.totalorder %v9267_v9, %v10021_v15  ;;  %vm1202_vm11 = vmpackc.low %vm10883_vm7, %vm10883_vm7 }
  0xe1   : > { %2200 = vrot.lane.b32.xlu0 %v2169_v29, %s17840_s30  ;;  %v815_v29 = vld [vmem:[%s10011_s9 + $0xb8] sm:$0xff]  ;;  %vm17934_vm6 = vsmask.f32 256  ;;  %v1649_v32 = vunpack.c.l.b16 %v1575_v55  ;;  %v846_v57 = vpack.c.bf16 %v814_v44, %v814_v44  ;;  %v1885_v39 = vshrl.u32 %v10789_v37, 16 }
  0xe2   : > { %v10907_v56 = vsel %vm17934_vm6, %v10729_v20, %v1026_v7  ;;  %v1232_v7 = vsel %vm1202_vm11, 65537, %v17890_v43  ;;  %vm17936_vm9 = vcmask 121856   ;;  %vm17937_vm7 = vcmask 1046528   ;;  %vm10927_vm6 = vmpackc.low %vm10027_vm5, %vm1344_vm4 }
  0xe3   : > { %v2069_v48 = vpop.permute.xlu0 %2068  ;;  %v1889_v20 = vshll.u32 %v10907_v56, 16  ;;  %vm10935_vm11 = vcmp.ne.s32.totalorder %v1649_v32, %v10021_v15  ;;  %v914_v9 = vunpack.c.l.b16 %v846_v57  ;;  %vm17946_vm4 = vcmask 171008  }
  0xe4   : > { %v2469_v8 = vsel %vm17932_vm8, %v2436_v27, %v2069_v48  ;;  %vm17935_vm8 = vcmask 97280   ;;  %v1650_v48 = vunpack.c.h.b16 %v1575_v55  ;;  %v1145_v27 = vand.u32 15, %v1113_v14 }
  0xe5   : > { %1949 = vrot.lane.b32.xlu1 %v10764_v38, %s17837_s6  ;;  %v2502_v38 = vsel %vm17935_vm8, %v2469_v8, %v2109_v59  ;;  %v2171_v59 = vsel %vm17937_vm7, %v2168_v50, %v10902_v54  ;;  %v17938_v55 = vmov 0  ;;  %v1793_v8 = vsel %vm10826_vm2, %v10907_v56, 0 }
  0xe6   : > { %2032 = vrot.lane.b32.xlu2 %v2001_v33, %s17835_s10  ;;  %v847_v33 = vpack.c.bf16 %v815_v29, %v815_v29  ;;  %v2535_v0 = vsel %vm17936_vm9, %v2502_v38, %v10726_v46  ;;  %v17939_v55 = vsel %vm10927_vm6, 4294967295, %v17938_v55  ;;  %vm17943_vm8 = vcmask 146432  }
  0xe7   : > { %v2275_v23 = vpop.permute.xlu1 %2274  ;;  %17940 = vst [vmem:[#allocation35_spill] sm:$0xff] %v17939_v55  ;;  %vm10941_vm9 = vcmp.ne.s32.totalorder %v1650_v48, %v9996_v5  ;;  %vm10948_vm7 = vcmp.lt.s32.totalorder %v1145_v27, 15  ;;  %v1736_v38 = vsel %vm10927_vm6, %v10688_v26, 0  ;;  %v1887_v48 = vor.u32 %v1885_v39, %v10818_v63 }
  0xe8   : > { %v10913_v6 = vpop.permute.xlu2 %1941  ;;  %v915_v29 = vunpack.c.l.b16 %v847_v33  ;;  %v10959_v57 = vrot.slane %v1889_v20, 1  ;;  %vm10968_vm2 = vmpackc.low %vm10941_vm9, %vm10935_vm11  ;;  %v17951_v27 = vmov 0  ;;  %v1115_v39 = vadd.s32 200, %v9990_v1 }
  0xe9   : > { %2364 = vrot.lane.b32.xlu0 %v2334_v25, %s17821_s1  ;;  %v1262_v25 = vunpack.c.l.b16 %v1232_v7  ;;  %v17952_v27 = vsel %vm10968_vm2, 4294967295, %v17951_v27  ;;  %v1398_v20 = vsel %vm10349_vm13, %v10151_v62, 0  ;;  %vm17954_vm11 = vsmask.f32 7424  ;;  %v816_v62 = vld [vmem:[%s10011_s9 + $0xc0] sm:$0xff] }
  0xea   : > { %17953 = vst [vmem:[#allocation36_spill] sm:$0xff] %v17952_v27  ;;  %v935_v7 = vpack.c.b16 %v915_v29, %v914_v9  ;;  %vm17955_vm9 = vcmask 1046528   ;;  %v1707_v44 = vsel %vm10968_vm2, %v10789_v37, 0  ;;  %v817_v29 = vld [vmem:[%s10011_s9 + $0xc8] sm:$0xff]  ;;  %vm17967_vm0 = vcmask 97280  }
  0xeb   : > { %v2239_v28 = vpop.permute.xlu0 %2238  ;;  %v9269_v63 = vunpack.i.l.s16 %v1262_v25  ;;  %v11004_v32 = vrot.slane %v1707_v44, 1  ;;  %vm17968_vm13 = vcmask 121856  }
  0xec   : > { %v2568_v46 = vsel %vm17943_vm8, %v2535_v0, %v2239_v28  ;;  %vm17949_vm8 = vcmask 195584   ;;  %v10984_v0 = vsel %vm17954_vm11, %v1887_v48, %v10959_v57  ;;  %v1029_v9 = vshrl.u32 %v935_v7, 16 }
  0xed   : > { %2120 = vrot.lane.b32.xlu1 %v10839_v18, %s17824_s0  ;;  %v2601_v14 = vsel %vm17946_vm4, %v2568_v46, %v2275_v23  ;;  %vm17950_vm4 = vcmask 220160   ;;  %v10962_v23 = vrot.slane %v1793_v8, 1  ;;  %v1110_v46 = vadd.s32 160, %v9990_v1 }
  0xee   : > { %2202 = vrot.lane.b32.xlu2 %v2171_v59, %s17840_s30  ;;  %v2634_v28 = vsel %vm17949_vm8, %v2601_v14, %v10785_v16  ;;  %vm1466_vm8 = vmpackc.low %vm10948_vm7, %vm10948_vm7  ;;  %vm1351_vm7 = vcmp.ne.s32.totalorder %v9269_v63, %v10021_v15  ;;  %v1147_v14 = vand.u32 15, %v1115_v39  ;;  %v17957_v63 = vmov 0 }
  0xef   : > { %v2023_v33 = vpop.permute.xlu1 %2022  ;;  %9295 = vmatmul.msk.bf16.gmra.mxu0 %vm17950_vm4, %v2634_v28  ;;  %v2336_v8 = vsel %vm17955_vm9, %v10873_v2, %v10962_v23  ;;  %v1498_v50 = vsel %vm1466_vm8, 65537, %v17890_v43  ;;  %vm17956_vm4 = vcmask 23552   ;;  %v1776_v2 = vsel %vm10927_vm6, %v10789_v37, 0  ;;  %vm11010_vm8 = vmpackc.low %vm10027_vm5, %vm1351_vm7 }
  0xf0   : > { %v10972_v16 = vpop.permute.xlu2 %2112  ;;  %v1530_v28 = vunpack.c.l.b16 %v1498_v50  ;;  %v1142_v48 = vand.u32 15, %v1110_v46  ;;  %v17958_v63 = vsel %vm11010_vm8, 4294967295, %v17957_v63  ;;  %v11014_v39 = vrot.slane %v1029_v9, 7 }
  0xf1   : > { %2080 = vrot.lane.b32.xlu0 %v1736_v38, %s17830_s4  ;;  %17959 = vst [vmem:[#allocation37_spill] sm:$0xff] %v17958_v63  ;;  %vm17960_vm11 = vcmask 48128   ;;  %vm11018_vm9 = vcmp.lt.s32.totalorder %v1147_v14, 15 }
  0xf2   : > { %v11026_v50 = vpack.c.b16 %v1530_v28, %v9993_v4  ;;  %vm11034_vm7 = vcmp.gt.s32.totalorder %v1142_v48, 0 }
  0xf3   : > { %v1940_v59 = vpop.permute.xlu0 %1939 }
  0xf4   : > { %v2393_v25 = vsel %vm17956_vm4, %v1398_v20, %v1940_v59  ;;  %v1032_v20 = vshll.u32 %v935_v7, 16  ;;  %v848_v59 = vpack.c.bf16 %v816_v62, %v816_v62  ;;  %vm17963_vm4 = vcmask 1046528  }
  0xf5   : > { %2286 = vrot.lane.b32.xlu1 %v10984_v0, %s17854_s29  ;;  %v2438_v34 = vsel %vm17960_vm11, %v2393_v25, %v2023_v33  ;;  %v2003_v46 = vsel %vm17963_vm4, %v10861_v10, %v11004_v32  ;;  %v1737_v7 = vsel %vm11010_vm8, %v10789_v37, 0  ;;  %v1761_v33 = vsel %vm10968_vm2, %v10907_v56, 0  ;;  %vm1468_vm4 = vmpackc.low %vm11018_vm9, %vm11018_vm9 }
  0xf6   : > { %2366 = vrot.lane.b32.xlu2 %v2336_v8, %s17821_s1  ;;  %v849_v8 = vpack.c.bf16 %v817_v29, %v817_v29  ;;  %vm17966_vm11 = vcmask 72704   ;;  %v1034_v10 = vor.u32 %v1032_v20, %v11014_v39  ;;  %v916_v14 = vunpack.c.l.b16 %v848_v59 }
  0xf7   : > { %v2193_v38 = vpop.permute.xlu1 %2192  ;;  %v2471_v29 = vsel %vm17966_vm11, %v2438_v34, %v10824_v40  ;;  %v11047_v28 = vrot.slane %v1761_v33, 1  ;;  %vm1204_vm11 = vmpackc.low %vm11034_vm7, %vm11034_vm7  ;;  %v1576_v34 = vrot.slane %v11026_v50, 7  ;;  %v1500_v48 = vsel %vm1468_vm4, 65537, %v17890_v43 }
  0xf8   : > { %v11006_v21 = vpop.permute.xlu2 %2278  ;;  %v917_v25 = vunpack.c.l.b16 %v849_v8  ;;  %vm17970_vm9 = vcmask 1046528   ;;  %vm17972_vm7 = vcmask 1040384   ;;  %v1777_v62 = vsel %vm11010_vm8, %v10907_v56, 0 }
  0xf9   : > { %2250 = vrot.lane.b32.xlu0 %v1776_v2, %s17841_s7  ;;  %v2173_v50 = vsel %vm17970_vm9, %v10902_v54, %v11047_v28  ;;  %vm17974_vm4 = vcmask 171008  }
  0xfa   : > { %v936_v44 = vpack.c.b16 %v917_v25, %v916_v14 }
  0xfb   : > { %v2111_v9 = vpop.permute.xlu0 %2110 }
  0xfc   : > { %v2504_v2 = vsel %vm17967_vm0, %v2471_v29, %v2111_v9  ;;  %vm17969_vm0 = vsmask.f32 256  ;;  %v17971_v9 = vrot.slane %v10850_v24, 7 }
  0xfd   : > { %2034 = vrot.lane.b32.xlu1 %v2003_v46, %s17835_s10  ;;  %v2537_v20 = vsel %vm17968_vm13, %v2504_v2, %v2193_v38  ;;  %v11059_v8 = vsel %vm17969_vm0, %v10866_v45, %v1034_v10  ;;  %v1234_v46 = vsel %vm1204_vm11, 65537, %v17890_v43  ;;  %vm17973_vm13 = vcmask 146432  }
  0xfe   : > { %2082 = vrot.lane.b32.xlu2 %v1737_v7, %s17830_s4  ;;  %v1577_v38 = vsel %vm17972_vm7, %v17971_v9, %v1576_v34  ;;  %v1532_v7 = vunpack.c.l.b16 %v1500_v48  ;;  %v2570_v33 = vsel %vm17973_vm13, %v2537_v20, %v10868_v17  ;;  %v1264_v54 = vunpack.c.l.b16 %v1234_v46 }
  0xff   : > { %v2357_v40 = vpop.permute.xlu1 %2356  ;;  %v1037_v10 = vshrl.u32 %v936_v44, 16  ;;  %vm17975_vm11 = vcmask 195584   ;;  %v1656_v14 = vunpack.c.l.b16 %v1577_v38  ;;  %v1657_v25 = vunpack.c.h.b16 %v1577_v38 }
 0x100   : > { %v11055_v59 = vpop.permute.xlu2 %2026  ;;  %vm17976_vm0 = vcmask 220160   ;;  %v1893_v2 = vshrl.u32 %v10907_v56, 16  ;;  %v1897_v48 = vshll.u32 %v11059_v8, 16  ;;  %v11088_v20 = vpack.c.b16 %v1532_v7, %v9993_v4 }
 0x101   : > { %1951 = vrot.lane.b32.xlu0 %v10839_v18, %s17837_s6  ;;  %v1794_v18 = vsel %vm10968_vm2, %v11059_v8, 0  ;;  %v1399_v46 = vsel %vm10439_vm14, %v10190_v42, 0  ;;  %v9271_v9 = vunpack.i.l.s16 %v1264_v54  ;;  %v11095_v38 = vrot.slane %v1037_v10, 7 }
 0x102   : > { %v11083_v17 = vrot.slane %v1794_v18, 1  ;;  %vm1660_vm9 = vcmp.ne.s32.totalorder %v1656_v14, %v10021_v15  ;;  %vm1661_vm7 = vcmp.ne.s32.totalorder %v1657_v25, %v9996_v5  ;;  %vm17977_vm13 = vcmask 1046528   ;;  %v818_v14 = vld [vmem:[%s10011_s9 + $0xd0] sm:$0xff] }
 0x103   : > { %v2277_v45 = vpop.permute.xlu0 %2276  ;;  %v1895_v7 = vor.u32 %v1893_v2, %v10959_v57  ;;  %v17487_v18 = vrot.slane %v11088_v20, 7  ;;  %v17979_v10 = vmov 0  ;;  %v1112_v2 = vadd.s32 176, %v9990_v1 }
 0x104   : > { %v2603_v29 = vsel %vm17974_vm4, %v2570_v33, %v2277_v45  ;;  %v1040_v33 = vshll.u32 %v936_v44, 16  ;;  %v1117_v45 = vadd.s32 216, %v9990_v1  ;;  %v2338_v42 = vsel %vm17977_vm13, %v10962_v23, %v11083_v17  ;;  %v819_v23 = vld [vmem:[%s10011_s9 + $0xd8] sm:$0xff] }
 0x105   : > { %2204 = vrot.lane.b32.xlu1 %v2173_v50, %s17840_s30  ;;  %v2636_v24 = vsel %vm17975_vm11, %v2603_v29, %v2357_v40  ;;  %vm17978_vm4 = vcmask 23552   ;;  %vm1358_vm11 = vcmp.ne.s32.totalorder %v9271_v9, %v10021_v15  ;;  %vm17982_vm13 = vcmask 48128  }
 0x106   : > { %2252 = vrot.lane.b32.xlu2 %v1777_v62, %s17841_s7  ;;  %9296 = vmatmul.msk.bf16.gmra.mxu0 %vm17976_vm0, %v2636_v24  ;;  %v1899_v62 = vrot.slane %v1897_v48, 1  ;;  %v2396_v44 = vsel %vm17978_vm4, %v1399_v46, %v10913_v6  ;;  %v1149_v54 = vand.u32 15, %v1117_v45  ;;  %vm11110_vm0 = vmpackc.low %vm1661_vm7, %vm1660_vm9  ;;  %v1042_v24 = vor.u32 %v1040_v33, %v11095_v38 }
 0x107   : > { %v2073_v40 = vpop.permute.xlu1 %2072  ;;  %v17980_v10 = vsel %vm11110_vm0, 4294967295, %v17979_v10  ;;  %vm17983_vm4 = vsmask.f32 7424  ;;  %vm17984_vm9 = vcmask 1040384   ;;  %vm11130_vm7 = vmpackc.low %vm10027_vm5, %vm1358_vm11  ;;  %v17985_v46 = vmov 0 }
 0x108   : > { %v11093_v50 = vpop.permute.xlu2 %2196  ;;  %17981 = vst [vmem:[#allocation38_spill] sm:$0xff] %v17980_v10  ;;  %v11122_v6 = vsel %vm17983_vm4, %v1895_v7, %v1899_v62  ;;  %v1579_v25 = vsel %vm17984_vm9, %v1576_v34, %v17487_v18  ;;  %v17986_v46 = vsel %vm11130_vm7, 4294967295, %v17985_v46  ;;  %v850_v9 = vpack.c.bf16 %v818_v14, %v818_v14 }
 0x109   : > { %2122 = vrot.lane.b32.xlu0 %v10984_v0, %s17824_s0  ;;  %17987 = vst [vmem:[#allocation39_spill] sm:$0xff] %v17986_v46  ;;  %v851_v33 = vpack.c.bf16 %v819_v23, %v819_v23  ;;  %vm17990_vm4 = vsmask.f32 256  ;;  %vm17991_vm11 = vcmask 72704   ;;  %v1144_v23 = vand.u32 15, %v1112_v2 }
 0x10a   : > { %v1762_v45 = vsel %vm11110_vm0, %v11059_v8, 0 }
 0x10b   : > { %v2025_v29 = vpop.permute.xlu0 %2024  ;;  %vm11169_vm10 = vcmp.gt.s32.totalorder %v1144_v23, 0  ;;  %v2174_v23 = vrot.slane %v1762_v45, 1 }
 0x10c   : > { %v2440_v57 = vsel %vm17982_vm13, %v2396_v44, %v2025_v29  ;;  %vm11137_vm13 = vcmp.lt.s32.totalorder %v1149_v54, 15  ;;  %v1663_v44 = vunpack.c.l.b16 %v1579_v25  ;;  %v1664_v29 = vunpack.c.h.b16 %v1579_v25 }
 0x10d   : > { %2368 = vrot.lane.b32.xlu1 %v2338_v42, %s17821_s1  ;;  %v11145_v42 = vsel %vm17990_vm4, %v11014_v39, %v1042_v24  ;;  %v2473_v7 = vsel %vm17991_vm11, %v2440_v57, %v2073_v40  ;;  %v1738_v54 = vsel %vm11130_vm7, %v10907_v56, 0  ;;  %vm1470_vm9 = vmpackc.low %vm11137_vm13, %vm11137_vm13  ;;  %v1901_v39 = vshrl.u32 %v11059_v8, 16 }
 0x10e   : > { %1953 = vrot.lane.b32.xlu2 %v10984_v0, %s17837_s6  ;;  %v1708_v0 = vsel %vm11110_vm0, %v10907_v56, 0  ;;  %v1905_v40 = vshll.u32 %v11145_v42, 16  ;;  %v918_v24 = vunpack.c.l.b16 %v850_v9  ;;  %v919_v57 = vunpack.c.l.b16 %v851_v33 }
 0x10f   : > { %v2243_v48 = vpop.permute.xlu1 %2242  ;;  %v2004_v14 = vrot.slane %v1708_v0, 1  ;;  %vm17992_vm4 = vcmask 97280   ;;  %vm17993_vm11 = vcmask 121856   ;;  %vm1667_vm2 = vcmp.ne.s32.totalorder %v1663_v44, %v10021_v15 }
 0x110   : > { %v11141_v34 = vpop.permute.xlu2 %2360  ;;  %v2506_v25 = vsel %vm17992_vm4, %v2473_v7, %v10972_v16  ;;  %vm1668_vm14 = vcmp.ne.s32.totalorder %v1664_v29, %v9996_v5  ;;  %v1502_v2 = vsel %vm1470_vm9, 65537, %v17890_v43  ;;  %vm17994_vm13 = vcmask 1046528  }
 0x111   : > { %2288 = vrot.lane.b32.xlu0 %v11122_v6, %s17854_s29  ;;  %v2005_v0 = vsel %vm17994_vm13, %v11004_v32, %v2004_v14  ;;  %v11173_v33 = vrot.slane %v1905_v40, 1  ;;  %v937_v7 = vpack.c.b16 %v919_v57, %v918_v24  ;;  %vm17997_vm9 = vcmask 146432   ;;  %vm11181_vm4 = vmpackc.low %vm1668_vm14, %vm1667_vm2 }
 0x112   : > { %v1534_v32 = vunpack.c.l.b16 %v1502_v2  ;;  %vm18001_vm13 = vsmask.f32 7424  ;;  %vm18002_vm14 = vcmask 171008   ;;  %v1709_v40 = vsel %vm11181_vm4, %v11059_v8, 0 }
 0x113   : > { %v2195_v18 = vpop.permute.xlu0 %2194  ;;  %v1045_v24 = vshrl.u32 %v937_v7, 16  ;;  %vm18003_vm2 = vcmask 195584   ;;  %v1114_v2 = vadd.s32 192, %v9990_v1 }
 0x114   : > { %v2539_v27 = vsel %vm17993_vm11, %v2506_v25, %v2195_v18  ;;  %v1903_v18 = vor.u32 %v1901_v39, %v1899_v62  ;;  %vm1206_vm11 = vmpackc.low %vm11169_vm10, %vm11169_vm10  ;;  %v1778_v62 = vsel %vm11130_vm7, %v11059_v8, 0  ;;  %vm18004_vm10 = vcmask 220160  }
 0x115   : > { %2084 = vrot.lane.b32.xlu1 %v1738_v54, %s17830_s4  ;;  %v2572_v44 = vsel %vm17997_vm9, %v2539_v27, %v2243_v48  ;;  %v17998_v54 = vmov 0  ;;  %v1236_v25 = vsel %vm1206_vm11, 65537, %v17890_v43  ;;  %vm18005_vm9 = vcmask 1046528  }
 0x116   : > { %2124 = vrot.lane.b32.xlu2 %v11122_v6, %s17824_s0  ;;  %v17999_v54 = vsel %vm11181_vm4, 4294967295, %v17998_v54  ;;  %v11194_v27 = vsel %vm18001_vm13, %v1903_v18, %v11173_v33  ;;  %v2605_v48 = vsel %vm18002_vm14, %v2572_v44, %v11006_v21  ;;  %v1400_v21 = vsel %vm10579_vm3, %v10279_v49, 0  ;;  %vm18007_vm13 = vmmov %vm18005_vm9 }
 0x117   : > { %v1944_v16 = vpop.permute.xlu1 %1943  ;;  %18000 = vst [vmem:[#allocation40_spill] sm:$0xff] %v17999_v54  ;;  %v2175_v9 = vsel %vm18005_vm9, %v11047_v28, %v2174_v23  ;;  %v11216_v18 = vrot.slane %v1709_v40, 1  ;;  %v1795_v44 = vsel %vm11110_vm0, %v11145_v42, 0  ;;  %v1146_v49 = vand.u32 15, %v1114_v2 }
 0x118   : > { %v11179_v29 = vpop.permute.xlu2 %2076  ;;  %vm18006_vm11 = vcmask 23552   ;;  %v11228_v40 = vrot.slane %v1795_v44, 1  ;;  %vm18008_vm14 = vcmask 48128   ;;  %v1763_v2 = vsel %vm11181_vm4, %v11145_v42, 0  ;;  %v821_v44 = vld [vmem:[%s10011_s9 + $0xe8] sm:$0xff] }
 0x119   : > { %2036 = vrot.lane.b32.xlu0 %v2005_v0, %s17835_s10  ;;  %v11205_v0 = vpack.c.b16 %v1534_v32, %v9993_v4  ;;  %v1266_v32 = vunpack.c.l.b16 %v1236_v25  ;;  %v2399_v28 = vsel %vm18006_vm11, %v1400_v21, %v1944_v16  ;;  %v2007_v25 = vsel %vm18007_vm13, %v2004_v14, %v11216_v18  ;;  %vm18014_vm11 = vmmov %vm18007_vm13 }
 0x11a   : > { %v2442_v10 = vsel %vm18008_vm14, %v2399_v28, %v11055_v59  ;;  %v18011_v21 = vrot.slane %v11088_v20, 7  ;;  %vm18013_vm9 = vcmask 72704   ;;  %v820_v59 = vld [vmem:[%s10011_s9 + $0xe0] sm:$0xff]  ;;  %v11257_v28 = vrot.slane %v1763_v2, 1 }
 0x11b   : > { %v2359_v39 = vpop.permute.xlu0 %2358  ;;  %vm18015_vm14 = vsmask.f32 256  ;;  %vm18047_vm0 = vcmask 97280  }
 0x11c   : > { %v2638_v57 = vsel %vm18003_vm2, %v2605_v48, %v2359_v39  ;;  %v1048_v39 = vshll.u32 %v937_v7, 16  ;;  %vm11238_vm2 = vcmp.gt.s32.totalorder %v1146_v49, 0 }
 0x11d   : > { %2254 = vrot.lane.b32.xlu1 %v1778_v62, %s17841_s7  ;;  %9297 = vmatmul.msk.bf16.gmra.mxu0 %vm18004_vm10, %v2638_v57  ;;  %v11221_v62 = vrot.slane %v1045_v24, 7  ;;  %v17500_v57 = vrot.slane %v11205_v0, 7  ;;  %v9273_v24 = vunpack.i.l.s16 %v1266_v32  ;;  %vm18012_vm10 = vcmask 1040384  }
 0x11e   : > { %2290 = vrot.lane.b32.xlu2 %v11194_v27, %s17854_s29  ;;  %v1119_v32 = vadd.s32 232, %v9990_v1 }
 0x11f   : > { %v2115_v45 = vpop.permute.xlu1 %2114  ;;  %v1050_v7 = vor.u32 %v1048_v39, %v11221_v62  ;;  %v1581_v14 = vsel %vm18012_vm10, %v18011_v21, %v17500_v57  ;;  %v2340_v39 = vsel %vm18014_vm11, %v11083_v17, %v11228_v40  ;;  %vm1365_vm13 = vcmp.ne.s32.totalorder %v9273_v24, %v10021_v15  ;;  %vm1208_vm10 = vmpackc.low %vm11238_vm2, %vm11238_vm2 }
 0x120   : > { %v11223_v48 = vpop.permute.xlu2 %2246  ;;  %v1670_v20 = vunpack.c.l.b16 %v1581_v14  ;;  %v852_v17 = vpack.c.bf16 %v820_v59, %v820_v59  ;;  %v853_v21 = vpack.c.bf16 %v821_v44, %v821_v44  ;;  %v1151_v2 = vand.u32 15, %v1119_v32 }
 0x121   : > { %2206 = vrot.lane.b32.xlu0 %v2175_v9, %s17840_s30  ;;  %v1909_v57 = vshrl.u32 %v11145_v42, 16  ;;  %vm18018_vm11 = vcmask 121856   ;;  %vm18019_vm2 = vcmask 1046528  }
 0x122   : > { %v920_v24 = vunpack.c.l.b16 %v852_v17  ;;  %v921_v44 = vunpack.c.l.b16 %v853_v21 }
 0x123   : > { %v2075_v61 = vpop.permute.xlu0 %2074 }
 0x124   : > { %v2475_v9 = vsel %vm18013_vm9, %v2442_v10, %v2075_v61  ;;  %v11262_v61 = vsel %vm18015_vm14, %v11095_v38, %v1050_v7  ;;  %vm18017_vm9 = vcmask 97280   ;;  %v1238_v7 = vsel %vm1208_vm10, 65537, %v17890_v43  ;;  %vm11282_vm14 = vmpackc.low %vm10027_vm5, %vm1365_vm13 }
 0x125   : > { %1955 = vrot.lane.b32.xlu1 %v11122_v6, %s17837_s6  ;;  %18016 = vst [vmem:[#allocation41_spill] sm:$0xff] %v11262_v61  ;;  %v2508_v10 = vsel %vm18017_vm9, %v2475_v9, %v2115_v45  ;;  %v1913_v38 = vshll.u32 %v11262_v61, 16  ;;  %v2177_v45 = vsel %vm18019_vm2, %v2174_v23, %v11257_v28  ;;  %v1796_v9 = vsel %vm11181_vm4, %v11262_v61, 0 }
 0x126   : > { %2038 = vrot.lane.b32.xlu2 %v2007_v25, %s17835_s10  ;;  %v1671_v25 = vunpack.c.h.b16 %v1581_v14  ;;  %v2541_v16 = vsel %vm18018_vm11, %v2508_v10, %v11093_v50  ;;  %v18020_v14 = vmov 0  ;;  %vm11290_vm10 = vcmp.ne.s32.totalorder %v1670_v20, %v10021_v15 }
 0x127   : > { %v2281_v49 = vpop.permute.xlu1 %2280  ;;  %v18021_v14 = vsel %vm11282_vm14, 4294967295, %v18020_v14  ;;  %vm18024_vm9 = vcmask 146432   ;;  %vm18027_vm13 = vcmask 171008   ;;  %vm11303_vm2 = vcmp.lt.s32.totalorder %v1151_v2, 15 }
 0x128   : > { %v11268_v6 = vpop.permute.xlu2 %1947  ;;  %vm11296_vm11 = vcmp.ne.s32.totalorder %v1671_v25, %v9996_v5  ;;  %v1739_v10 = vsel %vm11282_vm14, %v11059_v8, 0  ;;  %v1911_v25 = vor.u32 %v1909_v57, %v11173_v33  ;;  %v11314_v17 = vrot.slane %v1913_v38, 1 }
 0x129   : > { %2370 = vrot.lane.b32.xlu0 %v2340_v39, %s17821_s1  ;;  %v1268_v39 = vunpack.c.l.b16 %v1238_v7  ;;  %vm11323_vm4 = vmpackc.low %vm11296_vm11, %vm11290_vm10  ;;  %v18032_v2 = vmov 0  ;;  %v938_v7 = vpack.c.b16 %v921_v44, %v920_v24  ;;  %v1121_v57 = vadd.s32 248, %v9990_v1  ;;  %v823_v44 = vld [vmem:[%s10011_s9 + $0xf8] sm:$0xff] }
 0x12a   : > { %v18033_v2 = vsel %vm11323_vm4, 4294967295, %v18032_v2  ;;  %v1401_v38 = vsel %vm10647_vm1, %v10381_v47, 0  ;;  %vm18035_vm10 = vsmask.f32 7424  ;;  %vm18036_vm11 = vcmask 1046528   ;;  %v822_v47 = vld [vmem:[%s10011_s9 + $0xf0] sm:$0xff] }
 0x12b   : > { %v2245_v52 = vpop.permute.xlu0 %2244  ;;  %18034 = vst [vmem:[#allocation42_spill] sm:$0xff] %v18033_v2  ;;  %v9275_v33 = vunpack.i.l.s16 %v1268_v39  ;;  %v1710_v59 = vsel %vm11323_vm4, %v11145_v42, 0  ;;  %v1053_v24 = vshrl.u32 %v938_v7, 16  ;;  %vm18048_vm1 = vcmask 121856   ;;  %s17549_s9 = smov 40  }
 0x12c   : > { %v2574_v50 = vsel %vm18024_vm9, %v2541_v16, %v2245_v52  ;;  %vm18030_vm9 = vcmask 195584   ;;  %v11339_v16 = vsel %vm18035_vm10, %v1911_v25, %v11314_v17  ;;  %v11359_v20 = vrot.slane %v1710_v59, 1 }
 0x12d   : > { %2126 = vrot.lane.b32.xlu1 %v11194_v27, %s17824_s0  ;;  %v2607_v32 = vsel %vm18027_vm13, %v2574_v50, %v2281_v49  ;;  %vm18031_vm13 = vcmask 220160   ;;  %v11317_v49 = vrot.slane %v1796_v9, 1  ;;  %v1116_v50 = vadd.s32 208, %v9990_v1 }
 0x12e   : > { %2208 = vrot.lane.b32.xlu2 %v2177_v45, %s17840_s30  ;;  %v2640_v52 = vsel %vm18030_vm9, %v2607_v32, %v11141_v34  ;;  %vm1472_vm9 = vmpackc.low %vm11303_vm2, %vm11303_vm2  ;;  %vm1372_vm2 = vcmp.ne.s32.totalorder %v9275_v33, %v10021_v15  ;;  %v1153_v32 = vand.u32 15, %v1121_v57  ;;  %v18038_v33 = vmov 0 }
 0x12f   : > { %v2029_v21 = vpop.permute.xlu1 %2028  ;;  %9298 = vmatmul.msk.bf16.gmra.mxu0 %vm18031_vm13, %v2640_v52  ;;  %v2342_v9 = vsel %vm18036_vm11, %v11228_v40, %v11317_v49  ;;  %v1504_v23 = vsel %vm1472_vm9, 65537, %v17890_v43  ;;  %vm18037_vm13 = vcmask 23552   ;;  %v1779_v40 = vsel %vm11282_vm14, %v11145_v42, 0  ;;  %vm11365_vm9 = vmpackc.low %vm10027_vm5, %vm1372_vm2 }
 0x130   : > { %v11327_v34 = vpop.permute.xlu2 %2118  ;;  %v1536_v52 = vunpack.c.l.b16 %v1504_v23  ;;  %v1148_v25 = vand.u32 15, %v1116_v50  ;;  %v18039_v33 = vsel %vm11365_vm9, 4294967295, %v18038_v33  ;;  %v11369_v57 = vrot.slane %v1053_v24, 7 }
 0x131   : > { %2086 = vrot.lane.b32.xlu0 %v1739_v10, %s17830_s4  ;;  %vm18040_vm10 = vcmask 48128   ;;  %vm11373_vm11 = vcmp.lt.s32.totalorder %v1153_v32, 15 }
 0x132   : > { %v11381_v23 = vpack.c.b16 %v1536_v52, %v9993_v4  ;;  %vm11389_vm2 = vcmp.gt.s32.totalorder %v1148_v25, 0 }
 0x133   : > { %v1946_v45 = vpop.permute.xlu0 %1945 }
 0x134   : > { %v2402_v39 = vsel %vm18037_vm13, %v1401_v38, %v1946_v45  ;;  %v1056_v38 = vshll.u32 %v938_v7, 16  ;;  %v854_v45 = vpack.c.bf16 %v822_v47, %v822_v47  ;;  %vm18043_vm13 = vcmask 1046528  }
 0x135   : > { %2292 = vrot.lane.b32.xlu1 %v11339_v16, %s17854_s29  ;;  %v2444_v30 = vsel %vm18040_vm10, %v2402_v39, %v2029_v21  ;;  %v2009_v50 = vsel %vm18043_vm13, %v11216_v18, %v11359_v20  ;;  %v1740_v7 = vsel %vm11365_vm9, %v11145_v42, 0  ;;  %v1764_v21 = vsel %vm11323_vm4, %v11262_v61, 0  ;;  %vm1474_vm13 = vmpackc.low %vm11373_vm11, %vm11373_vm11 }
 0x136   : > { %2372 = vrot.lane.b32.xlu2 %v2342_v9, %s17821_s1  ;;  %v855_v9 = vpack.c.bf16 %v823_v44, %v823_v44  ;;  %vm18046_vm10 = vcmask 72704   ;;  %v1058_v18 = vor.u32 %v1056_v38, %v11369_v57  ;;  %v922_v32 = vunpack.c.l.b16 %v854_v45 }
 0x137   : > { %v2199_v10 = vpop.permute.xlu1 %2198  ;;  %v2477_v44 = vsel %vm18046_vm10, %v2444_v30, %v11179_v29  ;;  %v11402_v52 = vrot.slane %v1764_v21, 1  ;;  %vm1210_vm10 = vmpackc.low %vm11389_vm2, %vm11389_vm2  ;;  %v1582_v30 = vrot.slane %v11381_v23, 7  ;;  %v1506_v25 = vsel %vm1474_vm13, 65537, %v17890_v43 }
 0x138   : > { %v11361_v54 = vpop.permute.xlu2 %2284  ;;  %v923_v39 = vunpack.c.l.b16 %v855_v9  ;;  %vm18050_vm11 = vcmask 1046528   ;;  %vm18052_vm2 = vcmask 1040384   ;;  %v1780_v47 = vsel %vm11365_vm9, %v11262_v61, 0 }
 0x139   : > { %2256 = vrot.lane.b32.xlu0 %v1779_v40, %s17841_s7  ;;  %v2179_v23 = vsel %vm18050_vm11, %v11257_v28, %v11402_v52  ;;  %vm18054_vm13 = vcmask 171008  }
 0x13a   : > { %v939_v59 = vpack.c.b16 %v923_v39, %v922_v32 }
 0x13b   : > { %v2117_v24 = vpop.permute.xlu0 %2116 }
 0x13c   : > { %v2510_v40 = vsel %vm18047_vm0, %v2477_v44, %v2117_v24  ;;  %vm18049_vm0 = vsmask.f32 256  ;;  %v18051_v24 = vrot.slane %v11205_v0, 7 }
 0x13d   : > { %2040 = vrot.lane.b32.xlu1 %v2009_v50, %s17835_s10  ;;  %v2543_v38 = vsel %vm18048_vm1, %v2510_v40, %v2199_v10  ;;  %v11414_v9 = vsel %vm18049_vm0, %v11221_v62, %v1058_v18  ;;  %v1240_v50 = vsel %vm1210_vm10, 65537, %v17890_v43  ;;  %vm18053_vm1 = vcmask 146432  }
 0x13e   : > { %2088 = vrot.lane.b32.xlu2 %v1740_v7, %s17830_s4  ;;  %v1583_v10 = vsel %vm18052_vm2, %v18051_v24, %v1582_v30  ;;  %v1538_v7 = vunpack.c.l.b16 %v1506_v25  ;;  %v2576_v21 = vsel %vm18053_vm1, %v2543_v38, %v11223_v48  ;;  %v1270_v28 = vunpack.c.l.b16 %v1240_v50 }
 0x13f   : > { %v2363_v29 = vpop.permute.xlu1 %2362  ;;  %v1061_v18 = vshrl.u32 %v939_v59, 16  ;;  %vm18055_vm10 = vcmask 195584   ;;  %v1677_v32 = vunpack.c.l.b16 %v1583_v10  ;;  %v1678_v39 = vunpack.c.h.b16 %v1583_v10 }
 0x140   : > { %v11410_v45 = vpop.permute.xlu2 %2032  ;;  %vm18056_vm0 = vcmask 220160   ;;  %v1917_v40 = vshrl.u32 %v11262_v61, 16  ;;  %v1921_v25 = vshll.u32 %v11414_v9, 16  ;;  %v1554_v38 = vpack.c.b16 %v1538_v7, %v9993_v4 }
 0x141   : > { %1957 = vrot.lane.b32.xlu0 %v11194_v27, %s17837_s6  ;;  %v1797_v27 = vsel %vm11323_vm4, %v11414_v9, 0  ;;  %v9277_v24 = vunpack.i.l.s16 %v1270_v28  ;;  %v11448_v10 = vrot.slane %v1061_v18, 7  ;;  %vm1681_vm11 = vcmp.ne.s32.totalorder %v1677_v32, %v10021_v15 }
 0x142   : > { %v11438_v48 = vrot.slane %v1797_v27, 1  ;;  %vm1682_vm2 = vcmp.ne.s32.totalorder %v1678_v39, %v9996_v5  ;;  %vm18057_vm1 = vcmask 1046528   ;;  %v1919_v7 = vor.u32 %v1917_v40, %v11314_v17 }
 0x143   : > { %v2283_v62 = vpop.permute.xlu0 %2282  ;;  %v18060_v28 = vmov 0  ;;  %vm18065_vm4 = vcmask 1040384   ;;  %v18066_v39 = vmov 0  ;;  %v1925_v2 = vshrl.u32 %v11414_v9, 16 }
 0x144   : > { %v2609_v44 = vsel %vm18054_vm13, %v2576_v21, %v2283_v62  ;;  %v1064_v21 = vshll.u32 %v939_v59, 16  ;;  %v2344_v4 = vsel %vm18057_vm1, %v11317_v49, %v11438_v48  ;;  %v11458_v62 = vrot.slane %v1554_v38, 7 }
 0x145   : > { %2210 = vrot.lane.b32.xlu1 %v2179_v23, %s17840_s30  ;;  %v2642_v0 = vsel %vm18055_vm10, %v2609_v44, %v2363_v29  ;;  %v1402_v23 = vsel %vm10774_vm12, %v10448_v36, 0  ;;  %v1923_v36 = vrot.slane %v1921_v25, 1  ;;  %vm18058_vm13 = vcmask 23552   ;;  %v11465_v44 = vld [vmem:[%s18059_s5] ss:$0 sm:$0xff] }
 0x146   : > { %2258 = vrot.lane.b32.xlu2 %v1780_v47, %s17841_s7  ;;  %9299 = vmatmul.msk.bf16.gmra.mxu0 %vm18056_vm0, %v2642_v0  ;;  %v2405_v47 = vsel %vm18058_vm13, %v1402_v23, %v11268_v6  ;;  %vm1379_vm10 = vcmp.ne.s32.totalorder %v9277_v24, %v10021_v15  ;;  %vm11468_vm0 = vmpackc.low %vm1682_vm2, %vm1681_vm11  ;;  %v1066_v17 = vor.u32 %v1064_v21, %v11448_v10  ;;  %vm18063_vm1 = vcmask 48128   ;;  %v11496_v25 = vld [vmem:[%s18068_s26] ss:$0 sm:$0xff] }
 0x147   : > { %v2079_v50 = vpop.permute.xlu1 %2078  ;;  %v18061_v28 = vsel %vm11468_vm0, 4294967295, %v18060_v28  ;;  %vm18064_vm13 = vsmask.f32 7424  ;;  %v1585_v18 = vsel %vm18065_vm4, %v1582_v30, %v11458_v62  ;;  %v1118_v0 = vadd.s32 224, %v9990_v1  ;;  %vm11485_vm11 = vmpackc.low %vm10027_vm5, %vm1379_vm10 }
 0x148   : > { %v11446_v29 = vpop.permute.xlu2 %2202  ;;  %18062 = vst [vmem:[#allocation43_spill] sm:$0xff] %v18061_v28  ;;  %v11478_v6 = vsel %vm18064_vm13, %v1919_v7, %v1923_v36  ;;  %v18067_v39 = vsel %vm11485_vm11, 4294967295, %v18066_v39  ;;  %v1711_v40 = vsel %vm11468_vm0, %v11262_v61, 0  ;;  %vm18069_vm4 = vsmask.f32 256 }
 0x149   : > { %2128 = vrot.lane.b32.xlu0 %v11339_v16, %s17824_s0  ;;  %v11502_v38 = vsel %vm18069_vm4, %v11369_v57, %v1066_v17  ;;  %vm18070_vm2 = vcmask 72704   ;;  %v1684_v24 = vunpack.c.l.b16 %v1585_v18  ;;  %v1685_v21 = vunpack.c.h.b16 %v1585_v18 }
 0x14a   : > { %v2010_v7 = vrot.slane %v1711_v40, 1  ;;  %v1929_v57 = vshll.u32 %v11502_v38, 16  ;;  %vm18071_vm10 = vcmask 97280  }
 0x14b   : > { %v2721_v59 = vpop.f32.mrf.mxu0  ;;  %v2031_v27 = vpop.permute.xlu0 %2030  ;;  %vm1688_vm13 = vcmp.ne.s32.totalorder %v1684_v24, %v10021_v15  ;;  %vm1689_vm4 = vcmp.ne.s32.totalorder %v1685_v21, %v9996_v5  ;;  %v1765_v24 = vsel %vm11468_vm0, %v11414_v9, 0 }
 0x14c   : > { %v2446_v49 = vsel %vm18063_vm1, %v2405_v47, %v2031_v27  ;;  %v1150_v47 = vand.u32 15, %v1118_v0  ;;  %vm18072_vm1 = vcmask 121856  }
 0x14d   : > { %2374 = vrot.lane.b32.xlu1 %v2344_v4, %s17821_s1  ;;  %v2479_v23 = vsel %vm18070_vm2, %v2446_v49, %v2079_v50  ;;  %v1741_v4 = vsel %vm11485_vm11, %v11262_v61, 0  ;;  %vm18073_vm2 = vcmask 1046528  }
 0x14e   : > { %1959 = vrot.lane.b32.xlu2 %v11339_v16, %s17837_s6  ;;  %v2805_v16 = vmul.f32 %v11465_v44, %v2721_v59  ;;  %v2512_v49 = vsel %vm18071_vm10, %v2479_v23, %v11327_v34  ;;  %v2011_v40 = vsel %vm18073_vm2, %v11359_v20, %v2010_v7  ;;  %vm11525_vm12 = vcmp.gt.s32.totalorder %v1150_v47, 0 }
 0x14f   : > { %v2249_v32 = vpop.permute.xlu1 %2248  ;;  %v1927_v23 = vor.u32 %v1925_v2, %v1923_v36  ;;  %vm18078_vm10 = vcmask 146432   ;;  %v18079_v20 = vmov 0  ;;  %vm1212_vm2 = vmpackc.low %vm11525_vm12, %vm11525_vm12  ;;  %v1781_v36 = vsel %vm11485_vm11, %v11414_v9, 0 }
 0x150   : > { %v11498_v30 = vpop.permute.xlu2 %2366  ;;  %v2841_v17 = vadd.f32 %v11496_v25, %v2805_v16  ;;  %vm18084_vm12 = vcmask 195584  }
 0x151   : > { %2294 = vrot.lane.b32.xlu0 %v11478_v6, %s17854_s29 }
 0x152   : > { %v11534_v21 = vmax.f32 %v2841_v17, 0.0 }
 0x153   : > { %v2723_v59 = vpop.f32.mrf.mxu0  ;;  %v2201_v27 = vpop.permute.xlu0 %2200 }
 0x154   : > { %v2806_v50 = vmul.f32 %v11465_v44, %v2723_v59  ;;  %v2545_v18 = vsel %vm18072_vm1, %v2512_v49, %v2201_v27  ;;  %v11529_v59 = vrot.slane %v1929_v57, 1  ;;  %18076 = vst [vmem:[#allocation44_spill] sm:$0xff] %v11534_v21  ;;  %vm11541_vm1 = vmpackc.low %vm1689_vm4, %vm1688_vm13  ;;  %vm18082_vm13 = vsmask.f32 7424 }
 0x155   : > { %2090 = vrot.lane.b32.xlu1 %v1741_v4, %s17830_s4  ;;  %v2578_v27 = vsel %vm18078_vm10, %v2545_v18, %v2249_v32  ;;  %v18080_v20 = vsel %vm11541_vm1, 4294967295, %v18079_v20  ;;  %v2180_v32 = vrot.slane %v1765_v24, 1  ;;  %vm18083_vm4 = vcmask 171008  }
 0x156   : > { %v2842_v0 = vadd.f32 %v11496_v25, %v2806_v50  ;;  %2130 = vrot.lane.b32.xlu2 %v11478_v6, %s17824_s0  ;;  %18081 = vst [vmem:[#allocation46_spill] sm:$0xff] %v18080_v20  ;;  %v11556_v17 = vsel %vm18082_vm13, %v1927_v23, %v11529_v59  ;;  %v2611_v49 = vsel %vm18083_vm4, %v2578_v27, %v11361_v54  ;;  %v1712_v18 = vsel %vm11541_vm1, %v11414_v9, 0 }
 0x157   : > { %v1950_v34 = vpop.permute.xlu1 %1949  ;;  %v1242_v24 = vsel %vm1212_vm2, 65537, %v17890_v43  ;;  %vm18085_vm10 = vcmask 220160   ;;  %v1403_v54 = vsel %vm10927_vm6, %v10560_v12, 0  ;;  %vm18086_vm13 = vcmask 1046528  }
 0x158   : > { %v11536_v4 = vmax.f32 %v2842_v0, 0.0  ;;  %v11539_v50 = vpop.permute.xlu2 %2082  ;;  %v2905_v0 = vpack.c.bf16 %v11534_v21, %v11534_v21  ;;  %v2181_v27 = vsel %vm18086_vm13, %v11402_v52, %v2180_v32  ;;  %v11577_v21 = vrot.slane %v1712_v18, 1  ;;  %vm18088_vm4 = vmmov %vm18086_vm13 }
 0x159   : > { %2042 = vrot.lane.b32.xlu0 %v2011_v40, %s17835_s10  ;;  %vm18087_vm2 = vcmask 23552   ;;  %vm18092_vm13 = vmmov %vm18088_vm4 }
 0x15a   : > { %18077 = vst [vmem:[#allocation45_spill] sm:$0xff] %v11536_v4  ;;  %v2906_v2 = vpack.c.bf16 %v11536_v4, %v11536_v4  ;;  %v2408_v12 = vsel %vm18087_vm2, %v1403_v54, %v1950_v34  ;;  %v2013_v18 = vsel %vm18088_vm4, %v2010_v7, %v11577_v21  ;;  %v1766_v34 = vsel %vm11541_vm1, %v11502_v38, 0 }
 0x15b   : > { %v2365_v47 = vpop.permute.xlu0 %2364  ;;  %v2726_v57 = vpop.f32.mrf.mxu0  ;;  %vm18093_vm4 = vcmask 97280  }
 0x15c   : > { %v2807_v40 = vmul.f32 %v11465_v44, %v2726_v57  ;;  %v2644_v16 = vsel %vm18084_vm12, %v2611_v49, %v2365_v47  ;;  %v2979_v23 = vunpack.c.l.b16 %v2906_v2  ;;  %v1272_v47 = vunpack.c.l.b16 %v1242_v24 }
 0x15d   : > { %2260 = vrot.lane.b32.xlu1 %v1781_v36, %s17841_s7  ;;  %9300 = vmatmul.msk.bf16.gmra.mxu0 %vm18085_vm10, %v2644_v16  ;;  %v1798_v36 = vsel %vm11468_vm0, %v11502_v38, 0  ;;  %v2978_v49 = vunpack.c.l.b16 %v2905_v0  ;;  %vm18090_vm12 = vcmask 48128   ;;  %vm18091_vm10 = vcmask 72704  }
 0x15e   : > { %2296 = vrot.lane.b32.xlu2 %v11556_v17, %s17854_s29  ;;  %v2843_v2 = vadd.f32 %v11496_v25, %v2807_v40  ;;  %v2345_v55 = vrot.slane %v1798_v36, 1  ;;  %v9279_v61 = vunpack.i.l.s16 %v1272_v47  ;;  %v2448_v0 = vsel %vm18090_vm12, %v2408_v12, %v11410_v45 }
 0x15f   : > { %v2121_v57 = vpop.permute.xlu1 %2120  ;;  %v3010_v4 = vpack.c.b16 %v2979_v23, %v2978_v49  ;;  %vm18118_vm0 = vcmask 121856  }
 0x160   : > { %v11583_v16 = vpop.permute.xlu2 %2252  ;;  %v11589_v28 = vmax.f32 %v2843_v2, 0.0  ;;  %v2346_v54 = vsel %vm18092_vm13, %v11438_v48, %v2345_v55  ;;  %vm1386_vm2 = vcmp.ne.s32.totalorder %v9279_v61, %v10021_v15  ;;  %v2096_v48 = vshrl.u32 %v11502_v38, 16 }
 0x161   : > { %2212 = vrot.lane.b32.xlu0 %v2181_v27, %s17840_s30  ;;  %v3027_v23 = vshrl.u32 %v3010_v4, 16  ;;  %v11604_v27 = vrot.slane %v1766_v34, 1  ;;  %vm11625_vm12 = vmpackc.low %vm10027_vm5, %vm1386_vm2  ;;  %vm18098_vm2 = vcmask 146432  }
 0x162   : > { %18089 = vst [vmem:[#allocation47_spill] sm:$0xff] %v11589_v28 }
 0x163   : > { %v2081_v52 = vpop.permute.xlu0 %2080  ;;  %v2728_v11 = vpop.f32.mrf.mxu0  ;;  %v3029_v2 = vrot.slane %v3027_v23, 7 }
 0x164   : > { %v2808_v40 = vmul.f32 %v11465_v44, %v2728_v11  ;;  %v2481_v24 = vsel %vm18091_vm10, %v2448_v0, %v2081_v52  ;;  %v11610_v11 = vsel %vm10049_vm15, %v11448_v10, 0  ;;  %v18095_v10 = vmov 0 }
 0x165   : > { %1961 = vrot.lane.b32.xlu1 %v11478_v6, %s17837_s6  ;;  %v2907_v6 = vpack.c.bf16 %v11589_v28, %v11589_v28  ;;  %v2514_v36 = vsel %vm18093_vm4, %v2481_v24, %v2121_v57  ;;  %v18096_v10 = vsel %vm11625_vm12, 4294967295, %v18095_v10  ;;  %v2100_v57 = vshll.u32 %v11610_v11, 16 }
 0x166   : > { %v2844_v7 = vadd.f32 %v11496_v25, %v2808_v40  ;;  %2044 = vrot.lane.b32.xlu2 %v2013_v18, %s17835_s10  ;;  %vm18097_vm10 = vcmask 121856   ;;  %v2183_v18 = vsel %vm18092_vm13, %v2180_v32, %v11604_v27  ;;  %v1799_v0 = vsel %vm11541_vm1, %v11610_v11, 0 }
 0x167   : > { %v2287_v45 = vpop.permute.xlu1 %2286  ;;  %v2547_v12 = vsel %vm18097_vm10, %v2514_v36, %v11446_v29  ;;  %v3030_v40 = vshll.u32 %v3010_v4, 16  ;;  %v2980_v34 = vunpack.c.l.b16 %v2907_v6  ;;  %vm18099_vm4 = vcmask 171008  }
 0x168   : > { %v11615_v47 = vmax.f32 %v2844_v7, 0.0  ;;  %v11617_v49 = vpop.permute.xlu2 %1953  ;;  %v1742_v32 = vsel %vm11625_vm12, %v11414_v9, 0  ;;  %v2098_v36 = vor.u32 %v2096_v48, %v11529_v59  ;;  %vm18100_vm10 = vcmask 195584  }
 0x169   : > { %2376 = vrot.lane.b32.xlu0 %v2346_v54, %s17821_s1  ;;  %v11649_v6 = vrot.slane %v2100_v57, 1  ;;  %vm18101_vm13 = vcmask 220160   ;;  %v1120_v57 = vadd.s32 240, %v9990_v1  ;;  %vm18115_vm1 = vcmask 97280  }
 0x16a   : > { %18094 = vst [vmem:[#allocation48_spill] sm:$0xff] %v11615_v47  ;;  %v2908_v61 = vpack.c.bf16 %v11615_v47, %v11615_v47 }
 0x16b   : > { %v2251_v52 = vpop.permute.xlu0 %2250 }
 0x16c   : > { %v2981_v24 = vunpack.c.l.b16 %v2908_v61  ;;  %v2580_v23 = vsel %vm18098_vm2, %v2547_v12, %v2251_v52  ;;  %v2731_v7 = vpop.f32.mrf.mxu0  ;;  %v3032_v61 = vor.u32 %v3030_v40, %v3029_v2  ;;  %v11652_v52 = vrot.slane %v1799_v0, 1 }
 0x16d   : > { %v2809_v54 = vmul.f32 %v11465_v44, %v2731_v7  ;;  %2132 = vrot.lane.b32.xlu1 %v11556_v17, %s17824_s0  ;;  %v2613_v29 = vsel %vm18099_vm4, %v2580_v23, %v2287_v45  ;;  %vm18102_vm2 = vsmask.f32 7424  ;;  %vm18103_vm4 = vcmask 1046528  }
 0x16e   : > { %v3011_v47 = vpack.c.b16 %v2981_v24, %v2980_v34  ;;  %2214 = vrot.lane.b32.xlu2 %v2183_v18, %s17840_s30  ;;  %v2646_v4 = vsel %vm18100_vm10, %v2613_v29, %v11498_v30  ;;  %v11662_v30 = vsel %vm18102_vm2, %v2098_v36, %v11649_v6  ;;  %v11666_v48 = vsel %vm10049_vm15, 0, %v3032_v61 }
 0x16f   : > { %v2035_v12 = vpop.permute.xlu1 %2034  ;;  %9301 = vmatmul.msk.bf16.gmra.mxu0 %vm18101_vm13, %v2646_v4  ;;  %v2845_v7 = vadd.f32 %v11496_v25, %v2809_v54  ;;  %v1404_v18 = vsel %vm11010_vm8, %v10688_v26, 0  ;;  %v2348_v40 = vsel %vm18103_vm4, %v2345_v55, %v11652_v52  ;;  %vm18105_vm10 = vnez %v17802_v31 }
 0x170   : > { %v3034_v45 = vshrl.u32 %v3011_v47, 16  ;;  %v11654_v23 = vpop.permute.xlu2 %2124  ;;  %v3037_v34 = vshll.u32 %v3011_v47, 16  ;;  %vm18106_vm13 = vcmask 23552   ;;  %v1782_v55 = vsel %vm11625_vm12, %v11502_v38, 0 }
 0x171   : > { %2092 = vrot.lane.b32.xlu0 %v1742_v32, %s17830_s4  ;;  %v11674_v54 = vmax.f32 %v2845_v7, 0.0  ;;  %v3187_v32 = vsel %vm18105_vm10, %v11666_v48, 0  ;;  %v1152_v47 = vand.u32 15, %v1120_v57  ;;  %vm18107_vm2 = vcmask 48128  }
 0x172   : > { %v11658_v59 = vrot.slane %v3034_v45, 7  ;;  %v3269_v45 = vshll.u32 %v11666_v48, 16  ;;  %vm18109_vm4 = vsmask.f32 256  ;;  %vm18112_vm15 = vcmask 72704  }
 0x173   : > { %v1952_v0 = vpop.permute.xlu0 %1951  ;;  %18104 = vst [vmem:[#allocation49_spill] sm:$0xff] %v11674_v54 }
 0x174   : > { %v2733_v24 = vpop.f32.mrf.mxu0  ;;  %v3039_v36 = vor.u32 %v3037_v34, %v11658_v59  ;;  %v2411_v26 = vsel %vm18106_vm13, %v1404_v18, %v1952_v0  ;;  %v2909_v34 = vpack.c.bf16 %v11674_v54, %v11674_v54  ;;  %vm11703_vm13 = vcmp.gt.s32.totalorder %v1152_v47, 0 }
 0x175   : > { %v2810_v29 = vmul.f32 %v11465_v44, %v2733_v24  ;;  %2298 = vrot.lane.b32.xlu1 %v11662_v30, %s17854_s29  ;;  %v11692_v24 = vrot.slane %v3187_v32, 1  ;;  %v2450_v18 = vsel %vm18107_vm2, %v2411_v26, %v2035_v12  ;;  %v3271_v1 = vrot.slane %v3269_v45, 1 }
 0x176   : > { %2378 = vrot.lane.b32.xlu2 %v2348_v40, %s17821_s1  ;;  %v11701_v57 = vsel %vm18109_vm4, %v3029_v2, %v3039_v36  ;;  %v2483_v54 = vsel %vm18112_vm15, %v2450_v18, %v11539_v50  ;;  %vm18113_vm2 = vnez %v17799_v58  ;;  %vm18114_vm4 = vcmask 1046528   ;;  %vm1214_vm15 = vmpackc.low %vm11703_vm13, %vm11703_vm13 }
 0x177   : > { %v2846_v4 = vadd.f32 %v11496_v25, %v2810_v29  ;;  %v2205_v61 = vpop.permute.xlu1 %2204  ;;  %v3203_v12 = vsel %vm18113_vm2, %v11666_v48, 0  ;;  %v3442_v2 = vsel %vm18114_vm4, %v10069_v60, %v11692_v24  ;;  %v2982_v36 = vunpack.c.l.b16 %v2909_v34 }
 0x178   : > { %v11690_v7 = vpop.permute.xlu2 %2290  ;;  %v3220_v47 = vsel %vm18105_vm10, %v11701_v57, 0  ;;  %vm18116_vm4 = vsmask.f32 7424  ;;  %v3277_v40 = vshll.u32 %v11701_v57, 16  ;;  %vm18120_vm13 = vcmask 171008  }
 0x179   : > { %v11697_v0 = vmax.f32 %v2846_v4, 0.0  ;;  %2262 = vrot.lane.b32.xlu0 %v1782_v55, %s17841_s7  ;;  %v3272_v45 = vsel %vm18116_vm4, %v10069_v60, %v3271_v1  ;;  %vm18122_vm4 = vcmask 195584  }
 0x17a   : > { %v3279_v20 = vrot.slane %v3277_v40, 1 }
 0x17b   : > { %18108 = vst [vmem:[#allocation50_spill] sm:$0xff] %v11697_v0  ;;  %v2910_v29 = vpack.c.bf16 %v11697_v0, %v11697_v0  ;;  %v2123_v32 = vpop.permute.xlu0 %2122 }
 0x17c   : > { %v2516_v55 = vsel %vm18115_vm1, %v2483_v54, %v2123_v32  ;;  %vm18117_vm1 = vnez %v17804_v35  ;;  %v1244_v32 = vsel %vm1214_vm15, 65537, %v17890_v43  ;;  %vm18121_vm15 = vcmask 1046528  }
 0x17d   : > { %v2983_v26 = vunpack.c.l.b16 %v2910_v29  ;;  %3473 = vrot.lane.b32.xlu1 %v3442_v2, %s17656_s27  ;;  %v3219_v54 = vsel %vm18117_vm1, %v11666_v48, 0  ;;  %v2549_v34 = vsel %vm18118_vm0, %v2516_v55, %v2205_v61  ;;  %v11734_v29 = vrot.slane %v3220_v47, 1 }
 0x17e   : > { %3521 = vrot.lane.b32.xlu2 %v3203_v12, %s17821_s1  ;;  %v3610_v2 = vrot.slane %v3219_v54, 1  ;;  %vm18119_vm0 = vcmask 146432   ;;  %v1274_v28 = vunpack.c.l.b16 %v1244_v32  ;;  %v1405_v32 = vsel %vm11130_vm7, %v10789_v37, 0 }
 0x17f   : > { %v3012_v50 = vpack.c.b16 %v2983_v26, %v2982_v36  ;;  %v2369_v4 = vpop.permute.xlu1 %2368  ;;  %v3273_v36 = vshrl.u32 %v11666_v48, 16  ;;  %v2582_v61 = vsel %vm18119_vm0, %v2549_v34, %v11583_v16  ;;  %v1692_v34 = vunpack.c.h.b16 %v11458_v62 }
 0x180   : > { %v11732_v18 = vpop.permute.xlu2 %2038  ;;  %v3612_v43 = vsel %vm18121_vm15, %v3610_v2, %v11734_v29  ;;  %vm18123_vm0 = vcmask 220160   ;;  %vm18125_vm15 = vsmask.f32 7424 }
 0x181   : > { %v3042_v12 = vshrl.u32 %v3012_v50, 16  ;;  %3393 = vrot.lane.b32.xlu0 %v3272_v45, %s17658_s28  ;;  %v3045_v0 = vshll.u32 %v3012_v50, 16  ;;  %v1691_v45 = vunpack.c.l.b16 %v11458_v62  ;;  %v3236_v50 = vsel %vm18113_vm2, %v11701_v57, 0 }
 0x182   : > { %v3275_v40 = vor.u32 %v3273_v36, %v3271_v1  ;;  %v9281_v36 = vunpack.i.l.s16 %v1274_v28 }
 0x183   : > { %v11740_v26 = vrot.slane %v3042_v12, 7  ;;  %v2289_v55 = vpop.permute.xlu0 %2288  ;;  %v2736_v47 = vpop.f32.mrf.mxu0 }
 0x184   : > { %v2615_v51 = vsel %vm18120_vm13, %v2582_v61, %v2289_v55  ;;  %vm18124_vm13 = vsmask.f32 256  ;;  %v11771_v12 = vsel %vm18125_vm15, %v3275_v40, %v3279_v20  ;;  %vm18127_vm15 = vcmask 1046528  }
 0x185   : > { %v3047_v54 = vor.u32 %v3045_v0, %v11740_v26  ;;  %3643 = vrot.lane.b32.xlu1 %v3612_v43, %s17549_s9  ;;  %v2648_v16 = vsel %vm18122_vm4, %v2615_v51, %v2369_v4  ;;  %v3252_v0 = vsel %vm18117_vm1, %v11701_v57, 0  ;;  %v2811_v51 = vmul.f32 %v11465_v44, %v2736_v47  ;;  %s17652_s9 = smov 64  }
 0x186   : > { %3691 = vrot.lane.b32.xlu2 %v3236_v50, %s17545_s25  ;;  %9302 = vmatmul.msk.bf16.gmra.mxu0 %vm18123_vm0, %v2648_v16  ;;  %s17654_s25 = smov 32   ;;  %v3775_v37 = vrot.slane %v3252_v0, 1  ;;  %vm1695_vm4 = vcmp.ne.s32.totalorder %v1691_v45, %v10021_v15  ;;  %vm1696_vm0 = vcmp.ne.s32.totalorder %v1692_v34, %v9996_v5  ;;  %v3281_v16 = vshrl.u32 %v11701_v57, 16 }
 0x187   : > { %v11765_v43 = vsel %vm18124_vm13, %v11658_v59, %v3047_v54  ;;  %v2085_v62 = vpop.permute.xlu1 %2084  ;;  %vm18126_vm13 = vcmask 23552   ;;  %v2847_v55 = vadd.f32 %v11496_v25, %v2811_v51  ;;  %vm1393_vm1 = vcmp.ne.s32.totalorder %v9281_v36, %v10021_v15  ;;  %vm11793_vm2 = vmpackc.low %vm1696_vm0, %vm1695_vm4 }
 0x188   : > { %v11768_v4 = vpop.permute.xlu2 %2208  ;;  %v3253_v1 = vsel %vm18105_vm10, %v11765_v43, 0  ;;  %v3285_v2 = vshll.u32 %v11765_v43, 16  ;;  %v2414_v61 = vsel %vm18126_vm13, %v1405_v32, %v11617_v49  ;;  %v18128_v45 = vmov 0  ;;  %vm11806_vm4 = vmpackc.low %vm10027_vm5, %vm1393_vm1 }
 0x189   : > { %3561 = vrot.lane.b32.xlu0 %v11771_v12, %s17654_s25  ;;  %v11779_v59 = vrot.slane %v3253_v1, 1  ;;  %v18129_v45 = vsel %vm11793_vm2, 4294967295, %v18128_v45  ;;  %vm18130_vm13 = vcmask 48128   ;;  %v3283_v0 = vor.u32 %v3281_v16, %v3279_v20 }
 0x18a   : > { %v11790_v40 = vrot.slane %v3285_v2, 1  ;;  %v11802_v32 = vmax.f32 %v2847_v55, 0.0  ;;  %v18132_v1 = vmov 0  ;;  %v1713_v2 = vsel %vm11793_vm2, %v11502_v38, 0 }
 0x18b   : > { %v2037_v47 = vpop.permute.xlu0 %2036  ;;  %v2738_v54 = vpop.f32.mrf.mxu0  ;;  %v3777_v28 = vsel %vm18127_vm15, %v3775_v37, %v11779_v59  ;;  %v18133_v1 = vsel %vm11806_vm4, 4294967295, %v18132_v1  ;;  %vm18135_vm0 = vsmask.f32 7424  ;;  %vm18136_vm15 = vcmask 72704  }
 0x18c   : > { %v2812_v50 = vmul.f32 %v11465_v44, %v2738_v54  ;;  %v2452_v49 = vsel %vm18130_vm13, %v2414_v61, %v2037_v47  ;;  %18131 = vst [vmem:[#allocation51_spill] sm:$0xff] %v11802_v32  ;;  %v11819_v20 = vsel %vm18135_vm0, %v3283_v0, %v11790_v40  ;;  %v1743_v61 = vsel %vm11806_vm4, %v11502_v38, 0 }
 0x18d   : > { %3807 = vrot.lane.b32.xlu1 %v3777_v28, %s17652_s9  ;;  %v2014_v55 = vrot.slane %v1713_v2, 1  ;;  %v2911_v47 = vpack.c.bf16 %v11802_v32, %v11802_v32  ;;  %v2266_v28 = vshrl.u32 %v11610_v11, 16  ;;  %vm18137_vm5 = vcmask 97280  }
 0x18e   : > { %v2848_v34 = vadd.f32 %v11496_v25, %v2812_v50  ;;  %1963 = vrot.lane.b32.xlu2 %v11556_v17, %s17837_s6  ;;  %v2485_v17 = vsel %vm18136_vm15, %v2452_v49, %v2085_v62  ;;  %s17621_s6 = smov 56   ;;  %vm18138_vm1 = vcmask 121856   ;;  %vm18139_vm13 = vcmask 1046528  }
 0x18f   : > { %v2255_v51 = vpop.permute.xlu1 %2254  ;;  %v2518_v62 = vsel %vm18137_vm5, %v2485_v17, %v11654_v23  ;;  %v2015_v38 = vsel %vm18139_vm13, %v11577_v21, %v2014_v55  ;;  %v2984_v49 = vunpack.c.l.b16 %v2911_v47  ;;  %v2268_v0 = vor.u32 %v2266_v28, %v11649_v6 }
 0x190   : > { %v11813_v36 = vmax.f32 %v2848_v34, 0.0  ;;  %v11815_v37 = vpop.permute.xlu2 %2372  ;;  %v1767_v2 = vsel %vm11793_vm2, %v11610_v11, 0  ;;  %vm18140_vm0 = vcmask 146432   ;;  %v1783_v21 = vsel %vm11806_vm4, %v11610_v11, 0 }
 0x191   : > { %3727 = vrot.lane.b32.xlu0 %v11819_v20, %s17621_s6  ;;  %vm18141_vm15 = vcmask 171008   ;;  %vm18142_vm5 = vsmask.f32 7424  ;;  %vm18144_vm13 = vcmask 220160   ;;  %v1406_v28 = vsel %vm11282_vm14, %v10907_v56, 0 }
 0x192   : > { %18134 = vst [vmem:[#allocation52_spill] sm:$0xff] %v11813_v36  ;;  %v2912_v22 = vpack.c.bf16 %v11813_v36, %v11813_v36  ;;  %v2269_v47 = vsel %vm18142_vm5, %v2268_v0, %v10069_v60  ;;  %vm18147_vm5 = vcmask 23552   ;;  %vm18173_vm2 = vnez %v17823_v3 }
 0x193   : > { %v2207_v54 = vpop.permute.xlu0 %2206  ;;  %vm18177_vm10 = vcmask 171008   ;;  %vm18231_vm14 = vcmask 1046528  }
 0x194   : > { %v2985_v50 = vunpack.c.l.b16 %v2912_v22  ;;  %v2551_v16 = vsel %vm18138_vm1, %v2518_v62, %v2207_v54  ;;  %vm18143_vm1 = vcmask 195584  }
 0x195   : > { %2094 = vrot.lane.b32.xlu1 %v1743_v61, %s17830_s4  ;;  %v2584_v23 = vsel %vm18140_vm0, %v2551_v16, %v2255_v51  ;;  %vm18145_vm0 = vcmask 1046528   ;;  %s18190_s4 = sld [smem:[#allocation78_spill]] }
 0x196   : > { %2134 = vrot.lane.b32.xlu2 %v11662_v30, %s17824_s0  ;;  %v3013_v22 = vpack.c.b16 %v2985_v50, %v2984_v49  ;;  %v2184_v30 = vrot.slane %v1767_v2, 1  ;;  %v2617_v6 = vsel %vm18141_vm15, %v2584_v23, %v11690_v7  ;;  %vm18146_vm15 = vnez %v17809_v53  ;;  %s18385_s0 = smov 56  }
 0x197   : > { %v1956_v34 = vpop.permute.xlu1 %1955  ;;  %v3188_v7 = vsel %vm18146_vm15, %v11701_v57, 0 }
 0x198   : > { %v11845_v17 = vpop.permute.xlu2 %2088  ;;  %v3050_v54 = vshrl.u32 %v3013_v22, 16  ;;  %v2185_v11 = vsel %vm18145_vm0, %v11604_v27, %v2184_v30  ;;  %v2417_v49 = vsel %vm18147_vm5, %v1406_v28, %v1956_v34  ;;  %v11874_v56 = vrot.slane %v3188_v7, 1  ;;  %vm18150_vm5 = vmmov %vm18145_vm0 }
 0x199   : > { %2046 = vrot.lane.b32.xlu0 %v2015_v38, %s17835_s10  ;;  %v3053_v2 = vshll.u32 %v3013_v22, 16  ;;  %v2349_v22 = vsel %vm18150_vm5, %v11652_v52, %v10069_v60  ;;  %vm18156_vm5 = vcmask 146432   ;;  %s18363_s10 = sld [smem:[#allocation79_spill]] }
 0x19a   : > { %v2741_v61 = vpop.f32.mrf.mxu0  ;;  %v11870_v38 = vrot.slane %v3050_v54, 7 }
 0x19b   : > { %v2371_v55 = vpop.permute.xlu0 %2370  ;;  %v2813_v50 = vmul.f32 %v11465_v44, %v2741_v61 }
 0x19c   : > { %v2650_v51 = vsel %vm18143_vm1, %v2617_v6, %v2371_v55  ;;  %vm18148_vm1 = vcmask 48128   ;;  %v3055_v30 = vor.u32 %v3053_v2, %v11870_v38  ;;  %v3444_v6 = vsel %vm18145_vm0, %v11692_v24, %v11874_v56 }
 0x19d   : > { %9303 = vmatmul.msk.bf16.gmra.mxu0 %vm18144_vm13, %v2650_v51  ;;  %2264 = vrot.lane.b32.xlu1 %v1783_v21, %s17841_s7  ;;  %v2849_v21 = vadd.f32 %v11496_v25, %v2813_v50  ;;  %v2454_v61 = vsel %vm18148_vm1, %v2417_v49, %v11732_v18  ;;  %vm18149_vm13 = vcmask 72704   ;;  %v3221_v18 = vsel %vm18146_vm15, %v11765_v43, 0  ;;  %s18159_s7 = smov 40  }
 0x19e   : > { %2300 = vrot.lane.b32.xlu2 %v2269_v47, %s17854_s29  ;;  %vm18153_vm1 = vcmask 97280   ;;  %v11907_v52 = vrot.slane %v3221_v18, 1  ;;  %vm18155_vm0 = vcmask 121856   ;;  %s18170_s29 = smov 48  }
 0x19f   : > { %v2127_v62 = vpop.permute.xlu1 %2126  ;;  %v11897_v54 = vmax.f32 %v2849_v21, 0.0 }
 0x1a0   : > { %v11868_v16 = vpop.permute.xlu2 %2258 }
 0x1a1   : > { %2216 = vrot.lane.b32.xlu0 %v2185_v11, %s17840_s30  ;;  %18152 = vst [vmem:[#allocation54_spill] sm:$0xff] %v11897_v54  ;;  %s18492_s30 = smov 16  }
 0x1a2   : > { %v2743_v0 = vpop.f32.mrf.mxu0 }
 0x1a3   : > { %v2814_v27 = vmul.f32 %v11465_v44, %v2743_v0  ;;  %v2087_v23 = vpop.permute.xlu0 %2086 }
 0x1a4   : > { %v2487_v34 = vsel %vm18149_vm13, %v2454_v61, %v2087_v23  ;;  %vm18154_vm13 = vsmask.f32 256 }
 0x1a5   : > { %v2850_v55 = vadd.f32 %v11496_v25, %v2814_v27  ;;  %3395 = vrot.lane.b32.xlu1 %v11771_v12, %s17658_s28  ;;  %v2520_v24 = vsel %vm18153_vm1, %v2487_v34, %v2127_v62  ;;  %v11904_v12 = vsel %vm18154_vm13, %v11740_v26, %v3055_v30  ;;  %v2913_v62 = vpack.c.bf16 %v11897_v54, %v11897_v54 }
 0x1a6   : > { %3475 = vrot.lane.b32.xlu2 %v3444_v6, %s17656_s27  ;;  %v2553_v7 = vsel %vm18155_vm0, %v2520_v24, %v11768_v4  ;;  %v3293_v26 = vshll.u32 %v11904_v12, 16  ;;  %vm18157_vm1 = vcmask 1046528   ;;  %vm18158_vm13 = vcmask 171008  }
 0x1a7   : > { %v11895_v47 = vmax.f32 %v2850_v55, 0.0  ;;  %v2293_v51 = vpop.permute.xlu1 %2292  ;;  %v3614_v2 = vsel %vm18157_vm1, %v11734_v29, %v11907_v52  ;;  %vm18160_vm0 = vcmask 195584   ;;  %v3254_v21 = vsel %vm18146_vm15, %v11904_v12, 0 }
 0x1a8   : > { %v11900_v28 = vpop.permute.xlu2 %1959  ;;  %v2986_v55 = vunpack.c.l.b16 %v2913_v62  ;;  %vm18162_vm1 = vnez %v17807_v41  ;;  %v3289_v6 = vshrl.u32 %v11765_v43, 16  ;;  %vm18166_vm15 = vcmask 23552  }
 0x1a9   : > { %18151 = vst [vmem:[#allocation53_spill] sm:$0xff] %v11895_v47  ;;  %2380 = vrot.lane.b32.xlu0 %v2349_v22, %s17821_s1  ;;  %v2914_v11 = vpack.c.bf16 %v11895_v47, %v11895_v47  ;;  %v3204_v29 = vsel %vm18162_vm1, %v11701_v57, 0  ;;  %v11937_v22 = vrot.slane %v3293_v26, 1 }
 0x1ab   : > { %v2257_v50 = vpop.permute.xlu0 %2256  ;;  %v2987_v23 = vunpack.c.l.b16 %v2914_v11  ;;  %v1407_v11 = vsel %vm11365_vm9, %v11059_v8, 0  ;;  %vm17584_vm9 = vcmask 523264  }
 0x1ac   : > { %v2586_v49 = vsel %vm18156_vm5, %v2553_v7, %v2257_v50  ;;  %v2746_v0 = vpop.f32.mrf.mxu0  ;;  %vm18161_vm5 = vcmask 220160  }
 0x1ad   : > { %3563 = vrot.lane.b32.xlu1 %v11819_v20, %s17654_s25  ;;  %v2619_v27 = vsel %vm18158_vm13, %v2586_v49, %v2293_v51  ;;  %v2815_v61 = vmul.f32 %v11465_v44, %v2746_v0  ;;  %v3014_v18 = vpack.c.b16 %v2987_v23, %v2986_v55  ;;  %v3291_v51 = vor.u32 %v3289_v6, %v11790_v40 }
 0x1ae   : > { %3645 = vrot.lane.b32.xlu2 %v3614_v2, %s18159_s7  ;;  %v2652_v4 = vsel %vm18160_vm0, %v2619_v27, %v11815_v37  ;;  %v11940_v37 = vrot.slane %v3254_v21, 1  ;;  %vm18163_vm13 = vsmask.f32 7424  ;;  %vm18164_vm0 = vcmask 1046528  }
 0x1af   : > { %v2041_v30 = vpop.permute.xlu1 %2040  ;;  %9304 = vmatmul.msk.bf16.gmra.mxu0 %vm18161_vm5, %v2652_v4  ;;  %v2851_v24 = vadd.f32 %v11496_v25, %v2815_v61  ;;  %v11949_v62 = vsel %vm18163_vm13, %v3291_v51, %v11937_v22  ;;  %vm18165_vm5 = vnez %v17815_v19  ;;  %v3058_v8 = vshrl.u32 %v3014_v18, 16 }
 0x1b0   : > { %v11931_v34 = vpop.permute.xlu2 %2130  ;;  %v3779_v40 = vsel %vm18164_vm0, %v11779_v59, %v11940_v37  ;;  %v3189_v0 = vsel %vm18165_vm5, %v11765_v43, 0  ;;  %v3237_v59 = vsel %vm18162_vm1, %v11765_v43, 0  ;;  %vm18168_vm13 = vcmask 48128  }
 0x1b1   : > { %3523 = vrot.lane.b32.xlu0 %v3204_v29, %s17821_s1  ;;  %v11962_v2 = vmax.f32 %v2851_v24, 0.0  ;;  %v11970_v21 = vrot.slane %v3189_v0, 1  ;;  %v11976_v29 = vrot.slane %v3058_v8, 7 }
 0x1b3   : > { %v1958_v7 = vpop.permute.xlu0 %1957  ;;  %18167 = vst [vmem:[#allocation55_spill] sm:$0xff] %v11962_v2  ;;  %v2915_v6 = vpack.c.bf16 %v11962_v2, %v11962_v2 }
 0x1b4   : > { %v2748_v50 = vpop.f32.mrf.mxu0  ;;  %v2420_v26 = vsel %vm18166_vm15, %v1407_v11, %v1958_v7  ;;  %v3061_v11 = vshll.u32 %v3014_v18, 16  ;;  %vm18171_vm15 = vcmask 72704   ;;  %v3222_v18 = vsel %vm18165_vm5, %v11904_v12, 0 }
 0x1b5   : > { %v2816_v49 = vmul.f32 %v11465_v44, %v2748_v50  ;;  %3729 = vrot.lane.b32.xlu1 %v11949_v62, %s17621_s6  ;;  %v2456_v61 = vsel %vm18168_vm13, %v2420_v26, %v2041_v30  ;;  %v3446_v30 = vsel %vm18164_vm0, %v11874_v56, %v11970_v21  ;;  %vm18172_vm13 = vcmask 97280  }
 0x1b6   : > { %3809 = vrot.lane.b32.xlu2 %v3779_v40, %s17652_s9  ;;  %v2489_v7 = vsel %vm18171_vm15, %v2456_v61, %v11845_v17  ;;  %v3205_v40 = vsel %vm18173_vm2, %v11765_v43, 0  ;;  %v3063_v0 = vor.u32 %v3061_v11, %v11976_v29  ;;  %v2988_v17 = vunpack.c.l.b16 %v2915_v6 }
 0x1b7   : > { %v2852_v27 = vadd.f32 %v11496_v25, %v2816_v49  ;;  %v2211_v23 = vpop.permute.xlu1 %2210  ;;  %vm18174_vm15 = vcmask 121856   ;;  %vm18175_vm0 = vsmask.f32 256 }
 0x1b8   : > { %v11965_v4 = vpop.permute.xlu2 %2296  ;;  %v12006_v61 = vsel %vm18175_vm0, %v11870_v38, %v3063_v0  ;;  %vm18179_vm0 = vcmask 195584  }
 0x1b9   : > { %v11973_v55 = vmax.f32 %v2852_v27, 0.0  ;;  %3693 = vrot.lane.b32.xlu0 %v3237_v59, %s18170_s29  ;;  %v12000_v27 = vrot.slane %v3222_v18, 1  ;;  %v3301_v18 = vshll.u32 %v12006_v61, 16 }
 0x1bb   : > { %18169 = vst [vmem:[#allocation56_spill] sm:$0xff] %v11973_v55  ;;  %v2916_v51 = vpack.c.bf16 %v11973_v55, %v11973_v55  ;;  %v2129_v24 = vpop.permute.xlu0 %2128 }
 0x1bc   : > { %v2522_v49 = vsel %vm18172_vm13, %v2489_v7, %v2129_v24  ;;  %vm18176_vm13 = vcmask 146432  }
 0x1bd   : > { %v2989_v50 = vunpack.c.l.b16 %v2916_v51  ;;  %3477 = vrot.lane.b32.xlu1 %v3446_v30, %s17656_s27  ;;  %v2555_v56 = vsel %vm18174_vm15, %v2522_v49, %v2211_v23  ;;  %vm18178_vm15 = vcmask 1046528  }
 0x1be   : > { %3525 = vrot.lane.b32.xlu2 %v3205_v40, %s17821_s1  ;;  %v2588_v51 = vsel %vm18176_vm13, %v2555_v56, %v11868_v16  ;;  %v3616_v23 = vsel %vm18178_vm15, %v11907_v52, %v12000_v27  ;;  %v3255_v16 = vsel %vm18165_vm5, %v12006_v61, 0  ;;  %vm18181_vm13 = vcmask 23552  }
 0x1bf   : > { %v2375_v8 = vpop.permute.xlu1 %2374  ;;  %v3015_v59 = vpack.c.b16 %v2989_v50, %v2988_v17  ;;  %v1408_v50 = vsel %vm11485_vm11, %v11145_v42, 0  ;;  %v12030_v40 = vrot.slane %v3255_v16, 1  ;;  %vm17560_vm5 = vcmask 1043456  }
 0x1c0   : > { %v11998_v26 = vpop.permute.xlu2 %2044  ;;  %v2423_v17 = vsel %vm18181_vm13, %v1408_v50, %v11900_v28  ;;  %vm18186_vm13 = vsmask.f32 256  ;;  %vm18195_vm11 = vcmask 1046528  }
 0x1c1   : > { %3397 = vrot.lane.b32.xlu0 %v11819_v20, %s17658_s28  ;;  %v3066_v7 = vshrl.u32 %v3015_v59, 16  ;;  %v3238_v20 = vsel %vm18173_vm2, %v11904_v12, 0 }
 0x1c3   : > { %v2295_v24 = vpop.permute.xlu0 %2294  ;;  %v2751_v6 = vpop.f32.mrf.mxu0  ;;  %v12033_v0 = vrot.slane %v3066_v7, 7 }
 0x1c4   : > { %v2621_v11 = vsel %vm18177_vm10, %v2588_v51, %v2295_v24  ;;  %vm18180_vm10 = vcmask 220160   ;;  %v2817_v30 = vmul.f32 %v11465_v44, %v2751_v6  ;;  %v3781_v6 = vsel %vm18178_vm15, %v11940_v37, %v12030_v40 }
 0x1c5   : > { %3647 = vrot.lane.b32.xlu1 %v3616_v23, %s18159_s7  ;;  %v2654_v38 = vsel %vm18179_vm0, %v2621_v11, %v2375_v8  ;;  %v3069_v8 = vshll.u32 %v3015_v59, 16  ;;  %v3297_v11 = vshrl.u32 %v11904_v12, 16  ;;  %v3303_v23 = vrot.slane %v3301_v18, 1 }
 0x1c6   : > { %3695 = vrot.lane.b32.xlu2 %v3238_v20, %s18170_s29  ;;  %9305 = vmatmul.msk.bf16.gmra.mxu0 %vm18180_vm10, %v2654_v38  ;;  %v2853_v56 = vadd.f32 %v11496_v25, %v2817_v30  ;;  %vm18182_vm0 = vcmask 48128   ;;  %vm18185_vm10 = vsmask.f32 7424  ;;  %vm18187_vm15 = vcmask 72704  }
 0x1c7   : > { %v2091_v52 = vpop.permute.xlu1 %2090  ;;  %v3071_v7 = vor.u32 %v3069_v8, %v12033_v0  ;;  %v3299_v20 = vor.u32 %v3297_v11, %v11937_v22  ;;  %v18188_v22 = vld [vmem:[#allocation25_spill] sm:$0xff] }
 0x1c8   : > { %v12028_v49 = vpop.permute.xlu2 %2214  ;;  %v12052_v38 = vmax.f32 %v2853_v56, 0.0  ;;  %v2945_v56 = vld [vmem:[%s18190_s4 + $0x20] sm:$0xf] }
 0x1c9   : > { %3565 = vrot.lane.b32.xlu0 %v11949_v62, %s17654_s25  ;;  %v12059_v50 = vsel %vm18185_vm10, %v3299_v20, %v3303_v23  ;;  %v12063_v18 = vsel %vm18186_vm13, %v11976_v29, %v3071_v7  ;;  %vm18191_vm10 = vcmask 97280   ;;  %vm18192_vm13 = vnez %v17832_v13 }
 0x1ca   : > { %18183 = vst [vmem:[#allocation57_spill] sm:$0xff] %v12052_v38  ;;  %v2917_v29 = vpack.c.bf16 %v12052_v38, %v12052_v38  ;;  %v3309_v11 = vshll.u32 %v12063_v18, 16 }
 0x1cb   : > { %v2043_v51 = vpop.permute.xlu0 %2042  ;;  %v2753_v24 = vpop.f32.mrf.mxu0 }
 0x1cc   : > { %v2818_v42 = vmul.f32 %v11465_v44, %v2753_v24  ;;  %v2458_v28 = vsel %vm18182_vm0, %v2423_v17, %v2043_v51  ;;  %vm18189_vm0 = vnez %v18188_v22  ;;  %v4134_v24 = vunpack.c.l.b16 %v2945_v56 }
 0x1cd   : > { %3811 = vrot.lane.b32.xlu1 %v3781_v6, %s17652_s9  ;;  %v2491_v17 = vsel %vm18187_vm15, %v2458_v28, %v2091_v52  ;;  %vm18193_vm15 = vcmask 121856   ;;  %v2990_v20 = vunpack.c.l.b16 %v2917_v29  ;;  %v3223_v29 = vsel %vm18189_vm0, %v12006_v61, 0 }
 0x1ce   : > { %v2854_v59 = vadd.f32 %v11496_v25, %v2818_v42  ;;  %3399 = vrot.lane.b32.xlu2 %v11949_v62, %s17658_s28  ;;  %v3190_v62 = vsel %vm18189_vm0, %v11904_v12, 0  ;;  %v2524_v52 = vsel %vm18191_vm10, %v2491_v17, %v11931_v34  ;;  %v3206_v42 = vsel %vm18192_vm13, %v11904_v12, 0 }
 0x1cf   : > { %v2261_v16 = vpop.permute.xlu1 %2260  ;;  %v3447_v6 = vrot.slane %v3190_v62, 1  ;;  %vm18194_vm10 = vcmask 146432  }
 0x1d0   : > { %v12054_v37 = vmax.f32 %v2854_v59, 0.0  ;;  %v12056_v30 = vpop.permute.xlu2 %2378  ;;  %v4139_v59 = vpack.c.b16 %v4134_v24, %v4134_v24  ;;  %v12096_v24 = vrot.slane %v3309_v11, 1  ;;  %v3239_v11 = vsel %vm18192_vm13, %v12006_v61, 0 }
 0x1d1   : > { %3731 = vrot.lane.b32.xlu0 %v12059_v50, %s17621_s6  ;;  %v3448_v62 = vsel %vm18195_vm11, %v11970_v21, %v3447_v6  ;;  %vm18197_vm11 = vcmask 195584  }
 0x1d2   : > { %18184 = vst [vmem:[#allocation58_spill] sm:$0xff] %v12054_v37  ;;  %v2918_v8 = vpack.c.bf16 %v12054_v37, %v12054_v37  ;;  %v4179_v34 = vsel %vm17560_vm5, %v4139_v59, 0  ;;  %v3617_v59 = vrot.slane %v3223_v29, 1  ;;  %vm18199_vm5 = vsmask.f32 7424 }
 0x1d3   : > { %v2213_v51 = vpop.permute.xlu0 %2212  ;;  %4184 = vmatpush.bf16.msra.mxu1 %v4179_v34 }
 0x1d4   : > { %v2991_v7 = vunpack.c.l.b16 %v2918_v8  ;;  %v2557_v28 = vsel %vm18193_vm15, %v2524_v52, %v2213_v51  ;;  %v3305_v51 = vshrl.u32 %v12006_v61, 16  ;;  %vm18196_vm15 = vcmask 171008  }
 0x1d5   : > { %3527 = vrot.lane.b32.xlu1 %v3206_v42, %s17821_s1  ;;  %v2590_v17 = vsel %vm18194_vm10, %v2557_v28, %v2261_v16  ;;  %v9595_v16 = vld [vmem:[%s18190_s4 + $0x18] sm:$0xff]  ;;  %vm18198_vm10 = vcmask 220160  }
 0x1d6   : > { %3567 = vrot.lane.b32.xlu2 %v12059_v50, %s17654_s25  ;;  %v3016_v8 = vpack.c.b16 %v2991_v7, %v2990_v20  ;;  %v2623_v21 = vsel %vm18196_vm15, %v2590_v17, %v11965_v4  ;;  %v3307_v7 = vor.u32 %v3305_v51, %v3303_v23  ;;  %v18200_v4 = vld [vmem:[#allocation41_spill] sm:$0xff]  ;;  %v18201_v17 = vld [vmem:[#allocation26_spill] sm:$0xff] }
 0x1d7   : > { %v1962_v56 = vpop.permute.xlu1 %1961  ;;  %4185 = vmatpush.bf16.msra.mxu1 %v9595_v16  ;;  %v1409_v23 = vsel %vm11625_vm12, %v18200_v4, 0  ;;  %vm18202_vm15 = vnez %v18201_v17  ;;  %v9594_v51 = vld [vmem:[%s18190_s4 + $0x10] sm:$0xff]  ;;  %v3256_v4 = vsel %vm18189_vm0, %v12063_v18, 0  ;;  %vm18213_vm0 = vcmask 121856  }
 0x1d8   : > { %v12090_v5 = vpop.permute.xlu2 %3521  ;;  %v3074_v20 = vshrl.u32 %v3016_v8, 16  ;;  %v12114_v34 = vsel %vm18199_vm5, %v3307_v7, %v12096_v24  ;;  %vm18203_vm5 = vcmask 1046528   ;;  %v3077_v37 = vshll.u32 %v3016_v8, 16 }
 0x1d9   : > { %3479 = vrot.lane.b32.xlu0 %v3448_v62, %s17656_s27  ;;  %v3191_v62 = vsel %vm18202_vm15, %v12006_v61, 0  ;;  %vm18225_vm12 = vcmask 64512  }
 0x1da   : > { %v2756_v52 = vpop.f32.mrf.mxu0  ;;  %v12132_v7 = vrot.slane %v3074_v20, 7 }
 0x1db   : > { %v2377_v42 = vpop.permute.xlu0 %2376  ;;  %v2819_v16 = vmul.f32 %v11465_v44, %v2756_v52  ;;  %4186 = vmatpush.bf16.msra.mxu1 %v9594_v51  ;;  %v9593_v52 = vld [vmem:[%s18190_s4 + $0x8] sm:$0xff] }
 0x1dc   : > { %v2656_v28 = vsel %vm18197_vm11, %v2623_v21, %v2377_v42  ;;  %v3618_v42 = vsel %vm18203_vm5, %v12000_v27, %v3617_v59  ;;  %vm18204_vm11 = vcmask 23552   ;;  %vm18206_vm5 = vcmask 72704  }
 0x1dd   : > { %9306 = vmatmul.msk.bf16.gmra.mxu0 %vm18198_vm10, %v2656_v28  ;;  %3697 = vrot.lane.b32.xlu1 %v3239_v11, %s18170_s29  ;;  %v2426_v28 = vsel %vm18204_vm11, %v1409_v23, %v1962_v56  ;;  %v12136_v11 = vrot.slane %v3191_v62, 1  ;;  %v2855_v51 = vadd.f32 %v11496_v25, %v2819_v16  ;;  %vm18205_vm10 = vcmask 48128  }
 0x1de   : > { %3733 = vrot.lane.b32.xlu2 %v12114_v34, %s17621_s6  ;;  %v2460_v56 = vsel %vm18205_vm10, %v2426_v28, %v11998_v26  ;;  %v3782_v23 = vrot.slane %v3256_v4, 1  ;;  %v3079_v62 = vor.u32 %v3077_v37, %v12132_v7  ;;  %vm18207_vm11 = vcmask 1046528   ;;  %v9592_v26 = vld [vmem:[%s18190_s4] sm:$0xff]  ;;  %s17747_s4 = smov 80  }
 0x1df   : > { %v2133_v29 = vpop.permute.xlu1 %2132  ;;  %4187 = vmatpush.bf16.msra.mxu1 %v9593_v52  ;;  %v12164_v8 = vmax.f32 %v2855_v51, 0.0  ;;  %vm18210_vm10 = vcmask 97280  }
 0x1e0   : > { %v12128_v21 = vpop.permute.xlu2 %3691 }
 0x1e1   : > { %3649 = vrot.lane.b32.xlu0 %v3618_v42, %s18159_s7  ;;  %18209 = vst [vmem:[#allocation41_spill] sm:$0xff] %v12164_v8 }
 0x1e2   : > { %v2758_v15 = vpop.f32.mrf.mxu0 }
 0x1e3   : > { %v2820_v27 = vmul.f32 %v11465_v44, %v2758_v15  ;;  %v2093_v20 = vpop.permute.xlu0 %2092  ;;  %v3450_v15 = vsel %vm18207_vm11, %v3447_v6, %v12136_v11  ;;  %v3224_v44 = vsel %vm18202_vm15, %v12063_v18, 0  ;;  %4188 = vmatpush.bf16.msra.mxu1 %v9592_v26 }
 0x1e4   : > { %v2493_v38 = vsel %vm18206_vm5, %v2460_v56, %v2093_v20  ;;  %vm18211_vm5 = vmmov %vm18207_vm11  ;;  %vm18212_vm11 = vsmask.f32 256  ;;  %v12176_v4 = vrot.slane %v3224_v44, 1  ;;  %v18219_v44 = vld [vmem:[#allocation27_spill] sm:$0xff] }
 0x1e5   : > { %v2856_v42 = vadd.f32 %v11496_v25, %v2820_v27  ;;  %3401 = vrot.lane.b32.xlu1 %v12059_v50, %s17658_s28  ;;  %v2526_v50 = vsel %vm18210_vm10, %v2493_v38, %v2133_v29  ;;  %v3783_v6 = vsel %vm18211_vm5, %v12030_v40, %v3782_v23  ;;  %v12173_v28 = vsel %vm18212_vm11, %v12033_v0, %v3079_v62 }
 0x1e6   : > { %3481 = vrot.lane.b32.xlu2 %v3450_v15, %s17656_s27  ;;  %v2559_v38 = vsel %vm18213_vm0, %v2526_v50, %v12028_v49  ;;  %v2919_v27 = vpack.c.bf16 %v12164_v8, %v12164_v8  ;;  %vm18214_vm10 = vcmask 146432   ;;  %v3317_v0 = vshll.u32 %v12173_v28, 16 }
 0x1e7   : > { %v12162_v37 = vmax.f32 %v2856_v42, 0.0  ;;  %v2299_v25 = vpop.permute.xlu1 %2298  ;;  %vm18215_vm5 = vcmask 171008   ;;  %vm18216_vm11 = vcmask 1046528   ;;  %vm18217_vm0 = vcmask 195584  }
 0x1e8   : > { %v12167_v16 = vpop.permute.xlu2 %1963  ;;  %v3620_v56 = vsel %vm18216_vm11, %v3617_v59, %v12176_v4  ;;  %v3257_v42 = vsel %vm18202_vm15, %v12173_v28, 0  ;;  %v12204_v59 = vld [vmem:[%s18059_s5] ss:$0 sm:$0xff]  ;;  %vm17573_vm15 = vcmask 130048   ;;  %s18638_s5 = sld [smem:[#allocation82_spill]] }
 0x1e9   : > { %18208 = vst [vmem:[#allocation25_spill] sm:$0xff] %v12162_v37  ;;  %3813 = vrot.lane.b32.xlu0 %v3783_v6, %s17652_s9  ;;  %v2920_v52 = vpack.c.bf16 %v12162_v37, %v12162_v37  ;;  %v3313_v6 = vshrl.u32 %v12063_v18, 16 }
 0x1eb   : > { %v2263_v29 = vpop.permute.xlu0 %2262  ;;  %v2993_v62 = vunpack.c.l.b16 %v2920_v52  ;;  %v12210_v52 = vrot.slane %v3317_v0, 1 }
 0x1ec   : > { %v2592_v40 = vsel %vm18214_vm10, %v2559_v38, %v2263_v29  ;;  %v2761_v20 = vpop.f32.mrf.mxu0  ;;  %vm18218_vm10 = vcmask 220160   ;;  %v12213_v38 = vrot.slane %v3257_v42, 1 }
 0x1ed   : > { %v2625_v51 = vsel %vm18215_vm5, %v2592_v40, %v2299_v25  ;;  %3569 = vrot.lane.b32.xlu1 %v12114_v34, %s17654_s25  ;;  %vm18220_vm5 = vnez %v18219_v44  ;;  %v2992_v25 = vunpack.c.l.b16 %v2919_v27  ;;  %v2821_v50 = vmul.f32 %v12204_v59, %v2761_v20 }
 0x1ee   : > { %3651 = vrot.lane.b32.xlu2 %v3620_v56, %s18159_s7  ;;  %v2658_v49 = vsel %vm18217_vm0, %v2625_v51, %v12056_v30  ;;  %v3207_v26 = vsel %vm18220_vm5, %v12006_v61, 0  ;;  %v3315_v27 = vor.u32 %v3313_v6, %v12096_v24  ;;  %v12219_v51 = vld [vmem:[%s18068_s26] ss:$0 sm:$0xff]  ;;  %vm18221_vm0 = vsmask.f32 7424 }
 0x1ef   : > { %v3474_v15 = vpop.permute.xlu1 %3473  ;;  %9307 = vmatmul.msk.bf16.gmra.mxu0 %vm18218_vm10, %v2658_v49  ;;  %v3017_v29 = vpack.c.b16 %v2993_v62, %v2992_v25  ;;  %v2857_v20 = vadd.f32 %v12219_v51, %v2821_v50  ;;  %vm18222_vm10 = vmmov %vm18216_vm11  ;;  %v18223_v62 = vld [vmem:[#allocation28_spill] sm:$0xff] }
 0x1f0   : > { %v12207_v30 = vpop.permute.xlu2 %2134  ;;  %v12224_v0 = vsel %vm18221_vm0, %v3315_v27, %v12210_v52  ;;  %v3785_v24 = vsel %vm18222_vm10, %v3782_v23, %v12213_v38  ;;  %vm18224_vm11 = vnez %v18223_v62  ;;  %v3240_v23 = vsel %vm18220_vm5, %v12063_v18, 0 }
 0x1f1   : > { %3529 = vrot.lane.b32.xlu0 %v3207_v26, %s17821_s1  ;;  %v3192_v42 = vsel %vm18224_vm11, %v12063_v18, 0  ;;  %v3082_v26 = vshrl.u32 %v3017_v29, 16  ;;  %v12237_v27 = vmax.f32 %v2857_v20, 0.0  ;;  %vm18228_vm0 = vcmask 195584  }
 0x1f2   : > { %v12244_v37 = vrot.slane %v3192_v42, 1 }
 0x1f3   : > { %v3394_v40 = vpop.permute.xlu0 %3393  ;;  %18226 = vst [vmem:[#allocation59_spill] sm:$0xff] %v12237_v27  ;;  %v2921_v2 = vpack.c.bf16 %v12237_v27, %v12237_v27 }
 0x1f4   : > { %v2763_v56 = vpop.f32.mrf.mxu0  ;;  %v3841_v25 = vsel %vm18225_vm12, 0, %v3394_v40  ;;  %v12250_v40 = vrot.slane %v3082_v26, 7  ;;  %vm17575_vm12 = vcmask 261120  }
 0x1f5   : > { %v2822_v49 = vmul.f32 %v12204_v59, %v2763_v56  ;;  %3735 = vrot.lane.b32.xlu1 %v12224_v0, %s17621_s6  ;;  %v3889_v8 = vsel %vm17573_vm15, %v3841_v25, %v3474_v15  ;;  %v3452_v15 = vsel %vm18222_vm10, %v12136_v11, %v12244_v37  ;;  %vm17578_vm15 = vcmask 326656   ;;  %v18229_v25 = vld [vmem:[#allocation29_spill] sm:$0xff] }
 0x1f6   : > { %3815 = vrot.lane.b32.xlu2 %v3785_v24, %s17652_s9  ;;  %v3085_v24 = vshll.u32 %v3017_v29, 16  ;;  %v3921_v42 = vsel %vm18228_vm0, %v3889_v8, %v12090_v5  ;;  %v3225_v29 = vsel %vm18224_vm11, %v12173_v28, 0  ;;  %v2994_v11 = vunpack.c.l.b16 %v2921_v2 }
 0x1f7   : > { %v2858_v50 = vadd.f32 %v12219_v51, %v2822_v49  ;;  %v3644_v6 = vpop.permute.xlu1 %3643  ;;  %vm17589_vm0 = vcmask 392192   ;;  %vm17585_vm10 = vcmask 457728  }
 0x1f8   : > { %v12239_v56 = vpop.permute.xlu2 %2300 }
 0x1f9   : > { %v12247_v55 = vmax.f32 %v2858_v50, 0.0  ;;  %3699 = vrot.lane.b32.xlu0 %v3240_v23, %s18170_s29  ;;  %v3208_v50 = vsel %vm10579_vm3, %v12063_v18, 0  ;;  %v3087_v23 = vor.u32 %v3085_v24, %v12250_v40 }
 0x1fb   : > { %18227 = vst [vmem:[#allocation60_spill] sm:$0xff] %v12247_v55  ;;  %v2922_v20 = vpack.c.bf16 %v12247_v55, %v12247_v55  ;;  %v3562_v49 = vpop.permute.xlu0 %3561 }
 0x1fc   : > { %v3954_v26 = vsel %vm17575_vm12, %v3921_v42, %v3562_v49  ;;  %v12274_v42 = vrot.slane %v3225_v29, 1  ;;  %vm18230_vm12 = vsmask.f32 256 }
 0x1fd   : > { %3483 = vrot.lane.b32.xlu1 %v3452_v15, %s17656_s27  ;;  %v2995_v5 = vunpack.c.l.b16 %v2922_v20  ;;  %v3987_v55 = vsel %vm17578_vm15, %v3954_v26, %v3644_v6  ;;  %v12280_v15 = vsel %vm18230_vm12, %v12132_v7, %v3087_v23  ;;  %vm17582_vm15 = vcmask 588800  }
 0x1fe   : > { %3531 = vrot.lane.b32.xlu2 %v3208_v50, %s17821_s1  ;;  %v4020_v2 = vsel %vm17589_vm0, %v3987_v55, %v12128_v21  ;;  %v3622_v50 = vsel %vm18231_vm14, %v12176_v4, %v12274_v42  ;;  %v3258_v55 = vsel %vm18224_vm11, %v12280_v15, 0  ;;  %v1410_v23 = vsel %vm11806_vm4, %v11414_v9, 0 }
 0x1ff   : > { %v3808_v8 = vpop.permute.xlu1 %3807  ;;  %v3018_v20 = vpack.c.b16 %v2995_v5, %v2994_v11  ;;  %v12304_v11 = vrot.slane %v3258_v55, 1  ;;  %vm18232_vm14 = vcmask 23552   ;;  %v3321_v9 = vshrl.u32 %v12173_v28, 16 }
 0x200   : > { %v12272_v49 = vpop.permute.xlu2 %3475  ;;  %vm18233_vm12 = vcmask 1046528   ;;  %vm18251_vm0 = vsmask.f32 7424 }
 0x201   : > { %3403 = vrot.lane.b32.xlu0 %v12114_v34, %s17658_s28  ;;  %v3241_v34 = vsel %vm10579_vm3, %v12173_v28, 0  ;;  %v3090_v21 = vshrl.u32 %v3018_v20, 16  ;;  %v3787_v55 = vsel %vm18233_vm12, %v12213_v38, %v12304_v11  ;;  %vm18238_vm12 = vcmask 72704  }
 0x203   : > { %v3728_v24 = vpop.permute.xlu0 %3727  ;;  %v2766_v6 = vpop.f32.mrf.mxu0 }
 0x204   : > { %v4053_v26 = vsel %vm17585_vm10, %v4020_v2, %v3728_v24  ;;  %v2823_v29 = vmul.f32 %v12204_v59, %v2766_v6  ;;  %v12309_v2 = vrot.slane %v3090_v21, 7  ;;  %v2429_v24 = vsel %vm18232_vm14, %v1410_v23, %v12167_v16 }
 0x205   : > { %3653 = vrot.lane.b32.xlu1 %v3622_v50, %s18159_s7  ;;  %v4086_v7 = vsel %vm17584_vm9, %v4053_v26, %v3808_v8  ;;  %v3325_v8 = vshll.u32 %v12280_v15, 16  ;;  %vm18237_vm14 = vsmask.f32 7424  ;;  %vm18241_vm9 = vsmask.f32 256 }
 0x206   : > { %3701 = vrot.lane.b32.xlu2 %v3241_v34, %s18170_s29  ;;  %9325 = vmatmul.msk.bf16.vlgmr.msra.gmra.mxu1 %vm17582_vm15, %v4086_v7  ;;  %v2859_v6 = vadd.f32 %v12219_v51, %v2823_v29  ;;  %v3093_v34 = vshll.u32 %v3018_v20, 16  ;;  %vm18234_vm15 = vcmask 48128   ;;  %v3323_v20 = vor.u32 %v3321_v9, %v12210_v52 }
 0x207   : > { %v2095_v4 = vpop.permute.xlu1 %2094  ;;  %v3327_v27 = vrot.slane %v3325_v8, 1  ;;  %vm18245_vm10 = vcmask 121856  }
 0x208   : > { %v12302_v5 = vpop.permute.xlu2 %3645  ;;  %v3095_v21 = vor.u32 %v3093_v34, %v12309_v2  ;;  %v12326_v23 = vmax.f32 %v2859_v6, 0.0 }
 0x209   : > { %3571 = vrot.lane.b32.xlu0 %v12224_v0, %s17654_s25  ;;  %v3328_v8 = vsel %vm18237_vm14, %v3323_v20, %v3327_v27  ;;  %vm18242_vm14 = vcmask 97280  }
 0x20a   : > { %18235 = vst [vmem:[#allocation29_spill] sm:$0xff] %v12326_v23  ;;  %v12340_v52 = vsel %vm18241_vm9, %v12250_v40, %v3095_v21  ;;  %v2923_v6 = vpack.c.bf16 %v12326_v23, %v12326_v23  ;;  %vm18246_vm9 = vcmask 146432  }
 0x20b   : > { %v2047_v26 = vpop.permute.xlu0 %2046  ;;  %v2768_v50 = vpop.f32.mrf.mxu0  ;;  %v3333_v40 = vshll.u32 %v12340_v52, 16 }
 0x20c   : > { %v2824_v7 = vmul.f32 %v12204_v59, %v2768_v50  ;;  %v2462_v16 = vsel %vm18234_vm15, %v2429_v24, %v2047_v26  ;;  %v18239_v24 = vld [vmem:[#allocation30_spill] sm:$0xff]  ;;  %v2996_v21 = vunpack.c.l.b16 %v2923_v6 }
 0x20d   : > { %3817 = vrot.lane.b32.xlu1 %v3787_v55, %s17652_s9  ;;  %v2495_v34 = vsel %vm18238_vm12, %v2462_v16, %v2095_v4  ;;  %vm18240_vm15 = vnez %v18239_v24 }
 0x20e   : > { %v2860_v29 = vadd.f32 %v12219_v51, %v2824_v7  ;;  %3405 = vrot.lane.b32.xlu2 %v12224_v0, %s17658_s28  ;;  %v3193_v26 = vsel %vm18240_vm15, %v12173_v28, 0  ;;  %v2528_v4 = vsel %vm18242_vm14, %v2495_v34, %v12207_v30  ;;  %v18243_v7 = vld [vmem:[#allocation31_spill] sm:$0xff]  ;;  %vm18247_vm14 = vcmask 1046528  }
 0x20f   : > { %v2265_v50 = vpop.permute.xlu1 %2264  ;;  %vm18244_vm12 = vnez %v18243_v7  ;;  %v3453_v16 = vrot.slane %v3193_v26, 1  ;;  %v3329_v26 = vshrl.u32 %v12280_v15, 16 }
 0x210   : > { %v12328_v47 = vmax.f32 %v2860_v29, 0.0  ;;  %v12330_v38 = vpop.permute.xlu2 %3809  ;;  %v3209_v55 = vsel %vm18244_vm12, %v12173_v28, 0 }
 0x211   : > { %3737 = vrot.lane.b32.xlu0 %v3328_v8, %s17621_s6  ;;  %v3454_v30 = vsel %vm18247_vm14, %v12244_v37, %v3453_v16  ;;  %v3242_v37 = vsel %vm18244_vm12, %v12280_v15, 0  ;;  %vm18250_vm14 = vcmask 220160  }
 0x212   : > { %18236 = vst [vmem:[#allocation61_spill] sm:$0xff] %v12328_v47  ;;  %v2924_v0 = vpack.c.bf16 %v12328_v47, %v12328_v47 }
 0x213   : > { %v2217_v9 = vpop.permute.xlu0 %2216 }
 0x214   : > { %v2997_v29 = vunpack.c.l.b16 %v2924_v0  ;;  %v2561_v20 = vsel %vm18245_vm10, %v2528_v4, %v2217_v9  ;;  %v12362_v0 = vrot.slane %v3333_v40, 1  ;;  %v3226_v9 = vsel %vm18240_vm15, %v12280_v15, 0 }
 0x215   : > { %3533 = vrot.lane.b32.xlu1 %v3209_v55, %s17821_s1  ;;  %v2594_v23 = vsel %vm18246_vm9, %v2561_v20, %v2265_v50  ;;  %vm18248_vm10 = vcmask 171008   ;;  %v3331_v55 = vor.u32 %v3329_v26, %v3327_v27  ;;  %vm18249_vm9 = vcmask 195584   ;;  %v18252_v27 = vld [vmem:[#allocation32_spill] sm:$0xff] }
 0x216   : > { %3573 = vrot.lane.b32.xlu2 %v3328_v8, %s17654_s25  ;;  %v3019_v34 = vpack.c.b16 %v2997_v29, %v2996_v21  ;;  %v2627_v50 = vsel %vm18248_vm10, %v2594_v23, %v12239_v56  ;;  %v3623_v29 = vrot.slane %v3226_v9, 1  ;;  %vm18253_vm10 = vnez %v18252_v27 }
 0x217   : > { %v3396_v47 = vpop.permute.xlu1 %3395  ;;  %v12377_v40 = vsel %vm18251_vm0, %v3331_v55, %v12362_v0  ;;  %v3194_v56 = vsel %vm18253_vm10, %v12280_v15, 0  ;;  %vm18255_vm0 = vcmask 64512  }
 0x218   : > { %v12356_v54 = vpop.permute.xlu2 %3525  ;;  %v3098_v21 = vshrl.u32 %v3019_v34, 16  ;;  %v3101_v36 = vshll.u32 %v3019_v34, 16 }
 0x219   : > { %3485 = vrot.lane.b32.xlu0 %v3454_v30, %s17656_s27  ;;  %v3172_v30 = vsel %vm18162_vm1, %v11666_v48, 0 }
 0x21a   : > { %v2771_v6 = vpop.f32.mrf.mxu0  ;;  %v3844_v55 = vsel %vm18255_vm0, %v3172_v30, %v3396_v47  ;;  %vm18258_vm0 = vcmask 1046528  }
 0x21b   : > { %v2381_v4 = vpop.permute.xlu0 %2380  ;;  %v2825_v26 = vmul.f32 %v12204_v59, %v2771_v6 }
 0x21c   : > { %v2660_v20 = vsel %vm18249_vm9, %v2627_v50, %v2381_v4  ;;  %vm18254_vm9 = vcmask 1046528   ;;  %v12392_v50 = vrot.slane %v3098_v21, 7 }
 0x21d   : > { %9308 = vmatmul.msk.bf16.gmra.mxu0 %vm18250_vm14, %v2660_v20  ;;  %3703 = vrot.lane.b32.xlu1 %v3242_v37, %s18170_s29  ;;  %v3624_v4 = vsel %vm18254_vm9, %v12274_v42, %v3623_v29  ;;  %v12396_v20 = vrot.slane %v3194_v56, 1  ;;  %v3259_v37 = vsel %vm18240_vm15, %v12340_v52, 0  ;;  %v2861_v62 = vadd.f32 %v12219_v51, %v2825_v26 }
 0x21e   : > { %3739 = vrot.lane.b32.xlu2 %v12377_v40, %s17621_s6  ;;  %vm18256_vm14 = vcmask 130048   ;;  %v3788_v21 = vrot.slane %v3259_v37, 1  ;;  %v3103_v47 = vor.u32 %v3101_v36, %v12392_v50  ;;  %vm18257_vm9 = vcmask 195584  }
 0x21f   : > { %v3564_v23 = vpop.permute.xlu1 %3563  ;;  %v3891_v42 = vsel %vm18256_vm14, %v3844_v55, %v12272_v49  ;;  %v3456_v34 = vsel %vm18258_vm0, %v3453_v16, %v12396_v20  ;;  %v3227_v26 = vsel %vm18253_vm10, %v12340_v52, 0  ;;  %v12417_v55 = vmax.f32 %v2861_v62, 0.0 }
 0x220   : > { %v12388_v9 = vpop.permute.xlu2 %3695  ;;  %vm18261_vm14 = vcmask 261120   ;;  %v12429_v16 = vrot.slane %v3227_v26, 1  ;;  %vm18264_vm15 = vcmask 326656  }
 0x221   : > { %3655 = vrot.lane.b32.xlu0 %v3624_v4, %s18159_s7  ;;  %18260 = vst [vmem:[#allocation63_spill] sm:$0xff] %v12417_v55 }
 0x222   : > { %v2773_v48 = vpop.f32.mrf.mxu0 }
 0x223   : > { %v2826_v6 = vmul.f32 %v12204_v59, %v2773_v48  ;;  %v3524_v32 = vpop.permute.xlu0 %3523 }
 0x224   : > { %v3923_v30 = vsel %vm18257_vm9, %v3891_v42, %v3524_v32  ;;  %vm18262_vm9 = vmmov %vm18258_vm0  ;;  %vm18263_vm0 = vsmask.f32 256 }
 0x225   : > { %v2862_v56 = vadd.f32 %v12219_v51, %v2826_v6  ;;  %3407 = vrot.lane.b32.xlu1 %v3328_v8, %s17658_s28  ;;  %v3956_v36 = vsel %vm18261_vm14, %v3923_v30, %v3564_v23  ;;  %v3789_v32 = vsel %vm18262_vm9, %v12304_v11, %v3788_v21  ;;  %v12426_v8 = vsel %vm18263_vm0, %v12309_v2, %v3103_v47 }
 0x226   : > { %3487 = vrot.lane.b32.xlu2 %v3456_v34, %s17656_s27  ;;  %v3989_v23 = vsel %vm18264_vm15, %v3956_v36, %v12302_v5  ;;  %v2925_v6 = vpack.c.bf16 %v12417_v55, %v12417_v55  ;;  %vm18265_vm14 = vcmask 392192   ;;  %v3341_v2 = vshll.u32 %v12426_v8, 16  ;;  %v18269_v36 = vld [vmem:[#allocation33_spill] sm:$0xff] }
 0x227   : > { %v12415_v4 = vmax.f32 %v2862_v56, 0.0  ;;  %v3730_v49 = vpop.permute.xlu1 %3729  ;;  %v3626_v47 = vsel %vm18262_vm9, %v3623_v29, %v12429_v16  ;;  %vm18266_vm0 = vcmask 457728   ;;  %vm18267_vm15 = vcmask 523264  }
 0x228   : > { %v12420_v37 = vpop.permute.xlu2 %3399  ;;  %v3260_v34 = vsel %vm18253_vm10, %v12426_v8, 0  ;;  %vm18270_vm11 = vnez %v18269_v36  ;;  %v2998_v29 = vunpack.c.l.b16 %v2925_v6  ;;  %vm18271_vm9 = vsmask.f32 7424 }
 0x229   : > { %18259 = vst [vmem:[#allocation62_spill] sm:$0xff] %v12415_v4  ;;  %3819 = vrot.lane.b32.xlu0 %v3789_v32, %s17652_s9  ;;  %v2926_v48 = vpack.c.bf16 %v12415_v4, %v12415_v4  ;;  %v3210_v32 = vsel %vm18270_vm11, %v12280_v15, 0  ;;  %vm18286_vm10 = vcmask 457728  }
 0x22b   : > { %v3694_v62 = vpop.permute.xlu0 %3693  ;;  %v2999_v30 = vunpack.c.l.b16 %v2926_v48 }
 0x22c   : > { %v4022_v11 = vsel %vm18265_vm14, %v3989_v23, %v3694_v62  ;;  %v2776_v42 = vpop.f32.mrf.mxu0  ;;  %vm18268_vm14 = vcmask 588800   ;;  %v3337_v62 = vshrl.u32 %v12340_v52, 16  ;;  %v12458_v23 = vrot.slane %v3341_v2, 1 }
 0x22d   : > { %3575 = vrot.lane.b32.xlu1 %v12377_v40, %s17654_s25  ;;  %v4055_v56 = vsel %vm18266_vm0, %v4022_v11, %v3730_v49  ;;  %v2827_v49 = vmul.f32 %v12204_v59, %v2776_v42  ;;  %v3020_v11 = vpack.c.b16 %v2999_v30, %v2998_v29  ;;  %v3173_v42 = vsel %vm18173_vm2, %v11701_v57, 0  ;;  %v18273_v30 = vld [vmem:[#allocation34_spill] sm:$0xff] }
 0x22e   : > { %3657 = vrot.lane.b32.xlu2 %v3626_v47, %s18159_s7  ;;  %v4088_v5 = vsel %vm18267_vm15, %v4055_v56, %v12330_v38  ;;  %v12461_v38 = vrot.slane %v3260_v34, 1  ;;  %v3339_v47 = vor.u32 %v3337_v62, %v12362_v0  ;;  %vm18272_vm0 = vcmask 1046528  }
 0x22f   : > { %v3478_v26 = vpop.permute.xlu1 %3477  ;;  %9326 = vmatmul.msk.bf16.gmra.mxu1 %vm18268_vm14, %v4088_v5  ;;  %v2863_v5 = vadd.f32 %v12219_v51, %v2827_v49  ;;  %vm18274_vm15 = vnez %v18273_v30  ;;  %vm18275_vm14 = vcmask 64512  }
 0x230   : > { %v12455_v48 = vpop.permute.xlu2 %3567  ;;  %v12467_v6 = vsel %vm18271_vm9, %v3339_v47, %v12458_v23  ;;  %v3791_v0 = vsel %vm18272_vm0, %v3788_v21, %v12461_v38  ;;  %v3195_v34 = vsel %vm18274_vm15, %v12340_v52, 0  ;;  %v3243_v21 = vsel %vm18270_vm11, %v12340_v52, 0 }
 0x231   : > { %3535 = vrot.lane.b32.xlu0 %v3210_v32, %s17821_s1  ;;  %v3106_v32 = vshrl.u32 %v3020_v11, 16  ;;  %v12483_v62 = vmax.f32 %v2863_v5, 0.0  ;;  %v12490_v47 = vrot.slane %v3195_v34, 1  ;;  %vm18277_vm9 = vcmask 130048  }
 0x232   : > { %vm18279_vm0 = vcmask 195584  }
 0x233   : > { %v3398_v56 = vpop.permute.xlu0 %3397  ;;  %18276 = vst [vmem:[#allocation64_spill] sm:$0xff] %v12483_v62 }
 0x234   : > { %v2778_v4 = vpop.f32.mrf.mxu0  ;;  %v3847_v29 = vsel %vm18275_vm14, %v3173_v42, %v3398_v56  ;;  %v12496_v56 = vrot.slane %v3106_v32, 7  ;;  %vm18280_vm14 = vcmask 1046528  }
 0x235   : > { %v2828_v2 = vmul.f32 %v12204_v59, %v2778_v4  ;;  %3741 = vrot.lane.b32.xlu1 %v12467_v6, %s17621_s6  ;;  %v3893_v55 = vsel %vm18277_vm9, %v3847_v29, %v3478_v26  ;;  %v3458_v26 = vsel %vm18280_vm14, %v12396_v20, %v12490_v47  ;;  %vm18281_vm9 = vcmask 261120  }
 0x236   : > { %3821 = vrot.lane.b32.xlu2 %v3791_v0, %s17652_s9  ;;  %v2927_v0 = vpack.c.bf16 %v12483_v62, %v12483_v62  ;;  %v3925_v34 = vsel %vm18279_vm0, %v3893_v55, %v12356_v54  ;;  %vm18283_vm0 = vcmask 326656   ;;  %vm18284_vm14 = vsmask.f32 256 }
 0x237   : > { %v2864_v49 = vadd.f32 %v12219_v51, %v2828_v2  ;;  %v3648_v57 = vpop.permute.xlu1 %3647  ;;  %v3109_v2 = vshll.u32 %v3020_v11, 16  ;;  %v3228_v11 = vsel %vm18274_vm15, %v12426_v8, 0 }
 0x238   : > { %v12485_v4 = vpop.permute.xlu2 %3733  ;;  %v3000_v55 = vunpack.c.l.b16 %v2927_v0 }
 0x239   : > { %v12493_v27 = vmax.f32 %v2864_v49, 0.0  ;;  %3705 = vrot.lane.b32.xlu0 %v3243_v21, %s18170_s29  ;;  %v3211_v49 = vsel %vm10927_vm6, %v12340_v52, 0  ;;  %v3111_v21 = vor.u32 %v3109_v2, %v12496_v56 }
 0x23b   : > { %18278 = vst [vmem:[#allocation65_spill] sm:$0xff] %v12493_v27  ;;  %v2928_v5 = vpack.c.bf16 %v12493_v27, %v12493_v27  ;;  %v3566_v42 = vpop.permute.xlu0 %3565 }
 0x23c   : > { %v3958_v29 = vsel %vm18281_vm9, %v3925_v34, %v3566_v42  ;;  %v12520_v34 = vrot.slane %v3228_v11, 1  ;;  %vm18285_vm9 = vcmask 392192  }
 0x23d   : > { %3489 = vrot.lane.b32.xlu1 %v3458_v26, %s17656_s27  ;;  %v3001_v27 = vunpack.c.l.b16 %v2928_v5  ;;  %v3991_v20 = vsel %vm18283_vm0, %v3958_v29, %v3648_v57  ;;  %v12526_v26 = vsel %vm18284_vm14, %v12392_v50, %v3111_v21  ;;  %vm18287_vm0 = vcmask 1046528  }
 0x23e   : > { %3537 = vrot.lane.b32.xlu2 %v3211_v49, %s17821_s1  ;;  %v4024_v5 = vsel %vm18285_vm9, %v3991_v20, %v12388_v9  ;;  %v3628_v57 = vsel %vm18287_vm0, %v12429_v16, %v12520_v34  ;;  %vm18288_vm14 = vcmask 523264   ;;  %v3174_v20 = vsel %vm18192_vm13, %v11765_v43, 0  ;;  %vm18290_vm9 = vmmov %vm18287_vm0 }
 0x23f   : > { %v3812_v54 = vpop.permute.xlu1 %3811  ;;  %v3021_v62 = vpack.c.b16 %v3001_v27, %v3000_v55  ;;  %v3261_v27 = vsel %vm18274_vm15, %v12526_v26, 0  ;;  %v3349_v55 = vshll.u32 %v12526_v26, 16  ;;  %vm18291_vm0 = vcmask 64512  }
 0x240   : > { %v12518_v42 = vpop.permute.xlu2 %3481  ;;  %v12547_v21 = vrot.slane %v3261_v27, 1  ;;  %vm18307_vm15 = vsmask.f32 7424 }
 0x241   : > { %3409 = vrot.lane.b32.xlu0 %v12377_v40, %s17658_s28  ;;  %v3244_v40 = vsel %vm10927_vm6, %v12426_v8, 0  ;;  %v3114_v9 = vshrl.u32 %v3021_v62, 16  ;;  %v3351_v27 = vrot.slane %v3349_v55, 1 }
 0x243   : > { %v3732_v2 = vpop.permute.xlu0 %3731  ;;  %v2781_v49 = vpop.f32.mrf.mxu0 }
 0x244   : > { %v4057_v0 = vsel %vm18286_vm10, %v4024_v5, %v3732_v2  ;;  %vm18289_vm10 = vcmask 588800   ;;  %v2829_v29 = vmul.f32 %v12204_v59, %v2781_v49 }
 0x245   : > { %3659 = vrot.lane.b32.xlu1 %v3628_v57, %s18159_s7  ;;  %v4090_v50 = vsel %vm18288_vm14, %v4057_v0, %v3812_v54  ;;  %v12552_v54 = vrot.slane %v3114_v9, 7  ;;  %v3345_v0 = vshrl.u32 %v12426_v8, 16  ;;  %v3117_v57 = vshll.u32 %v3021_v62, 16 }
 0x246   : > { %3707 = vrot.lane.b32.xlu2 %v3244_v40, %s18170_s29  ;;  %9327 = vmatmul.msk.bf16.gmra.mxu1 %vm18289_vm10, %v4090_v50  ;;  %v2865_v5 = vadd.f32 %v12219_v51, %v2829_v29  ;;  %v3793_v50 = vsel %vm18290_vm9, %v12461_v38, %v12547_v21  ;;  %v3850_v9 = vsel %vm18291_vm0, %v3174_v20, %v12420_v37  ;;  %vm18292_vm14 = vcmask 130048  }
 0x247   : > { %v3528_v16 = vpop.permute.xlu1 %3527  ;;  %v3119_v43 = vor.u32 %v3117_v57, %v12552_v54  ;;  %v3347_v62 = vor.u32 %v3345_v0, %v12458_v23  ;;  %vm18295_vm10 = vsmask.f32 7424  ;;  %vm18296_vm9 = vcmask 195584  }
 0x248   : > { %v12545_v11 = vpop.permute.xlu2 %3651  ;;  %v3212_v0 = vsel %vm11010_vm8, %v12426_v8, 0 }
 0x249   : > { %3577 = vrot.lane.b32.xlu0 %v12467_v6, %s17654_s25  ;;  %v3352_v37 = vsel %vm18295_vm10, %v3347_v62, %v3351_v27  ;;  %vm18300_vm10 = vcmask 261120  }
 0x24b   : > { %v3480_v2 = vpop.permute.xlu0 %3479  ;;  %v2783_v49 = vpop.f32.mrf.mxu0 }
 0x24c   : > { %v2830_v40 = vmul.f32 %v12204_v59, %v2783_v49  ;;  %v3895_v29 = vsel %vm18292_vm14, %v3850_v9, %v3480_v2  ;;  %v12572_v49 = vmax.f32 %v2865_v5, 0.0  ;;  %v18297_v2 = vld [vmem:[#allocation36_spill] sm:$0xff]  ;;  %vm18299_vm14 = vsmask.f32 256 }
 0x24d   : > { %3823 = vrot.lane.b32.xlu1 %v3793_v50, %s17652_s9  ;;  %v3927_v20 = vsel %vm18296_vm9, %v3895_v29, %v3528_v16  ;;  %vm18298_vm0 = vnez %v18297_v2  ;;  %v12586_v23 = vsel %vm18299_vm14, %v12496_v56, %v3119_v43  ;;  %vm18301_vm9 = vcmask 326656  }
 0x24e   : > { %v2866_v30 = vadd.f32 %v12219_v51, %v2830_v40  ;;  %3411 = vrot.lane.b32.xlu2 %v12467_v6, %s17658_s28  ;;  %18293 = vst [vmem:[#allocation66_spill] sm:$0xff] %v12572_v49  ;;  %v3196_v57 = vsel %vm18298_vm0, %v12426_v8, 0  ;;  %v3960_v16 = vsel %vm18300_vm10, %v3927_v20, %v12455_v48  ;;  %v3357_v56 = vshll.u32 %v12586_v23, 16 }
 0x24f   : > { %v3698_v38 = vpop.permute.xlu1 %3697  ;;  %v3459_v40 = vrot.slane %v3196_v57, 1  ;;  %vm18302_vm14 = vcmask 392192   ;;  %vm18303_vm10 = vcmask 1046528   ;;  %v3353_v57 = vshrl.u32 %v12526_v26, 16 }
 0x250   : > { %v12574_v55 = vmax.f32 %v2866_v30, 0.0  ;;  %v12576_v24 = vpop.permute.xlu2 %3815  ;;  %v2929_v30 = vpack.c.bf16 %v12572_v49, %v12572_v49 }
 0x251   : > { %3743 = vrot.lane.b32.xlu0 %v3352_v37, %s17621_s6  ;;  %v3460_v48 = vsel %vm18303_vm10, %v12490_v47, %v3459_v40  ;;  %v3245_v47 = vsel %vm11010_vm8, %v12526_v26, 0  ;;  %vm18306_vm10 = vcmask 588800  }
 0x252   : > { %18294 = vst [vmem:[#allocation67_spill] sm:$0xff] %v12574_v55  ;;  %v2930_v6 = vpack.c.bf16 %v12574_v55, %v12574_v55  ;;  %v3002_v43 = vunpack.c.l.b16 %v2929_v30 }
 0x253   : > { %v3650_v5 = vpop.permute.xlu0 %3649 }
 0x254   : > { %v3003_v50 = vunpack.c.l.b16 %v2930_v6  ;;  %v3993_v9 = vsel %vm18301_vm9, %v3960_v16, %v3650_v5  ;;  %v12608_v6 = vrot.slane %v3357_v56, 1  ;;  %v3229_v5 = vsel %vm18298_vm0, %v12526_v26, 0 }
 0x255   : > { %3539 = vrot.lane.b32.xlu1 %v3212_v0, %s17821_s1  ;;  %v4026_v62 = vsel %vm18302_vm14, %v3993_v9, %v3698_v38  ;;  %vm18304_vm9 = vcmask 457728   ;;  %v3355_v0 = vor.u32 %v3353_v57, %v3351_v27  ;;  %vm18305_vm14 = vcmask 523264  }
 0x256   : > { %3579 = vrot.lane.b32.xlu2 %v3352_v37, %s17654_s25  ;;  %v3022_v20 = vpack.c.b16 %v3003_v50, %v3002_v43  ;;  %v4059_v38 = vsel %vm18304_vm9, %v4026_v62, %v12485_v4  ;;  %v3629_v50 = vrot.slane %v3229_v5, 1  ;;  %v18308_v4 = vld [vmem:[#allocation38_spill] sm:$0xff] }
 0x257   : > { %v3402_v29 = vpop.permute.xlu1 %3401  ;;  %v12623_v56 = vsel %vm18307_vm15, %v3355_v0, %v12608_v6  ;;  %vm18309_vm9 = vnez %v18308_v4  ;;  %vm18311_vm15 = vcmask 64512  }
 0x258   : > { %v12602_v55 = vpop.permute.xlu2 %3531  ;;  %v3122_v43 = vshrl.u32 %v3022_v20, 16  ;;  %v3197_v27 = vsel %vm18309_vm9, %v12526_v26, 0  ;;  %v3125_v49 = vshll.u32 %v3022_v20, 16 }
 0x259   : > { %3491 = vrot.lane.b32.xlu0 %v3460_v48, %s17656_s27  ;;  %v3175_v48 = vsel %vm18220_vm5, %v11904_v12, 0  ;;  %vm18342_vm5 = vcmask 523264  }
 0x25a   : > { %v2786_v30 = vpop.f32.mrf.mxu0  ;;  %v3853_v0 = vsel %vm18311_vm15, %v3175_v48, %v3402_v29  ;;  %vm18314_vm15 = vcmask 1046528  }
 0x25b   : > { %v3814_v16 = vpop.permute.xlu0 %3813  ;;  %v2831_v57 = vmul.f32 %v12204_v59, %v2786_v30 }
 0x25c   : > { %v4092_v9 = vsel %vm18305_vm14, %v4059_v38, %v3814_v16  ;;  %vm18310_vm14 = vcmask 1046528   ;;  %v12638_v38 = vrot.slane %v3122_v43, 7 }
 0x25d   : > { %9328 = vmatmul.msk.bf16.gmra.mxu1 %vm18306_vm10, %v4092_v9  ;;  %3709 = vrot.lane.b32.xlu1 %v3245_v47, %s18170_s29  ;;  %v3630_v16 = vsel %vm18310_vm14, %v12520_v34, %v3629_v50  ;;  %v12642_v9 = vrot.slane %v3197_v27, 1  ;;  %v3262_v47 = vsel %vm18298_vm0, %v12586_v23, 0  ;;  %v2867_v17 = vadd.f32 %v12219_v51, %v2831_v57 }
 0x25e   : > { %3745 = vrot.lane.b32.xlu2 %v12623_v56, %s17621_s6  ;;  %vm18312_vm10 = vcmask 130048   ;;  %v3794_v43 = vrot.slane %v3262_v47, 1  ;;  %v3127_v29 = vor.u32 %v3125_v49, %v12638_v38  ;;  %vm18313_vm14 = vcmask 195584  }
 0x25f   : > { %v3570_v62 = vpop.permute.xlu1 %3569  ;;  %v3897_v34 = vsel %vm18312_vm10, %v3853_v0, %v12518_v42  ;;  %v3462_v20 = vsel %vm18314_vm15, %v3459_v40, %v12642_v9  ;;  %v3230_v57 = vsel %vm18309_vm9, %v12586_v23, 0  ;;  %v12663_v0 = vmax.f32 %v2867_v17, 0.0 }
 0x260   : > { %v12634_v5 = vpop.permute.xlu2 %3701  ;;  %vm18317_vm10 = vcmask 261120   ;;  %v12675_v40 = vrot.slane %v3230_v57, 1  ;;  %vm18320_vm0 = vcmask 326656  }
 0x261   : > { %3661 = vrot.lane.b32.xlu0 %v3630_v16, %s18159_s7  ;;  %18316 = vst [vmem:[#allocation69_spill] sm:$0xff] %v12663_v0 }
 0x262   : > { %v2788_v12 = vpop.f32.mrf.mxu0 }
 0x263   : > { %v2832_v30 = vmul.f32 %v12204_v59, %v2788_v12  ;;  %v3530_v44 = vpop.permute.xlu0 %3529 }
 0x264   : > { %v3929_v48 = vsel %vm18313_vm14, %v3897_v34, %v3530_v44  ;;  %vm18318_vm14 = vmmov %vm18314_vm15  ;;  %vm18319_vm15 = vsmask.f32 256 }
 0x265   : > { %v2868_v27 = vadd.f32 %v12219_v51, %v2832_v30  ;;  %3413 = vrot.lane.b32.xlu1 %v3352_v37, %s17658_s28  ;;  %v3962_v49 = vsel %vm18317_vm10, %v3929_v48, %v3570_v62  ;;  %v3795_v44 = vsel %vm18318_vm14, %v12547_v21, %v3794_v43  ;;  %v12672_v37 = vsel %vm18319_vm15, %v12552_v54, %v3127_v29 }
 0x266   : > { %3493 = vrot.lane.b32.xlu2 %v3462_v20, %s17656_s27  ;;  %v3995_v62 = vsel %vm18320_vm0, %v3962_v49, %v12545_v11  ;;  %v2931_v30 = vpack.c.bf16 %v12663_v0, %v12663_v0  ;;  %vm18321_vm10 = vcmask 392192   ;;  %v3365_v54 = vshll.u32 %v12672_v37, 16 }
 0x267   : > { %v12661_v16 = vmax.f32 %v2868_v27, 0.0  ;;  %v3736_v42 = vpop.permute.xlu1 %3735  ;;  %v3632_v29 = vsel %vm18318_vm14, %v3629_v50, %v12675_v40  ;;  %vm18322_vm15 = vcmask 457728   ;;  %vm18323_vm0 = vcmask 523264  }
 0x268   : > { %v12666_v47 = vpop.permute.xlu2 %3405  ;;  %v3263_v20 = vsel %vm18309_vm9, %v12672_v37, 0  ;;  %v3213_v49 = vsel %vm11130_vm7, %v12526_v26, 0  ;;  %v3004_v50 = vunpack.c.l.b16 %v2931_v30  ;;  %vm18325_vm14 = vsmask.f32 7424 }
 0x269   : > { %18315 = vst [vmem:[#allocation68_spill] sm:$0xff] %v12661_v16  ;;  %3825 = vrot.lane.b32.xlu0 %v3795_v44, %s17652_s9  ;;  %v2932_v12 = vpack.c.bf16 %v12661_v16, %v12661_v16  ;;  %vm18336_vm9 = vnez %v18021_v14 }
 0x26b   : > { %v3700_v17 = vpop.permute.xlu0 %3699  ;;  %v3005_v48 = vunpack.c.l.b16 %v2932_v12  ;;  %v3361_v12 = vshrl.u32 %v12586_v23, 16 }
 0x26c   : > { %v4028_v21 = vsel %vm18321_vm10, %v3995_v62, %v3700_v17  ;;  %v2791_v34 = vpop.f32.mrf.mxu0  ;;  %vm18324_vm10 = vcmask 588800   ;;  %v12704_v17 = vrot.slane %v3365_v54, 1 }
 0x26d   : > { %3581 = vrot.lane.b32.xlu1 %v12623_v56, %s17654_s25  ;;  %v4061_v27 = vsel %vm18322_vm15, %v4028_v21, %v3736_v42  ;;  %v2833_v42 = vmul.f32 %v12204_v59, %v2791_v34  ;;  %v3023_v62 = vpack.c.b16 %v3005_v48, %v3004_v50  ;;  %v3363_v21 = vor.u32 %v3361_v12, %v12608_v6  ;;  %v18327_v48 = vld [vmem:[#allocation40_spill] sm:$0xff] }
 0x26e   : > { %3663 = vrot.lane.b32.xlu2 %v3632_v29, %s18159_s7  ;;  %v4094_v11 = vsel %vm18323_vm0, %v4061_v27, %v12576_v24  ;;  %v12707_v24 = vrot.slane %v3263_v20, 1  ;;  %v3176_v34 = vsel %vm10579_vm3, %v12006_v61, 0  ;;  %vm18326_vm15 = vcmask 1046528  }
 0x26f   : > { %v3484_v57 = vpop.permute.xlu1 %3483  ;;  %9329 = vmatmul.msk.bf16.gmra.mxu1 %vm18324_vm10, %v4094_v11  ;;  %v2869_v27 = vadd.f32 %v12219_v51, %v2833_v42  ;;  %v12713_v30 = vsel %vm18325_vm14, %v3363_v21, %v12704_v17  ;;  %vm18328_vm0 = vnez %v18327_v48  ;;  %vm18329_vm10 = vcmask 64512  }
 0x270   : > { %v12701_v44 = vpop.permute.xlu2 %3573  ;;  %v3797_v6 = vsel %vm18326_vm15, %v3794_v43, %v12707_v24  ;;  %v3198_v20 = vsel %vm18328_vm0, %v12586_v23, 0  ;;  %v3246_v43 = vsel %vm11130_vm7, %v12586_v23, 0  ;;  %vm18331_vm14 = vcmask 130048  }
 0x271   : > { %3541 = vrot.lane.b32.xlu0 %v3213_v49, %s17821_s1  ;;  %v3130_v49 = vshrl.u32 %v3023_v62, 16  ;;  %v12729_v12 = vmax.f32 %v2869_v27, 0.0  ;;  %vm18333_vm15 = vcmask 195584   ;;  %vm18340_vm3 = vcmask 457728  }
 0x273   : > { %v3404_v29 = vpop.permute.xlu0 %3403  ;;  %18330 = vst [vmem:[#allocation70_spill] sm:$0xff] %v12729_v12 }
 0x274   : > { %v2793_v11 = vpop.f32.mrf.mxu0  ;;  %v3856_v50 = vsel %vm18329_vm10, %v3176_v34, %v3404_v29  ;;  %v3132_v29 = vrot.slane %v3130_v49, 7  ;;  %vm18334_vm10 = vcmask 1046528   ;;  %v3214_v49 = vsel %vm18336_vm9, %v12586_v23, 0 }
 0x275   : > { %v2834_v54 = vmul.f32 %v12204_v59, %v2793_v11  ;;  %3747 = vrot.lane.b32.xlu1 %v12713_v30, %s17621_s6  ;;  %v12736_v11 = vrot.slane %v3198_v20, 1  ;;  %v3899_v16 = vsel %vm18331_vm14, %v3856_v50, %v3484_v57  ;;  %vm18335_vm14 = vcmask 261120  }
 0x276   : > { %3827 = vrot.lane.b32.xlu2 %v3797_v6, %s17652_s9  ;;  %v2933_v6 = vpack.c.bf16 %v12729_v12, %v12729_v12  ;;  %v3931_v4 = vsel %vm18333_vm15, %v3899_v16, %v12602_v55  ;;  %vm18337_vm15 = vcmask 326656  }
 0x277   : > { %v2870_v42 = vadd.f32 %v12219_v51, %v2834_v54  ;;  %v3654_v61 = vpop.permute.xlu1 %3653  ;;  %v3133_v54 = vshll.u32 %v3023_v62, 16  ;;  %v3464_v57 = vsel %vm18334_vm10, %v12642_v9, %v12736_v11  ;;  %v3231_v62 = vsel %vm18328_vm0, %v12672_v37, 0 }
 0x278   : > { %v12731_v21 = vpop.permute.xlu2 %3739  ;;  %v3006_v16 = vunpack.c.l.b16 %v2933_v6  ;;  %vm18338_vm10 = vsmask.f32 256 }
 0x279   : > { %v12739_v0 = vmax.f32 %v2870_v42, 0.0  ;;  %3711 = vrot.lane.b32.xlu0 %v3246_v43, %s18170_s29  ;;  %v3135_v50 = vor.u32 %v3133_v54, %v3132_v29 }
 0x27b   : > { %18332 = vst [vmem:[#allocation71_spill] sm:$0xff] %v12739_v0  ;;  %v2934_v34 = vpack.c.bf16 %v12739_v0, %v12739_v0  ;;  %v3572_v27 = vpop.permute.xlu0 %3571 }
 0x27c   : > { %v3964_v20 = vsel %vm18335_vm14, %v3931_v4, %v3572_v27  ;;  %v12763_v4 = vrot.slane %v3231_v62, 1  ;;  %v12769_v27 = vsel %vm18338_vm10, %v12638_v38, %v3135_v50  ;;  %vm18339_vm14 = vcmask 392192  }
 0x27d   : > { %3495 = vrot.lane.b32.xlu1 %v3464_v57, %s17656_s27  ;;  %v3007_v42 = vunpack.c.l.b16 %v2934_v34  ;;  %v3997_v9 = vsel %vm18337_vm15, %v3964_v20, %v3654_v61  ;;  %vm18341_vm15 = vcmask 1046528   ;;  %v3247_v20 = vsel %vm18336_vm9, %v12672_v37, 0 }
 0x27e   : > { %3543 = vrot.lane.b32.xlu2 %v3214_v49, %s17821_s1  ;;  %v4030_v34 = vsel %vm18339_vm14, %v3997_v9, %v12634_v5  ;;  %v3634_v61 = vsel %vm18341_vm15, %v12675_v40, %v12763_v4  ;;  %v3264_v38 = vsel %vm18328_vm0, %v12769_v27, 0  ;;  %v3373_v50 = vshll.u32 %v12769_v27, 16 }
 0x27f   : > { %v3818_v55 = vpop.permute.xlu1 %3817  ;;  %v3024_v57 = vpack.c.b16 %v3007_v42, %v3006_v16  ;;  %v12789_v40 = vrot.slane %v3264_v38, 1  ;;  %vm18345_vm10 = vcmask 64512   ;;  %vm18346_vm14 = vcmask 130048  }
 0x280   : > { %v12761_v43 = vpop.permute.xlu2 %3487  ;;  %vm18353_vm0 = vnez %v18039_v33 }
 0x281   : > { %3415 = vrot.lane.b32.xlu0 %v12623_v56, %s17658_s28  ;;  %v3138_v5 = vshrl.u32 %v3024_v57, 16  ;;  %v3141_v9 = vshll.u32 %v3024_v57, 16 }
 0x283   : > { %v3738_v54 = vpop.permute.xlu0 %3737  ;;  %v12794_v42 = vrot.slane %v3138_v5, 7 }
 0x284   : > { %v4063_v6 = vsel %vm18340_vm3, %v4030_v34, %v3738_v54  ;;  %vm18343_vm3 = vcmask 588800   ;;  %v3369_v54 = vshrl.u32 %v12672_v37, 16 }
 0x285   : > { %3665 = vrot.lane.b32.xlu1 %v3634_v61, %s18159_s7  ;;  %v4096_v56 = vsel %vm18342_vm5, %v4063_v6, %v3818_v55  ;;  %v3177_v55 = vsel %vm18244_vm12, %v12063_v18, 0  ;;  %vm18344_vm5 = vmmov %vm18341_vm15  ;;  %v3375_v6 = vrot.slane %v3373_v50, 1  ;;  %vm18347_vm15 = vsmask.f32 7424 }
 0x286   : > { %3713 = vrot.lane.b32.xlu2 %v3247_v20, %s18170_s29  ;;  %9330 = vmatmul.msk.bf16.gmra.mxu1 %vm18343_vm3, %v4096_v56  ;;  %v3799_v34 = vsel %vm18344_vm5, %v12707_v24, %v12789_v40  ;;  %v3859_v61 = vsel %vm18345_vm10, %v3177_v55, %v12666_v47  ;;  %v3143_v20 = vor.u32 %v3141_v9, %v12794_v42  ;;  %vm18348_vm3 = vcmask 195584   ;;  %v18349_v47 = vld [vmem:[#allocation42_spill] sm:$0xff] }
 0x287   : > { %v3534_v49 = vpop.permute.xlu1 %3533  ;;  %v3371_v18 = vor.u32 %v3369_v54, %v12704_v17  ;;  %vm18350_vm5 = vnez %v18349_v47  ;;  %vm18351_vm10 = vsmask.f32 256 }
 0x288   : > { %v12787_v62 = vpop.permute.xlu2 %3657  ;;  %v3199_v50 = vsel %vm18350_vm5, %v12672_v37, 0  ;;  %v12820_v55 = vsel %vm18351_vm10, %v3132_v29, %v3143_v20  ;;  %vm18356_vm10 = vcmask 1046528  }
 0x289   : > { %3583 = vrot.lane.b32.xlu0 %v12713_v30, %s17654_s25  ;;  %v3376_v24 = vsel %vm18347_vm15, %v3371_v18, %v3375_v6  ;;  %v3465_v9 = vrot.slane %v3199_v50, 1  ;;  %vm18354_vm15 = vcmask 326656   ;;  %v3381_v54 = vshll.u32 %v12820_v55, 16 }
 0x28b   : > { %v3486_v16 = vpop.permute.xlu0 %3485  ;;  %v12838_v18 = vrot.slane %v3381_v54, 1 }
 0x28c   : > { %v3901_v56 = vsel %vm18346_vm14, %v3859_v61, %v3486_v16  ;;  %vm18352_vm14 = vcmask 261120  }
 0x28d   : > { %3829 = vrot.lane.b32.xlu1 %v3799_v34, %s17652_s9  ;;  %v3933_v5 = vsel %vm18348_vm3, %v3901_v56, %v3534_v49  ;;  %v4190_v34 = vpop.f32.mrf.mxu1  ;;  %vm18355_vm3 = vcmask 392192   ;;  %v3377_v56 = vshrl.u32 %v12769_v27, 16 }
 0x28e   : > { %3417 = vrot.lane.b32.xlu2 %v12713_v30, %s17658_s28  ;;  %v3966_v17 = vsel %vm18352_vm14, %v3933_v5, %v12701_v44  ;;  %v3215_v30 = vsel %vm18353_vm0, %v12672_v37, 0  ;;  %v3466_v44 = vsel %vm18356_vm10, %v12736_v11, %v3465_v9  ;;  %v3232_v5 = vsel %vm18350_vm5, %v12769_v27, 0 }
 0x28f   : > { %v3704_v57 = vpop.permute.xlu1 %3703  ;;  %vm18357_vm14 = vcmask 457728   ;;  %v3635_v54 = vrot.slane %v3232_v5, 1  ;;  %vm18360_vm10 = vsmask.f32 7424  ;;  %v12865_v5 = vld [vmem:[%s18363_s10] ss:$0 sm:$0xff] }
 0x290   : > { %v12811_v38 = vpop.permute.xlu2 %3821 }
 0x291   : > { %3749 = vrot.lane.b32.xlu0 %v3376_v24, %s17621_s6 }
 0x293   : > { %v3656_v16 = vpop.permute.xlu0 %3655 }
 0x294   : > { %v3999_v49 = vsel %vm18354_vm15, %v3966_v17, %v3656_v16  ;;  %vm18358_vm15 = vcmask 523264  }
 0x295   : > { %3545 = vrot.lane.b32.xlu1 %v3215_v30, %s17821_s1  ;;  %v4032_v61 = vsel %vm18355_vm3, %v3999_v49, %v3704_v57  ;;  %v3379_v30 = vor.u32 %v3377_v56, %v3375_v6  ;;  %v3248_v49 = vsel %vm18353_vm0, %v12769_v27, 0  ;;  %vm18359_vm3 = vcmask 588800  }
 0x296   : > { %3585 = vrot.lane.b32.xlu2 %v3376_v24, %s17654_s25  ;;  %v4065_v57 = vsel %vm18357_vm14, %v4032_v61, %v12731_v21  ;;  %v18361_v21 = vld [vmem:[#allocation43_spill] sm:$0xff]  ;;  %v4192_v61 = vpop.f32.mrf.mxu1 }
 0x297   : > { %v3408_v29 = vpop.permute.xlu1 %3407  ;;  %vm18362_vm14 = vnez %v18361_v21  ;;  %v4275_v0 = vmul.f32 %v12865_v5, %v4192_v61 }
 0x298   : > { %v12832_v20 = vpop.permute.xlu2 %3537  ;;  %v3200_v6 = vsel %vm18362_vm14, %v12769_v27, 0 }
 0x299   : > { %3497 = vrot.lane.b32.xlu0 %v3466_v44, %s17656_s27  ;;  %v12854_v44 = vsel %vm18360_vm10, %v3379_v30, %v12838_v18  ;;  %vm18368_vm10 = vcmask 130048  }
 0x29a   : > { %v2796_v50 = vpop.f32.mrf.mxu0 }
 0x29b   : > { %v2835_v16 = vmul.f32 %v12204_v59, %v2796_v50  ;;  %v3820_v17 = vpop.permute.xlu0 %3819 }
 0x29c   : > { %v4098_v11 = vsel %vm18358_vm15, %v4065_v57, %v3820_v17  ;;  %v3178_v17 = vsel %vm18270_vm11, %v12173_v28, 0  ;;  %vm18364_vm15 = vcmask 1046528   ;;  %vm18379_vm11 = vnez %v18067_v39 }
 0x29d   : > { %9331 = vmatmul.msk.bf16.gmra.mxu1 %vm18359_vm3, %v4098_v11  ;;  %3715 = vrot.lane.b32.xlu1 %v3248_v49, %s18170_s29  ;;  %v2871_v56 = vadd.f32 %v12219_v51, %v2835_v16  ;;  %v3636_v30 = vsel %vm18364_vm15, %v12763_v4, %v3635_v54  ;;  %vm18365_vm3 = vcmask 64512   ;;  %v12876_v16 = vrot.slane %v3200_v6, 1 }
 0x29e   : > { %3751 = vrot.lane.b32.xlu2 %v12854_v44, %s17621_s6  ;;  %v3862_v11 = vsel %vm18365_vm3, %v3178_v17, %v3408_v29  ;;  %v3265_v49 = vsel %vm18350_vm5, %v12820_v55, 0  ;;  %v4274_v4 = vmul.f32 %v12865_v5, %v4190_v34  ;;  %s18367_s6 = sld [smem:[#allocation80_spill]]  ;;  %vm18369_vm15 = vcmask 195584  }
 0x29f   : > { %v3576_v50 = vpop.permute.xlu1 %3575  ;;  %v12882_v48 = vmax.f32 %v2871_v56, 0.0  ;;  %v3903_v6 = vsel %vm18368_vm10, %v3862_v11, %v12761_v43  ;;  %v12893_v17 = vrot.slane %v3265_v49, 1  ;;  %vm18370_vm3 = vcmask 1046528  }
 0x2a0   : > { %v12870_v57 = vpop.permute.xlu2 %3707  ;;  %v3233_v34 = vsel %vm18362_vm14, %v12820_v55, 0  ;;  %vm18372_vm10 = vcmask 261120   ;;  %vm18376_vm5 = vcmask 457728  }
 0x2a1   : > { %3667 = vrot.lane.b32.xlu0 %v3636_v30, %s18159_s7  ;;  %18366 = vst [vmem:[#allocation72_spill] sm:$0xff] %v12882_v48  ;;  %v2935_v43 = vpack.c.bf16 %v12882_v48, %v12882_v48  ;;  %v12919_v49 = vrot.slane %v3233_v34, 1 }
 0x2a2   : > { %v2798_v12 = vpop.f32.mrf.mxu0 }
 0x2a3   : > { %v2836_v28 = vmul.f32 %v12204_v59, %v2798_v12  ;;  %v3536_v2 = vpop.permute.xlu0 %3535  ;;  %v3468_v59 = vsel %vm18370_vm3, %v3465_v9, %v12876_v16 }
 0x2a4   : > { %v12889_v29 = vld [vmem:[%s18367_s6] ss:$0 sm:$0xff]  ;;  %v3935_v56 = vsel %vm18369_vm15, %v3903_v6, %v3536_v2  ;;  %vm18373_vm15 = vmmov %vm18370_vm3  ;;  %v3008_v6 = vunpack.c.l.b16 %v2935_v43  ;;  %vm18374_vm3 = vcmask 326656  }
 0x2a5   : > { %v2872_v61 = vadd.f32 %v12219_v51, %v2836_v28  ;;  %3419 = vrot.lane.b32.xlu1 %v3376_v24, %s17658_s28  ;;  %v4311_v12 = vadd.f32 %v12889_v29, %v4275_v0  ;;  %v4310_v2 = vadd.f32 %v12889_v29, %v4274_v4  ;;  %v3968_v24 = vsel %vm18372_vm10, %v3935_v56, %v3576_v50 }
 0x2a6   : > { %3499 = vrot.lane.b32.xlu2 %v3468_v59, %s17656_s27  ;;  %v3801_v0 = vsel %vm18373_vm15, %v12789_v40, %v12893_v17  ;;  %v4001_v50 = vsel %vm18374_vm3, %v3968_v24, %v12787_v62  ;;  %vm18375_vm10 = vcmask 392192   ;;  %v3638_v34 = vsel %vm18373_vm15, %v3635_v54, %v12919_v49 }
 0x2a7   : > { %v12907_v30 = vmax.f32 %v2872_v61, 0.0  ;;  %v3742_v51 = vpop.permute.xlu1 %3741  ;;  %v4343_v28 = vmax.f32 %v4311_v12, 0.0  ;;  %v4342_v4 = vmax.f32 %v4310_v2, 0.0  ;;  %vm18377_vm3 = vcmask 523264  }
 0x2a8   : > { %v12911_v11 = vpop.permute.xlu2 %3411  ;;  %vm18381_vm15 = vcmask 64512  }
 0x2a9   : > { %18371 = vst [vmem:[#allocation73_spill] sm:$0xff] %v12907_v30  ;;  %v2936_v9 = vpack.c.bf16 %v12907_v30, %v12907_v30  ;;  %3831 = vrot.lane.b32.xlu0 %v3801_v0, %s17652_s9  ;;  %v4375_v43 = vpack.c.bf16 %v4343_v28, %v4343_v28  ;;  %v4374_v0 = vpack.c.bf16 %v4342_v4, %v4342_v4 }
 0x2ab   : > { %v3009_v61 = vunpack.c.l.b16 %v2936_v9  ;;  %v3706_v59 = vpop.permute.xlu0 %3705  ;;  %v3216_v9 = vsel %vm18379_vm11, %v12769_v27, 0 }
 0x2ac   : > { %v4034_v56 = vsel %vm18375_vm10, %v4001_v50, %v3706_v59  ;;  %v4195_v48 = vpop.f32.mrf.mxu1  ;;  %vm18378_vm10 = vcmask 588800   ;;  %v4447_v59 = vunpack.c.l.b16 %v4374_v0  ;;  %v3179_v50 = vsel %vm10927_vm6, %v12280_v15, 0 }
 0x2ad   : > { %v3025_v47 = vpack.c.b16 %v3009_v61, %v3008_v6  ;;  %v4276_v40 = vmul.f32 %v12865_v5, %v4195_v48  ;;  %3587 = vrot.lane.b32.xlu1 %v12854_v44, %s17654_s25  ;;  %v4067_v12 = vsel %vm18376_vm5, %v4034_v56, %v3742_v51  ;;  %v4448_v6 = vunpack.c.l.b16 %v4375_v43 }
 0x2ae   : > { %3669 = vrot.lane.b32.xlu2 %v3638_v34, %s18159_s7  ;;  %v4100_v62 = vsel %vm18377_vm3, %v4067_v12, %v12811_v38  ;;  %vm18380_vm5 = vsmask.f32 256  ;;  %vm18382_vm3 = vcmask 130048   ;;  %vm18395_vm6 = vcmask 523264  }
 0x2af   : > { %v3146_v2 = vshrl.u32 %v3025_v47, 16  ;;  %v3490_v24 = vpop.permute.xlu1 %3489  ;;  %9332 = vmatmul.msk.bf16.gmra.mxu1 %vm18378_vm10, %v4100_v62  ;;  %v3149_v51 = vshll.u32 %v3025_v47, 16  ;;  %v4312_v28 = vadd.f32 %v12889_v29, %v4276_v40  ;;  %v3385_v40 = vshrl.u32 %v12820_v55, 16 }
 0x2b0   : > { %v12934_v48 = vpop.permute.xlu2 %3579  ;;  %v4479_v12 = vpack.c.b16 %v4448_v6, %v4447_v59  ;;  %vm18383_vm10 = vcmask 1046528  }
 0x2b1   : > { %v12939_v54 = vrot.slane %v3146_v2, 7  ;;  %3547 = vrot.lane.b32.xlu0 %v3216_v9, %s17821_s1  ;;  %v4344_v34 = vmax.f32 %v4312_v28, 0.0  ;;  %v3387_v28 = vor.u32 %v3385_v40, %v12838_v18  ;;  %v18386_v18 = vld [vmem:[#allocation46_spill] sm:$0xff] }
 0x2b3   : > { %v3151_v38 = vor.u32 %v3149_v51, %v12939_v54  ;;  %v3410_v61 = vpop.permute.xlu0 %3409  ;;  %v3249_v51 = vsel %vm18379_vm11, %v12820_v55, 0 }
 0x2b4   : > { %v4197_v4 = vpop.f32.mrf.mxu1  ;;  %v3865_v43 = vsel %vm18381_vm15, %v3179_v50, %v3410_v61  ;;  %vm18387_vm15 = vnez %v18386_v18 }
 0x2b5   : > { %v12949_v56 = vsel %vm18380_vm5, %v12794_v42, %v3151_v38  ;;  %v4277_v47 = vmul.f32 %v12865_v5, %v4197_v4  ;;  %v4376_v38 = vpack.c.bf16 %v4344_v34, %v4344_v34  ;;  %v3905_v61 = vsel %vm18382_vm3, %v3865_v43, %v3490_v24 }
 0x2b6   : > { %v3266_v62 = vsel %vm18362_vm14, %v12949_v56, 0  ;;  %v3389_v2 = vshll.u32 %v12949_v56, 16  ;;  %v4496_v4 = vshrl.u32 %v4479_v12, 16  ;;  %vm18384_vm5 = vsmask.f32 7424 }
 0x2b7   : > { %v4313_v15 = vadd.f32 %v12889_v29, %v4277_v47  ;;  %v3660_v0 = vpop.permute.xlu1 %3659  ;;  %v12959_v9 = vrot.slane %v3266_v62, 1  ;;  %v3201_v24 = vsel %vm18387_vm15, %v12820_v55, 0  ;;  %vm18388_vm3 = vcmask 195584  }
 0x2b8   : > { %v12961_v42 = vpop.permute.xlu2 %3745  ;;  %v3391_v6 = vrot.slane %v3389_v2, 1  ;;  %v3937_v34 = vsel %vm18388_vm3, %v3905_v61, %v12832_v20  ;;  %v4449_v40 = vunpack.c.l.b16 %v4376_v38  ;;  %v4498_v2 = vrot.slane %v4496_v4, 7 }
 0x2b9   : > { %v4345_v59 = vmax.f32 %v4313_v15, 0.0  ;;  %3717 = vrot.lane.b32.xlu0 %v3249_v51, %s18170_s29  ;;  %v3803_v50 = vsel %vm18383_vm10, %v12893_v17, %v12959_v9  ;;  %vm18389_vm10 = vcmask 261120   ;;  %v12984_v15 = vrot.slane %v3201_v24, 1 }
 0x2ba   : > { %3833 = vrot.lane.b32.xlu2 %v3803_v50, %s17652_s9  ;;  %v12974_v47 = vsel %vm18384_vm5, %v3387_v28, %v3391_v6  ;;  %vm18390_vm5 = vcmask 326656   ;;  %vm18391_vm3 = vnez %v18096_v10  ;;  %vm18394_vm14 = vcmask 457728  }
 0x2bb   : > { %v4377_v62 = vpack.c.bf16 %v4345_v59, %v4345_v59  ;;  %v3578_v30 = vpop.permute.xlu0 %3577  ;;  %3753 = vrot.lane.b32.xlu1 %v12974_v47, %s18385_s0  ;;  %v4499_v59 = vshll.u32 %v4479_v12, 16  ;;  %v3217_v20 = vsel %vm18391_vm3, %v12820_v55, 0 }
 0x2bc   : > { %v3970_v43 = vsel %vm18389_vm10, %v3937_v34, %v3578_v30  ;;  %vm18392_vm10 = vcmask 1046528  }
 0x2bd   : > { %v4450_v17 = vunpack.c.l.b16 %v4377_v62  ;;  %v4003_v50 = vsel %vm18390_vm5, %v3970_v43, %v3660_v0  ;;  %v4501_v38 = vor.u32 %v4499_v59, %v4498_v2  ;;  %v3470_v30 = vsel %vm18392_vm10, %v12876_v16, %v12984_v15 }
 0x2be   : > { %vm18393_vm5 = vcmask 392192   ;;  %vm18398_vm10 = vcmask 588800  }
 0x2bf   : > { %v4480_v51 = vpack.c.b16 %v4450_v17, %v4449_v40  ;;  %v3824_v28 = vpop.permute.xlu1 %3823  ;;  %v4036_v0 = vsel %vm18393_vm5, %v4003_v50, %v12870_v57  ;;  %v18396_v40 = vld [vmem:[#allocation19_spill] sm:$0xff]  ;;  %vm18401_vm5 = vsmask.f32 256 }
 0x2c0   : > { %v12987_v21 = vpop.permute.xlu2 %3493  ;;  %vm18397_vm12 = vnez %v18396_v40 }
 0x2c1   : > { %3421 = vrot.lane.b32.xlu0 %v12854_v44, %s17658_s28  ;;  %v4503_v61 = vshrl.u32 %v4480_v51, 16  ;;  %v3234_v44 = vsel %vm18387_vm15, %v12949_v56, 0  ;;  %v13009_v16 = vsel %vm18397_vm12, 0, %v4501_v38  ;;  %v13019_v43 = vsel %vm18397_vm12, %v12939_v54, 0 }
 0x2c2   : > { %3549 = vrot.lane.b32.xlu2 %v3217_v20, %s17821_s1  ;;  %v13014_v57 = vrot.slane %v3234_v44, 1  ;;  %v4506_v50 = vshll.u32 %v4480_v51, 16  ;;  %v3250_v38 = vsel %vm18391_vm3, %v12949_v56, 0  ;;  %v3553_v51 = vshrl.u32 %v12949_v56, 16 }
 0x2c3   : > { %v4200_v12 = vpop.f32.mrf.mxu1  ;;  %v3744_v4 = vpop.permute.xlu0 %3743  ;;  %3501 = vrot.lane.b32.xlu1 %v3470_v30, %s17656_s27  ;;  %v13011_v17 = vrot.slane %v4503_v61, 7  ;;  %v4738_v61 = vshll.u32 %v13009_v16, 16  ;;  %v3180_v44 = vsel %vm11010_vm8, %v12340_v52, 0  ;;  %vm18411_vm12 = vcmask 1046528  }
 0x2c4   : > { %v4278_v62 = vmul.f32 %v12865_v5, %v4200_v12  ;;  %v4069_v24 = vsel %vm18394_vm14, %v4036_v0, %v3744_v4  ;;  %v3557_v12 = vshll.u32 %v13019_v43, 16  ;;  %vm18400_vm14 = vcmask 64512  }
 0x2c5   : > { %v4102_v34 = vsel %vm18395_vm6, %v4069_v24, %v3824_v28  ;;  %v4508_v30 = vor.u32 %v4506_v50, %v13011_v17  ;;  %vm18399_vm6 = vcmask 1046528   ;;  %v3868_v50 = vsel %vm18400_vm14, %v3180_v44, %v12911_v11 }
 0x2c6   : > { %9333 = vmatmul.msk.bf16.gmra.mxu1 %vm18398_vm10, %v4102_v34  ;;  %v4314_v20 = vadd.f32 %v12889_v29, %v4278_v62  ;;  %v3640_v54 = vsel %vm18399_vm6, %v12919_v49, %v13014_v57  ;;  %v3555_v34 = vor.u32 %v3553_v51, %v3391_v6  ;;  %v4740_v49 = vrot.slane %v4738_v61, 1 }
 0x2c7   : > { %v3540_v59 = vpop.permute.xlu1 %3539  ;;  %v13048_v40 = vsel %vm18401_vm5, %v4498_v2, %v4508_v30  ;;  %vm18402_vm10 = vcmask 130048   ;;  %v13052_v52 = vrot.slane %v3557_v12, 1  ;;  %vm18403_vm6 = vsmask.f32 7424 }
 0x2c8   : > { %v13022_v28 = vpop.permute.xlu2 %3663  ;;  %v4346_v62 = vmax.f32 %v4314_v20, 0.0  ;;  %vm18404_vm14 = vcmask 195584   ;;  %vm18405_vm5 = vmmov %vm18403_vm6  ;;  %vm18418_vm8 = vsmask.f32 256 }
 0x2c9   : > { %3589 = vrot.lane.b32.xlu0 %v12974_v47, %s17654_s25  ;;  %v13058_v11 = vsel %vm18403_vm6, %v3555_v34, %v13052_v52  ;;  %v4741_v30 = vsel %vm18405_vm5, %v10069_v60, %v4740_v49  ;;  %vm18407_vm6 = vcmask 1046528   ;;  %vm18409_vm5 = vcmask 326656  }
 0x2ca   : > { %3719 = vrot.lane.b32.xlu2 %v3250_v38, %s18170_s29  ;;  %v3267_v38 = vsel %vm18387_vm15, %v13019_v43, 0  ;;  %vm18417_vm15 = vcmask 588800  }
 0x2cb   : > { %v4202_v0 = vpop.f32.mrf.mxu1  ;;  %v3492_v4 = vpop.permute.xlu0 %3491  ;;  %3671 = vrot.lane.b32.xlu1 %v3640_v54, %s18159_s7  ;;  %v13060_v61 = vrot.slane %v3267_v38, 1 }
 0x2cc   : > { %v4279_v24 = vmul.f32 %v12865_v5, %v4202_v0  ;;  %v3907_v63 = vsel %vm18402_vm10, %v3868_v50, %v3492_v4  ;;  %v4378_v0 = vpack.c.bf16 %v4346_v62, %v4346_v62  ;;  %vm18406_vm10 = vnez %v17802_v31 }
 0x2cd   : > { %v3939_v2 = vsel %vm18404_vm14, %v3907_v63, %v3540_v59  ;;  %v4656_v12 = vsel %vm18406_vm10, %v13009_v16, 0  ;;  %v4746_v4 = vshll.u32 %v13048_v40, 16  ;;  %v3805_v62 = vsel %vm18407_vm6, %v12959_v9, %v13060_v61 }
 0x2ce   : > { %v4315_v54 = vadd.f32 %v12889_v29, %v4279_v24  ;;  %v4451_v59 = vunpack.c.l.b16 %v4378_v0  ;;  %vm18408_vm14 = vcmask 261120   ;;  %v13078_v50 = vrot.slane %v4656_v12, 1 }
 0x2cf   : > { %v3710_v20 = vpop.permute.xlu1 %3709  ;;  %v3972_v34 = vsel %vm18408_vm14, %v3939_v2, %v12934_v48  ;;  %vm18410_vm6 = vcmask 392192   ;;  %vm18412_vm14 = vsmask.f32 7424  ;;  %v4689_v2 = vsel %vm18406_vm10, %v13048_v40, 0 }
 0x2d0   : > { %v4347_v6 = vmax.f32 %v4315_v54, 0.0  ;;  %v13054_v51 = vpop.permute.xlu2 %3827  ;;  %v4742_v54 = vshrl.u32 %v13009_v16, 16  ;;  %v4911_v0 = vsel %vm18411_vm12, %v10069_v60, %v13078_v50  ;;  %vm18414_vm12 = vcmask 457728  }
 0x2d1   : > { %3755 = vrot.lane.b32.xlu0 %v13058_v11, %s18385_s0 }
 0x2d2   : > { %v4379_v44 = vpack.c.bf16 %v4347_v6, %v4347_v6  ;;  %4862 = vrot.lane.b32.xlu2 %v4741_v30, %s17658_s28  ;;  %v4748_v6 = vrot.slane %v4746_v4, 1  ;;  %v4744_v32 = vor.u32 %v4742_v54, %v4740_v49 }
 0x2d3   : > { %v3662_v63 = vpop.permute.xlu0 %3661  ;;  %3835 = vrot.lane.b32.xlu1 %v3805_v62, %s17652_s9 }
 0x2d4   : > { %v4452_v24 = vunpack.c.l.b16 %v4379_v44  ;;  %v4005_v38 = vsel %vm18409_vm5, %v3972_v34, %v3662_v63  ;;  %v13090_v48 = vsel %vm18412_vm14, %v4744_v32, %v4748_v6  ;;  %vm18413_vm5 = vnez %v17799_v58 }
 0x2d5   : > { %v4038_v9 = vsel %vm18410_vm6, %v4005_v38, %v3710_v20  ;;  %v4672_v20 = vsel %vm18413_vm5, %v13009_v16, 0  ;;  %vm18415_vm6 = vnez %v17804_v35  ;;  %vm18416_vm14 = vcmask 523264  }
 0x2d6   : > { %v4481_v30 = vpack.c.b16 %v4452_v24, %v4451_v59  ;;  %v4071_v32 = vsel %vm18414_vm12, %v4038_v9, %v12961_v42  ;;  %v13110_v59 = vrot.slane %v4689_v2, 1  ;;  %v4750_v42 = vshrl.u32 %v13048_v40, 16 }
 0x2d7   : > { %v3414_v18 = vpop.permute.xlu1 %3413  ;;  %vm18419_vm12 = vcmask 1046528  }
 0x2d8   : > { %v4511_v36 = vshrl.u32 %v4481_v30, 16  ;;  %v13083_v7 = vpop.permute.xlu2 %3543  ;;  %v4514_v49 = vshll.u32 %v4481_v30, 16  ;;  %v3181_v30 = vsel %vm11130_vm7, %v12426_v8, 0  ;;  %v4705_v8 = vsel %vm18413_vm5, %v13048_v40, 0 }
 0x2d9   : > { %4942 = vrot.lane.b32.xlu0 %v4911_v0, %s17656_s27  ;;  %vm18431_vm5 = vcmask 523264  }
 0x2da   : > { %v13095_v12 = vrot.slane %v4511_v36, 7  ;;  %v4205_v4 = vpop.f32.mrf.mxu1  ;;  %5030 = vrot.lane.b32.xlu2 %v13090_v48, %s17654_s25  ;;  %v4688_v36 = vsel %vm18415_vm6, %v13009_v16, 0 }
 0x2db   : > { %v3826_v44 = vpop.permute.xlu0 %3825  ;;  %4990 = vrot.lane.b32.xlu1 %v4672_v20, %s17821_s1  ;;  %v5079_v34 = vrot.slane %v4688_v36, 1 }
 0x2dc   : > { %v4516_v62 = vor.u32 %v4514_v49, %v13095_v12  ;;  %v4104_v63 = vsel %vm18416_vm14, %v4071_v32, %v3826_v44  ;;  %v4280_v32 = vmul.f32 %v12865_v5, %v4205_v4  ;;  %vm18422_vm14 = vcmask 130048  }
 0x2dd   : > { %9334 = vmatmul.msk.bf16.gmra.mxu1 %vm18417_vm15, %v4104_v63  ;;  %v5081_v0 = vsel %vm18419_vm12, %v5079_v34, %v13110_v59  ;;  %vm18420_vm15 = vcmask 64512   ;;  %vm18423_vm12 = vnez %v18129_v45 }
 0x2de   : > { %v13115_v24 = vsel %vm18418_vm8, %v13011_v17, %v4516_v62  ;;  %v3871_v2 = vsel %vm18420_vm15, %v3181_v30, %v3414_v18  ;;  %v4752_v17 = vor.u32 %v4750_v42, %v4748_v6  ;;  %vm18421_vm8 = vsmask.f32 7424 }
 0x2df   : > { %v3582_v38 = vpop.permute.xlu1 %3581  ;;  %v4754_v54 = vshll.u32 %v13115_v24, 16  ;;  %v4722_v20 = vsel %vm18406_vm10, %v13115_v24, 0  ;;  %v4721_v6 = vsel %vm18415_vm6, %v13048_v40, 0  ;;  %v3909_v63 = vsel %vm18422_vm14, %v3871_v2, %v12987_v21 }
 0x2e0   : > { %v13122_v9 = vpop.permute.xlu2 %3713  ;;  %v13150_v4 = vrot.slane %v4722_v20, 1  ;;  %v3202_v34 = vsel %vm18423_vm12, %v12949_v56, 0  ;;  %vm18424_vm15 = vcmask 195584   ;;  %v5244_v30 = vrot.slane %v4721_v6, 1 }
 0x2e1   : > { %5112 = vrot.lane.b32.xlu0 %v5081_v0, %s18159_s7  ;;  %v13128_v49 = vrot.slane %v4754_v54, 1  ;;  %v4316_v0 = vadd.f32 %v12889_v29, %v4280_v32  ;;  %vm18426_vm14 = vcmask 1046528   ;;  %vm18427_vm6 = vcmask 326656  }
 0x2e2   : > { %v4207_v44 = vpop.f32.mrf.mxu1  ;;  %v5246_v20 = vsel %vm18426_vm14, %v5244_v30, %v13150_v4  ;;  %vm18533_vm10 = vcmask 588800  }
 0x2e3   : > { %v4281_v36 = vmul.f32 %v12865_v5, %v4207_v44  ;;  %v3542_v62 = vpop.permute.xlu0 %3541  ;;  %5160 = vrot.lane.b32.xlu1 %v4705_v8, %s18170_s29  ;;  %v13141_v18 = vsel %vm18421_vm8, %v4752_v17, %v13128_v49  ;;  %v3471_v44 = vrot.slane %v3202_v34, 1  ;;  %vm18425_vm8 = vcmask 261120  }
 0x2e4   : > { %5196 = vrot.lane.b32.xlu2 %v13141_v18, %s18385_s0  ;;  %v3941_v54 = vsel %vm18424_vm15, %v3909_v63, %v3542_v62  ;;  %v4348_v35 = vmax.f32 %v4316_v0, 0.0  ;;  %vm18428_vm15 = vmmov %vm18426_vm14  ;;  %vm18430_vm14 = vcmask 457728  }
 0x2e5   : > { %v4317_v42 = vadd.f32 %v12889_v29, %v4281_v36  ;;  %v3974_v21 = vsel %vm18425_vm8, %v3941_v54, %v3582_v38  ;;  %v3472_v32 = vsel %vm18428_vm15, %v12984_v15, %v3471_v44  ;;  %vm18429_vm8 = vcmask 392192  }
 0x2e6   : > { %v4007_v36 = vsel %vm18427_vm6, %v3974_v21, %v13022_v28  ;;  %v3235_v28 = vsel %vm18423_vm12, %v13019_v43, 0  ;;  %vm18432_vm6 = vcmask 588800   ;;  %v3723_v44 = vshrl.u32 %v13019_v43, 16 }
 0x2e7   : > { %v3748_v17 = vpop.permute.xlu1 %3747  ;;  %v4349_v8 = vmax.f32 %v4317_v42, 0.0  ;;  %v4380_v42 = vpack.c.bf16 %v4348_v35, %v4348_v35  ;;  %v3641_v30 = vrot.slane %v3235_v28, 1  ;;  %vm18498_vm12 = vcmask 588800  }
 0x2e8   : > { %v13159_v2 = vpop.permute.xlu2 %3417 }
 0x2e9   : > { %5276 = vrot.lane.b32.xlu0 %v5246_v20, %s17652_s9  ;;  %v4381_v6 = vpack.c.bf16 %v4349_v8, %v4349_v8  ;;  %v4453_v0 = vunpack.c.l.b16 %v4380_v42 }
 0x2eb   : > { %v3712_v58 = vpop.permute.xlu0 %3711  ;;  %3423 = vrot.lane.b32.xlu1 %v12974_v47, %s17658_s28  ;;  %v4454_v54 = vunpack.c.l.b16 %v4381_v6  ;;  %v3251_v6 = vsel %vm11806_vm4, %v13019_v43, 0 }
 0x2ec   : > { %v4040_v38 = vsel %vm18429_vm8, %v4007_v36, %v3712_v58  ;;  %v4210_v62 = vpop.f32.mrf.mxu1  ;;  %3503 = vrot.lane.b32.xlu2 %v3472_v32, %s17656_s27  ;;  %v3218_v58 = vsel %vm11806_vm4, %v12949_v56, 0  ;;  %v3182_v56 = vsel %vm18336_vm9, %v12526_v26, 0  ;;  %vm18435_vm8 = vcmask 130048  }
 0x2ed   : > { %v4073_v63 = vsel %vm18430_vm14, %v4040_v38, %v3748_v17  ;;  %v4482_v21 = vpack.c.b16 %v4454_v54, %v4453_v0  ;;  %v4282_v8 = vmul.f32 %v12865_v5, %v4210_v62  ;;  %vm18436_vm14 = vsmask.f32 7424 }
 0x2ee   : > { %v4106_v34 = vsel %vm18431_vm5, %v4073_v63, %v13054_v51  ;;  %vm18433_vm5 = vmmov %vm18428_vm15  ;;  %vm18434_vm15 = vcmask 64512  }
 0x2ef   : > { %v3496_v47 = vpop.permute.xlu1 %3495  ;;  %9335 = vmatmul.msk.bf16.gmra.mxu1 %vm18432_vm6, %v4106_v34  ;;  %v3642_v35 = vsel %vm18433_vm5, %v13014_v57, %v3641_v30  ;;  %v4519_v63 = vshrl.u32 %v4482_v21, 16  ;;  %v4318_v62 = vadd.f32 %v12889_v29, %v4282_v8  ;;  %vm18437_vm6 = vmmov %vm18433_vm5  ;;  %vm18438_vm5 = vnez %v17809_v53 }
 0x2f0   : > { %v13179_v15 = vpop.permute.xlu2 %3585  ;;  %v3806_v28 = vsel %vm18437_vm6, %v13060_v61, %v10069_v60  ;;  %v4657_v43 = vsel %vm18438_vm5, %v13048_v40, 0 }
 0x2f1   : > { %3551 = vrot.lane.b32.xlu0 %v3218_v58, %s17821_s1  ;;  %v13219_v58 = vrot.slane %v4519_v63, 7  ;;  %v4350_v30 = vmax.f32 %v4318_v62, 0.0  ;;  %v13222_v0 = vrot.slane %v4657_v43, 1 }
 0x2f3   : > { %v3416_v51 = vpop.permute.xlu0 %3415  ;;  %3591 = vrot.lane.b32.xlu1 %v13058_v11, %s17654_s25  ;;  %v3725_v11 = vor.u32 %v3723_v44, %v13052_v52 }
 0x2f4   : > { %v4212_v17 = vpop.f32.mrf.mxu1  ;;  %3673 = vrot.lane.b32.xlu2 %v3642_v35, %s18159_s7  ;;  %v3874_v36 = vsel %vm18434_vm15, %v3182_v56, %v3416_v51  ;;  %vm18439_vm15 = vcmask 195584   ;;  %v4522_v51 = vshll.u32 %v4482_v21, 16 }
 0x2f5   : > { %v4283_v20 = vmul.f32 %v12865_v5, %v4212_v17  ;;  %v3911_v26 = vsel %vm18435_vm8, %v3874_v36, %v3496_v47  ;;  %v3726_v34 = vsel %vm18436_vm14, %v3725_v11, %v10069_v60  ;;  %vm18440_vm8 = vcmask 261120  }
 0x2f6   : > { %v3943_v47 = vsel %vm18439_vm15, %v3911_v26, %v13083_v7  ;;  %vm18441_vm14 = vcmask 326656   ;;  %v4524_v44 = vor.u32 %v4522_v51, %v13219_v58  ;;  %v4382_v7 = vpack.c.bf16 %v4350_v30, %v4350_v30 }
 0x2f7   : > { %v3666_v32 = vpop.permute.xlu1 %3665  ;;  %v4319_v57 = vadd.f32 %v12889_v29, %v4283_v20  ;;  %v4913_v20 = vsel %vm18437_vm6, %v13078_v50, %v13222_v0  ;;  %vm18442_vm15 = vcmask 392192   ;;  %v4673_v11 = vsel %vm18162_vm1, %v13048_v40, 0 }
 0x2f8   : > { %v13199_v38 = vpop.permute.xlu2 %3751  ;;  %vm18445_vm6 = vcmask 523264  }
 0x2f9   : > { %3721 = vrot.lane.b32.xlu0 %v3251_v6, %s18170_s29  ;;  %v4351_v42 = vmax.f32 %v4319_v57, 0.0  ;;  %v4455_v6 = vunpack.c.l.b16 %v4382_v7 }
 0x2fb   : > { %v3584_v52 = vpop.permute.xlu0 %3583  ;;  %3757 = vrot.lane.b32.xlu1 %v3726_v34, %s18385_s0  ;;  %v4383_v61 = vpack.c.bf16 %v4351_v42, %v4351_v42  ;;  %v4706_v42 = vsel %vm18162_vm1, %v13115_v24, 0 }
 0x2fc   : > { %3837 = vrot.lane.b32.xlu2 %v3806_v28, %s17652_s9  ;;  %v3976_v54 = vsel %vm18440_vm8, %v3943_v47, %v3584_v52  ;;  %vm18443_vm8 = vcmask 457728  }
 0x2fd   : > { %v4009_v17 = vsel %vm18441_vm14, %v3976_v54, %v3666_v32  ;;  %v4456_v32 = vunpack.c.l.b16 %v4383_v61  ;;  %vm18444_vm14 = vsmask.f32 256 }
 0x2fe   : > { %v4042_v21 = vsel %vm18442_vm15, %v4009_v17, %v13122_v9  ;;  %v13246_v50 = vsel %vm18444_vm14, %v13095_v12, %v4524_v44  ;;  %vm18446_vm15 = vcmask 588800   ;;  %v3183_v12 = vsel %vm18353_vm0, %v12586_v23, 0 }
 0x2ff   : > { %v3830_v35 = vpop.permute.xlu1 %3829  ;;  %v4483_v62 = vpack.c.b16 %v4456_v32, %v4455_v6  ;;  %v4762_v34 = vshll.u32 %v13246_v50, 16  ;;  %v4723_v47 = vsel %vm18438_vm5, %v13246_v50, 0  ;;  %v4758_v23 = vshrl.u32 %v13115_v24, 16 }
 0x300   : > { %v13228_v56 = vpop.permute.xlu2 %3499  ;;  %vm18448_vm14 = vcmask 64512   ;;  %v13278_v7 = vrot.slane %v4723_v47, 1 }
 0x301   : > { %4864 = vrot.lane.b32.xlu0 %v13090_v48, %s17658_s28  ;;  %v4690_v48 = vsel %vm18438_vm5, %v13115_v24, 0  ;;  %v4527_v54 = vshrl.u32 %v4483_v62, 16  ;;  %v4764_v51 = vrot.slane %v4762_v34, 1  ;;  %v4760_v44 = vor.u32 %v4758_v23, %v13128_v49 }
 0x302   : > { %v13250_v63 = vrot.slane %v4690_v48, 1  ;;  %vm18457_vm5 = vcmask 392192  }
 0x303   : > { %v4215_v8 = vpop.f32.mrf.mxu1  ;;  %v3750_v36 = vpop.permute.xlu0 %3749  ;;  %4944 = vrot.lane.b32.xlu1 %v4913_v20, %s17656_s27 }
 0x304   : > { %v4075_v57 = vsel %vm18443_vm8, %v4042_v21, %v3750_v36  ;;  %4992 = vrot.lane.b32.xlu2 %v4673_v11, %s17821_s1  ;;  %vm18447_vm8 = vcmask 1046528   ;;  %v4284_v61 = vmul.f32 %v12865_v5, %v4215_v8  ;;  %v13281_v21 = vrot.slane %v4527_v54, 7 }
 0x305   : > { %v4108_v9 = vsel %vm18445_vm6, %v4075_v57, %v3830_v35  ;;  %v5083_v52 = vsel %vm18447_vm8, %v13110_v59, %v13250_v63  ;;  %v3877_v35 = vsel %vm18448_vm14, %v3183_v12, %v13159_v2  ;;  %vm18449_vm6 = vcmask 130048  }
 0x306   : > { %9336 = vmatmul.msk.bf16.gmra.mxu1 %vm18446_vm15, %v4108_v9  ;;  %vm18450_vm15 = vsmask.f32 7424  ;;  %v4320_v11 = vadd.f32 %v12889_v29, %v4284_v61  ;;  %vm18451_vm8 = vcmask 195584   ;;  %vm18452_vm14 = vnez %v17815_v19 }
 0x307   : > { %v3546_v26 = vpop.permute.xlu1 %3545  ;;  %v13284_v36 = vsel %vm18450_vm15, %v4760_v44, %v4764_v51  ;;  %v4658_v49 = vsel %vm18452_vm14, %v13115_v24, 0  ;;  %v4530_v8 = vshll.u32 %v4483_v62, 16  ;;  %vm18454_vm15 = vcmask 261120  }
 0x308   : > { %v13268_v30 = vpop.permute.xlu2 %3669  ;;  %v4352_v62 = vmax.f32 %v4320_v11, 0.0  ;;  %v4674_v54 = vsel %vm18173_vm2, %v13115_v24, 0 }
 0x309   : > { %5032 = vrot.lane.b32.xlu0 %v13141_v18, %s17654_s25  ;;  %v4532_v6 = vor.u32 %v4530_v8, %v13281_v21 }
 0x30b   : > { %v4217_v28 = vpop.f32.mrf.mxu1  ;;  %v3498_v43 = vpop.permute.xlu0 %3497  ;;  %5114 = vrot.lane.b32.xlu1 %v5083_v52, %s18159_s7  ;;  %v13304_v52 = vrot.slane %v4658_v49, 1 }
 0x30c   : > { %v4285_v59 = vmul.f32 %v12865_v5, %v4217_v28  ;;  %5162 = vrot.lane.b32.xlu2 %v4706_v42, %s18170_s29  ;;  %v3913_v17 = vsel %vm18449_vm6, %v3877_v35, %v3498_v43  ;;  %vm18453_vm6 = vcmask 1046528   ;;  %v4384_v42 = vpack.c.bf16 %v4352_v62, %v4352_v62 }
 0x30d   : > { %v3945_v48 = vsel %vm18451_vm8, %v3913_v17, %v3546_v26  ;;  %v5248_v32 = vsel %vm18453_vm6, %v13150_v4, %v13278_v7  ;;  %vm18455_vm8 = vcmask 326656   ;;  %vm18456_vm6 = vsmask.f32 256 }
 0x30e   : > { %v4321_v20 = vadd.f32 %v12889_v29, %v4285_v59  ;;  %v3978_v26 = vsel %vm18454_vm15, %v3945_v48, %v13179_v15  ;;  %v13309_v28 = vsel %vm18456_vm6, %v13219_v58, %v4532_v6  ;;  %vm18458_vm15 = vcmask 1046528  }
 0x30f   : > { %v3716_v2 = vpop.permute.xlu1 %3715  ;;  %v4915_v15 = vsel %vm18458_vm15, %v13222_v0, %v13304_v52  ;;  %v4770_v0 = vshll.u32 %v13309_v28, 16  ;;  %vm18461_vm6 = vcmask 588800   ;;  %v4707_v6 = vsel %vm18173_vm2, %v13246_v50, 0 }
 0x310   : > { %v4353_v57 = vmax.f32 %v4321_v20, 0.0  ;;  %v4457_v20 = vunpack.c.l.b16 %v4384_v42 }
 0x311   : > { %5198 = vrot.lane.b32.xlu0 %v13284_v36, %s18385_s0  ;;  %v13335_v48 = vrot.slane %v4770_v0, 1 }
 0x312   : > { %v4385_v4 = vpack.c.bf16 %v4353_v57, %v4353_v57  ;;  %v4724_v57 = vsel %vm18452_vm14, %v13309_v28, 0 }
 0x313   : > { %v3668_v9 = vpop.permute.xlu0 %3667  ;;  %5278 = vrot.lane.b32.xlu1 %v5248_v32, %s17652_s9 }
 0x314   : > { %v13300_v34 = vpop.permute.xlu2 %3833  ;;  %4866 = vrot.lane.b32.xlu2 %v13141_v18, %s17658_s28  ;;  %v4011_v12 = vsel %vm18455_vm8, %v3978_v26, %v3668_v9  ;;  %v4691_v18 = vsel %vm18452_vm14, %v13246_v50, 0  ;;  %v4458_v58 = vunpack.c.l.b16 %v4385_v4  ;;  %vm18460_vm8 = vcmask 523264  }
 0x315   : > { %v4044_v43 = vsel %vm18457_vm5, %v4011_v12, %v3716_v2  ;;  %vm18459_vm5 = vcmask 457728   ;;  %v13331_v44 = vrot.slane %v4691_v18, 1  ;;  %v3184_v2 = vsel %vm18379_vm11, %v12672_v37, 0 }
 0x316   : > { %v4077_v23 = vsel %vm18459_vm5, %v4044_v43, %v13199_v38  ;;  %v4484_v11 = vpack.c.b16 %v4458_v58, %v4457_v20  ;;  %v4766_v38 = vshrl.u32 %v13246_v50, 16  ;;  %vm18462_vm5 = vcmask 64512  }
 0x317   : > { %v3420_v59 = vpop.permute.xlu1 %3419  ;;  %v5085_v49 = vsel %vm18458_vm15, %v13250_v63, %v13331_v44  ;;  %v13364_v43 = vrot.slane %v4724_v57, 1  ;;  %vm18465_vm15 = vnez %v18188_v22  ;;  %vm18471_vm14 = vcmask 392192  }
 0x318   : > { %v3880_v8 = vsel %vm18462_vm5, %v3184_v2, %v3420_v59  ;;  %v4768_v32 = vor.u32 %v4766_v38, %v4764_v51  ;;  %v4535_v26 = vshrl.u32 %v4484_v11, 16  ;;  %vm18466_vm5 = vcmask 195584  }
 0x319   : > { %4946 = vrot.lane.b32.xlu0 %v4915_v15, %s17656_s27  ;;  %v4659_v15 = vsel %vm18465_vm15, %v13246_v50, 0 }
 0x31a   : > { %v4220_v47 = vpop.f32.mrf.mxu1  ;;  %v13374_v58 = vrot.slane %v4659_v15, 1 }
 0x31b   : > { %v3832_v35 = vpop.permute.xlu0 %3831  ;;  %4994 = vrot.lane.b32.xlu1 %v4674_v54, %s17821_s1  ;;  %v4286_v37 = vmul.f32 %v12865_v5, %v4220_v47  ;;  %v13371_v54 = vrot.slane %v4535_v26, 7 }
 0x31c   : > { %v4110_v61 = vsel %vm18460_vm8, %v4077_v23, %v3832_v35  ;;  %v13327_v17 = vpop.permute.xlu2 %3549  ;;  %5034 = vrot.lane.b32.xlu2 %v13284_v36, %s17654_s25  ;;  %vm18463_vm8 = vsmask.f32 7424  ;;  %v4538_v35 = vshll.u32 %v4484_v11, 16  ;;  %s18472_s25 = sld [smem:[#allocation81_spill]] }
 0x31d   : > { %9337 = vmatmul.msk.bf16.gmra.mxu1 %vm18461_vm6, %v4110_v61  ;;  %v13356_v51 = vsel %vm18463_vm8, %v4768_v32, %v13335_v48  ;;  %vm18464_vm6 = vcmask 130048   ;;  %vm18467_vm8 = vcmask 261120   ;;  %v4692_v32 = vsel %vm18465_vm15, %v13309_v28, 0 }
 0x31e   : > { %v3915_v12 = vsel %vm18464_vm6, %v3880_v8, %v13228_v56  ;;  %v4322_v56 = vadd.f32 %v12889_v29, %v4286_v37  ;;  %vm18468_vm6 = vcmask 1046528   ;;  %v4540_v61 = vor.u32 %v4538_v35, %v13371_v54 }
 0x31f   : > { %v3588_v42 = vpop.permute.xlu1 %3587  ;;  %v5250_v23 = vsel %vm18468_vm6, %v13278_v7, %v13364_v43 }
 0x320   : > { %v4354_v20 = vmax.f32 %v4322_v56, 0.0 }
 0x321   : > { %5116 = vrot.lane.b32.xlu0 %v5085_v49, %s18159_s7 }
 0x322   : > { %v4222_v9 = vpop.f32.mrf.mxu1  ;;  %v4386_v26 = vpack.c.bf16 %v4354_v20, %v4354_v20 }
 0x323   : > { %v4287_v62 = vmul.f32 %v12865_v5, %v4222_v9  ;;  %v3548_v63 = vpop.permute.xlu0 %3547  ;;  %5164 = vrot.lane.b32.xlu1 %v4707_v6, %s18170_s29 }
 0x324   : > { %v13360_v4 = vpop.permute.xlu2 %3719  ;;  %5200 = vrot.lane.b32.xlu2 %v13356_v51, %s18385_s0  ;;  %v3947_v47 = vsel %vm18466_vm5, %v3915_v12, %v3548_v63  ;;  %vm18469_vm5 = vcmask 326656   ;;  %v4675_v63 = vsel %vm18192_vm13, %v13246_v50, 0 }
 0x325   : > { %v4323_v18 = vadd.f32 %v12889_v29, %v4287_v62  ;;  %v3980_v59 = vsel %vm18467_vm8, %v3947_v47, %v3588_v42  ;;  %vm18470_vm8 = vmmov %vm18468_vm6  ;;  %vm18473_vm6 = vcmask 457728   ;;  %v13406_v62 = vrot.slane %v4692_v32, 1 }
 0x326   : > { %v4013_v2 = vsel %vm18469_vm5, %v3980_v59, %v13268_v30  ;;  %v4917_v49 = vsel %vm18470_vm8, %v13304_v52, %v13374_v58  ;;  %v4414_v30 = vld [vmem:[%s18472_s25 + $0x20] sm:$0xf]  ;;  %vm18475_vm5 = vcmask 523264   ;;  %vm18476_vm8 = vcmask 588800  }
 0x327   : > { %v4355_v0 = vmax.f32 %v4323_v18, 0.0  ;;  %v5596_v9 = vunpack.c.l.b16 %v4414_v30  ;;  %v4459_v18 = vunpack.c.l.b16 %v4386_v26 }
 0x329   : > { %5280 = vrot.lane.b32.xlu0 %v5250_v23, %s17652_s9  ;;  %v5601_v12 = vpack.c.b16 %v5596_v9, %v5596_v9  ;;  %s18478_s9 = smov 32   ;;  %v9599_v23 = vld [vmem:[%s18472_s25 + $0x18] sm:$0xff] }
 0x32b   : > { %v3718_v38 = vpop.permute.xlu0 %3717  ;;  %4868 = vrot.lane.b32.xlu1 %v13284_v36, %s17658_s28  ;;  %v4387_v36 = vpack.c.bf16 %v4355_v0, %v4355_v0  ;;  %v3185_v0 = vsel %vm18391_vm3, %v12769_v27, 0  ;;  %v4708_v27 = vsel %vm18192_vm13, %v13309_v28, 0  ;;  %s18489_s28 = smov 8  }
 0x32c   : > { %v4046_v7 = vsel %vm18471_vm14, %v4013_v2, %v3718_v38  ;;  %v4225_v11 = vpop.f32.mrf.mxu1  ;;  %v13390_v8 = vpop.permute.xlu2 %4862  ;;  %4948 = vrot.lane.b32.xlu2 %v4917_v49, %s17656_s27  ;;  %vm18474_vm14 = vsmask.f32 256  ;;  %v4774_v49 = vshrl.u32 %v13309_v28, 16  ;;  %s18486_s27 = smov 64  }
 0x32d   : > { %v3754_v57 = vpop.permute.xlu1 %3753  ;;  %v13402_v6 = vsel %vm18474_vm14, %v13281_v21, %v4540_v61  ;;  %v4460_v15 = vunpack.c.l.b16 %v4387_v36  ;;  %vm18479_vm14 = vcmask 1046528   ;;  %v4288_v20 = vmul.f32 %v12865_v5, %v4225_v11  ;;  %v9598_v11 = vld [vmem:[%s18472_s25 + $0x10] sm:$0xff] }
 0x32e   : > { %v4079_v52 = vsel %vm18473_vm6, %v4046_v7, %v3754_v57  ;;  %v4778_v42 = vshll.u32 %v13402_v6, 16  ;;  %vm18477_vm6 = vcmask 1043456   ;;  %v4725_v59 = vsel %vm18465_vm15, %v13402_v6, 0 }
 0x32f   : > { %v4112_v37 = vsel %vm18475_vm5, %v4079_v52, %v13300_v34  ;;  %v5639_v21 = vsel %vm18477_vm6, %v5601_v12, 0  ;;  %v5087_v34 = vsel %vm18479_vm14, %v13331_v44, %v13406_v62  ;;  %v4485_v35 = vpack.c.b16 %v4460_v15, %v4459_v18 }
 0x330   : > { %9338 = vmatmul.msk.bf16.gmra.mxu1 %vm18476_vm8, %v4112_v37  ;;  %5644 = vmatpush.bf16.msra.mxu2 %v5639_v21  ;;  %vm18480_vm5 = vcmask 64512   ;;  %v13436_v7 = vrot.slane %v4778_v42, 1  ;;  %v13438_v32 = vrot.slane %v4725_v59, 1  ;;  %v4776_v36 = vor.u32 %v4774_v49, %v13335_v48  ;;  %v9597_v21 = vld [vmem:[%s18472_s25 + $0x8] sm:$0xff] }
 0x331   : > { %4996 = vrot.lane.b32.xlu0 %v4675_v63, %s17821_s1  ;;  %v4543_v57 = vshrl.u32 %v4485_v35, 16  ;;  %vm18481_vm8 = vcmask 130048   ;;  %v4324_v52 = vadd.f32 %v12889_v29, %v4288_v20  ;;  %vm18482_vm6 = vsmask.f32 7424  ;;  %v18483_v63 = vld [vmem:[#allocation26_spill] sm:$0xff] }
 0x332   : > { %v13453_v26 = vsel %vm18482_vm6, %v4776_v36, %v13436_v7  ;;  %v5252_v48 = vsel %vm18479_vm14, %v13364_v43, %v13438_v32  ;;  %vm18487_vm6 = vcmask 261120   ;;  %vm18488_vm14 = vcmask 326656  }
 0x333   : > { %v3422_v47 = vpop.permute.xlu0 %3421  ;;  %5036 = vrot.lane.b32.xlu1 %v13356_v51, %s18478_s9  ;;  %v13469_v18 = vrot.slane %v4543_v57, 7  ;;  %vm18495_vm15 = vcmask 457728  }
 0x334   : > { %v4227_v56 = vpop.f32.mrf.mxu1  ;;  %5118 = vrot.lane.b32.xlu2 %v5087_v34, %s18159_s7  ;;  %v3883_v38 = vsel %vm18480_vm5, %v3185_v0, %v3422_v47  ;;  %v13433_v2 = vpop.permute.xlu2 %5030  ;;  %5645 = vmatpush.bf16.msra.mxu2 %v9599_v23  ;;  %vm18484_vm5 = vnez %v18483_v63  ;;  %v4356_v34 = vmax.f32 %v4324_v52, 0.0  ;;  %v4546_v23 = vshll.u32 %v4485_v35, 16 }
 0x335   : > { %v4289_v61 = vmul.f32 %v12865_v5, %v4227_v56  ;;  %v3502_v44 = vpop.permute.xlu1 %3501  ;;  %v4660_v12 = vsel %vm18484_vm5, %v13309_v28, 0 }
 0x336   : > { %v3917_v9 = vsel %vm18481_vm8, %v3883_v38, %v3502_v44  ;;  %vm18485_vm8 = vcmask 195584   ;;  %v13474_v59 = vrot.slane %v4660_v12, 1  ;;  %v4548_v44 = vor.u32 %v4546_v23, %v13469_v18 }
 0x337   : > { %v4325_v30 = vadd.f32 %v12889_v29, %v4289_v61  ;;  %v3949_v42 = vsel %vm18485_vm8, %v3917_v9, %v13327_v17  ;;  %v9596_v61 = vld [vmem:[%s18472_s25] sm:$0xff]  ;;  %v4388_v20 = vpack.c.bf16 %v4356_v34, %v4356_v34  ;;  %vm18490_vm8 = vcmask 1046528   ;;  %s19231_s25 = smov 96  }
 0x338   : > { %5646 = vmatpush.bf16.msra.mxu2 %v9598_v11  ;;  %v4919_v38 = vsel %vm18490_vm8, %v13374_v58, %v13474_v59  ;;  %vm18496_vm8 = vsmask.f32 256 }
 0x339   : > { %5166 = vrot.lane.b32.xlu0 %v4708_v27, %s18170_s29  ;;  %v4357_v15 = vmax.f32 %v4325_v30, 0.0  ;;  %v18493_v27 = vld [vmem:[#allocation27_spill] sm:$0xff]  ;;  %v13499_v58 = vsel %vm18496_vm8, %v13371_v54, %v4548_v44  ;;  %v4461_v9 = vunpack.c.l.b16 %v4388_v20  ;;  %vm18501_vm8 = vcmask 130048  }
 0x33b   : > { %v3590_v37 = vpop.permute.xlu0 %3589  ;;  %5202 = vrot.lane.b32.xlu1 %v13453_v26, %s18385_s0  ;;  %v4389_v0 = vpack.c.bf16 %v4357_v15, %v4357_v15  ;;  %v4786_v15 = vshll.u32 %v13499_v58, 16 }
 0x33c   : > { %5282 = vrot.lane.b32.xlu2 %v5252_v48, %s18486_s27  ;;  %v3982_v47 = vsel %vm18487_vm6, %v3949_v42, %v3590_v37  ;;  %5647 = vmatpush.bf16.msra.mxu2 %v9597_v21  ;;  %vm18491_vm6 = vcmask 392192  }
 0x33d   : > { %v3672_v43 = vpop.permute.xlu1 %3671  ;;  %v4462_v11 = vunpack.c.l.b16 %v4389_v0  ;;  %v4782_v0 = vshrl.u32 %v13402_v6, 16 }
 0x33e   : > { %v13472_v56 = vpop.permute.xlu2 %5196  ;;  %v4015_v17 = vsel %vm18488_vm14, %v3982_v47, %v3672_v43  ;;  %vm18494_vm14 = vnez %v18493_v27  ;;  %v4726_v43 = vsel %vm18484_vm5, %v13499_v58, 0 }
 0x33f   : > { %v4048_v30 = vsel %vm18491_vm6, %v4015_v17, %v13360_v4  ;;  %v4676_v36 = vsel %vm18494_vm14, %v13309_v28, 0  ;;  %vm18497_vm6 = vcmask 523264   ;;  %v4486_v12 = vpack.c.b16 %v4462_v11, %v4461_v9 }
 0x340   : > { %5648 = vmatpush.bf16.msra.mxu2 %v9596_v61  ;;  %v4709_v47 = vsel %vm18494_vm14, %v13402_v6, 0  ;;  %v13528_v61 = vld [vmem:[%s18363_s10] ss:$0 sm:$0xff]  ;;  %s18789_s10 = sld [smem:[#allocation84_spill]] }
 0x341   : > { %4870 = vrot.lane.b32.xlu0 %v13356_v51, %s18489_s28  ;;  %v4693_v51 = vsel %vm18484_vm5, %v13402_v6, 0  ;;  %v4551_v34 = vshrl.u32 %v4486_v12, 16  ;;  %vm18510_vm5 = vcmask 392192  }
 0x342   : > { %v13504_v48 = vrot.slane %v4693_v51, 1 }
 0x343   : > { %v4230_v49 = vpop.f32.mrf.mxu1  ;;  %v3756_v35 = vpop.permute.xlu0 %3755  ;;  %4950 = vrot.lane.b32.xlu1 %v4919_v38, %s18492_s30  ;;  %v13538_v51 = vrot.slane %v4551_v34, 7 }
 0x344   : > { %v4081_v57 = vsel %vm18495_vm15, %v4048_v30, %v3756_v35  ;;  %4998 = vrot.lane.b32.xlu2 %v4676_v36, %s17821_s1  ;;  %vm18499_vm15 = vcmask 1046528   ;;  %v4290_v44 = vmul.f32 %v13528_v61, %v4230_v49  ;;  %v13535_v30 = vrot.slane %v4726_v43, 1 }
 0x345   : > { %v3836_v4 = vpop.permute.xlu1 %3835  ;;  %v5089_v54 = vsel %vm18499_vm15, %v13406_v62, %v13504_v48  ;;  %v4788_v62 = vrot.slane %v4786_v15, 1  ;;  %vm18503_vm15 = vcmask 195584  }
 0x346   : > { %v4114_v52 = vsel %vm18497_vm6, %v4081_v57, %v3836_v4  ;;  %v13502_v37 = vpop.permute.xlu2 %3503  ;;  %vm18502_vm6 = vsmask.f32 7424  ;;  %v4326_v11 = vadd.f32 %v12889_v29, %v4290_v44  ;;  %v18504_v57 = vld [vmem:[#allocation28_spill] sm:$0xff]  ;;  %v4554_v4 = vshll.u32 %v4486_v12, 16 }
 0x347   : > { %9339 = vmatmul.msk.bf16.gmra.mxu1 %vm18498_vm12, %v4114_v52  ;;  %vm18500_vm12 = vcmask 64512  }
 0x348   : > { %v5309_v17 = vsel %vm18500_vm12, 0, %v13390_v8  ;;  %vm18505_vm12 = vnez %v18504_v57 }
 0x349   : > { %5038 = vrot.lane.b32.xlu0 %v13453_v26, %s18478_s9 }
 0x34b   : > { %v4232_v42 = vpop.f32.mrf.mxu1  ;;  %v4943_v21 = vpop.permute.xlu0 %4942  ;;  %5120 = vrot.lane.b32.xlu1 %v5089_v54, %s18159_s7 }
 0x34c   : > { %v4291_v23 = vmul.f32 %v12865_v5, %v4232_v42  ;;  %5168 = vrot.lane.b32.xlu2 %v4709_v47, %s18170_s29  ;;  %v5356_v38 = vsel %vm18501_vm8, %v5309_v17, %v4943_v21  ;;  %v4784_v5 = vor.u32 %v4782_v0, %v13436_v7  ;;  %v4661_v7 = vsel %vm18505_vm12, %v13402_v6, 0 }
 0x34d   : > { %v4991_v20 = vpop.permute.xlu1 %4990  ;;  %vm18506_vm8 = vcmask 1046528   ;;  %v13559_v42 = vrot.slane %v4661_v7, 1  ;;  %v4358_v21 = vmax.f32 %v4326_v11, 0.0  ;;  %v4694_v0 = vsel %vm18505_vm12, %v13499_v58, 0 }
 0x34e   : > { %v13532_v35 = vpop.permute.xlu2 %3673  ;;  %v4327_v36 = vadd.f32 %v12889_v29, %v4291_v23  ;;  %v13541_v8 = vsel %vm18502_vm6, %v4784_v5, %v4788_v62  ;;  %v5388_v49 = vsel %vm18503_vm15, %v5356_v38, %v4991_v20  ;;  %v5254_v9 = vsel %vm18506_vm8, %v13438_v32, %v13535_v30 }
 0x34f   : > { %v4556_v29 = vor.u32 %v4554_v4, %v13538_v51  ;;  %vm18507_vm6 = vcmask 261120   ;;  %vm18508_vm15 = vcmask 326656   ;;  %vm18509_vm8 = vsmask.f32 256 }
 0x350   : > { %v4359_v52 = vmax.f32 %v4327_v36, 0.0  ;;  %v5420_v54 = vsel %vm18507_vm6, %v5388_v49, %v13433_v2  ;;  %vm18511_vm6 = vcmask 1046528   ;;  %v13586_v36 = vrot.slane %v4694_v0, 1  ;;  %v18520_v0 = vld [vmem:[#allocation30_spill] sm:$0xff] }
 0x351   : > { %5204 = vrot.lane.b32.xlu0 %v13541_v8, %s18385_s0  ;;  %v13566_v34 = vsel %vm18509_vm8, %v13469_v18, %v4556_v29  ;;  %v4921_v2 = vsel %vm18511_vm6, %v13474_v59, %v13559_v42  ;;  %vm18514_vm8 = vcmask 523264   ;;  %vm18515_vm6 = vcmask 588800  }
 0x352   : > { %v4391_v32 = vpack.c.bf16 %v4359_v52, %v4359_v52  ;;  %v4794_v59 = vshll.u32 %v13566_v34, 16 }
 0x353   : > { %v5113_v15 = vpop.permute.xlu0 %5112  ;;  %5284 = vrot.lane.b32.xlu1 %v5254_v9, %s18486_s27  ;;  %v4790_v9 = vshrl.u32 %v13499_v58, 16 }
 0x354   : > { %4872 = vrot.lane.b32.xlu2 %v13453_v26, %s18489_s28  ;;  %v5452_v12 = vsel %vm18508_vm15, %v5420_v54, %v5113_v15  ;;  %v4390_v26 = vpack.c.bf16 %v4358_v21, %v4358_v21  ;;  %vm18512_vm15 = vnez %v18229_v25  ;;  %v4464_v18 = vunpack.c.l.b16 %v4391_v32 }
 0x355   : > { %v5161_v47 = vpop.permute.xlu1 %5160  ;;  %v4677_v44 = vsel %vm18512_vm15, %v13402_v6, 0  ;;  %v13592_v52 = vrot.slane %v4794_v59, 1  ;;  %v4792_v54 = vor.u32 %v4790_v9, %v4788_v62  ;;  %v4727_v21 = vsel %vm18505_vm12, %v13566_v34, 0 }
 0x356   : > { %v13562_v43 = vpop.permute.xlu2 %3837  ;;  %v5484_v23 = vsel %vm18510_vm5, %v5452_v12, %v5161_v47  ;;  %vm18513_vm5 = vcmask 457728   ;;  %v4463_v11 = vunpack.c.l.b16 %v4390_v26  ;;  %v4710_v47 = vsel %vm18512_vm15, %v13499_v58, 0 }
 0x357   : > { %v5516_v38 = vsel %vm18513_vm5, %v5484_v23, %v13472_v56  ;;  %v3186_v56 = vsel %vm11806_vm4, %v12820_v55, 0  ;;  %vm18516_vm5 = vcmask 1046528   ;;  %v13619_v26 = vrot.slane %v4727_v21, 1 }
 0x358   : > { %v4487_v4 = vpack.c.b16 %v4464_v18, %v4463_v11  ;;  %v5091_v15 = vsel %vm18516_vm5, %v13504_v48, %v13586_v36  ;;  %vm18519_vm5 = vcmask 130048   ;;  %vm18524_vm12 = vcmask 1046528  }
 0x359   : > { %4952 = vrot.lane.b32.xlu0 %v4921_v2, %s18492_s30  ;;  %v5256_v9 = vsel %vm18524_vm12, %v13535_v30, %v13619_v26  ;;  %vm18527_vm4 = vcmask 392192  }
 0x35a   : > { %v4235_v17 = vpop.f32.mrf.mxu1  ;;  %v4559_v32 = vshrl.u32 %v4487_v4, 16 }
 0x35b   : > { %v5277_v20 = vpop.permute.xlu0 %5276  ;;  %5000 = vrot.lane.b32.xlu1 %v4677_v44, %s17821_s1  ;;  %v4292_v55 = vmul.f32 %v13528_v61, %v4235_v17  ;;  %v13627_v44 = vld [vmem:[%s18367_s6] ss:$0 sm:$0xff]  ;;  %s18644_s6 = sld [smem:[#allocation83_spill]] }
 0x35c   : > { %5040 = vrot.lane.b32.xlu2 %v13541_v8, %s18478_s9  ;;  %v5548_v5 = vsel %vm18514_vm8, %v5516_v38, %v5277_v20  ;;  %vm18517_vm8 = vcmask 64512   ;;  %v13633_v59 = vrot.slane %v4559_v32, 7 }
 0x35d   : > { %9357 = vmatmul.msk.bf16.vlgmr.msra.gmra.mxu2 %vm18515_vm6, %v5548_v5  ;;  %v3424_v49 = vpop.permute.xlu1 %3423  ;;  %vm18518_vm6 = vsmask.f32 7424  ;;  %v4328_v5 = vadd.f32 %v13627_v44, %v4292_v55 }
 0x35e   : > { %v13589_v7 = vpop.permute.xlu2 %4992  ;;  %v3886_v29 = vsel %vm18517_vm8, %v3186_v56, %v3424_v49  ;;  %v13613_v62 = vsel %vm18518_vm6, %v4792_v54, %v13592_v52  ;;  %vm18521_vm8 = vnez %v18520_v0  ;;  %vm18522_vm6 = vcmask 195584  }
 0x35f   : > { %v3919_v2 = vsel %vm18519_vm5, %v3886_v29, %v13502_v37  ;;  %v4662_v17 = vsel %vm18521_vm8, %v13499_v58, 0  ;;  %vm18523_vm5 = vcmask 261120   ;;  %v4562_v56 = vshll.u32 %v4487_v4, 16 }
 0x360   : > { %v13636_v11 = vrot.slane %v4662_v17, 1  ;;  %v4360_v54 = vmax.f32 %v4328_v5, 0.0  ;;  %v4695_v32 = vsel %vm18521_vm8, %v13566_v34, 0 }
 0x361   : > { %5122 = vrot.lane.b32.xlu0 %v5091_v15, %s18159_s7  ;;  %v4564_v29 = vor.u32 %v4562_v56, %v13633_v59 }
 0x362   : > { %v4237_v12 = vpop.f32.mrf.mxu1 }
 0x363   : > { %v4293_v23 = vmul.f32 %v13528_v61, %v4237_v12  ;;  %5170 = vrot.lane.b32.xlu1 %v4710_v47, %s18170_s29  ;;  %v3552_v48 = vpop.permute.xlu0 %3551 }
 0x364   : > { %5206 = vrot.lane.b32.xlu2 %v13613_v62, %s18385_s0  ;;  %v3951_v20 = vsel %vm18522_vm6, %v3919_v2, %v3552_v48  ;;  %vm18525_vm6 = vcmask 326656   ;;  %v13663_v2 = vrot.slane %v4695_v32, 1 }
 0x365   : > { %v4329_v18 = vadd.f32 %v13627_v44, %v4293_v23  ;;  %v3592_v38 = vpop.permute.xlu1 %3591 }
 0x366   : > { %v13631_v37 = vpop.permute.xlu2 %5162  ;;  %v3984_v49 = vsel %vm18523_vm5, %v3951_v20, %v3592_v38  ;;  %vm18526_vm5 = vmmov %vm18524_vm12  ;;  %vm18528_vm12 = vcmask 457728  }
 0x367   : > { %v4361_v15 = vmax.f32 %v4329_v18, 0.0  ;;  %v4017_v12 = vsel %vm18525_vm6, %v3984_v49, %v13532_v35  ;;  %v4923_v47 = vsel %vm18526_vm5, %v13559_v42, %v13636_v11  ;;  %vm18529_vm6 = vsmask.f32 256  ;;  %v18531_v18 = vld [vmem:[#allocation31_spill] sm:$0xff] }
 0x368   : > { %v13661_v35 = vsel %vm18529_vm6, %v13538_v51, %v4564_v29  ;;  %v4392_v42 = vpack.c.bf16 %v4360_v54, %v4360_v54  ;;  %vm18532_vm5 = vnez %v18531_v18  ;;  %v4641_v29 = vsel %vm18162_vm1, %v13009_v16, 0 }
 0x369   : > { %5286 = vrot.lane.b32.xlu0 %v5256_v9, %s18486_s27  ;;  %v4393_v55 = vpack.c.bf16 %v4361_v15, %v4361_v15  ;;  %v4678_v20 = vsel %vm18532_vm5, %v13499_v58, 0  ;;  %v4802_v5 = vshll.u32 %v13661_v35, 16  ;;  %v4728_v56 = vsel %vm18521_vm8, %v13661_v35, 0 }
 0x36a   : > { %v4465_v49 = vunpack.c.l.b16 %v4392_v42  ;;  %v4711_v16 = vsel %vm18532_vm5, %v13566_v34, 0  ;;  %vm18536_vm6 = vcmask 130048   ;;  %vm18547_vm8 = vcmask 457728  }
 0x36b   : > { %4874 = vrot.lane.b32.xlu1 %v13541_v8, %s18489_s28  ;;  %v3722_v21 = vpop.permute.xlu0 %3721  ;;  %v4466_v38 = vunpack.c.l.b16 %v4393_v55  ;;  %v13691_v32 = vrot.slane %v4802_v5, 1  ;;  %v13693_v55 = vrot.slane %v4728_v56, 1  ;;  %vm18550_vm1 = vcmask 588800  }
 0x36c   : > { %v4050_v30 = vsel %vm18527_vm4, %v4017_v12, %v3722_v21  ;;  %v4240_v4 = vpop.f32.mrf.mxu1  ;;  %4954 = vrot.lane.b32.xlu2 %v4923_v47, %s18492_s30  ;;  %vm18530_vm4 = vcmask 523264  }
 0x36d   : > { %v3758_v23 = vpop.permute.xlu1 %3757  ;;  %v4488_v15 = vpack.c.b16 %v4466_v38, %v4465_v49  ;;  %v4294_v12 = vmul.f32 %v13528_v61, %v4240_v4 }
 0x36e   : > { %v4083_v8 = vsel %vm18528_vm12, %v4050_v30, %v3758_v23  ;;  %v13657_v48 = vpop.permute.xlu2 %4866  ;;  %vm18534_vm12 = vcmask 1046528   ;;  %v4798_v30 = vshrl.u32 %v13566_v34, 16 }
 0x36f   : > { %v4116_v17 = vsel %vm18530_vm4, %v4083_v8, %v13562_v43  ;;  %v5093_v43 = vsel %vm18534_vm12, %v13586_v36, %v13663_v2  ;;  %v4567_v42 = vshrl.u32 %v4488_v15, 16  ;;  %vm18537_vm4 = vsmask.f32 7424 }
 0x370   : > { %9340 = vmatmul.msk.bf16.gmra.mxu1 %vm18533_vm10, %v4116_v17  ;;  %vm18535_vm10 = vcmask 64512   ;;  %v4800_v8 = vor.u32 %v4798_v30, %v13592_v52  ;;  %v4330_v17 = vadd.f32 %v13627_v44, %v4294_v12  ;;  %v5258_v5 = vsel %vm18534_vm12, %v13619_v26, %v13693_v55  ;;  %v18538_v52 = vld [vmem:[#allocation32_spill] sm:$0xff] }
 0x371   : > { %5002 = vrot.lane.b32.xlu0 %v4678_v20, %s17821_s1  ;;  %v4570_v26 = vshll.u32 %v4488_v15, 16  ;;  %vm18542_vm12 = vcmask 326656  }
 0x372   : > { %v13705_v20 = vsel %vm18537_vm4, %v4800_v8, %v13691_v32  ;;  %vm18541_vm4 = vcmask 261120  }
 0x373   : > { %5042 = vrot.lane.b32.xlu1 %v13613_v62, %s18478_s9  ;;  %v4865_v51 = vpop.permute.xlu0 %4864 }
 0x374   : > { %v4242_v9 = vpop.f32.mrf.mxu1  ;;  %5124 = vrot.lane.b32.xlu2 %v5093_v43, %s18159_s7  ;;  %v5312_v47 = vsel %vm18535_vm10, %v4641_v29, %v4865_v51  ;;  %vm18539_vm10 = vnez %v18538_v52 }
 0x375   : > { %v4295_v54 = vmul.f32 %v13528_v61, %v4242_v9  ;;  %v4945_v21 = vpop.permute.xlu1 %4944  ;;  %v4663_v49 = vsel %vm18539_vm10, %v13566_v34, 0  ;;  %v13718_v9 = vrot.slane %v4567_v42, 7 }
 0x376   : > { %v13688_v36 = vpop.permute.xlu2 %5034  ;;  %v5358_v4 = vsel %vm18536_vm6, %v5312_v47, %v4945_v21  ;;  %vm18540_vm6 = vcmask 195584   ;;  %v13723_v12 = vrot.slane %v4663_v49, 1 }
 0x377   : > { %v4331_v23 = vadd.f32 %v13627_v44, %v4295_v54  ;;  %v5390_v43 = vsel %vm18540_vm6, %v5358_v4, %v13589_v7  ;;  %v4362_v54 = vmax.f32 %v4330_v17, 0.0  ;;  %vm18543_vm6 = vcmask 1046528   ;;  %v18545_v4 = vld [vmem:[#allocation33_spill] sm:$0xff] }
 0x379   : > { %5172 = vrot.lane.b32.xlu0 %v4711_v16, %s18170_s29  ;;  %v4363_v51 = vmax.f32 %v4331_v23, 0.0  ;;  %v4572_v23 = vor.u32 %v4570_v26, %v13718_v9  ;;  %v4394_v7 = vpack.c.bf16 %v4362_v54, %v4362_v54  ;;  %v4925_v16 = vsel %vm18543_vm6, %v13636_v11, %v13723_v12 }
 0x37a   : > { %vm18548_vm6 = vsmask.f32 256  ;;  %v4642_v26 = vsel %vm18173_vm2, %v13048_v40, 0 }
 0x37b   : > { %5208 = vrot.lane.b32.xlu1 %v13705_v20, %s18385_s0  ;;  %v5033_v38 = vpop.permute.xlu0 %5032  ;;  %v4395_v47 = vpack.c.bf16 %v4363_v51, %v4363_v51  ;;  %v13745_v11 = vsel %vm18548_vm6, %v13633_v59, %v4572_v23  ;;  %v4467_v51 = vunpack.c.l.b16 %v4394_v7  ;;  %vm18553_vm6 = vcmask 130048  }
 0x37c   : > { %5288 = vrot.lane.b32.xlu2 %v5258_v5, %s18486_s27  ;;  %v5422_v56 = vsel %vm18541_vm4, %v5390_v43, %v5033_v38  ;;  %vm18544_vm4 = vcmask 392192   ;;  %v4810_v54 = vshll.u32 %v13745_v11, 16  ;;  %v4729_v7 = vsel %vm18539_vm10, %v13745_v11, 0 }
 0x37d   : > { %v5115_v29 = vpop.permute.xlu1 %5114  ;;  %v4468_v38 = vunpack.c.l.b16 %v4395_v47 }
 0x37e   : > { %v13721_v21 = vpop.permute.xlu2 %5200  ;;  %v5454_v30 = vsel %vm18542_vm12, %v5422_v56, %v5115_v29  ;;  %vm18546_vm12 = vnez %v18545_v4  ;;  %v4812_v40 = vrot.slane %v4810_v54, 1 }
 0x37f   : > { %v5486_v15 = vsel %vm18544_vm4, %v5454_v30, %v13631_v37  ;;  %v4679_v17 = vsel %vm18546_vm12, %v13566_v34, 0  ;;  %vm18549_vm4 = vcmask 523264   ;;  %v4489_v29 = vpack.c.b16 %v4468_v38, %v4467_v51 }
 0x380   : > { %v4712_v23 = vsel %vm18546_vm12, %v13661_v35, 0  ;;  %v13779_v51 = vrot.slane %v4729_v7, 1 }
 0x381   : > { %4876 = vrot.lane.b32.xlu0 %v13613_v62, %s18489_s28  ;;  %v4696_v62 = vsel %vm18539_vm10, %v13661_v35, 0  ;;  %vm18562_vm10 = vcmask 392192  }
 0x382   : > { %v13750_v56 = vrot.slane %v4696_v62, 1 }
 0x383   : > { %v4245_v8 = vpop.f32.mrf.mxu1  ;;  %4956 = vrot.lane.b32.xlu1 %v4925_v16, %s18492_s30  ;;  %v5199_v42 = vpop.permute.xlu0 %5198  ;;  %v4575_v16 = vshrl.u32 %v4489_v29, 16 }
 0x384   : > { %v5518_v5 = vsel %vm18547_vm8, %v5486_v15, %v5199_v42  ;;  %5004 = vrot.lane.b32.xlu2 %v4679_v17, %s17821_s1  ;;  %vm18551_vm8 = vcmask 1046528   ;;  %v4296_v17 = vmul.f32 %v13528_v61, %v4245_v8 }
 0x385   : > { %v5279_v49 = vpop.permute.xlu1 %5278  ;;  %v5095_v59 = vsel %vm18551_vm8, %v13663_v2, %v13750_v56  ;;  %v4806_v2 = vshrl.u32 %v13661_v35, 16  ;;  %vm18555_vm8 = vcmask 195584  }
 0x386   : > { %v13747_v37 = vpop.permute.xlu2 %4948  ;;  %v5550_v43 = vsel %vm18549_vm4, %v5518_v5, %v5279_v49  ;;  %vm18554_vm4 = vsmask.f32 7424 }
 0x387   : > { %9358 = vmatmul.msk.bf16.gmra.mxu2 %vm18550_vm1, %v5550_v43  ;;  %vm18552_vm1 = vcmask 64512   ;;  %v4808_v49 = vor.u32 %v4806_v2, %v13691_v32 }
 0x388   : > { %v5315_v15 = vsel %vm18552_vm1, %v4642_v26, %v13657_v48  ;;  %v4332_v48 = vadd.f32 %v13627_v44, %v4296_v17  ;;  %v18556_v26 = vld [vmem:[#allocation34_spill] sm:$0xff] }
 0x389   : > { %5044 = vrot.lane.b32.xlu0 %v13705_v20, %s18478_s9  ;;  %v13785_v54 = vsel %vm18554_vm4, %v4808_v49, %v4812_v40  ;;  %vm18557_vm1 = vnez %v18556_v26  ;;  %vm18559_vm4 = vcmask 261120  }
 0x38a   : > { %v4664_v32 = vsel %vm18557_vm1, %v13661_v35, 0 }
 0x38b   : > { %v4247_v47 = vpop.f32.mrf.mxu1  ;;  %5126 = vrot.lane.b32.xlu1 %v5095_v59, %s18159_s7  ;;  %v4947_v30 = vpop.permute.xlu0 %4946  ;;  %v13782_v59 = vrot.slane %v4575_v16, 7  ;;  %v13803_v2 = vrot.slane %v4664_v32, 1 }
 0x38c   : > { %v4297_v42 = vmul.f32 %v13528_v61, %v4247_v47  ;;  %5174 = vrot.lane.b32.xlu2 %v4712_v23, %s18170_s29  ;;  %v5360_v38 = vsel %vm18553_vm6, %v5315_v15, %v4947_v30  ;;  %v4578_v47 = vshll.u32 %v4489_v29, 16  ;;  %vm18558_vm6 = vcmask 1046528  }
 0x38d   : > { %v4995_v62 = vpop.permute.xlu1 %4994  ;;  %v5260_v30 = vsel %vm18558_vm6, %v13693_v55, %v13779_v51  ;;  %v4364_v15 = vmax.f32 %v4332_v48, 0.0  ;;  %vm18561_vm6 = vsmask.f32 256 }
 0x38e   : > { %v13776_v5 = vpop.permute.xlu2 %5118  ;;  %v4333_v43 = vadd.f32 %v13627_v44, %v4297_v42  ;;  %v5392_v8 = vsel %vm18555_vm8, %v5360_v38, %v4995_v62  ;;  %v4580_v16 = vor.u32 %v4578_v47, %v13782_v59  ;;  %vm18560_vm8 = vcmask 326656  }
 0x38f   : > { %v5424_v42 = vsel %vm18559_vm4, %v5392_v8, %v13688_v36  ;;  %vm18563_vm4 = vcmask 1046528   ;;  %v18564_v8 = vld [vmem:[#allocation35_spill] sm:$0xff] }
 0x390   : > { %v4365_v23 = vmax.f32 %v4333_v43, 0.0  ;;  %v13810_v38 = vsel %vm18561_vm6, %v13718_v9, %v4580_v16  ;;  %v4927_v36 = vsel %vm18563_vm4, %v13723_v12, %v13803_v2  ;;  %v4697_v43 = vsel %vm18557_vm1, %v13745_v11, 0 }
 0x391   : > { %5210 = vrot.lane.b32.xlu0 %v13785_v54, %s18385_s0  ;;  %v4818_v12 = vshll.u32 %v13810_v38, 16  ;;  %vm18567_vm6 = vcmask 523264   ;;  %vm18568_vm4 = vcmask 588800  }
 0x392   : > { %v4397_v55 = vpack.c.bf16 %v4365_v23, %v4365_v23 }
 0x393   : > { %5290 = vrot.lane.b32.xlu1 %v5260_v30, %s18486_s27  ;;  %v5117_v7 = vpop.permute.xlu0 %5116 }
 0x394   : > { %4878 = vrot.lane.b32.xlu2 %v13705_v20, %s18489_s28  ;;  %v5456_v29 = vsel %vm18560_vm8, %v5424_v42, %v5117_v7  ;;  %v4396_v20 = vpack.c.bf16 %v4364_v15, %v4364_v15  ;;  %vm18565_vm8 = vnez %v18564_v8  ;;  %v4470_v9 = vunpack.c.l.b16 %v4397_v55 }
 0x395   : > { %v5165_v17 = vpop.permute.xlu1 %5164  ;;  %v4680_v32 = vsel %vm18565_vm8, %v13661_v35, 0  ;;  %v13830_v7 = vrot.slane %v4697_v43, 1  ;;  %v13836_v55 = vrot.slane %v4818_v12, 1  ;;  %v4730_v43 = vsel %vm18557_vm1, %v13810_v38, 0 }
 0x396   : > { %v13806_v62 = vpop.permute.xlu2 %5282  ;;  %v5488_v49 = vsel %vm18562_vm10, %v5456_v29, %v5165_v17  ;;  %vm18566_vm10 = vcmask 457728   ;;  %v4469_v16 = vunpack.c.l.b16 %v4396_v20  ;;  %v4814_v17 = vshrl.u32 %v13745_v11, 16 }
 0x397   : > { %v5520_v30 = vsel %vm18566_vm10, %v5488_v49, %v13721_v21  ;;  %v4643_v21 = vsel %vm18192_vm13, %v13115_v24, 0  ;;  %vm18569_vm10 = vcmask 1046528   ;;  %vm18575_vm1 = vcmask 195584  }
 0x398   : > { %v4490_v29 = vpack.c.b16 %v4470_v9, %v4469_v16  ;;  %v5097_v49 = vsel %vm18569_vm10, %v13750_v56, %v13830_v7  ;;  %v4816_v20 = vor.u32 %v4814_v17, %v4812_v40  ;;  %v4713_v9 = vsel %vm18565_vm8, %v13745_v11, 0  ;;  %v18573_v16 = vld [vmem:[#allocation36_spill] sm:$0xff] }
 0x399   : > { %4958 = vrot.lane.b32.xlu0 %v4927_v36, %s18492_s30  ;;  %vm18572_vm10 = vcmask 130048   ;;  %vm18580_vm13 = vcmask 392192  }
 0x39a   : > { %v4250_v48 = vpop.f32.mrf.mxu1 }
 0x39b   : > { %5006 = vrot.lane.b32.xlu1 %v4680_v32, %s17821_s1  ;;  %v5281_v47 = vpop.permute.xlu0 %5280  ;;  %v4298_v24 = vmul.f32 %v13528_v61, %v4250_v48 }
 0x39c   : > { %5046 = vrot.lane.b32.xlu2 %v13785_v54, %s18478_s9  ;;  %v5552_v23 = vsel %vm18567_vm6, %v5520_v30, %v5281_v47  ;;  %vm18570_vm6 = vcmask 64512   ;;  %v4583_v47 = vshrl.u32 %v4490_v29, 16 }
 0x39d   : > { %v4869_v42 = vpop.permute.xlu1 %4868  ;;  %9359 = vmatmul.msk.bf16.gmra.mxu2 %vm18568_vm4, %v5552_v23  ;;  %vm18571_vm4 = vsmask.f32 7424  ;;  %v13863_v23 = vrot.slane %v4730_v43, 1 }
 0x39e   : > { %v13833_v15 = vpop.permute.xlu2 %4998  ;;  %v5318_v36 = vsel %vm18570_vm6, %v4643_v21, %v4869_v42  ;;  %v13857_v40 = vsel %vm18571_vm4, %v4816_v20, %v13836_v55  ;;  %vm18574_vm6 = vnez %v18573_v16  ;;  %v13872_v20 = vrot.slane %v4583_v47, 7 }
 0x39f   : > { %v5362_v12 = vsel %vm18572_vm10, %v5318_v36, %v13747_v37  ;;  %v4665_v48 = vsel %vm18574_vm6, %v13745_v11, 0  ;;  %v4334_v37 = vadd.f32 %v13627_v44, %v4298_v24  ;;  %vm18576_vm4 = vcmask 261120  }
 0x3a0   : > { %v13875_v36 = vrot.slane %v4665_v48, 1  ;;  %vm18577_vm10 = vcmask 1046528  }
 0x3a1   : > { %5128 = vrot.lane.b32.xlu0 %v5097_v49, %s18159_s7 }
 0x3a2   : > { %v4252_v32 = vpop.f32.mrf.mxu1 }
 0x3a3   : > { %v4299_v30 = vmul.f32 %v13528_v61, %v4252_v32  ;;  %5176 = vrot.lane.b32.xlu1 %v4713_v9, %s18170_s29  ;;  %v4997_v56 = vpop.permute.xlu0 %4996  ;;  %v5262_v32 = vsel %vm18577_vm10, %v13779_v51, %v13863_v23  ;;  %v4586_v9 = vshll.u32 %v4490_v29, 16  ;;  %v4698_v29 = vsel %vm18574_vm6, %v13810_v38, 0 }
 0x3a4   : > { %5212 = vrot.lane.b32.xlu2 %v13857_v40, %s18385_s0  ;;  %v5394_v17 = vsel %vm18575_vm1, %v5362_v12, %v4997_v56  ;;  %v4366_v56 = vmax.f32 %v4334_v37, 0.0  ;;  %vm18578_vm1 = vcmask 326656  }
 0x3a5   : > { %v4335_v42 = vadd.f32 %v13627_v44, %v4299_v30  ;;  %v5037_v21 = vpop.permute.xlu1 %5036  ;;  %v4588_v30 = vor.u32 %v4586_v9, %v13872_v20 }
 0x3a6   : > { %v13870_v49 = vpop.permute.xlu2 %5168  ;;  %v5426_v43 = vsel %vm18576_vm4, %v5394_v17, %v5037_v21  ;;  %vm18579_vm4 = vmmov %vm18577_vm10  ;;  %vm18581_vm10 = vcmask 457728  }
 0x3a7   : > { %v4367_v26 = vmax.f32 %v4335_v42, 0.0  ;;  %v5458_v24 = vsel %vm18578_vm1, %v5426_v43, %v13776_v5  ;;  %v4929_v12 = vsel %vm18579_vm4, %v13803_v2, %v13875_v36  ;;  %vm18582_vm1 = vsmask.f32 256 }
 0x3a8   : > { %v13900_v5 = vsel %vm18582_vm1, %v13782_v59, %v4588_v30  ;;  %v4398_v2 = vpack.c.bf16 %v4366_v56, %v4366_v56  ;;  %v13904_v43 = vrot.slane %v4698_v29, 1  ;;  %vm18584_vm4 = vcmask 588800  }
 0x3a9   : > { %5292 = vrot.lane.b32.xlu0 %v5262_v32, %s18486_s27  ;;  %v4399_v48 = vpack.c.bf16 %v4367_v26, %v4367_v26  ;;  %v18585_v26 = vld [vmem:[#allocation37_spill] sm:$0xff]  ;;  %v4731_v30 = vsel %vm18574_vm6, %v13900_v5, 0  ;;  %vm18588_vm1 = vcmask 64512   ;;  %vm18601_vm6 = vcmask 588800  }
 0x3aa   : > { %vm18586_vm2 = vnez %v18585_v26 }
 0x3ab   : > { %4880 = vrot.lane.b32.xlu1 %v13785_v54, %s18489_s28  ;;  %v5167_v47 = vpop.permute.xlu0 %5166  ;;  %v4681_v32 = vsel %vm18586_vm2, %v13745_v11, 0  ;;  %v4472_v9 = vunpack.c.l.b16 %v4399_v48  ;;  %v4822_v48 = vshrl.u32 %v13810_v38, 16 }
 0x3ac   : > { %v5490_v51 = vsel %vm18580_vm13, %v5458_v24, %v5167_v47  ;;  %4960 = vrot.lane.b32.xlu2 %v4929_v12, %s18492_s30  ;;  %vm18583_vm13 = vcmask 523264   ;;  %v4826_v47 = vshll.u32 %v13900_v5, 16  ;;  %v4471_v24 = vunpack.c.l.b16 %v4398_v2 }
 0x3ad   : > { %v4255_v42 = vpop.f32.mrf.mxu1  ;;  %v5203_v17 = vpop.permute.xlu1 %5202  ;;  %v4644_v12 = vsel %vm18494_vm14, %v13246_v50, 0  ;;  %v4714_v50 = vsel %vm18586_vm2, %v13810_v38, 0 }
 0x3ae   : > { %v5522_v54 = vsel %vm18581_vm10, %v5490_v51, %v5203_v17  ;;  %v13896_v21 = vpop.permute.xlu2 %4872  ;;  %vm18587_vm10 = vcmask 1046528   ;;  %v4491_v56 = vpack.c.b16 %v4472_v9, %v4471_v24  ;;  %v4300_v17 = vmul.f32 %v13528_v61, %v4255_v42 }
 0x3af   : > { %v5554_v37 = vsel %vm18583_vm13, %v5522_v54, %v13806_v62  ;;  %v5099_v62 = vsel %vm18587_vm10, %v13830_v7, %v13904_v43  ;;  %v4824_v24 = vor.u32 %v4822_v48, %v13836_v55  ;;  %vm18589_vm13 = vcmask 130048   ;;  %v18591_v55 = vld [vmem:[#allocation38_spill] sm:$0xff] }
 0x3b0   : > { %9360 = vmatmul.msk.bf16.gmra.mxu2 %vm18584_vm4, %v5554_v37  ;;  %v13930_v37 = vrot.slane %v4826_v47, 1  ;;  %vm18590_vm4 = vsmask.f32 7424 }
 0x3b1   : > { %5008 = vrot.lane.b32.xlu0 %v4681_v32, %s17821_s1  ;;  %v13932_v32 = vrot.slane %v4731_v30, 1 }
 0x3b2   : > { %v13944_v47 = vsel %vm18590_vm4, %v4824_v24, %v13930_v37  ;;  %vm18594_vm4 = vcmask 261120  }
 0x3b3   : > { %5048 = vrot.lane.b32.xlu1 %v13857_v40, %s18478_s9  ;;  %v4871_v59 = vpop.permute.xlu0 %4870 }
 0x3b4   : > { %5130 = vrot.lane.b32.xlu2 %v5099_v62, %s18159_s7  ;;  %v5321_v54 = vsel %vm18588_vm1, %v4644_v12, %v4871_v59  ;;  %v4591_v62 = vshrl.u32 %v4491_v56, 16  ;;  %v4336_v59 = vadd.f32 %v13627_v44, %v4300_v17  ;;  %v5264_v12 = vsel %vm18587_vm10, %v13863_v23, %v13932_v32 }
 0x3b5   : > { %v4257_v51 = vpop.f32.mrf.mxu1  ;;  %v4951_v29 = vpop.permute.xlu1 %4950  ;;  %vm18592_vm1 = vnez %v18591_v55  ;;  %v4594_v23 = vshll.u32 %v4491_v56, 16  ;;  %vm18595_vm10 = vcmask 326656   ;;  %v4682_v56 = vsel %vm11130_vm7, %v13810_v38, 0 }
 0x3b6   : > { %v4301_v7 = vmul.f32 %v13528_v61, %v4257_v51  ;;  %v13928_v2 = vpop.permute.xlu2 %5040  ;;  %v5364_v42 = vsel %vm18589_vm13, %v5321_v54, %v4951_v29  ;;  %v4666_v51 = vsel %vm18592_vm1, %v13810_v38, 0  ;;  %vm18593_vm13 = vcmask 195584  }
 0x3b7   : > { %v5396_v48 = vsel %vm18593_vm13, %v5364_v42, %v13833_v15  ;;  %v13957_v17 = vrot.slane %v4591_v62, 7  ;;  %v13962_v16 = vrot.slane %v4666_v51, 1  ;;  %vm18596_vm13 = vcmask 1046528  }
 0x3b8   : > { %v4337_v9 = vadd.f32 %v13627_v44, %v4301_v7 }
 0x3b9   : > { %5178 = vrot.lane.b32.xlu0 %v4714_v50, %s18170_s29  ;;  %v4368_v50 = vmax.f32 %v4336_v59, 0.0  ;;  %v4931_v62 = vsel %vm18596_vm13, %v13875_v36, %v13962_v16  ;;  %vm18599_vm13 = vsmask.f32 256 }
 0x3ba   : > { %v4369_v29 = vmax.f32 %v4337_v9, 0.0  ;;  %v4596_v9 = vor.u32 %v4594_v23, %v13957_v17  ;;  %v4715_v23 = vsel %vm11130_vm7, %v13900_v5, 0 }
 0x3bb   : > { %5214 = vrot.lane.b32.xlu1 %v13944_v47, %s18385_s0  ;;  %v5039_v30 = vpop.permute.xlu0 %5038  ;;  %v4400_v15 = vpack.c.bf16 %v4368_v50, %v4368_v50 }
 0x3bc   : > { %5294 = vrot.lane.b32.xlu2 %v5264_v12, %s18486_s27  ;;  %v5428_v54 = vsel %vm18594_vm4, %v5396_v48, %v5039_v30  ;;  %v4401_v52 = vpack.c.bf16 %v4369_v29, %v4369_v29  ;;  %vm18597_vm4 = vcmask 392192   ;;  %v4699_v30 = vsel %vm18592_vm1, %v13900_v5, 0 }
 0x3bd   : > { %v5121_v7 = vpop.permute.xlu1 %5120  ;;  %v13984_v36 = vsel %vm18599_vm13, %v13872_v20, %v4596_v9  ;;  %vm18604_vm13 = vcmask 130048  }
 0x3be   : > { %v13960_v24 = vpop.permute.xlu2 %5206  ;;  %v5460_v0 = vsel %vm18595_vm10, %v5428_v54, %v5121_v7  ;;  %vm18598_vm10 = vcmask 457728   ;;  %v13989_v54 = vrot.slane %v4699_v30, 1  ;;  %v4834_v7 = vshll.u32 %v13984_v36, 16 }
 0x3bf   : > { %v5492_v59 = vsel %vm18597_vm4, %v5460_v0, %v13870_v49  ;;  %v4473_v0 = vunpack.c.l.b16 %v4400_v15  ;;  %vm18600_vm4 = vcmask 523264   ;;  %v4732_v9 = vsel %vm18592_vm1, %v13984_v36, 0 }
 0x3c0   : > { %v4645_v15 = vsel %vm18512_vm15, %v13309_v28, 0  ;;  %vm18613_vm1 = vcmask 392192   ;;  %vm18614_vm15 = vcmask 1046528  }
 0x3c1   : > { %4882 = vrot.lane.b32.xlu0 %v13857_v40, %s18489_s28  ;;  %v4474_v40 = vunpack.c.l.b16 %v4401_v52 }
 0x3c3   : > { %4962 = vrot.lane.b32.xlu1 %v4931_v62, %s18492_s30  ;;  %v5205_v42 = vpop.permute.xlu0 %5204  ;;  %v4492_v52 = vpack.c.b16 %v4474_v40, %v4473_v0 }
 0x3c4   : > { %v5524_v12 = vsel %vm18598_vm10, %v5492_v59, %v5205_v42  ;;  %v4260_v51 = vpop.f32.mrf.mxu1  ;;  %5010 = vrot.lane.b32.xlu2 %v4682_v56, %s17821_s1  ;;  %vm18602_vm10 = vcmask 1046528   ;;  %v4836_v59 = vrot.slane %v4834_v7, 1 }
 0x3c5   : > { %v5285_v29 = vpop.permute.xlu1 %5284  ;;  %v5101_v20 = vsel %vm18602_vm10, %v13904_v43, %v13989_v54  ;;  %v4599_v62 = vshrl.u32 %v4492_v52, 16  ;;  %v4830_v43 = vshrl.u32 %v13900_v5, 16  ;;  %v4302_v30 = vmul.f32 %v13528_v61, %v4260_v51 }
 0x3c6   : > { %v13986_v49 = vpop.permute.xlu2 %4954  ;;  %v5556_v48 = vsel %vm18600_vm4, %v5524_v12, %v5285_v29  ;;  %vm18605_vm4 = vsmask.f32 7424  ;;  %vm18606_vm10 = vcmask 195584  }
 0x3c7   : > { %9361 = vmatmul.msk.bf16.gmra.mxu2 %vm18601_vm6, %v5556_v48  ;;  %vm18603_vm6 = vcmask 64512   ;;  %v4832_v28 = vor.u32 %v4830_v43, %v13930_v37  ;;  %v14018_v48 = vrot.slane %v4732_v9, 1  ;;  %v4602_v9 = vshll.u32 %v4492_v52, 16 }
 0x3c8   : > { %v5324_v56 = vsel %vm18603_vm6, %v4645_v15, %v13896_v21  ;;  %v4338_v21 = vadd.f32 %v13627_v44, %v4302_v30 }
 0x3c9   : > { %5050 = vrot.lane.b32.xlu0 %v13944_v47, %s18478_s9  ;;  %v14024_v7 = vsel %vm18605_vm4, %v4832_v28, %v4836_v59  ;;  %vm18610_vm4 = vcmask 261120  }
 0x3cb   : > { %5132 = vrot.lane.b32.xlu1 %v5101_v20, %s18159_s7  ;;  %v4953_v50 = vpop.permute.xlu0 %4952 }
 0x3cc   : > { %v4262_v42 = vpop.f32.mrf.mxu1  ;;  %5180 = vrot.lane.b32.xlu2 %v4715_v23, %s18170_s29  ;;  %v5366_v29 = vsel %vm18604_vm13, %v5324_v56, %v4953_v50  ;;  %v14021_v23 = vrot.slane %v4599_v62, 7  ;;  %v18607_v50 = vld [vmem:[#allocation40_spill] sm:$0xff]  ;;  %vm18609_vm13 = vcmask 1046528  }
 0x3cd   : > { %v4303_v40 = vmul.f32 %v13528_v61, %v4262_v42  ;;  %v5001_v12 = vpop.permute.xlu1 %5000  ;;  %vm18608_vm6 = vnez %v18607_v50  ;;  %v5266_v15 = vsel %vm18609_vm13, %v13932_v32, %v14018_v48  ;;  %vm18612_vm13 = vsmask.f32 256  ;;  %v18683_v50 = vld [vmem:[#allocation50_spill] sm:$0xff] }
 0x3ce   : > { %v14015_v0 = vpop.permute.xlu2 %5124  ;;  %v5398_v51 = vsel %vm18606_vm10, %v5366_v29, %v5001_v12  ;;  %v4667_v37 = vsel %vm18608_vm6, %v13900_v5, 0  ;;  %v4604_v43 = vor.u32 %v4602_v9, %v14021_v23  ;;  %vm18611_vm10 = vcmask 326656  }
 0x3cf   : > { %v4339_v20 = vadd.f32 %v13627_v44, %v4303_v40  ;;  %v5430_v56 = vsel %vm18610_vm4, %v5398_v51, %v13928_v2  ;;  %v4932_v30 = vrot.slane %v4667_v37, 1  ;;  %v4370_v40 = vmax.f32 %v4338_v21, 0.0 }
 0x3d0   : > { %v14047_v28 = vsel %vm18612_vm13, %v13957_v17, %v4604_v43  ;;  %v4683_v21 = vsel %vm18336_vm9, %v13900_v5, 0  ;;  %vm18617_vm4 = vcmask 588800   ;;  %vm18619_vm13 = vcmask 64512  }
 0x3d1   : > { %5216 = vrot.lane.b32.xlu0 %v14024_v7, %s18385_s0  ;;  %v4371_v62 = vmax.f32 %v4339_v20, 0.0  ;;  %v4933_v2 = vsel %vm18614_vm15, %v13962_v16, %v4932_v30  ;;  %v4402_v51 = vpack.c.bf16 %v4370_v40, %v4370_v40  ;;  %v4842_v16 = vshll.u32 %v14047_v28, 16 }
 0x3d2   : > { %vm18616_vm15 = vcmask 523264  }
 0x3d3   : > { %5296 = vrot.lane.b32.xlu1 %v5266_v15, %s18486_s27  ;;  %v5123_v42 = vpop.permute.xlu0 %5122  ;;  %v4403_v32 = vpack.c.bf16 %v4371_v62, %v4371_v62 }
 0x3d4   : > { %4884 = vrot.lane.b32.xlu2 %v13944_v47, %s18489_s28  ;;  %v5462_v52 = vsel %vm18611_vm10, %v5430_v56, %v5123_v42  ;;  %v4700_v47 = vsel %vm18608_vm6, %v13984_v36, 0  ;;  %v4475_v42 = vunpack.c.l.b16 %v4402_v51  ;;  %vm18618_vm10 = vcmask 1046528  }
 0x3d5   : > { %v5171_v12 = vpop.permute.xlu1 %5170  ;;  %v4476_v37 = vunpack.c.l.b16 %v4403_v32  ;;  %v5102_v62 = vrot.slane %v4700_v47, 1  ;;  %v4733_v51 = vsel %vm18608_vm6, %v14047_v28, 0  ;;  %v4716_v47 = vsel %vm18336_vm9, %v13984_v36, 0 }
 0x3d6   : > { %v14043_v29 = vpop.permute.xlu2 %5288  ;;  %v5494_v20 = vsel %vm18613_vm1, %v5462_v52, %v5171_v12  ;;  %vm18615_vm1 = vcmask 457728   ;;  %v4838_v52 = vshrl.u32 %v13984_v36, 16  ;;  %v14070_v12 = vrot.slane %v4842_v16, 1 }
 0x3d7   : > { %v5526_v9 = vsel %vm18615_vm1, %v5494_v20, %v13960_v24  ;;  %v4493_v40 = vpack.c.b16 %v4476_v37, %v4475_v42  ;;  %v4646_v24 = vsel %vm18532_vm5, %v13402_v6, 0  ;;  %v5103_v32 = vsel %vm18618_vm10, %v13989_v54, %v5102_v62 }
 0x3d8   : > { %vm18620_vm1 = vsmask.f32 7424  ;;  %vm18624_vm10 = vcmask 195584   ;;  %vm18631_vm6 = vsmask.f32 256 }
 0x3d9   : > { %4964 = vrot.lane.b32.xlu0 %v4933_v2, %s18492_s30  ;;  %v4840_v2 = vor.u32 %v4838_v52, %v4836_v59  ;;  %v14094_v59 = vrot.slane %v4733_v51, 1 }
 0x3db   : > { %5012 = vrot.lane.b32.xlu1 %v4683_v21, %s17821_s1  ;;  %v5287_v17 = vpop.permute.xlu0 %5286  ;;  %v4607_v21 = vshrl.u32 %v4493_v40, 16  ;;  %v14088_v54 = vsel %vm18620_vm1, %v4840_v2, %v14070_v12  ;;  %vm18626_vm1 = vcmask 1046528  }
 0x3dc   : > { %5052 = vrot.lane.b32.xlu2 %v14024_v7, %s18478_s9  ;;  %v5558_v15 = vsel %vm18616_vm15, %v5526_v9, %v5287_v17  ;;  %vm18621_vm15 = vcmask 130048   ;;  %v18622_v17 = vld [vmem:[#allocation42_spill] sm:$0xff] }
 0x3dd   : > { %v4875_v43 = vpop.permute.xlu1 %4874  ;;  %9362 = vmatmul.msk.bf16.gmra.mxu2 %vm18617_vm4, %v5558_v15  ;;  %vm18623_vm4 = vnez %v18622_v17 }
 0x3de   : > { %v14067_v56 = vpop.permute.xlu2 %5004  ;;  %v5327_v20 = vsel %vm18619_vm13, %v4646_v24, %v4875_v43  ;;  %v4668_v9 = vsel %vm18623_vm4, %v13984_v36, 0  ;;  %v14102_v43 = vrot.slane %v4607_v21, 7  ;;  %vm18625_vm13 = vcmask 261120  }
 0x3df   : > { %v5368_v37 = vsel %vm18621_vm15, %v5327_v20, %v13986_v49  ;;  %v14104_v52 = vrot.slane %v4668_v9, 1  ;;  %v5268_v24 = vsel %vm18626_vm1, %v14018_v48, %v14094_v59  ;;  %vm18627_vm15 = vcmask 326656  }
 0x3e0   : > { %v5650_v20 = vpop.f32.mrf.mxu2  ;;  %v4701_v48 = vsel %vm18623_vm4, %v14047_v28, 0 }
 0x3e1   : > { %5134 = vrot.lane.b32.xlu0 %v5103_v32, %s18159_s7  ;;  %v4610_v32 = vshll.u32 %v4493_v40, 16 }
 0x3e3   : > { %5182 = vrot.lane.b32.xlu1 %v4716_v47, %s18170_s29  ;;  %v5003_v6 = vpop.permute.xlu0 %5002  ;;  %v4612_v2 = vor.u32 %v4610_v32, %v14102_v43 }
 0x3e4   : > { %5218 = vrot.lane.b32.xlu2 %v14088_v54, %s18385_s0  ;;  %v5400_v16 = vsel %vm18624_vm10, %v5368_v37, %v5003_v6  ;;  %vm18628_vm10 = vmmov %vm18626_vm1  ;;  %vm18630_vm1 = vcmask 457728  }
 0x3e5   : > { %v5043_v15 = vpop.permute.xlu1 %5042  ;;  %v4935_v21 = vsel %vm18628_vm10, %v4932_v30, %v14104_v52  ;;  %vm18633_vm10 = vcmask 588800  }
 0x3e6   : > { %v14100_v42 = vpop.permute.xlu2 %5174  ;;  %v5432_v49 = vsel %vm18625_vm13, %v5400_v16, %v5043_v15  ;;  %vm18629_vm13 = vcmask 392192   ;;  %v14133_v15 = vrot.slane %v4701_v48, 1 }
 0x3e7   : > { %v5464_v47 = vsel %vm18627_vm15, %v5432_v49, %v14015_v0  ;;  %v14128_v0 = vsel %vm18631_vm6, %v14021_v23, %v4612_v2  ;;  %vm18632_vm15 = vcmask 523264   ;;  %v4684_v49 = vsel %vm18353_vm0, %v13984_v36, 0 }
 0x3e8   : > { %vm18634_vm6 = vcmask 1046528   ;;  %v5652_v2 = vpop.f32.mrf.mxu2 }
 0x3e9   : > { %5298 = vrot.lane.b32.xlu0 %v5268_v24, %s18486_s27  ;;  %v4850_v24 = vshll.u32 %v14128_v0, 16 }
 0x3eb   : > { %4886 = vrot.lane.b32.xlu1 %v14024_v7, %s18489_s28  ;;  %v5173_v51 = vpop.permute.xlu0 %5172 }
 0x3ec   : > { %v5496_v6 = vsel %vm18629_vm13, %v5464_v47, %v5173_v51  ;;  %4966 = vrot.lane.b32.xlu2 %v4935_v21, %s18492_s30  ;;  %v4734_v51 = vsel %vm18623_vm4, %v14128_v0, 0  ;;  %v4647_v47 = vsel %vm18546_vm12, %v13499_v58, 0  ;;  %vm18635_vm13 = vcmask 64512  }
 0x3ed   : > { %v5209_v40 = vpop.permute.xlu1 %5208  ;;  %v4265_v9 = vpop.f32.mrf.mxu1  ;;  %v4717_v58 = vsel %vm18353_vm0, %v14047_v28, 0  ;;  %vm18691_vm4 = vsmask.f32 256 }
 0x3ee   : > { %v5528_v37 = vsel %vm18630_vm1, %v5496_v6, %v5209_v40  ;;  %v14124_v7 = vpop.permute.xlu2 %4878  ;;  %v4304_v30 = vmul.f32 %v13528_v61, %v4265_v9  ;;  %v18636_v9 = vld [vmem:[#allocation45_spill] sm:$0xff]  ;;  %vm18639_vm1 = vcmask 130048  }
 0x3ef   : > { %v5560_v16 = vsel %vm18632_vm15, %v5528_v37, %v14043_v29  ;;  %v5105_v29 = vsel %vm18634_vm6, %v5102_v62, %v14133_v15  ;;  %v4846_v37 = vshrl.u32 %v14047_v28, 16  ;;  %v14157_v62 = vrot.slane %v4850_v24, 1  ;;  %v14171_v24 = vld [vmem:[%s18638_s5] ss:$0 sm:$0xff] }
 0x3f0   : > { %9363 = vmatmul.msk.bf16.gmra.mxu2 %vm18633_vm10, %v5560_v16  ;;  %v4340_v23 = vadd.f32 %v13627_v44, %v4304_v30  ;;  %v5731_v30 = vadd.f32 %v5652_v2, %v18636_v9  ;;  %vm18640_vm15 = vsmask.f32 7424 }
 0x3f1   : > { %5014 = vrot.lane.b32.xlu0 %v4684_v49, %s17821_s1 }
 0x3f2   : > { %v4372_v16 = vmax.f32 %v4340_v23, 0.0 }
 0x3f3   : > { %5054 = vrot.lane.b32.xlu1 %v14088_v54, %s18478_s9  ;;  %v4877_v32 = vpop.permute.xlu0 %4876 }
 0x3f4   : > { %5136 = vrot.lane.b32.xlu2 %v5105_v29, %s18159_s7  ;;  %v5330_v6 = vsel %vm18635_vm13, %v4647_v47, %v4877_v32  ;;  %v14161_v29 = vrot.slane %v4734_v51, 1  ;;  %v4848_v32 = vor.u32 %v4846_v37, %v14070_v12  ;;  %v18637_v47 = vld [vmem:[#allocation44_spill] sm:$0xff]  ;;  %v18641_v51 = vld [vmem:[#allocation43_spill] sm:$0xff]  ;;  %vm18643_vm13 = vcmask 195584  }
 0x3f5   : > { %v4957_v21 = vpop.permute.xlu1 %4956  ;;  %v4267_v48 = vpop.f32.mrf.mxu1  ;;  %v5730_v17 = vadd.f32 %v5650_v20, %v18637_v47  ;;  %vm18642_vm10 = vnez %v18641_v51  ;;  %v5783_v20 = vmul.f32 %v14171_v24, %v5731_v30  ;;  %v14196_v30 = vld [vmem:[%s18644_s6] ss:$0 sm:$0xff] }
 0x3f6   : > { %v14154_v40 = vpop.permute.xlu2 %5046  ;;  %v4305_v49 = vmul.f32 %v13528_v61, %v4267_v48  ;;  %v5370_v2 = vsel %vm18639_vm1, %v5330_v6, %v4957_v21  ;;  %v14178_v61 = vsel %vm18640_vm15, %v4848_v32, %v14157_v62  ;;  %v4669_v12 = vsel %vm18642_vm10, %v14047_v28, 0 }
 0x3f7   : > { %v4404_v48 = vpack.c.bf16 %v4372_v16, %v4372_v16  ;;  %v5402_v6 = vsel %vm18643_vm13, %v5370_v2, %v14067_v56  ;;  %v5782_v9 = vmul.f32 %v14171_v24, %v5730_v17  ;;  %vm18645_vm1 = vcmask 261120  }
 0x3f8   : > { %v4341_v23 = vadd.f32 %v13627_v44, %v4305_v49  ;;  %v5270_v44 = vsel %vm18634_vm6, %v14094_v59, %v14161_v29  ;;  %v14201_v47 = vrot.slane %v4669_v12, 1  ;;  %v5819_v59 = vadd.f32 %v14196_v30, %v5783_v20 }
 0x3f9   : > { %5184 = vrot.lane.b32.xlu0 %v4717_v58, %s18170_s29  ;;  %v4477_v56 = vunpack.c.l.b16 %v4404_v48  ;;  %vm18646_vm15 = vcmask 326656   ;;  %v5818_v17 = vadd.f32 %v14196_v30, %v5782_v9  ;;  %v4685_v12 = vsel %vm18379_vm11, %v14047_v28, 0 }
 0x3fa   : > { %v4373_v37 = vmax.f32 %v4341_v23, 0.0  ;;  %vm18648_vm13 = vcmask 392192  }
 0x3fb   : > { %5220 = vrot.lane.b32.xlu1 %v14178_v61, %s18385_s0  ;;  %v5045_v21 = vpop.permute.xlu0 %5044 }
 0x3fc   : > { %5300 = vrot.lane.b32.xlu2 %v5270_v44, %s18486_s27  ;;  %v4405_v16 = vpack.c.bf16 %v4373_v37, %v4373_v37  ;;  %v5434_v49 = vsel %vm18645_vm1, %v5402_v6, %v5045_v21  ;;  %v4937_v37 = vsel %vm18634_vm6, %v14104_v52, %v14201_v47  ;;  %v14214_v21 = vmax.f32 %v5819_v59, 0.0 }
 0x3fd   : > { %v5127_v58 = vpop.permute.xlu1 %5126  ;;  %vm18649_vm1 = vcmask 457728   ;;  %v14224_v52 = vmax.f32 %v5818_v17, 0.0  ;;  %vm18652_vm6 = vcmask 588800  }
 0x3fe   : > { %v14199_v32 = vpop.permute.xlu2 %5212  ;;  %v4478_v2 = vunpack.c.l.b16 %v4405_v16  ;;  %v5466_v23 = vsel %vm18646_vm15, %v5434_v49, %v5127_v58  ;;  %18647 = vst [vmem:[#allocation26_spill] sm:$0xff] %v14214_v21  ;;  %vm18651_vm15 = vcmask 523264  }
 0x3ff   : > { %v5498_v6 = vsel %vm18648_vm13, %v5466_v23, %v14100_v42  ;;  %18650 = vst [vmem:[#allocation27_spill] sm:$0xff] %v14224_v52  ;;  %v5883_v42 = vpack.c.bf16 %v14214_v21, %v14214_v21  ;;  %vm18653_vm13 = vsmask.f32 256 }
 0x400   : > { %v4494_v44 = vpack.c.b16 %v4478_v2, %v4477_v56 }
 0x401   : > { %4888 = vrot.lane.b32.xlu0 %v14088_v54, %s18489_s28  ;;  %v4702_v54 = vsel %vm18642_vm10, %v14128_v0, 0 }
 0x402   : > { %v4615_v20 = vshrl.u32 %v4494_v44, 16  ;;  %v4618_v49 = vshll.u32 %v4494_v44, 16  ;;  %v14229_v2 = vrot.slane %v4702_v54, 1 }
 0x403   : > { %4968 = vrot.lane.b32.xlu1 %v4937_v37, %s18492_s30  ;;  %v5211_v48 = vpop.permute.xlu0 %5210  ;;  %v5882_v37 = vpack.c.bf16 %v14224_v52, %v14224_v52 }
 0x404   : > { %v5530_v9 = vsel %vm18649_vm1, %v5498_v6, %v5211_v48  ;;  %5016 = vrot.lane.b32.xlu2 %v4685_v12, %s17821_s1  ;;  %v4617_v16 = vrot.slane %v4615_v20, 7  ;;  %vm18654_vm1 = vcmask 1046528   ;;  %v5956_v48 = vunpack.c.l.b16 %v5883_v42  ;;  %v18655_v6 = vld [vmem:[#allocation47_spill] sm:$0xff] }
 0x405   : > { %v5291_v58 = vpop.permute.xlu1 %5290  ;;  %v5107_v12 = vsel %vm18654_vm1, %v14133_v15, %v14229_v2  ;;  %v4648_v15 = vsel %vm18565_vm8, %v13566_v34, 0  ;;  %v5955_v42 = vunpack.c.l.b16 %v5882_v37  ;;  %vm18659_vm1 = vcmask 195584  }
 0x406   : > { %v14226_v59 = vpop.permute.xlu2 %4960  ;;  %v5562_v56 = vsel %vm18651_vm15, %v5530_v9, %v5291_v58  ;;  %v4620_v23 = vor.u32 %v4618_v49, %v4617_v16  ;;  %v4854_v58 = vshrl.u32 %v14128_v0, 16  ;;  %vm18656_vm15 = vcmask 64512  }
 0x407   : > { %9364 = vmatmul.msk.bf16.gmra.mxu2 %vm18652_vm6, %v5562_v56  ;;  %vm18657_vm6 = vcmask 130048   ;;  %v5987_v34 = vpack.c.b16 %v5956_v48, %v5955_v42 }
 0x408   : > { %v14238_v17 = vsel %vm18653_vm13, %v14102_v43, %v4620_v23  ;;  %v4718_v43 = vsel %vm18379_vm11, %v14128_v0, 0  ;;  %v5333_v23 = vsel %vm18656_vm15, %v4648_v15, %v14124_v7  ;;  %v4856_v21 = vor.u32 %v4854_v58, %v14157_v62  ;;  %v18660_v7 = vld [vmem:[#allocation46_spill] sm:$0xff] }
 0x409   : > { %5056 = vrot.lane.b32.xlu0 %v14178_v61, %s18478_s9  ;;  %v4858_v20 = vshll.u32 %v14238_v17, 16  ;;  %v4735_v49 = vsel %vm18642_vm10, %v14238_v17, 0  ;;  %vm18658_vm13 = vsmask.f32 7424  ;;  %vm18661_vm15 = vnez %v18660_v7 }
 0x40a   : > { %v5655_v44 = vpop.f32.mrf.mxu2  ;;  %v14266_v51 = vrot.slane %v4735_v49, 1  ;;  %v6004_v48 = vshrl.u32 %v5987_v34, 16  ;;  %v18663_v49 = vld [vmem:[#allocation48_spill] sm:$0xff]  ;;  %vm18674_vm10 = vcmask 588800  }
 0x40b   : > { %v5732_v54 = vadd.f32 %v5655_v44, %v18655_v6  ;;  %5138 = vrot.lane.b32.xlu1 %v5107_v12, %s18159_s7  ;;  %v4959_v9 = vpop.permute.xlu0 %4958  ;;  %v4860_v56 = vrot.slane %v4858_v20, 1 }
 0x40c   : > { %5186 = vrot.lane.b32.xlu2 %v4718_v43, %s18170_s29  ;;  %v5372_v6 = vsel %vm18657_vm6, %v5333_v23, %v4959_v9  ;;  %vm18662_vm6 = vcmask 1046528  }
 0x40d   : > { %v5784_v44 = vmul.f32 %v14171_v24, %v5732_v54  ;;  %v5007_v12 = vpop.permute.xlu1 %5006  ;;  %v14269_v43 = vsel %vm18658_vm13, %v4856_v21, %v4860_v56  ;;  %v4670_v54 = vsel %vm18661_vm15, %v14128_v0, 0  ;;  %v5272_v62 = vsel %vm18662_vm6, %v14161_v29, %v14266_v51 }
 0x40e   : > { %v14263_v52 = vpop.permute.xlu2 %5130  ;;  %v5404_v20 = vsel %vm18659_vm1, %v5372_v6, %v5007_v12  ;;  %vm18664_vm13 = vcmask 261120   ;;  %v14287_v42 = vrot.slane %v4670_v54, 1  ;;  %vm18666_vm1 = vcmask 326656  }
 0x40f   : > { %v5820_v37 = vadd.f32 %v14196_v30, %v5784_v44  ;;  %v5436_v58 = vsel %vm18664_vm13, %v5404_v20, %v14154_v40  ;;  %vm18667_vm6 = vcmask 392192   ;;  %vm18668_vm13 = vcmask 1046528  }
 0x410   : > { %v6007_v20 = vshll.u32 %v5987_v34, 16 }
 0x411   : > { %5222 = vrot.lane.b32.xlu0 %v14269_v43, %s18385_s0  ;;  %v14289_v23 = vmax.f32 %v5820_v37, 0.0 }
 0x412   : > { %v5657_v9 = vpop.f32.mrf.mxu2 }
 0x413   : > { %v5733_v21 = vadd.f32 %v5657_v9, %v18663_v49  ;;  %v5129_v15 = vpop.permute.xlu0 %5128  ;;  %5302 = vrot.lane.b32.xlu1 %v5272_v62, %s18486_s27  ;;  %18665 = vst [vmem:[#allocation28_spill] sm:$0xff] %v14289_v23  ;;  %v14295_v9 = vrot.slane %v6004_v48, 7  ;;  %v5884_v37 = vpack.c.bf16 %v14289_v23, %v14289_v23  ;;  %v4703_v48 = vsel %vm18661_vm15, %v14238_v17, 0  ;;  %v18670_v49 = vld [vmem:[#allocation19_spill] sm:$0xff] }
 0x414   : > { %4890 = vrot.lane.b32.xlu2 %v14178_v61, %s18489_s28  ;;  %v5468_v29 = vsel %vm18666_vm1, %v5436_v58, %v5129_v15  ;;  %v4939_v61 = vsel %vm18668_vm13, %v14201_v47, %v14287_v42  ;;  %vm18671_vm1 = vnez %v18670_v49  ;;  %v4686_v47 = vsel %vm18391_vm3, %v14128_v0, 0 }
 0x415   : > { %v5785_v44 = vmul.f32 %v14171_v24, %v5733_v21  ;;  %v5177_v12 = vpop.permute.xlu1 %5176  ;;  %v14312_v21 = vsel %vm18671_vm1, %v4617_v16, 0  ;;  %v6009_v34 = vor.u32 %v6007_v20, %v14295_v9  ;;  %vm18673_vm13 = vcmask 523264  }
 0x416   : > { %v14293_v6 = vpop.permute.xlu2 %5294  ;;  %v5500_v40 = vsel %vm18667_vm6, %v5468_v29, %v5177_v12  ;;  %vm18672_vm6 = vcmask 457728   ;;  %v14326_v29 = vrot.slane %v4703_v48, 1  ;;  %v5957_v12 = vunpack.c.l.b16 %v5884_v37 }
 0x417   : > { %v5821_v62 = vadd.f32 %v14196_v30, %v5785_v44  ;;  %v5532_v44 = vsel %vm18672_vm6, %v5500_v40, %v14199_v32  ;;  %v5022_v20 = vshrl.u32 %v14238_v17, 16  ;;  %v5026_v23 = vshll.u32 %v14312_v21, 16 }
 0x418   : > { %v14335_v32 = vsel %vm18671_vm1, 0, %v6009_v34  ;;  %v4649_v37 = vsel %vm18586_vm2, %v13661_v35, 0  ;;  %vm18676_vm6 = vcmask 64512   ;;  %vm18685_vm1 = vsmask.f32 7424 }
 0x419   : > { %v14304_v54 = vmax.f32 %v5821_v62, 0.0  ;;  %4970 = vrot.lane.b32.xlu0 %v4939_v61, %s18492_s30  ;;  %v14346_v49 = vrot.slane %v5026_v23, 1  ;;  %v6246_v34 = vshll.u32 %v14335_v32, 16  ;;  %v4736_v23 = vsel %vm18661_vm15, %v14312_v21, 0 }
 0x41a   : > { %vm18689_vm15 = vcmask 392192   ;;  %vm18711_vm2 = vcmask 326656  }
 0x41b   : > { %18669 = vst [vmem:[#allocation31_spill] sm:$0xff] %v14304_v54  ;;  %v5885_v15 = vpack.c.bf16 %v14304_v54, %v14304_v54  ;;  %v5293_v58 = vpop.permute.xlu0 %5292  ;;  %5018 = vrot.lane.b32.xlu1 %v4686_v47, %s17821_s1  ;;  %v5024_v54 = vor.u32 %v5022_v20, %v4860_v56  ;;  %v4719_v56 = vsel %vm18391_vm3, %v14238_v17, 0 }
 0x41c   : > { %5058 = vrot.lane.b32.xlu2 %v14269_v43, %s18478_s9  ;;  %v5564_v16 = vsel %vm18673_vm13, %v5532_v44, %v5293_v58  ;;  %v18677_v44 = vld [vmem:[#allocation49_spill] sm:$0xff]  ;;  %vm18678_vm13 = vsmask.f32 7424 }
 0x41d   : > { %v5958_v62 = vunpack.c.l.b16 %v5885_v15  ;;  %v4881_v61 = vpop.permute.xlu1 %4880  ;;  %9365 = vmatmul.msk.bf16.gmra.mxu2 %vm18674_vm10, %v5564_v16  ;;  %vm18675_vm10 = vcmask 1046528  }
 0x41e   : > { %v14331_v47 = vpop.permute.xlu2 %5010  ;;  %v5109_v15 = vsel %vm18675_vm10, %v14229_v2, %v14326_v29  ;;  %v5336_v58 = vsel %vm18676_vm6, %v4649_v37, %v4881_v61  ;;  %v14356_v2 = vsel %vm18678_vm13, %v5024_v54, %v14346_v49  ;;  %vm18679_vm10 = vcmask 130048  }
 0x41f   : > { %v5988_v40 = vpack.c.b16 %v5958_v62, %v5957_v12  ;;  %v5374_v61 = vsel %vm18679_vm10, %v5336_v58, %v14226_v59  ;;  %vm18680_vm6 = vcmask 195584   ;;  %vm18681_vm13 = vcmask 261120  }
 0x420   : > { %v5660_v48 = vpop.f32.mrf.mxu2  ;;  %vm18682_vm10 = vcmask 1046528  }
 0x421   : > { %v5734_v16 = vadd.f32 %v5660_v48, %v18677_v44  ;;  %5140 = vrot.lane.b32.xlu0 %v5109_v15, %s18159_s7  ;;  %v6011_v35 = vshrl.u32 %v5988_v40, 16  ;;  %v14368_v15 = vrot.slane %v4736_v23, 1  ;;  %v6248_v44 = vrot.slane %v6246_v34, 1 }
 0x422   : > { %v6014_v58 = vshll.u32 %v5988_v40, 16 }
 0x423   : > { %v5786_v12 = vmul.f32 %v14171_v24, %v5734_v16  ;;  %v5009_v62 = vpop.permute.xlu0 %5008  ;;  %5188 = vrot.lane.b32.xlu1 %v4719_v56, %s18170_s29  ;;  %v14370_v54 = vrot.slane %v6011_v35, 7  ;;  %v5274_v59 = vsel %vm18682_vm10, %v14266_v51, %v14368_v15  ;;  %v6249_v35 = vsel %vm18685_vm1, %v10069_v60, %v6248_v44 }
 0x424   : > { %5224 = vrot.lane.b32.xlu2 %v14356_v2, %s18385_s0  ;;  %v5406_v20 = vsel %vm18680_vm6, %v5374_v61, %v5009_v62  ;;  %vm18684_vm6 = vnez %v17802_v31  ;;  %vm18688_vm10 = vcmask 326656   ;;  %vm18690_vm1 = vcmask 457728  }
 0x425   : > { %v5049_v37 = vpop.permute.xlu1 %5048  ;;  %v5822_v16 = vadd.f32 %v14196_v30, %v5786_v12  ;;  %v6164_v34 = vsel %vm18684_vm6, %v14335_v32, 0  ;;  %v6016_v23 = vor.u32 %v6014_v58, %v14370_v54  ;;  %v4651_v31 = vsel %vm18336_vm9, %v13810_v38, 0 }
 0x426   : > { %v14366_v48 = vpop.permute.xlu2 %5180  ;;  %v5438_v56 = vsel %vm18681_vm13, %v5406_v20, %v5049_v37  ;;  %vm18686_vm13 = vnez %v18129_v45  ;;  %v14397_v20 = vrot.slane %v6164_v34, 1 }
 0x427   : > { %v4671_v12 = vsel %vm18686_vm13, %v14238_v17, 0  ;;  %v14388_v61 = vmax.f32 %v5822_v16, 0.0 }
 0x428   : > { %v5662_v7 = vpop.f32.mrf.mxu2 }
 0x429   : > { %v5735_v62 = vadd.f32 %v5662_v7, %v18683_v50  ;;  %5304 = vrot.lane.b32.xlu0 %v5274_v59, %s18486_s27  ;;  %18687 = vst [vmem:[#allocation33_spill] sm:$0xff] %v14388_v61  ;;  %v5470_v7 = vsel %vm18688_vm10, %v5438_v56, %v14263_v52  ;;  %v14405_v52 = vsel %vm18691_vm4, %v14295_v9, %v6016_v23  ;;  %vm18694_vm10 = vcmask 588800  }
 0x42a   : > { %v5886_v56 = vpack.c.bf16 %v14388_v61, %v14388_v61  ;;  %v6254_v23 = vshll.u32 %v14405_v52, 16 }
 0x42b   : > { %v5787_v51 = vmul.f32 %v14171_v24, %v5735_v62  ;;  %v5179_v50 = vpop.permute.xlu0 %5178  ;;  %6370 = vrot.lane.b32.xlu1 %v6249_v35, %s18489_s28  ;;  %v4940_v62 = vrot.slane %v4671_v12, 1 }
 0x42c   : > { %v5502_v40 = vsel %vm18689_vm15, %v5470_v7, %v5179_v50  ;;  %4892 = vrot.lane.b32.xlu2 %v14269_v43, %s18489_s28  ;;  %vm18693_vm15 = vcmask 523264   ;;  %v6256_v61 = vrot.slane %v6254_v23, 1 }
 0x42d   : > { %v5823_v37 = vadd.f32 %v14196_v30, %v5787_v51  ;;  %v5215_v59 = vpop.permute.xlu1 %5214  ;;  %v5959_v51 = vunpack.c.l.b16 %v5886_v56 }
 0x42e   : > { %v5534_v16 = vsel %vm18690_vm1, %v5502_v40, %v5215_v59  ;;  %v14401_v58 = vpop.permute.xlu2 %4884  ;;  %vm18695_vm1 = vcmask 1046528   ;;  %v18697_v40 = vld [vmem:[#allocation20_spill] sm:$0xff]  ;;  %v18699_v59 = vld [vmem:[#allocation51_spill] sm:$0xff] }
 0x42f   : > { %v14409_v35 = vmax.f32 %v5823_v37, 0.0  ;;  %v5566_v43 = vsel %vm18693_vm15, %v5534_v16, %v14293_v6  ;;  %v6419_v34 = vsel %vm18695_vm1, %v10069_v60, %v14397_v20  ;;  %vm18696_vm4 = vmmov %vm18695_vm1  ;;  %vm18698_vm15 = vnez %v18697_v40 }
 0x430   : > { %9366 = vmatmul.msk.bf16.gmra.mxu2 %vm18694_vm10, %v5566_v43  ;;  %v4941_v9 = vsel %vm18696_vm4, %v14287_v42, %v4940_v62  ;;  %v6180_v37 = vsel %vm18698_vm15, %v14335_v32, 0  ;;  %v4650_v42 = vsel %vm11130_vm7, %v13745_v11, 0  ;;  %vm18700_vm10 = vcmask 64512  }
 0x431   : > { %18692 = vst [vmem:[#allocation35_spill] sm:$0xff] %v14409_v35  ;;  %v5887_v12 = vpack.c.bf16 %v14409_v35, %v14409_v35  ;;  %6450 = vrot.lane.b32.xlu0 %v6419_v34, %s18492_s30  ;;  %vm18701_vm1 = vnez %v18133_v1  ;;  %vm18702_vm4 = vcmask 130048   ;;  %vm18706_vm7 = vcmask 195584  }
 0x433   : > { %v5960_v50 = vunpack.c.l.b16 %v5887_v12  ;;  %v4883_v7 = vpop.permute.xlu0 %4882  ;;  %4972 = vrot.lane.b32.xlu1 %v4941_v9, %s18492_s30  ;;  %v5665_v6 = vpop.f32.mrf.mxu2  ;;  %v6250_v9 = vshrl.u32 %v14335_v32, 16 }
 0x434   : > { %v5736_v16 = vadd.f32 %v5665_v6, %v18699_v59  ;;  %6498 = vrot.lane.b32.xlu2 %v6180_v37, %s17821_s1  ;;  %v5339_v56 = vsel %vm18700_vm10, %v4650_v42, %v4883_v7  ;;  %v4687_v6 = vsel %vm18701_vm1, %v14238_v17, 0  ;;  %v6197_v7 = vsel %vm18684_vm6, %v14405_v52, 0 }
 0x435   : > { %v5989_v43 = vpack.c.b16 %v5960_v50, %v5959_v51  ;;  %v4963_v62 = vpop.permute.xlu1 %4962  ;;  %v6252_v51 = vor.u32 %v6250_v9, %v6248_v44  ;;  %vm18703_vm10 = vsmask.f32 7424 }
 0x436   : > { %v5788_v34 = vmul.f32 %v14171_v24, %v5736_v16  ;;  %v14434_v12 = vpop.permute.xlu2 %5052  ;;  %v5376_v11 = vsel %vm18702_vm4, %v5339_v56, %v4963_v62  ;;  %v18707_v62 = vld [vmem:[#allocation52_spill] sm:$0xff] }
 0x437   : > { %v6019_v35 = vshrl.u32 %v5989_v43, 16  ;;  %v6022_v37 = vshll.u32 %v5989_v43, 16  ;;  %v14449_v23 = vsel %vm18703_vm10, %v6252_v51, %v6256_v61  ;;  %v5408_v42 = vsel %vm18706_vm7, %v5376_v11, %v14331_v47 }
 0x438   : > { %v5824_v59 = vadd.f32 %v14196_v30, %v5788_v34  ;;  %v14462_v34 = vrot.slane %v6197_v7, 1  ;;  %vm18708_vm10 = vcmask 261120   ;;  %v4704_v51 = vsel %vm18686_vm13, %v14312_v21, 0 }
 0x439   : > { %v14440_v50 = vrot.slane %v6019_v35, 7  ;;  %5020 = vrot.lane.b32.xlu0 %v4687_v6, %s17821_s1  ;;  %v18704_v35 = vld [vmem:[#allocation21_spill] sm:$0xff]  ;;  %vm18710_vm7 = vsmask.f32 256 }
 0x43a   : > { %vm18705_vm4 = vnez %v18704_v35 }
 0x43b   : > { %v6024_v16 = vor.u32 %v6022_v37, %v14440_v50  ;;  %v5051_v17 = vpop.permute.xlu0 %5050  ;;  %6538 = vrot.lane.b32.xlu1 %v14449_v23, %s18478_s9  ;;  %v5667_v44 = vpop.f32.mrf.mxu2  ;;  %v6196_v43 = vsel %vm18705_vm4, %v14335_v32, 0  ;;  %v14468_v37 = vmax.f32 %v5824_v59, 0.0 }
 0x43c   : > { %v5737_v56 = vadd.f32 %v5667_v44, %v18707_v62  ;;  %5060 = vrot.lane.b32.xlu2 %v14356_v2, %s18478_s9  ;;  %v5440_v9 = vsel %vm18708_vm10, %v5408_v42, %v5051_v17  ;;  %v6587_v47 = vrot.slane %v6196_v43, 1  ;;  %vm18712_vm10 = vcmask 1046528  }
 0x43d   : > { %v5133_v6 = vpop.permute.xlu1 %5132  ;;  %18709 = vst [vmem:[#allocation37_spill] sm:$0xff] %v14468_v37  ;;  %v14475_v11 = vsel %vm18710_vm7, %v14370_v54, %v6024_v16  ;;  %v5110_v44 = vrot.slane %v4704_v51, 1  ;;  %v5888_v59 = vpack.c.bf16 %v14468_v37, %v14468_v37  ;;  %vm18714_vm13 = vmmov %vm18712_vm10  ;;  %vm18715_vm7 = vcmask 392192  }
 0x43e   : > { %v5789_v46 = vmul.f32 %v14171_v24, %v5737_v56  ;;  %v14471_v55 = vpop.permute.xlu2 %5218  ;;  %v5472_v7 = vsel %vm18711_vm2, %v5440_v9, %v5133_v6  ;;  %v6589_v17 = vsel %vm18712_vm10, %v6587_v47, %v14462_v34  ;;  %v6262_v54 = vshll.u32 %v14475_v11, 16 }
 0x43f   : > { %v5111_v43 = vsel %vm18714_vm13, %v14326_v29, %v5110_v44  ;;  %v6213_v62 = vsel %vm18698_vm15, %v14405_v52, 0  ;;  %vm18716_vm2 = vcmask 457728   ;;  %v6258_v6 = vshrl.u32 %v14405_v52, 16 }
 0x440   : > { %v5825_v2 = vadd.f32 %v14196_v30, %v5789_v46  ;;  %v5504_v46 = vsel %vm18715_vm7, %v5472_v7, %v14366_v48  ;;  %v5192_v51 = vshrl.u32 %v14312_v21, 16  ;;  %v5961_v47 = vunpack.c.l.b16 %v5888_v59 }
 0x441   : > { %6620 = vrot.lane.b32.xlu0 %v6589_v17, %s18159_s7  ;;  %vm18717_vm13 = vcmask 523264   ;;  %v14504_v40 = vrot.slane %v6262_v54, 1  ;;  %vm18718_vm15 = vcmask 588800   ;;  %v6230_v59 = vsel %vm18684_vm6, %v14475_v11, 0 }
 0x442   : > { %v14484_v42 = vmax.f32 %v5825_v2, 0.0  ;;  %v5194_v17 = vor.u32 %v5192_v51, %v14346_v49  ;;  %vm18719_vm10 = vsmask.f32 7424  ;;  %vm18722_vm6 = vcmask 64512  }
 0x443   : > { %v5217_v16 = vpop.permute.xlu0 %5216  ;;  %5142 = vrot.lane.b32.xlu1 %v5111_v43, %s18159_s7  ;;  %v4720_v43 = vsel %vm18701_vm1, %v14312_v21, 0  ;;  %vm18721_vm7 = vmmov %vm18719_vm10 }
 0x444   : > { %18713 = vst [vmem:[#allocation45_spill] sm:$0xff] %v14484_v42  ;;  %v5889_v56 = vpack.c.bf16 %v14484_v42, %v14484_v42  ;;  %v5536_v9 = vsel %vm18716_vm2, %v5504_v46, %v5217_v16  ;;  %6668 = vrot.lane.b32.xlu2 %v6213_v62, %s18170_s29  ;;  %v6260_v16 = vor.u32 %v6258_v6, %v6256_v61  ;;  %v18720_v62 = vld [vmem:[#allocation54_spill] sm:$0xff]  ;;  %v6229_v61 = vsel %vm18705_vm4, %v14405_v52, 0 }
 0x445   : > { %v5297_v29 = vpop.permute.xlu1 %5296  ;;  %v5195_v21 = vsel %vm18721_vm7, %v5194_v17, %v10069_v60  ;;  %v5342_v6 = vsel %vm18722_vm6, %v4651_v31, %v14401_v58  ;;  %vm18723_vm2 = vcmask 130048   ;;  %v6752_v35 = vrot.slane %v6229_v61, 1 }
 0x446   : > { %v5962_v48 = vunpack.c.l.b16 %v5889_v56  ;;  %v14501_v2 = vpop.permute.xlu2 %4966  ;;  %v5568_v7 = vsel %vm18717_vm13, %v5536_v9, %v5297_v29  ;;  %v14517_v54 = vsel %vm18719_vm10, %v6260_v16, %v14504_v40  ;;  %v14531_v29 = vrot.slane %v6230_v59, 1 }
 0x447   : > { %9367 = vmatmul.msk.bf16.gmra.mxu2 %vm18718_vm15, %v5568_v7  ;;  %vm18724_vm4 = vcmask 1046528   ;;  %vm18725_vm13 = vcmask 195584   ;;  %vm18726_vm15 = vnez %v17809_v53  ;;  %vm18729_vm7 = vcmask 261120  }
 0x448   : > { %v5990_v44 = vpack.c.b16 %v5962_v48, %v5961_v47  ;;  %v6754_v38 = vsel %vm18724_vm4, %v6752_v35, %v14531_v29  ;;  %v6165_v58 = vsel %vm18726_vm15, %v14405_v52, 0  ;;  %vm18727_vm10 = vmmov %vm18724_vm4  ;;  %vm18731_vm6 = vcmask 326656  }
 0x449   : > { %5190 = vrot.lane.b32.xlu0 %v4720_v43, %s18170_s29  ;;  %vm18733_vm4 = vcmask 392192  }
 0x44a   : > { %v5670_v46 = vpop.f32.mrf.mxu2  ;;  %v6027_v9 = vshrl.u32 %v5990_v44, 16  ;;  %v6030_v59 = vshll.u32 %v5990_v44, 16 }
 0x44b   : > { %v5738_v56 = vadd.f32 %v5670_v46, %v18720_v62  ;;  %v4965_v49 = vpop.permute.xlu0 %4964  ;;  %6704 = vrot.lane.b32.xlu1 %v14517_v54, %s18385_s0  ;;  %v5275_v62 = vsel %vm18727_vm10, %v14368_v15, %v10069_v60 }
 0x44c   : > { %5226 = vrot.lane.b32.xlu2 %v5195_v21, %s18385_s0  ;;  %v5378_v48 = vsel %vm18723_vm2, %v5342_v6, %v4965_v49  ;;  %v14539_v17 = vrot.slane %v6027_v9, 7  ;;  %v6420_v9 = vrot.slane %v6165_v58, 1  ;;  %vm18732_vm2 = vsmask.f32 256 }
 0x44d   : > { %v5790_v51 = vmul.f32 %v14171_v24, %v5738_v56  ;;  %v5013_v47 = vpop.permute.xlu1 %5012  ;;  %v18728_v56 = vld [vmem:[#allocation53_spill] sm:$0xff] }
 0x44e   : > { %v14537_v7 = vpop.permute.xlu2 %5136  ;;  %v5410_v16 = vsel %vm18725_vm13, %v5378_v48, %v5013_v47  ;;  %v6032_v61 = vor.u32 %v6030_v59, %v14539_v17  ;;  %vm18734_vm13 = vmmov %vm18727_vm10  ;;  %vm18736_vm10 = vnez %v17807_v41 }
 0x44f   : > { %v5826_v43 = vadd.f32 %v14196_v30, %v5790_v51  ;;  %v5442_v31 = vsel %vm18729_vm7, %v5410_v16, %v14434_v12  ;;  %v6198_v16 = vsel %vm18726_vm15, %v14475_v11, 0  ;;  %vm18737_vm7 = vcmask 457728  }
 0x450   : > { %v14568_v35 = vsel %vm18732_vm2, %v14440_v50, %v6032_v61  ;;  %v6181_v50 = vsel %vm18736_vm10, %v14405_v52, 0  ;;  %vm18739_vm2 = vcmask 588800  }
 0x451   : > { %6784 = vrot.lane.b32.xlu0 %v6754_v38, %s18486_s27  ;;  %v14559_v44 = vmax.f32 %v5826_v43, 0.0 }
 0x452   : > { %v5672_v46 = vpop.f32.mrf.mxu2 }
 0x453   : > { %v5739_v49 = vadd.f32 %v5672_v46, %v18728_v56  ;;  %v5135_v21 = vpop.permute.xlu0 %5134  ;;  %5306 = vrot.lane.b32.xlu1 %v5275_v62, %s18486_s27  ;;  %18730 = vst [vmem:[#allocation44_spill] sm:$0xff] %v14559_v44  ;;  %v5890_v38 = vpack.c.bf16 %v14559_v44, %v14559_v44  ;;  %v6270_v46 = vshll.u32 %v14568_v35, 16  ;;  %v14593_v56 = vrot.slane %v6198_v16, 1 }
 0x454   : > { %6372 = vrot.lane.b32.xlu2 %v14449_v23, %s18489_s28  ;;  %v5474_v15 = vsel %vm18731_vm6, %v5442_v31, %v5135_v21  ;;  %v6421_v23 = vsel %vm18734_vm13, %v14397_v20, %v6420_v9  ;;  %vm18738_vm6 = vcmask 523264  }
 0x455   : > { %v5791_v6 = vmul.f32 %v14171_v24, %v5739_v49  ;;  %v5183_v51 = vpop.permute.xlu1 %5182  ;;  %v5963_v49 = vunpack.c.l.b16 %v5890_v38  ;;  %v18742_v38 = vld [vmem:[#allocation55_spill] sm:$0xff] }
 0x456   : > { %v14563_v47 = vpop.permute.xlu2 %5300  ;;  %v5506_v12 = vsel %vm18733_vm4, %v5474_v15, %v5183_v51  ;;  %v6266_v15 = vshrl.u32 %v14475_v11, 16  ;;  %v4652_v51 = vsel %vm18353_vm0, %v13900_v5, 0  ;;  %vm18740_vm4 = vmmov %vm18734_vm13  ;;  %vm18741_vm13 = vcmask 64512  }
 0x457   : > { %v5827_v48 = vadd.f32 %v14196_v30, %v5791_v6  ;;  %v5538_v20 = vsel %vm18737_vm7, %v5506_v12, %v14471_v55  ;;  %v14599_v55 = vrot.slane %v6270_v46, 1  ;;  %v6591_v12 = vsel %vm18740_vm4, %v14462_v34, %v14593_v56 }
 0x458   : > { %v6214_v5 = vsel %vm18736_vm10, %v14475_v11, 0  ;;  %vm18743_vm7 = vsmask.f32 7424  ;;  %vm18747_vm4 = vcmask 261120  }
 0x459   : > { %v14575_v43 = vmax.f32 %v5827_v48, 0.0  ;;  %6452 = vrot.lane.b32.xlu0 %v6421_v23, %s18492_s30 }
 0x45b   : > { %18735 = vst [vmem:[#allocation47_spill] sm:$0xff] %v14575_v43  ;;  %v5891_v58 = vpack.c.bf16 %v14575_v43, %v14575_v43  ;;  %v5299_v59 = vpop.permute.xlu0 %5298  ;;  %6500 = vrot.lane.b32.xlu1 %v6181_v50, %s17821_s1  ;;  %v6268_v50 = vor.u32 %v6266_v15, %v14504_v40 }
 0x45c   : > { %6540 = vrot.lane.b32.xlu2 %v14517_v54, %s18478_s9  ;;  %v5570_v62 = vsel %vm18738_vm6, %v5538_v20, %v5299_v59  ;;  %vm18744_vm6 = vnez %v17815_v19 }
 0x45d   : > { %v5964_v21 = vunpack.c.l.b16 %v5891_v58  ;;  %v4887_v61 = vpop.permute.xlu1 %4886  ;;  %9368 = vmatmul.msk.bf16.gmra.mxu2 %vm18739_vm2, %v5570_v62  ;;  %v6231_v58 = vsel %vm18726_vm15, %v14568_v35, 0  ;;  %v14621_v46 = vsel %vm18743_vm7, %v6268_v50, %v14599_v55  ;;  %v6166_v40 = vsel %vm18744_vm6, %v14475_v11, 0 }
 0x45e   : > { %v14596_v31 = vpop.permute.xlu2 %5016  ;;  %v5345_v23 = vsel %vm18741_vm13, %v4652_v51, %v4887_v61  ;;  %vm18745_vm15 = vcmask 130048   ;;  %v14630_v62 = vrot.slane %v6231_v58, 1  ;;  %vm18746_vm2 = vcmask 195584  }
 0x45f   : > { %v5991_v6 = vpack.c.b16 %v5964_v21, %v5963_v49  ;;  %v5380_v53 = vsel %vm18745_vm15, %v5345_v23, %v14501_v2  ;;  %v14635_v15 = vrot.slane %v6166_v40, 1  ;;  %vm18748_vm13 = vcmask 1046528  }
 0x460   : > { %v5675_v48 = vpop.f32.mrf.mxu2  ;;  %v6756_v2 = vsel %vm18748_vm13, %v14531_v29, %v14630_v62  ;;  %vm18750_vm7 = vmmov %vm18748_vm13  ;;  %vm18752_vm15 = vcmask 326656   ;;  %vm18755_vm13 = vsmask.f32 256 }
 0x461   : > { %v5740_v16 = vadd.f32 %v5675_v48, %v18742_v38  ;;  %6622 = vrot.lane.b32.xlu0 %v6591_v12, %s18159_s7  ;;  %v6035_v59 = vshrl.u32 %v5991_v6, 16  ;;  %v6038_v23 = vshll.u32 %v5991_v6, 16  ;;  %v6423_v58 = vsel %vm18750_vm7, %v6420_v9, %v14635_v15 }
 0x462   : > { %vm18757_vm7 = vcmask 523264  }
 0x463   : > { %v5792_v20 = vmul.f32 %v14171_v24, %v5740_v16  ;;  %v5015_v34 = vpop.permute.xlu0 %5014  ;;  %6670 = vrot.lane.b32.xlu1 %v6214_v5, %s18170_s29  ;;  %v14637_v51 = vrot.slane %v6035_v59, 7  ;;  %v18749_v16 = vld [vmem:[#allocation56_spill] sm:$0xff]  ;;  %v6199_v5 = vsel %vm18744_vm6, %v14568_v35, 0 }
 0x464   : > { %6706 = vrot.lane.b32.xlu2 %v14621_v46, %s18385_s0  ;;  %v5412_v49 = vsel %vm18746_vm2, %v5380_v53, %v5015_v34  ;;  %vm18753_vm2 = vcmask 392192  }
 0x465   : > { %v5055_v21 = vpop.permute.xlu1 %5054  ;;  %v5828_v48 = vadd.f32 %v14196_v30, %v5792_v20  ;;  %v6040_v59 = vor.u32 %v6038_v23, %v14637_v51 }
 0x466   : > { %v14633_v61 = vpop.permute.xlu2 %5186  ;;  %v5444_v12 = vsel %vm18747_vm4, %v5412_v49, %v5055_v21  ;;  %vm18754_vm4 = vcmask 457728  }
 0x467   : > { %v14652_v20 = vmax.f32 %v5828_v48, 0.0  ;;  %v5476_v29 = vsel %vm18752_vm15, %v5444_v12, %v14537_v7  ;;  %v14665_v48 = vrot.slane %v6199_v5, 1  ;;  %vm18758_vm15 = vcmask 588800  }
 0x468   : > { %v5677_v38 = vpop.f32.mrf.mxu2 }
 0x469   : > { %v5741_v50 = vadd.f32 %v5677_v38, %v18749_v16  ;;  %6786 = vrot.lane.b32.xlu0 %v6756_v2, %s18486_s27  ;;  %18751 = vst [vmem:[#allocation48_spill] sm:$0xff] %v14652_v20  ;;  %v14669_v38 = vsel %vm18755_vm13, %v14539_v17, %v6040_v59  ;;  %v18761_v59 = vld [vmem:[#allocation57_spill] sm:$0xff]  ;;  %vm18762_vm13 = vcmask 64512  }
 0x46a   : > { %v6278_v17 = vshll.u32 %v14669_v38, 16 }
 0x46b   : > { %v5793_v34 = vmul.f32 %v14171_v24, %v5741_v50  ;;  %v5185_v40 = vpop.permute.xlu0 %5184  ;;  %6374 = vrot.lane.b32.xlu1 %v14517_v54, %s18489_s28  ;;  %v5892_v54 = vpack.c.bf16 %v14652_v20, %v14652_v20 }
 0x46c   : > { %v5508_v6 = vsel %vm18753_vm2, %v5476_v29, %v5185_v40  ;;  %6454 = vrot.lane.b32.xlu2 %v6423_v58, %s18492_s30  ;;  %vm18759_vm2 = vnez %v17823_v3  ;;  %v6232_v40 = vsel %vm18744_vm6, %v14669_v38, 0  ;;  %vm18763_vm6 = vcmask 130048  }
 0x46d   : > { %v5829_v9 = vadd.f32 %v14196_v30, %v5793_v34  ;;  %v5221_v53 = vpop.permute.xlu1 %5220  ;;  %v6182_v2 = vsel %vm18759_vm2, %v14475_v11, 0  ;;  %v5965_v16 = vunpack.c.l.b16 %v5892_v54  ;;  %v6215_v19 = vsel %vm18759_vm2, %v14568_v35, 0 }
 0x46e   : > { %v5540_v49 = vsel %vm18754_vm4, %v5508_v6, %v5221_v53  ;;  %v14663_v21 = vpop.permute.xlu2 %4890  ;;  %vm18760_vm4 = vcmask 1046528   ;;  %v4653_v6 = vsel %vm18379_vm11, %v13984_v36, 0  ;;  %vm18778_vm11 = vcmask 588800  }
 0x46f   : > { %v14673_v7 = vmax.f32 %v5829_v9, 0.0  ;;  %v5572_v12 = vsel %vm18757_vm7, %v5540_v49, %v14563_v47  ;;  %v6593_v5 = vsel %vm18760_vm4, %v14593_v56, %v14665_v48  ;;  %v6274_v56 = vshrl.u32 %v14568_v35, 16 }
 0x470   : > { %9369 = vmatmul.msk.bf16.gmra.mxu2 %vm18758_vm15, %v5572_v12  ;;  %v14703_v12 = vrot.slane %v6278_v17, 1  ;;  %vm18764_vm7 = vsmask.f32 7424  ;;  %vm18765_vm15 = vmmov %vm18760_vm4  ;;  %vm18766_vm4 = vnez %v18188_v22 }
 0x471   : > { %18756 = vst [vmem:[#allocation49_spill] sm:$0xff] %v14673_v7  ;;  %v5893_v23 = vpack.c.bf16 %v14673_v7, %v14673_v7  ;;  %6502 = vrot.lane.b32.xlu0 %v6182_v2, %s17821_s1  ;;  %v14705_v2 = vrot.slane %v6232_v40, 1 }
 0x473   : > { %v5966_v50 = vunpack.c.l.b16 %v5893_v23  ;;  %v4889_v58 = vpop.permute.xlu0 %4888  ;;  %6542 = vrot.lane.b32.xlu1 %v14621_v46, %s18478_s9  ;;  %v5680_v47 = vpop.f32.mrf.mxu2  ;;  %v6276_v23 = vor.u32 %v6274_v56, %v14599_v55  ;;  %v6758_v55 = vsel %vm18765_vm15, %v14630_v62, %v14705_v2 }
 0x474   : > { %v5742_v34 = vadd.f32 %v5680_v47, %v18761_v59  ;;  %6624 = vrot.lane.b32.xlu2 %v6593_v5, %s18159_s7  ;;  %v5348_v53 = vsel %vm18762_vm13, %v4653_v6, %v4889_v58  ;;  %v6167_v5 = vsel %vm18766_vm4, %v14568_v35, 0  ;;  %vm18767_vm13 = vcmask 195584  }
 0x475   : > { %v5992_v29 = vpack.c.b16 %v5966_v50, %v5965_v16  ;;  %v4969_v9 = vpop.permute.xlu1 %4968  ;;  %v14716_v58 = vsel %vm18764_vm7, %v6276_v23, %v14703_v12  ;;  %vm18771_vm7 = vcmask 326656  }
 0x476   : > { %v5794_v49 = vmul.f32 %v14171_v24, %v5742_v34  ;;  %v14700_v54 = vpop.permute.xlu2 %5058  ;;  %v5382_v16 = vsel %vm18763_vm6, %v5348_v53, %v4969_v9  ;;  %v18768_v34 = vld [vmem:[#allocation58_spill] sm:$0xff]  ;;  %vm18769_vm6 = vcmask 261120  }
 0x477   : > { %v6043_v36 = vshrl.u32 %v5992_v29, 16  ;;  %v5414_v59 = vsel %vm18767_vm13, %v5382_v16, %v14596_v31  ;;  %v6046_v23 = vshll.u32 %v5992_v29, 16  ;;  %vm18773_vm13 = vcmask 392192  }
 0x478   : > { %v5830_v50 = vadd.f32 %v14196_v30, %v5794_v49 }
 0x479   : > { %6672 = vrot.lane.b32.xlu0 %v6215_v19, %s18170_s29  ;;  %v14730_v6 = vrot.slane %v6043_v36, 7  ;;  %v14738_v19 = vrot.slane %v6167_v5, 1 }
 0x47a   : > { %v14733_v49 = vmax.f32 %v5830_v50, 0.0 }
 0x47b   : > { %v5057_v17 = vpop.permute.xlu0 %5056  ;;  %6708 = vrot.lane.b32.xlu1 %v14716_v58, %s18385_s0  ;;  %v5682_v47 = vpop.f32.mrf.mxu2 }
 0x47c   : > { %v5743_v40 = vadd.f32 %v5682_v47, %v18768_v34  ;;  %6788 = vrot.lane.b32.xlu2 %v6758_v55, %s18486_s27  ;;  %v5446_v9 = vsel %vm18769_vm6, %v5414_v59, %v5057_v17  ;;  %18770 = vst [vmem:[#allocation50_spill] sm:$0xff] %v14733_v49  ;;  %v6048_v47 = vor.u32 %v6046_v23, %v14730_v6 }
 0x47d   : > { %v5139_v53 = vpop.permute.xlu1 %5138  ;;  %v5894_v36 = vpack.c.bf16 %v14733_v49, %v14733_v49  ;;  %v6425_v17 = vsel %vm18765_vm15, %v14635_v15, %v14738_v19  ;;  %vm18774_vm6 = vnez %v17832_v13  ;;  %vm18776_vm15 = vsmask.f32 256 }
 0x47e   : > { %v5795_v62 = vmul.f32 %v14171_v24, %v5743_v40  ;;  %v14736_v56 = vpop.permute.xlu2 %5224  ;;  %v5478_v16 = vsel %vm18771_vm7, %v5446_v9, %v5139_v53  ;;  %v6183_v5 = vsel %vm18774_vm6, %v14568_v35, 0  ;;  %vm18775_vm7 = vcmask 457728  }
 0x47f   : > { %v5510_v29 = vsel %vm18773_vm13, %v5478_v16, %v14633_v61  ;;  %v14767_v61 = vsel %vm18776_vm15, %v14637_v51, %v6048_v47  ;;  %v5967_v40 = vunpack.c.l.b16 %v5894_v36  ;;  %vm18777_vm13 = vcmask 523264   ;;  %v18780_v47 = vld [vmem:[#allocation41_spill] sm:$0xff] }
 0x480   : > { %v5831_v31 = vadd.f32 %v14196_v30, %v5795_v62  ;;  %v6286_v16 = vshll.u32 %v14767_v61, 16  ;;  %vm18782_vm15 = vcmask 130048  }
 0x481   : > { %6376 = vrot.lane.b32.xlu0 %v14621_v46, %s18489_s28  ;;  %v6200_v46 = vsel %vm18766_vm4, %v14669_v38, 0 }
 0x482   : > { %v14747_v50 = vmax.f32 %v5831_v31, 0.0  ;;  %v14772_v23 = vrot.slane %v6200_v46, 1  ;;  %v4654_v46 = vsel %vm18391_vm3, %v14047_v28, 0  ;;  %vm18822_vm3 = vcmask 261120  }
 0x483   : > { %v5223_v55 = vpop.permute.xlu0 %5222  ;;  %6456 = vrot.lane.b32.xlu1 %v6425_v17, %s18492_s30 }
 0x484   : > { %18772 = vst [vmem:[#allocation20_spill] sm:$0xff] %v14747_v50  ;;  %v5895_v59 = vpack.c.bf16 %v14747_v50, %v14747_v50  ;;  %v5542_v34 = vsel %vm18775_vm7, %v5510_v29, %v5223_v55  ;;  %6504 = vrot.lane.b32.xlu2 %v6183_v5, %s17821_s1  ;;  %vm18779_vm7 = vcmask 1046528   ;;  %v6216_v29 = vsel %vm18774_vm6, %v14669_v38, 0 }
 0x485   : > { %v5303_v15 = vpop.permute.xlu1 %5302  ;;  %v6595_v51 = vsel %vm18779_vm7, %v14665_v48, %v14772_v23  ;;  %v6233_v5 = vsel %vm18766_vm4, %v14767_v61, 0  ;;  %v6282_v48 = vshrl.u32 %v14669_v38, 16  ;;  %vm18783_vm4 = vsmask.f32 7424 }
 0x486   : > { %v5968_v9 = vunpack.c.l.b16 %v5895_v59  ;;  %v5574_v53 = vsel %vm18777_vm13, %v5542_v34, %v5303_v15  ;;  %v14770_v62 = vpop.permute.xlu2 %4892  ;;  %v14794_v34 = vrot.slane %v6286_v16, 1  ;;  %v14803_v28 = vrot.slane %v6233_v5, 1  ;;  %v18787_v5 = vld [vmem:[#allocation25_spill] sm:$0xff] }
 0x487   : > { %9370 = vmatmul.msk.bf16.gmra.mxu2 %vm18778_vm11, %v5574_v53  ;;  %vm18781_vm11 = vcmask 64512   ;;  %vm18784_vm13 = vcmask 195584   ;;  %vm18785_vm7 = vnez %v18483_v63 }
 0x488   : > { %v5993_v31 = vpack.c.b16 %v5968_v9, %v5967_v40  ;;  %v5351_v15 = vsel %vm18781_vm11, %v4654_v46, %v14663_v21  ;;  %vm18786_vm11 = vcmask 1046528  }
 0x489   : > { %6544 = vrot.lane.b32.xlu0 %v14716_v58, %s18478_s9 }
 0x48a   : > { %v5685_v17 = vpop.f32.mrf.mxu2  ;;  %v6051_v59 = vshrl.u32 %v5993_v31, 16 }
 0x48b   : > { %v5744_v36 = vadd.f32 %v5685_v17, %v18780_v47  ;;  %v4971_v55 = vpop.permute.xlu0 %4970  ;;  %6626 = vrot.lane.b32.xlu1 %v6595_v51, %s18159_s7  ;;  %v6284_v17 = vor.u32 %v6282_v48, %v14703_v12  ;;  %v6054_v12 = vshll.u32 %v5993_v31, 16  ;;  %v5922_v31 = vld [vmem:[%s18789_s10 + $0x20] sm:$0xf] }
 0x48c   : > { %6674 = vrot.lane.b32.xlu2 %v6216_v29, %s18170_s29  ;;  %v5384_v22 = vsel %vm18782_vm15, %v5351_v15, %v4971_v55  ;;  %v14805_v51 = vrot.slane %v6051_v59, 7  ;;  %v6760_v29 = vsel %vm18786_vm11, %v14705_v2, %v14803_v28  ;;  %vm18788_vm15 = vcmask 261120  }
 0x48d   : > { %v5796_v40 = vmul.f32 %v14171_v24, %v5744_v36  ;;  %v5019_v9 = vpop.permute.xlu1 %5018  ;;  %v14809_v16 = vsel %vm18783_vm4, %v6284_v17, %v14794_v34  ;;  %v6168_v36 = vsel %vm18785_vm7, %v14669_v38, 0  ;;  %vm18791_vm4 = vcmask 326656  }
 0x48e   : > { %v14800_v53 = vpop.permute.xlu2 %6498  ;;  %v5416_v21 = vsel %vm18784_vm13, %v5384_v22, %v5019_v9  ;;  %v6056_v48 = vor.u32 %v6054_v12, %v14805_v51  ;;  %v7104_v12 = vunpack.c.l.b16 %v5922_v31  ;;  %vm18792_vm13 = vsmask.f32 256 }
 0x48f   : > { %v5832_v47 = vadd.f32 %v14196_v30, %v5796_v40  ;;  %v5448_v15 = vsel %vm18788_vm15, %v5416_v21, %v14700_v54  ;;  %v14828_v40 = vrot.slane %v6168_v36, 1  ;;  %vm18793_vm11 = vcmask 392192  }
 0x490   : > { %v7109_v21 = vpack.c.b16 %v7104_v12, %v7104_v12  ;;  %vm18794_vm15 = vcmask 1046528  }
 0x491   : > { %6710 = vrot.lane.b32.xlu0 %v14809_v16, %s18385_s0  ;;  %v14833_v2 = vmax.f32 %v5832_v47, 0.0  ;;  %v6427_v47 = vsel %vm18794_vm15, %v14738_v19, %v14828_v40  ;;  %vm18799_vm15 = vcmask 588800  }
 0x492   : > { %v5687_v55 = vpop.f32.mrf.mxu2 }
 0x493   : > { %v5745_v46 = vadd.f32 %v5687_v55, %v18787_v5  ;;  %v5141_v59 = vpop.permute.xlu0 %5140  ;;  %6790 = vrot.lane.b32.xlu1 %v6760_v29, %s18486_s27  ;;  %18790 = vst [vmem:[#allocation51_spill] sm:$0xff] %v14833_v2  ;;  %v6184_v5 = vsel %vm18494_vm14, %v14669_v38, 0 }
 0x494   : > { %6378 = vrot.lane.b32.xlu2 %v14716_v58, %s18489_s28  ;;  %v5480_v22 = vsel %vm18791_vm4, %v5448_v15, %v5141_v59  ;;  %v14842_v58 = vsel %vm18792_vm13, %v14730_v6, %v6056_v48  ;;  %vm18796_vm4 = vcmask 1043456   ;;  %vm18797_vm13 = vcmask 457728  }
 0x495   : > { %v5797_v9 = vmul.f32 %v14171_v24, %v5745_v46  ;;  %v5189_v17 = vpop.permute.xlu1 %5188  ;;  %v5896_v24 = vpack.c.bf16 %v14833_v2, %v14833_v2  ;;  %v7147_v6 = vsel %vm18796_vm4, %v7109_v21, 0  ;;  %v6294_v48 = vshll.u32 %v14842_v58, 16 }
 0x496   : > { %v14837_v55 = vpop.permute.xlu2 %5060  ;;  %v5512_v36 = vsel %vm18793_vm11, %v5480_v22, %v5189_v17  ;;  %7152 = vmatpush.bf16.msra.mxu3 %v7147_v6  ;;  %vm18798_vm11 = vcmask 523264   ;;  %vm18800_vm4 = vcmask 1046528   ;;  %v18801_v6 = vld [vmem:[#allocation59_spill] sm:$0xff]  ;;  %v6298_v7 = vshrl.u32 %v14842_v58, 16 }
 0x497   : > { %v5833_v54 = vadd.f32 %v14196_v30, %v5797_v9  ;;  %v6201_v30 = vsel %vm18785_vm7, %v14767_v61, 0  ;;  %v5544_v59 = vsel %vm18797_vm13, %v5512_v36, %v14736_v56  ;;  %v9603_v9 = vld [vmem:[%s18789_s10 + $0x18] sm:$0xff]  ;;  %v5969_v22 = vunpack.c.l.b16 %v5896_v24 }
 0x498   : > { %v14869_v31 = vrot.slane %v6201_v30, 1  ;;  %v6290_v36 = vshrl.u32 %v14767_v61, 16  ;;  %vm18802_vm13 = vsmask.f32 7424 }
 0x499   : > { %v14850_v29 = vmax.f32 %v5833_v54, 0.0  ;;  %6458 = vrot.lane.b32.xlu0 %v6427_v47, %s18492_s30  ;;  %v9602_v54 = vld [vmem:[%s18789_s10 + $0x10] sm:$0xff]  ;;  %v14883_v47 = vrot.slane %v6294_v48, 1 }
 0x49a   : > { %7153 = vmatpush.bf16.msra.mxu3 %v9603_v9  ;;  %v6597_v24 = vsel %vm18800_vm4, %v14772_v23, %v14869_v31  ;;  %v14900_v23 = vld [vmem:[%s18638_s5] ss:$0 sm:$0xff] }
 0x49b   : > { %18795 = vst [vmem:[#allocation21_spill] sm:$0xff] %v14850_v29  ;;  %v5897_v19 = vpack.c.bf16 %v14850_v29, %v14850_v29  ;;  %v5305_v46 = vpop.permute.xlu0 %5304  ;;  %6506 = vrot.lane.b32.xlu1 %v6184_v5, %s17821_s1 }
 0x49c   : > { %v5576_v15 = vsel %vm18798_vm11, %v5544_v59, %v5305_v46  ;;  %6546 = vrot.lane.b32.xlu2 %v14809_v16, %s18478_s9  ;;  %v6234_v46 = vsel %vm18785_vm7, %v14842_v58, 0  ;;  %v6217_v59 = vsel %vm18494_vm14, %v14767_v61, 0  ;;  %vm18803_vm7 = vnez %v18504_v57  ;;  %vm18804_vm11 = vmmov %vm18800_vm4 }
 0x49d   : > { %v5970_v17 = vunpack.c.l.b16 %v5897_v19  ;;  %v14874_v12 = vpop.permute.xlu1 %6370  ;;  %9371 = vmatmul.msk.bf16.gmra.mxu2 %vm18799_vm15, %v5576_v15  ;;  %v6292_v19 = vor.u32 %v6290_v36, %v14794_v34  ;;  %v14912_v34 = vrot.slane %v6234_v46, 1  ;;  %vm18807_vm15 = vmmov %vm18800_vm4  ;;  %vm18808_vm4 = vsmask.f32 256 }
 0x49e   : > { %v14877_v56 = vpop.permute.xlu2 %6668  ;;  %7154 = vmatpush.bf16.msra.mxu3 %v9602_v54  ;;  %v4655_v57 = vsel %vm18701_vm1, %v14128_v0, 0 }
 0x49f   : > { %v5994_v21 = vpack.c.b16 %v5970_v17, %v5969_v22  ;;  %v14908_v63 = vsel %vm18802_vm13, %v6292_v19, %v14883_v47  ;;  %v6169_v22 = vsel %vm18803_vm7, %v14767_v61, 0  ;;  %v9601_v17 = vld [vmem:[%s18789_s10 + $0x8] sm:$0xff]  ;;  %v6762_v46 = vsel %vm18804_vm11, %v14803_v28, %v14912_v34 }
 0x4a0   : > { %v5690_v30 = vpop.f32.mrf.mxu2  ;;  %vm18810_vm13 = vnez %v18229_v25 }
 0x4a1   : > { %v5746_v5 = vadd.f32 %v5690_v30, %v18801_v6  ;;  %6628 = vrot.lane.b32.xlu0 %v6597_v24, %s18159_s7  ;;  %v6059_v48 = vshrl.u32 %v5994_v21, 16  ;;  %v14929_v24 = vld [vmem:[%s18644_s6] ss:$0 sm:$0xff] }
 0x4a2   : > { %7155 = vmatpush.bf16.msra.mxu3 %v9601_v17  ;;  %v18805_v17 = vld [vmem:[#allocation60_spill] sm:$0xff] }
 0x4a3   : > { %v5798_v15 = vmul.f32 %v14900_v23, %v5746_v5  ;;  %v14903_v9 = vpop.permute.xlu0 %6450  ;;  %6676 = vrot.lane.b32.xlu1 %v6217_v59, %s18170_s29  ;;  %v14924_v30 = vrot.slane %v6059_v48, 7  ;;  %v14932_v5 = vrot.slane %v6169_v22, 1  ;;  %v9600_v59 = vld [vmem:[%s18789_s10] sm:$0xff]  ;;  %v6062_v48 = vshll.u32 %v5994_v21, 16 }
 0x4a4   : > { %6712 = vrot.lane.b32.xlu2 %v14908_v63, %s18385_s0  ;;  %v6202_v21 = vsel %vm18803_vm7, %v14842_v58, 0 }
 0x4a5   : > { %v14920_v54 = vpop.permute.xlu1 %4972  ;;  %v5834_v6 = vadd.f32 %v14929_v24, %v5798_v15  ;;  %v6064_v42 = vor.u32 %v6062_v48, %v14924_v30  ;;  %v6429_v28 = vsel %vm18807_vm15, %v14828_v40, %v14932_v5  ;;  %v14966_v40 = vrot.slane %v6202_v21, 1 }
 0x4a6   : > { %v14922_v36 = vpop.permute.xlu2 %5226  ;;  %7156 = vmatpush.bf16.msra.mxu3 %v9600_v59  ;;  %v6185_v48 = vsel %vm18810_vm13, %v14767_v61, 0  ;;  %vm18813_vm15 = vcmask 130048  }
 0x4a7   : > { %v14943_v15 = vmax.f32 %v5834_v6, 0.0  ;;  %v6599_v21 = vsel %vm18804_vm11, %v14869_v31, %v14966_v40  ;;  %v6218_v31 = vsel %vm18810_vm13, %v14842_v58, 0 }
 0x4a8   : > { %v5692_v19 = vpop.f32.mrf.mxu2 }
 0x4a9   : > { %v5747_v37 = vadd.f32 %v5692_v19, %v18805_v17  ;;  %6792 = vrot.lane.b32.xlu0 %v6762_v46, %s18486_s27  ;;  %18806 = vst [vmem:[#allocation52_spill] sm:$0xff] %v14943_v15 }
 0x4ab   : > { %v5799_v22 = vmul.f32 %v14900_v23, %v5747_v37  ;;  %v5021_v44 = vpop.permute.xlu0 %5020  ;;  %6380 = vrot.lane.b32.xlu1 %v14809_v16, %s18489_s28  ;;  %v14960_v37 = vsel %vm18808_vm4, %v14805_v51, %v6064_v42  ;;  %v5898_v16 = vpack.c.bf16 %v14943_v15, %v14943_v15  ;;  %v18811_v15 = vld [vmem:[#allocation29_spill] sm:$0xff]  ;;  %vm18814_vm4 = vsmask.f32 7424 }
 0x4ac   : > { %6460 = vrot.lane.b32.xlu2 %v6429_v28, %s18492_s30 }
 0x4ad   : > { %v5835_v19 = vadd.f32 %v14929_v24, %v5799_v22  ;;  %v6539_v6 = vpop.permute.xlu1 %6538  ;;  %v6302_v22 = vshll.u32 %v14960_v37, 16  ;;  %v5971_v42 = vunpack.c.l.b16 %v5898_v16 }
 0x4ae   : > { %v14956_v46 = vpop.permute.xlu2 %6372 }
 0x4af   : > { %v14964_v59 = vmax.f32 %v5835_v19, 0.0  ;;  %v14989_v49 = vrot.slane %v6302_v22, 1 }
 0x4b1   : > { %18809 = vst [vmem:[#allocation54_spill] sm:$0xff] %v14964_v59  ;;  %v5899_v17 = vpack.c.bf16 %v14964_v59, %v14964_v59  ;;  %6508 = vrot.lane.b32.xlu0 %v6185_v48, %s17821_s1  ;;  %v6235_v48 = vsel %vm18803_vm7, %v14960_v37, 0  ;;  %vm18812_vm7 = vcmask 64512  }
 0x4b2   : > { %v14991_v50 = vrot.slane %v6235_v48, 1  ;;  %vm18817_vm1 = vmmov %vm18812_vm7 }
 0x4b3   : > { %v5972_v51 = vunpack.c.l.b16 %v5899_v17  ;;  %v6621_v28 = vpop.permute.xlu0 %6620  ;;  %6548 = vrot.lane.b32.xlu1 %v14908_v63, %s18478_s9  ;;  %v5695_v19 = vpop.f32.mrf.mxu2  ;;  %v5354_v0 = vsel %vm18817_vm1, %v4655_v57, %v14770_v62 }
 0x4b4   : > { %v5748_v43 = vadd.f32 %v5695_v19, %v18811_v15  ;;  %6630 = vrot.lane.b32.xlu2 %v6599_v21, %s18159_s7  ;;  %v6300_v15 = vor.u32 %v6298_v7, %v14883_v47  ;;  %v18815_v7 = vld [vmem:[#allocation30_spill] sm:$0xff]  ;;  %v5386_v48 = vsel %vm18813_vm15, %v5354_v0, %v14920_v54 }
 0x4b5   : > { %v5995_v59 = vpack.c.b16 %v5972_v51, %v5971_v42  ;;  %v5143_v16 = vpop.permute.xlu1 %5142  ;;  %vm18816_vm11 = vnez %v18815_v7 }
 0x4b6   : > { %v5800_v17 = vmul.f32 %v14900_v23, %v5748_v43  ;;  %v14986_v20 = vpop.permute.xlu2 %6540  ;;  %v6817_v43 = vsel %vm18812_vm7, 0, %v14874_v12  ;;  %v15008_v19 = vsel %vm18814_vm4, %v6300_v15, %v14989_v49  ;;  %v6170_v47 = vsel %vm18816_vm11, %v14842_v58, 0 }
 0x4b7   : > { %v6067_v42 = vshrl.u32 %v5995_v59, 16  ;;  %v6864_v22 = vsel %vm18813_vm15, %v6817_v43, %v14903_v9  ;;  %vm18818_vm7 = vcmask 1046528   ;;  %vm18820_vm4 = vcmask 195584   ;;  %vm18824_vm15 = vmmov %vm18822_vm3 }
 0x4b8   : > { %v5836_v51 = vadd.f32 %v14929_v24, %v5800_v17  ;;  %v6764_v9 = vsel %vm18818_vm7, %v14912_v34, %v14991_v50  ;;  %v18819_v17 = vld [vmem:[#allocation61_spill] sm:$0xff]  ;;  %v5418_v62 = vsel %vm18820_vm4, %v5386_v48, %v5021_v44  ;;  %vm18821_vm1 = vmmov %vm18820_vm4  ;;  %v15029_v2 = vrot.slane %v6170_v47, 1 }
 0x4b9   : > { %6678 = vrot.lane.b32.xlu0 %v6218_v31, %s18170_s29  ;;  %v15024_v15 = vrot.slane %v6067_v42, 7  ;;  %v6896_v57 = vsel %vm18821_vm1, %v6864_v22, %v14800_v53  ;;  %vm18823_vm7 = vcmask 326656   ;;  %v5450_v44 = vsel %vm18824_vm15, %v5418_v62, %v14837_v55 }
 0x4ba   : > { %v6928_v29 = vsel %vm18822_vm3, %v6896_v57, %v6539_v6  ;;  %v15032_v34 = vmax.f32 %v5836_v51, 0.0  ;;  %vm18825_vm4 = vmmov %vm18823_vm7  ;;  %vm18826_vm3 = vcmask 1046528   ;;  %vm18827_vm1 = vcmask 392192  }
 0x4bb   : > { %v5191_v12 = vpop.permute.xlu0 %5190  ;;  %6714 = vrot.lane.b32.xlu1 %v15008_v19, %s18385_s0  ;;  %v5697_v21 = vpop.f32.mrf.mxu2  ;;  %v6960_v42 = vsel %vm18823_vm7, %v6928_v29, %v6621_v28  ;;  %v5482_v22 = vsel %vm18825_vm4, %v5450_v44, %v5143_v16  ;;  %v6431_v6 = vsel %vm18826_vm3, %v14932_v5, %v15029_v2  ;;  %vm18828_vm7 = vmmov %vm18827_vm1  ;;  %vm18829_vm15 = vcmask 457728   ;;  %v18837_v44 = vld [vmem:[#allocation63_spill] sm:$0xff] }
 0x4bc   : > { %v5749_v31 = vadd.f32 %v5697_v21, %v18819_v17  ;;  %6794 = vrot.lane.b32.xlu2 %v6764_v9, %s18486_s27  ;;  %v6070_v21 = vshll.u32 %v5995_v59, 16  ;;  %v5900_v59 = vpack.c.bf16 %v15032_v34, %v15032_v34  ;;  %v5514_v29 = vsel %vm18827_vm1, %v5482_v22, %v5191_v12  ;;  %vm18832_vm1 = vmmov %vm18829_vm15 }
 0x4bd   : > { %v6705_v43 = vpop.permute.xlu1 %6704  ;;  %v6992_v55 = vsel %vm18828_vm7, %v6960_v42, %v14877_v56  ;;  %v6203_v5 = vsel %vm18816_vm11, %v14960_v37, 0  ;;  %vm18830_vm4 = vcmask 523264   ;;  %vm18831_vm3 = vsmask.f32 256 }
 0x4be   : > { %v5801_v54 = vmul.f32 %v14900_v23, %v5749_v31  ;;  %v15035_v0 = vpop.permute.xlu2 %6706  ;;  %v6072_v53 = vor.u32 %v6070_v21, %v15024_v15  ;;  %v7024_v51 = vsel %vm18829_vm15, %v6992_v55, %v6705_v43  ;;  %v5546_v17 = vsel %vm18832_vm1, %v5514_v29, %v14922_v36  ;;  %vm18834_vm15 = vmmov %vm18830_vm4 }
 0x4bf   : > { %vm18833_vm7 = vcmask 588800   ;;  %v5973_v31 = vunpack.c.l.b16 %v5900_v59  ;;  %v6219_v22 = vsel %vm18532_vm5, %v14960_v37, 0  ;;  %v6149_v59 = vsel %vm18736_vm10, %v14335_v32, 0 }
 0x4c0   : > { %v5837_v9 = vadd.f32 %v14929_v24, %v5801_v54  ;;  %v15069_v12 = vsel %vm18831_vm3, %v14924_v30, %v6072_v53  ;;  %v15077_v54 = vrot.slane %v6203_v5, 1  ;;  %vm18835_vm0 = vmmov %vm18833_vm7  ;;  %vm18839_vm3 = vcmask 130048  }
 0x4c1   : > { %6382 = vrot.lane.b32.xlu0 %v14908_v63, %s18489_s28  ;;  %v6186_v63 = vsel %vm18532_vm5, %v14842_v58, 0  ;;  %v6310_v30 = vshll.u32 %v15069_v12, 16  ;;  %vm18840_vm10 = vsmask.f32 7424  ;;  %v6220_v3 = vsel %vm18546_vm12, %v15069_v12, 0 }
 0x4c2   : > { %v15051_v28 = vmax.f32 %v5837_v9, 0.0 }
 0x4c3   : > { %v6785_v16 = vpop.permute.xlu0 %6784  ;;  %6462 = vrot.lane.b32.xlu1 %v6431_v6, %s18492_s30  ;;  %v6236_v6 = vsel %vm18816_vm11, %v15069_v12, 0  ;;  %v6312_v55 = vrot.slane %v6310_v30, 1  ;;  %vm18841_vm11 = vcmask 195584   ;;  %v18845_v30 = vld [vmem:[#allocation62_spill] sm:$0xff] }
 0x4c4   : > { %v5901_v47 = vpack.c.bf16 %v15051_v28, %v15051_v28  ;;  %6510 = vrot.lane.b32.xlu2 %v6186_v63, %s17821_s1  ;;  %v7056_v56 = vsel %vm18830_vm4, %v7024_v51, %v6785_v16  ;;  %vm18836_vm4 = vcmask 1046528   ;;  %v15106_v41 = vrot.slane %v6236_v6, 1 }
 0x4c5   : > { %v5307_v48 = vpop.permute.xlu1 %5306  ;;  %9389 = vmatmul.msk.bf16.vlgmr.msra.gmra.mxu3 %vm18833_vm7, %v7056_v56  ;;  %v6601_v36 = vsel %vm18836_vm4, %v14966_v40, %v15077_v54  ;;  %v6306_v40 = vshrl.u32 %v14960_v37, 16  ;;  %vm18844_vm7 = vmmov %vm18836_vm4  ;;  %vm18847_vm4 = vcmask 326656  }
 0x4c6   : > { %v5974_v62 = vunpack.c.l.b16 %v5901_v47  ;;  %v5578_v57 = vsel %vm18834_vm15, %v5546_v17, %v5307_v48  ;;  %v15075_v43 = vpop.permute.xlu2 %6454  ;;  %v18842_v17 = vld [vmem:[#allocation32_spill] sm:$0xff]  ;;  %vm18846_vm15 = vcmask 261120  }
 0x4c7   : > { %9372 = vmatmul.msk.bf16.gmra.mxu2 %vm18835_vm0, %v5578_v57  ;;  %vm18838_vm0 = vcmask 64512   ;;  %v6308_v47 = vor.u32 %v6306_v40, %v14989_v49  ;;  %vm18843_vm1 = vnez %v18842_v17  ;;  %v6766_v57 = vsel %vm18844_vm7, %v14991_v50, %v15106_v41 }
 0x4c8   : > { %v5996_v21 = vpack.c.b16 %v5974_v62, %v5973_v31  ;;  %v6820_v51 = vsel %vm18838_vm0, %v6149_v59, %v14956_v46  ;;  %v6171_v31 = vsel %vm18843_vm1, %v14960_v37, 0  ;;  %vm18848_vm0 = vsmask.f32 256 }
 0x4c9   : > { %6550 = vrot.lane.b32.xlu0 %v15008_v19, %s18478_s9  ;;  %v15111_v56 = vsel %vm18840_vm10, %v6308_v47, %v6312_v55  ;;  %vm18850_vm10 = vmmov %vm18844_vm7  ;;  %vm18852_vm7 = vcmask 523264  }
 0x4ca   : > { %v5700_v42 = vpop.f32.mrf.mxu2  ;;  %v6075_v29 = vshrl.u32 %v5996_v21, 16  ;;  %v6078_v62 = vshll.u32 %v5996_v21, 16 }
 0x4cb   : > { %v5750_v9 = vadd.f32 %v5700_v42, %v18837_v44  ;;  %v6453_v53 = vpop.permute.xlu0 %6452  ;;  %6632 = vrot.lane.b32.xlu1 %v6601_v36, %s18159_s7 }
 0x4cc   : > { %6680 = vrot.lane.b32.xlu2 %v6219_v22, %s18170_s29  ;;  %v6866_v5 = vsel %vm18839_vm3, %v6820_v51, %v6453_v53  ;;  %v15108_v32 = vrot.slane %v6075_v29, 7  ;;  %v6432_v53 = vrot.slane %v6171_v31, 1  ;;  %vm18849_vm3 = vcmask 392192  }
 0x4cd   : > { %v5802_v16 = vmul.f32 %v14900_v23, %v5750_v9  ;;  %v6501_v63 = vpop.permute.xlu1 %6500 }
 0x4ce   : > { %v15103_v7 = vpop.permute.xlu2 %6624  ;;  %v6898_v46 = vsel %vm18841_vm11, %v6866_v5, %v6501_v63  ;;  %v6080_v44 = vor.u32 %v6078_v62, %v15108_v32  ;;  %v6204_v63 = vsel %vm18843_vm1, %v15069_v12, 0  ;;  %vm18851_vm11 = vcmask 457728  }
 0x4cf   : > { %v5838_v48 = vadd.f32 %v14929_v24, %v5802_v16  ;;  %v6930_v9 = vsel %vm18846_vm15, %v6898_v46, %v14986_v20  ;;  %v15164_v31 = vrot.slane %v6204_v63, 1  ;;  %vm18853_vm15 = vcmask 588800  }
 0x4d0   : > { %v15139_v40 = vsel %vm18848_vm0, %v15024_v15, %v6080_v44  ;;  %v6187_v15 = vsel %vm18546_vm12, %v14960_v37, 0  ;;  %v6150_v44 = vsel %vm18759_vm2, %v14405_v52, 0  ;;  %vm18855_vm0 = vcmask 64512  }
 0x4d1   : > { %6716 = vrot.lane.b32.xlu0 %v15111_v56, %s18385_s0  ;;  %v15130_v21 = vmax.f32 %v5838_v48, 0.0  ;;  %v6318_v48 = vshll.u32 %v15139_v40, 16  ;;  %vm18857_vm2 = vsmask.f32 7424 }
 0x4d2   : > { %v5702_v49 = vpop.f32.mrf.mxu2 }
 0x4d3   : > { %v5751_v42 = vadd.f32 %v5702_v49, %v18845_v30  ;;  %v6623_v36 = vpop.permute.xlu0 %6622  ;;  %6796 = vrot.lane.b32.xlu1 %v6766_v57, %s18486_s27  ;;  %v5902_v51 = vpack.c.bf16 %v15130_v21, %v15130_v21 }
 0x4d4   : > { %6384 = vrot.lane.b32.xlu2 %v15008_v19, %s18489_s28  ;;  %v6962_v50 = vsel %vm18847_vm4, %v6930_v9, %v6623_v36  ;;  %v6433_v19 = vsel %vm18850_vm10, %v15029_v2, %v6432_v53  ;;  %v6314_v36 = vshrl.u32 %v15069_v12, 16  ;;  %vm18854_vm4 = vmmov %vm18850_vm10  ;;  %vm18861_vm10 = vcmask 195584  }
 0x4d5   : > { %v5803_v22 = vmul.f32 %v14900_v23, %v5751_v42  ;;  %v6671_v6 = vpop.permute.xlu1 %6670  ;;  %v5975_v62 = vunpack.c.l.b16 %v5902_v51 }
 0x4d6   : > { %v15134_v59 = vpop.permute.xlu2 %6788  ;;  %v6994_v20 = vsel %vm18849_vm3, %v6962_v50, %v6671_v6  ;;  %v18856_v6 = vld [vmem:[#allocation64_spill] sm:$0xff] }
 0x4d7   : > { %v5839_v29 = vadd.f32 %v14929_v24, %v5803_v22  ;;  %v7026_v2 = vsel %vm18851_vm11, %v6994_v20, %v15035_v0  ;;  %v15170_v0 = vrot.slane %v6318_v48, 1  ;;  %v6603_v22 = vsel %vm18854_vm4, %v15077_v54, %v15164_v31 }
 0x4d8   : > { %v6316_v20 = vor.u32 %v6314_v36, %v6312_v55  ;;  %v18858_v55 = vld [vmem:[#allocation34_spill] sm:$0xff]  ;;  %vm18862_vm11 = vcmask 261120  }
 0x4d9   : > { %v15146_v16 = vmax.f32 %v5839_v29, 0.0  ;;  %6464 = vrot.lane.b32.xlu0 %v6433_v19, %s18492_s30  ;;  %v6237_v19 = vsel %vm18843_vm1, %v15139_v40, 0  ;;  %vm18859_vm3 = vnez %v18858_v55  ;;  %vm18860_vm1 = vcmask 130048  }
 0x4da   : > { %v15191_v54 = vsel %vm18857_vm2, %v6316_v20, %v15170_v0  ;;  %vm18868_vm2 = vcmask 457728   ;;  %v6221_v55 = vsel %vm18565_vm8, %v15139_v40, 0 }
 0x4db   : > { %v5903_v5 = vpack.c.bf16 %v15146_v16, %v15146_v16  ;;  %v6787_v47 = vpop.permute.xlu0 %6786  ;;  %6512 = vrot.lane.b32.xlu1 %v6187_v15, %s17821_s1  ;;  %v6172_v15 = vsel %vm18859_vm3, %v15069_v12, 0 }
 0x4dc   : > { %6552 = vrot.lane.b32.xlu2 %v15111_v56, %s18478_s9  ;;  %v7058_v46 = vsel %vm18852_vm7, %v7026_v2, %v6787_v47  ;;  %vm18863_vm7 = vmmov %vm18854_vm4 }
 0x4dd   : > { %v5976_v49 = vunpack.c.l.b16 %v5903_v5  ;;  %v6375_v57 = vpop.permute.xlu1 %6374  ;;  %9390 = vmatmul.msk.bf16.gmra.mxu3 %vm18853_vm15, %v7058_v46  ;;  %v15200_v5 = vrot.slane %v6237_v19, 1  ;;  %v15205_v46 = vrot.slane %v6172_v15, 1  ;;  %vm18865_vm15 = vmmov %vm18854_vm4  ;;  %vm18866_vm4 = vcmask 326656  }
 0x4de   : > { %v15167_v30 = vpop.permute.xlu2 %6504  ;;  %v6823_v50 = vsel %vm18855_vm0, %v6150_v44, %v6375_v57  ;;  %vm18867_vm0 = vcmask 392192  }
 0x4df   : > { %v5997_v42 = vpack.c.b16 %v5976_v49, %v5975_v62  ;;  %v6868_v17 = vsel %vm18860_vm1, %v6823_v50, %v15075_v43  ;;  %v6768_v43 = vsel %vm18863_vm7, %v15106_v41, %v15200_v5  ;;  %v6435_v50 = vsel %vm18865_vm15, %v6432_v53, %v15205_v46 }
 0x4e0   : > { %v5705_v9 = vpop.f32.mrf.mxu2  ;;  %vm18869_vm1 = vsmask.f32 256  ;;  %vm18873_vm15 = vcmask 64512  }
 0x4e1   : > { %v5752_v29 = vadd.f32 %v5705_v9, %v18856_v6  ;;  %6634 = vrot.lane.b32.xlu0 %v6603_v22, %s18159_s7  ;;  %v6083_v52 = vshrl.u32 %v5997_v42, 16  ;;  %v6086_v44 = vshll.u32 %v5997_v42, 16  ;;  %v18864_v9 = vld [vmem:[#allocation65_spill] sm:$0xff]  ;;  %v6205_v6 = vsel %vm18859_vm3, %v15139_v40, 0 }
 0x4e2   : > { %v15235_v15 = vrot.slane %v6205_v6, 1 }
 0x4e3   : > { %v5804_v51 = vmul.f32 %v14900_v23, %v5752_v29  ;;  %v6503_v63 = vpop.permute.xlu0 %6502  ;;  %6682 = vrot.lane.b32.xlu1 %v6220_v3, %s18170_s29  ;;  %v15207_v62 = vrot.slane %v6083_v52, 7 }
 0x4e4   : > { %6718 = vrot.lane.b32.xlu2 %v15191_v54, %s18385_s0  ;;  %v6900_v47 = vsel %vm18861_vm10, %v6868_v17, %v6503_v63  ;;  %vm18870_vm10 = vcmask 523264  }
 0x4e5   : > { %v6543_v2 = vpop.permute.xlu1 %6542  ;;  %v5840_v49 = vadd.f32 %v14929_v24, %v5804_v51  ;;  %v6088_v29 = vor.u32 %v6086_v44, %v15207_v62  ;;  %v6605_v44 = vsel %vm18863_vm7, %v15164_v31, %v15235_v15  ;;  %v6322_v31 = vshrl.u32 %v15139_v40, 16 }
 0x4e6   : > { %v15203_v48 = vpop.permute.xlu2 %6674  ;;  %v6932_v57 = vsel %vm18862_vm11, %v6900_v47, %v6543_v2  ;;  %vm18871_vm11 = vcmask 588800   ;;  %v6188_v2 = vsel %vm18565_vm8, %v15069_v12, 0 }
 0x4e7   : > { %v15222_v20 = vmax.f32 %v5840_v49, 0.0  ;;  %v6964_v41 = vsel %vm18866_vm4, %v6932_v57, %v15103_v7  ;;  %v15239_v17 = vsel %vm18869_vm1, %v15108_v32, %v6088_v29  ;;  %v6151_v29 = vsel %vm18774_vm6, %v14475_v11, 0  ;;  %vm18876_vm4 = vmmov %vm18863_vm7 }
 0x4e8   : > { %v5707_v36 = vpop.f32.mrf.mxu2  ;;  %v6326_v32 = vshll.u32 %v15239_v17, 16  ;;  %v6324_v13 = vor.u32 %v6322_v31, %v15170_v0  ;;  %vm18874_vm6 = vcmask 130048   ;;  %vm18881_vm1 = vcmask 261120  }
 0x4e9   : > { %v5753_v22 = vadd.f32 %v5707_v36, %v18864_v9  ;;  %6798 = vrot.lane.b32.xlu0 %v6768_v43, %s18486_s27  ;;  %v5904_v7 = vpack.c.bf16 %v15222_v20, %v15222_v20  ;;  %v18872_v9 = vld [vmem:[#allocation66_spill] sm:$0xff]  ;;  %vm18884_vm7 = vcmask 392192  }
 0x4eb   : > { %v5805_v19 = vmul.f32 %v14900_v23, %v5753_v22  ;;  %v6673_v3 = vpop.permute.xlu0 %6672  ;;  %6386 = vrot.lane.b32.xlu1 %v15111_v56, %s18489_s28  ;;  %v5977_v57 = vunpack.c.l.b16 %v5904_v7 }
 0x4ec   : > { %v6996_v42 = vsel %vm18867_vm0, %v6964_v41, %v6673_v3  ;;  %6466 = vrot.lane.b32.xlu2 %v6435_v50, %s18492_s30  ;;  %v6238_v50 = vsel %vm18859_vm3, %v15239_v17, 0  ;;  %vm18875_vm3 = vsmask.f32 7424 }
 0x4ed   : > { %v5841_v53 = vadd.f32 %v14929_v24, %v5805_v19  ;;  %v6709_v52 = vpop.permute.xlu1 %6708 }
 0x4ee   : > { %v7028_v51 = vsel %vm18868_vm2, %v6996_v42, %v6709_v52  ;;  %v15233_v63 = vpop.permute.xlu2 %6378  ;;  %v15275_v52 = vrot.slane %v6238_v50, 1  ;;  %vm18879_vm2 = vcmask 195584  }
 0x4ef   : > { %v15243_v56 = vmax.f32 %v5841_v53, 0.0  ;;  %v7060_v47 = vsel %vm18870_vm10, %v7028_v51, %v15134_v59  ;;  %v15273_v53 = vrot.slane %v6326_v32, 1  ;;  %v18877_v32 = vld [vmem:[#allocation36_spill] sm:$0xff]  ;;  %vm18882_vm10 = vcmask 326656  }
 0x4f0   : > { %9391 = vmatmul.msk.bf16.gmra.mxu3 %vm18871_vm11, %v7060_v47  ;;  %v6770_v0 = vsel %vm18876_vm4, %v15200_v5, %v15275_v52  ;;  %vm18878_vm0 = vnez %v18877_v32  ;;  %vm18883_vm11 = vmmov %vm18876_vm4  ;;  %vm18888_vm4 = vcmask 523264  }
 0x4f1   : > { %v5905_v49 = vpack.c.bf16 %v15243_v56, %v15243_v56  ;;  %6514 = vrot.lane.b32.xlu0 %v6188_v2, %s17821_s1  ;;  %v15286_v47 = vsel %vm18875_vm3, %v6324_v13, %v15273_v53  ;;  %vm18887_vm3 = vsmask.f32 256 }
 0x4f3   : > { %v5978_v36 = vunpack.c.l.b16 %v5905_v49  ;;  %v6377_v43 = vpop.permute.xlu0 %6376  ;;  %6554 = vrot.lane.b32.xlu1 %v15191_v54, %s18478_s9  ;;  %v5710_v59 = vpop.f32.mrf.mxu2 }
 0x4f4   : > { %v5754_v22 = vadd.f32 %v5710_v59, %v18872_v9  ;;  %6636 = vrot.lane.b32.xlu2 %v6605_v44, %s18159_s7  ;;  %v6826_v3 = vsel %vm18873_vm15, %v6151_v29, %v6377_v43  ;;  %v18880_v43 = vld [vmem:[#allocation67_spill] sm:$0xff]  ;;  %vm18885_vm15 = vnez %v18585_v26 }
 0x4f5   : > { %v5998_v6 = vpack.c.b16 %v5978_v36, %v5977_v57  ;;  %v6457_v19 = vpop.permute.xlu1 %6456  ;;  %v6173_v57 = vsel %vm18878_vm0, %v15139_v40, 0 }
 0x4f6   : > { %v5806_v41 = vmul.f32 %v14900_v23, %v5754_v22  ;;  %v15270_v42 = vpop.permute.xlu2 %6546  ;;  %v6870_v51 = vsel %vm18874_vm6, %v6826_v3, %v6457_v19  ;;  %v15308_v19 = vrot.slane %v6173_v57, 1  ;;  %vm18886_vm6 = vcmask 457728  }
 0x4f7   : > { %v6091_v11 = vshrl.u32 %v5998_v6, 16  ;;  %v6902_v36 = vsel %vm18879_vm2, %v6870_v51, %v15167_v30  ;;  %v6094_v3 = vshll.u32 %v5998_v6, 16  ;;  %vm18889_vm2 = vcmask 588800  }
 0x4f8   : > { %v5842_v7 = vadd.f32 %v14929_v24, %v5806_v41 }
 0x4f9   : > { %6684 = vrot.lane.b32.xlu0 %v6221_v55, %s18170_s29  ;;  %v15300_v44 = vrot.slane %v6091_v11, 7  ;;  %v6437_v11 = vsel %vm18883_vm11, %v15205_v46, %v15308_v19 }
 0x4fa   : > { %v15303_v50 = vmax.f32 %v5842_v7, 0.0  ;;  %v6189_v7 = vsel %vm18885_vm15, %v15139_v40, 0 }
 0x4fb   : > { %v6545_v2 = vpop.permute.xlu0 %6544  ;;  %6720 = vrot.lane.b32.xlu1 %v15286_v47, %s18385_s0  ;;  %v5712_v49 = vpop.f32.mrf.mxu2  ;;  %v6096_v31 = vor.u32 %v6094_v3, %v15300_v44  ;;  %v18891_v3 = vld [vmem:[#allocation69_spill] sm:$0xff] }
 0x4fc   : > { %v5755_v59 = vadd.f32 %v5712_v49, %v18880_v43  ;;  %6800 = vrot.lane.b32.xlu2 %v6770_v0, %s18486_s27  ;;  %v6934_v9 = vsel %vm18881_vm1, %v6902_v36, %v6545_v2  ;;  %v5906_v55 = vpack.c.bf16 %v15303_v50, %v15303_v50  ;;  %vm18890_vm1 = vmmov %vm18883_vm11  ;;  %vm18893_vm11 = vcmask 130048  }
 0x4fd   : > { %v6627_v22 = vpop.permute.xlu1 %6626 }
 0x4fe   : > { %v5807_v5 = vmul.f32 %v14900_v23, %v5755_v59  ;;  %v15306_v29 = vpop.permute.xlu2 %6712  ;;  %v6966_v41 = vsel %vm18882_vm10, %v6934_v9, %v6627_v22  ;;  %v5979_v0 = vunpack.c.l.b16 %v5906_v55  ;;  %vm18892_vm10 = vcmask 64512  }
 0x4ff   : > { %v6998_v6 = vsel %vm18884_vm7, %v6966_v41, %v15203_v48  ;;  %v15337_v48 = vsel %vm18887_vm3, %v15207_v62, %v6096_v31  ;;  %v6222_v31 = vsel %vm18885_vm15, %v15239_v17, 0  ;;  %vm18900_vm3 = vcmask 261120  }
 0x500   : > { %v5843_v30 = vadd.f32 %v14929_v24, %v5807_v5  ;;  %v6334_v22 = vshll.u32 %v15337_v48, 16  ;;  %v6239_v55 = vsel %vm18878_vm0, %v15337_v48, 0 }
 0x501   : > { %6388 = vrot.lane.b32.xlu0 %v15191_v54, %s18489_s28  ;;  %v6206_v54 = vsel %vm18878_vm0, %v15239_v17, 0  ;;  %v15371_v27 = vrot.slane %v6239_v55, 1  ;;  %vm18895_vm0 = vcmask 195584  }
 0x502   : > { %v15317_v13 = vmax.f32 %v5843_v30, 0.0  ;;  %v15342_v59 = vrot.slane %v6206_v54, 1 }
 0x503   : > { %v6711_v51 = vpop.permute.xlu0 %6710  ;;  %6468 = vrot.lane.b32.xlu1 %v6437_v11, %s18492_s30  ;;  %v6152_v11 = vsel %vm18494_vm14, %v14568_v35, 0  ;;  %vm18894_vm14 = vsmask.f32 7424 }
 0x504   : > { %v5907_v2 = vpack.c.bf16 %v15317_v13, %v15317_v13  ;;  %v7030_v49 = vsel %vm18886_vm6, %v6998_v6, %v6711_v51  ;;  %6516 = vrot.lane.b32.xlu2 %v6189_v7, %s17821_s1  ;;  %v6607_v62 = vsel %vm18890_vm1, %v15235_v15, %v15342_v59  ;;  %v6330_v15 = vshrl.u32 %v15239_v17, 16  ;;  %vm18898_vm6 = vmmov %vm18890_vm1 }
 0x505   : > { %v6791_v46 = vpop.permute.xlu1 %6790  ;;  %v6336_v6 = vrot.slane %v6334_v22, 1  ;;  %v6829_v7 = vsel %vm18892_vm10, %v6152_v11, %v15233_v63  ;;  %vm18903_vm1 = vcmask 392192   ;;  %vm18904_vm10 = vmmov %vm18898_vm6 }
 0x506   : > { %v5980_v57 = vunpack.c.l.b16 %v5907_v2  ;;  %v15339_v36 = vpop.permute.xlu2 %6460  ;;  %v7062_v43 = vsel %vm18888_vm4, %v7030_v49, %v6791_v46  ;;  %v6332_v46 = vor.u32 %v6330_v15, %v15273_v53  ;;  %vm18901_vm4 = vcmask 326656  }
 0x507   : > { %9392 = vmatmul.msk.bf16.gmra.mxu3 %vm18889_vm2, %v7062_v43  ;;  %v18896_v43 = vld [vmem:[#allocation38_spill] sm:$0xff]  ;;  %vm18902_vm2 = vsmask.f32 256 }
 0x508   : > { %v5999_v9 = vpack.c.b16 %v5980_v57, %v5979_v0  ;;  %v15376_v0 = vsel %vm18894_vm14, %v6332_v46, %v6336_v6  ;;  %vm18897_vm7 = vnez %v18896_v43  ;;  %vm18907_vm14 = vcmask 457728  }
 0x509   : > { %6556 = vrot.lane.b32.xlu0 %v15286_v47, %s18478_s9  ;;  %v6174_v22 = vsel %vm18897_vm7, %v15239_v17, 0 }
 0x50a   : > { %v5715_v5 = vpop.f32.mrf.mxu2  ;;  %v6099_v51 = vshrl.u32 %v5999_v9, 16  ;;  %v6438_v11 = vrot.slane %v6174_v22, 1 }
 0x50b   : > { %v5756_v30 = vadd.f32 %v5715_v5, %v18891_v3  ;;  %v6459_v41 = vpop.permute.xlu0 %6458  ;;  %6638 = vrot.lane.b32.xlu1 %v6607_v62, %s18159_s7  ;;  %v6102_v5 = vshll.u32 %v5999_v9, 16  ;;  %v6772_v62 = vsel %vm18898_vm6, %v15275_v52, %v15371_v27  ;;  %v18899_v3 = vld [vmem:[#allocation68_spill] sm:$0xff]  ;;  %vm18909_vm6 = vcmask 588800  }
 0x50c   : > { %6686 = vrot.lane.b32.xlu2 %v6222_v31, %s18170_s29  ;;  %v6872_v49 = vsel %vm18893_vm11, %v6829_v7, %v6459_v41  ;;  %v15373_v35 = vrot.slane %v6099_v51, 7 }
 0x50d   : > { %v5808_v54 = vmul.f32 %v14900_v23, %v5756_v30  ;;  %v6507_v2 = vpop.permute.xlu1 %6506 }
 0x50e   : > { %v15368_v32 = vpop.permute.xlu2 %6630  ;;  %v6904_v63 = vsel %vm18895_vm0, %v6872_v49, %v6507_v2  ;;  %v6104_v31 = vor.u32 %v6102_v5, %v15373_v35  ;;  %vm18908_vm0 = vcmask 523264  }
 0x50f   : > { %v5844_v57 = vadd.f32 %v14929_v24, %v5808_v54  ;;  %v6936_v55 = vsel %vm18900_vm3, %v6904_v63, %v15270_v42  ;;  %v18905_v63 = vld [vmem:[#allocation39_spill] sm:$0xff]  ;;  %vm18910_vm3 = vmmov %vm18904_vm10 }
 0x510   : > { %v15404_v2 = vsel %vm18902_vm2, %v15300_v44, %v6104_v31  ;;  %vm18906_vm11 = vnez %v18905_v63 }
 0x511   : > { %6722 = vrot.lane.b32.xlu0 %v15376_v0, %s18385_s0  ;;  %v15395_v9 = vmax.f32 %v5844_v57, 0.0  ;;  %v6207_v57 = vsel %vm18897_vm7, %v15337_v48, 0  ;;  %v6190_v44 = vsel %vm18906_vm11, %v15239_v17, 0  ;;  %v6223_v25 = vsel %vm18906_vm11, %v15337_v48, 0 }
 0x512   : > { %v5717_v53 = vpop.f32.mrf.mxu2 }
 0x513   : > { %v5757_v30 = vadd.f32 %v5717_v53, %v18899_v3  ;;  %v6629_v41 = vpop.permute.xlu0 %6628  ;;  %6802 = vrot.lane.b32.xlu1 %v6772_v62, %s18486_s27  ;;  %v5908_v49 = vpack.c.bf16 %v15395_v9, %v15395_v9  ;;  %v6342_v53 = vshll.u32 %v15404_v2, 16  ;;  %v15429_v3 = vrot.slane %v6207_v57, 1 }
 0x514   : > { %6390 = vrot.lane.b32.xlu2 %v15286_v47, %s18489_s28  ;;  %v6968_v52 = vsel %vm18901_vm4, %v6936_v55, %v6629_v41  ;;  %v6439_v47 = vsel %vm18904_vm10, %v15308_v19, %v6438_v11  ;;  %vm18911_vm4 = vcmask 64512   ;;  %vm18918_vm10 = vcmask 261120  }
 0x515   : > { %v5809_v51 = vmul.f32 %v14900_v23, %v5757_v30  ;;  %v6677_v15 = vpop.permute.xlu1 %6676  ;;  %v5981_v30 = vunpack.c.l.b16 %v5908_v49  ;;  %v18912_v49 = vld [vmem:[#allocation70_spill] sm:$0xff] }
 0x516   : > { %v15399_v7 = vpop.permute.xlu2 %6794  ;;  %v7000_v42 = vsel %vm18903_vm1, %v6968_v52, %v6677_v15  ;;  %v6338_v52 = vshrl.u32 %v15337_v48, 16  ;;  %v6153_v15 = vsel %vm18810_vm13, %v14669_v38, 0  ;;  %vm18913_vm13 = vsmask.f32 7424 }
 0x517   : > { %v5845_v54 = vadd.f32 %v14929_v24, %v5809_v51  ;;  %v7032_v19 = vsel %vm18907_vm14, %v7000_v42, %v15306_v29  ;;  %v15435_v29 = vrot.slane %v6342_v53, 1  ;;  %v6609_v42 = vsel %vm18910_vm3, %v15342_v59, %v15429_v3  ;;  %vm18919_vm14 = vmmov %vm18910_vm3 }
 0x518   : > { %vm18917_vm1 = vcmask 195584  }
 0x519   : > { %v15411_v46 = vmax.f32 %v5845_v54, 0.0  ;;  %6470 = vrot.lane.b32.xlu0 %v6439_v47, %s18492_s30 }
 0x51b   : > { %v5909_v22 = vpack.c.bf16 %v15411_v46, %v15411_v46  ;;  %v6793_v5 = vpop.permute.xlu0 %6792  ;;  %6518 = vrot.lane.b32.xlu1 %v6190_v44, %s17821_s1  ;;  %v6340_v44 = vor.u32 %v6338_v52, %v6336_v6  ;;  %v18914_v6 = vld [vmem:[#allocation40_spill] sm:$0xff] }
 0x51c   : > { %6558 = vrot.lane.b32.xlu2 %v15376_v0, %s18478_s9  ;;  %v7064_v62 = vsel %vm18908_vm0, %v7032_v19, %v6793_v5  ;;  %vm18915_vm2 = vnez %v18914_v6  ;;  %vm18921_vm0 = vmmov %vm18910_vm3  ;;  %vm18923_vm3 = vcmask 392192   ;;  %v6224_v6 = vsel %vm18336_vm9, %v15404_v2, 0 }
 0x51d   : > { %v5982_v41 = vunpack.c.l.b16 %v5909_v22  ;;  %v6381_v31 = vpop.permute.xlu1 %6380  ;;  %9393 = vmatmul.msk.bf16.gmra.mxu3 %vm18909_vm6, %v7064_v62  ;;  %v6240_v22 = vsel %vm18897_vm7, %v15404_v2, 0  ;;  %v15456_v59 = vsel %vm18913_vm13, %v6340_v44, %v15435_v29  ;;  %v6175_v53 = vsel %vm18915_vm2, %v15337_v48, 0 }
 0x51e   : > { %v15432_v55 = vpop.permute.xlu2 %6510  ;;  %v6832_v47 = vsel %vm18911_vm4, %v6153_v15, %v6381_v31  ;;  %vm18916_vm7 = vcmask 130048   ;;  %v6773_v62 = vrot.slane %v6240_v22, 1  ;;  %v15468_v52 = vrot.slane %v6175_v53, 1 }
 0x51f   : > { %v6000_v51 = vpack.c.b16 %v5982_v41, %v5981_v30  ;;  %v6874_v43 = vsel %vm18916_vm7, %v6832_v47, %v15339_v36  ;;  %vm18922_vm6 = vcmask 326656   ;;  %vm18924_vm4 = vcmask 457728  }
 0x520   : > { %v5720_v54 = vpop.f32.mrf.mxu2  ;;  %v6774_v36 = vsel %vm18919_vm14, %v15371_v27, %v6773_v62  ;;  %v6441_v22 = vsel %vm18921_vm0, %v6438_v11, %v15468_v52  ;;  %vm18925_vm13 = vsmask.f32 256  ;;  %vm18926_vm7 = vcmask 523264  }
 0x521   : > { %v5758_v57 = vadd.f32 %v5720_v54, %v18912_v49  ;;  %6640 = vrot.lane.b32.xlu0 %v6609_v42, %s18159_s7  ;;  %v6107_v38 = vshrl.u32 %v6000_v51, 16  ;;  %v6110_v47 = vshll.u32 %v6000_v51, 16  ;;  %vm18929_vm14 = vcmask 64512  }
 0x523   : > { %v5810_v5 = vmul.f32 %v14900_v23, %v5758_v57  ;;  %v6509_v19 = vpop.permute.xlu0 %6508  ;;  %6688 = vrot.lane.b32.xlu1 %v6223_v25, %s18170_s29  ;;  %v15470_v15 = vrot.slane %v6107_v38, 7  ;;  %v18920_v57 = vld [vmem:[#allocation71_spill] sm:$0xff]  ;;  %v6208_v25 = vsel %vm18915_vm2, %v15404_v2, 0 }
 0x524   : > { %6724 = vrot.lane.b32.xlu2 %v15456_v59, %s18385_s0  ;;  %v6906_v30 = vsel %vm18917_vm1, %v6874_v43, %v6509_v19  ;;  %vm18927_vm1 = vcmask 588800  }
 0x525   : > { %v6549_v41 = vpop.permute.xlu1 %6548  ;;  %v5846_v54 = vadd.f32 %v14929_v24, %v5810_v5  ;;  %v6112_v38 = vor.u32 %v6110_v47, %v15470_v15 }
 0x526   : > { %v15466_v31 = vpop.permute.xlu2 %6680  ;;  %v6938_v42 = vsel %vm18918_vm10, %v6906_v30, %v6549_v41  ;;  %vm18928_vm10 = vmmov %vm18921_vm0 }
 0x527   : > { %v15484_v5 = vmax.f32 %v5846_v54, 0.0  ;;  %v6970_v27 = vsel %vm18922_vm6, %v6938_v42, %v15368_v32  ;;  %v15497_v54 = vrot.slane %v6208_v25, 1 }
 0x528   : > { %v5722_v49 = vpop.f32.mrf.mxu2 }
 0x529   : > { %v5759_v44 = vadd.f32 %v5722_v49, %v18920_v57  ;;  %6804 = vrot.lane.b32.xlu0 %v6774_v36, %s18486_s27  ;;  %v15501_v49 = vsel %vm18925_vm13, %v15373_v35, %v6112_v38  ;;  %v5910_v32 = vpack.c.bf16 %v15484_v5, %v15484_v5  ;;  %v6191_v36 = vsel %vm18336_vm9, %v15337_v48, 0 }
 0x52a   : > { %v6350_v35 = vshll.u32 %v15501_v49, 16  ;;  %v6241_v25 = vsel %vm18915_vm2, %v15501_v49, 0  ;;  %vm18930_vm2 = vcmask 130048   ;;  %vm18936_vm13 = vcmask 326656  }
 0x52b   : > { %v5811_v19 = vmul.f32 %v14900_v23, %v5759_v44  ;;  %v6679_v53 = vpop.permute.xlu0 %6678  ;;  %6392 = vrot.lane.b32.xlu1 %v15376_v0, %s18489_s28  ;;  %v5983_v57 = vunpack.c.l.b16 %v5910_v32 }
 0x52c   : > { %v7002_v51 = vsel %vm18923_vm3, %v6970_v27, %v6679_v53  ;;  %6472 = vrot.lane.b32.xlu2 %v6441_v22, %s18492_s30  ;;  %vm18934_vm3 = vcmask 195584  }
 0x52d   : > { %v5847_v11 = vadd.f32 %v14929_v24, %v5811_v19  ;;  %v6715_v43 = vpop.permute.xlu1 %6714  ;;  %v6154_v19 = vsel %vm18532_vm5, %v14767_v61, 0  ;;  %vm18931_vm5 = vsmask.f32 7424 }
 0x52e   : > { %v7034_v30 = vsel %vm18924_vm4, %v7002_v51, %v6715_v43  ;;  %v15495_v41 = vpop.permute.xlu2 %6384  ;;  %v6352_v43 = vrot.slane %v6350_v35, 1  ;;  %vm18935_vm4 = vcmask 261120  }
 0x52f   : > { %v15505_v0 = vmax.f32 %v5847_v11, 0.0  ;;  %v7066_v42 = vsel %vm18926_vm7, %v7034_v30, %v15399_v7  ;;  %v6611_v7 = vsel %vm18928_vm10, %v15429_v3, %v15497_v54  ;;  %v6346_v11 = vshrl.u32 %v15404_v2, 16  ;;  %vm18937_vm7 = vmmov %vm18921_vm0 }
 0x530   : > { %9394 = vmatmul.msk.bf16.gmra.mxu3 %vm18927_vm1, %v7066_v42  ;;  %v15533_v3 = vrot.slane %v6241_v25, 1  ;;  %vm18938_vm1 = vcmask 392192   ;;  %vm18939_vm10 = vnez %v18039_v33 }
 0x531   : > { %v5911_v47 = vpack.c.bf16 %v15505_v0, %v15505_v0  ;;  %6520 = vrot.lane.b32.xlu0 %v6191_v36, %s17821_s1  ;;  %v6348_v30 = vor.u32 %v6346_v11, %v15435_v29 }
 0x532   : > { %v6776_v36 = vsel %vm18921_vm0, %v6773_v62, %v15533_v3  ;;  %vm18943_vm0 = vcmask 588800  }
 0x533   : > { %v5984_v44 = vunpack.c.l.b16 %v5911_v47  ;;  %v6383_v22 = vpop.permute.xlu0 %6382  ;;  %6560 = vrot.lane.b32.xlu1 %v15456_v59, %s18478_s9  ;;  %v6353_v61 = vsel %vm18931_vm5, %v6348_v30, %v6352_v43  ;;  %v18932_v47 = vld [vmem:[#allocation42_spill] sm:$0xff]  ;;  %vm18942_vm5 = vcmask 523264  }
 0x534   : > { %6642 = vrot.lane.b32.xlu2 %v6611_v7, %s18159_s7  ;;  %v6835_v27 = vsel %vm18929_vm14, %v6154_v19, %v6383_v22  ;;  %vm18933_vm6 = vnez %v18932_v47  ;;  %vm18940_vm14 = vcmask 457728  }
 0x535   : > { %v6001_v38 = vpack.c.b16 %v5984_v44, %v5983_v57  ;;  %v6463_v53 = vpop.permute.xlu1 %6462  ;;  %v6176_v35 = vsel %vm18933_vm6, %v15404_v2, 0 }
 0x536   : > { %v15530_v51 = vpop.permute.xlu2 %6552  ;;  %v6876_v18 = vsel %vm18930_vm2, %v6835_v27, %v6463_v53  ;;  %v6442_v25 = vrot.slane %v6176_v35, 1  ;;  %vm18941_vm2 = vsmask.f32 256 }
 0x537   : > { %v6115_v32 = vshrl.u32 %v6001_v38, 16  ;;  %v6908_v29 = vsel %vm18934_vm3, %v6876_v18, %v15432_v55  ;;  %v6118_v19 = vshll.u32 %v6001_v38, 16  ;;  %v6192_v38 = vsel %vm18939_vm10, %v15404_v2, 0  ;;  %vm18944_vm3 = vmmov %vm18937_vm7 }
 0x538   : > { %v6443_v55 = vsel %vm18937_vm7, %v15468_v52, %v6442_v25 }
 0x539   : > { %6690 = vrot.lane.b32.xlu0 %v6224_v6, %s18170_s29  ;;  %v15551_v57 = vrot.slane %v6115_v32, 7  ;;  %v6209_v6 = vsel %vm18933_vm6, %v15501_v49, 0 }
 0x53a   : > { %v15580_v18 = vrot.slane %v6209_v6, 1 }
 0x53b   : > { %v6551_v42 = vpop.permute.xlu0 %6550  ;;  %6726 = vrot.lane.b32.xlu1 %v6353_v61, %s18385_s0  ;;  %v6120_v53 = vor.u32 %v6118_v19, %v15551_v57 }
 0x53c   : > { %6806 = vrot.lane.b32.xlu2 %v6776_v36, %s18486_s27  ;;  %v6940_v44 = vsel %vm18935_vm4, %v6908_v29, %v6551_v42  ;;  %v6613_v35 = vsel %vm18944_vm3, %v15497_v54, %v15580_v18  ;;  %v6354_v54 = vshrl.u32 %v15501_v49, 16  ;;  %vm18946_vm4 = vcmask 64512  }
 0x53d   : > { %v6633_v22 = vpop.permute.xlu1 %6632 }
 0x53e   : > { %v15554_v7 = vpop.permute.xlu2 %6718  ;;  %v6972_v62 = vsel %vm18936_vm13, %v6940_v44, %v6633_v22  ;;  %v6225_v22 = vsel %vm18939_vm10, %v15501_v49, 0  ;;  %vm18947_vm13 = vcmask 130048   ;;  %v6356_v6 = vor.u32 %v6354_v54, %v6352_v43 }
 0x53f   : > { %v7004_v11 = vsel %vm18938_vm1, %v6972_v62, %v15466_v31  ;;  %v6155_v62 = vsel %vm18546_vm12, %v14842_v58, 0  ;;  %vm18948_vm12 = vsmask.f32 7424  ;;  %vm18952_vm1 = vmmov %vm18944_vm3  ;;  %vm18958_vm3 = vnez %v18067_v39 }
 0x541   : > { %6394 = vrot.lane.b32.xlu0 %v15456_v59, %s18489_s28  ;;  %v15575_v59 = vsel %vm18941_vm2, %v15470_v15, %v6120_v53  ;;  %v18945_v15 = vld [vmem:[#allocation72_spill] sm:$0xff]  ;;  %vm18955_vm2 = vcmask 326656  }
 0x542   : > { %v6358_v42 = vshll.u32 %v15575_v59, 16  ;;  %v6242_v19 = vsel %vm18933_vm6, %v15575_v59, 0  ;;  %vm18949_vm6 = vcmask 195584  }
 0x543   : > { %v6717_v27 = vpop.permute.xlu0 %6716  ;;  %6474 = vrot.lane.b32.xlu1 %v6443_v55, %s18492_s30  ;;  %v6838_v55 = vsel %vm18946_vm4, %v6155_v62, %v15495_v41  ;;  %v18950_v41 = vld [vmem:[#allocation43_spill] sm:$0xff]  ;;  %vm18959_vm4 = vcmask 457728  }
 0x544   : > { %v7036_v30 = vsel %vm18940_vm14, %v7004_v11, %v6717_v27  ;;  %6522 = vrot.lane.b32.xlu2 %v6192_v38, %s17821_s1  ;;  %v15601_v53 = vrot.slane %v6358_v42, 1  ;;  %vm18951_vm7 = vnez %v18950_v41  ;;  %vm18954_vm14 = vcmask 261120  }
 0x545   : > { %v6797_v52 = vpop.permute.xlu1 %6796 }
 0x546   : > { %v15577_v31 = vpop.permute.xlu2 %6466  ;;  %v7068_v32 = vsel %vm18942_vm5, %v7036_v30, %v6797_v52  ;;  %v15609_v30 = vrot.slane %v6242_v19, 1  ;;  %v15613_v4 = vsel %vm18948_vm12, %v6356_v6, %v15601_v53  ;;  %vm18956_vm5 = vcmask 392192  }
 0x547   : > { %9395 = vmatmul.msk.bf16.gmra.mxu3 %vm18943_vm0, %v7068_v32  ;;  %v6177_v32 = vsel %vm18951_vm7, %v15501_v49, 0  ;;  %vm18957_vm0 = vmmov %vm18952_vm1  ;;  %vm18961_vm12 = vcmask 588800  }
 0x548   : > { %v6778_v43 = vsel %vm18952_vm1, %v15533_v3, %v15609_v30  ;;  %vm18963_vm1 = vcmask 64512  }
 0x549   : > { %6562 = vrot.lane.b32.xlu0 %v6353_v61, %s18478_s9 }
 0x54a   : > { %v5725_v36 = vpop.f32.mrf.mxu2 }
 0x54b   : > { %v5760_v29 = vadd.f32 %v5725_v36, %v18945_v15  ;;  %v6465_v44 = vpop.permute.xlu0 %6464  ;;  %6644 = vrot.lane.b32.xlu1 %v6613_v35, %s18159_s7  ;;  %v18953_v36 = vld [vmem:[#allocation73_spill] sm:$0xff] }
 0x54c   : > { %6692 = vrot.lane.b32.xlu2 %v6225_v22, %s18170_s29  ;;  %v6878_v38 = vsel %vm18947_vm13, %v6838_v55, %v6465_v44  ;;  %v15630_v44 = vrot.slane %v6177_v32, 1  ;;  %vm18960_vm13 = vcmask 523264  }
 0x54d   : > { %v5812_v27 = vmul.f32 %v14900_v23, %v5760_v29  ;;  %v6513_v11 = vpop.permute.xlu1 %6512 }
 0x54e   : > { %v15607_v47 = vpop.permute.xlu2 %6636  ;;  %v6910_v52 = vsel %vm18949_vm6, %v6878_v38, %v6513_v11  ;;  %v6445_v11 = vsel %vm18957_vm0, %v6442_v25, %v15630_v44  ;;  %vm18962_vm6 = vmmov %vm18957_vm0  ;;  %vm18968_vm0 = vcmask 326656  }
 0x54f   : > { %v5848_v58 = vadd.f32 %v14929_v24, %v5812_v27  ;;  %v6942_v29 = vsel %vm18954_vm14, %v6910_v52, %v15530_v51  ;;  %vm18965_vm14 = vcmask 195584  }
 0x551   : > { %6728 = vrot.lane.b32.xlu0 %v15613_v4, %s18385_s0  ;;  %v15632_v22 = vmax.f32 %v5848_v58, 0.0 }
 0x552   : > { %v5727_v42 = vpop.f32.mrf.mxu2 }
 0x553   : > { %v5761_v35 = vadd.f32 %v5727_v42, %v18953_v36  ;;  %v6635_v15 = vpop.permute.xlu0 %6634  ;;  %6808 = vrot.lane.b32.xlu1 %v6778_v43, %s18486_s27  ;;  %v5912_v51 = vpack.c.bf16 %v15632_v22, %v15632_v22 }
 0x554   : > { %6396 = vrot.lane.b32.xlu2 %v6353_v61, %s18489_s28  ;;  %v6974_v62 = vsel %vm18955_vm2, %v6942_v29, %v6635_v15  ;;  %v6156_v15 = vsel %vm18565_vm8, %v14960_v37, 0  ;;  %vm18964_vm8 = vcmask 130048   ;;  %vm18966_vm2 = vsmask.f32 256 }
 0x555   : > { %v5813_v19 = vmul.f32 %v14900_v23, %v5761_v35  ;;  %v6683_v54 = vpop.permute.xlu1 %6682  ;;  %v6210_v23 = vsel %vm18951_vm7, %v15575_v59, 0  ;;  %v5985_v32 = vunpack.c.l.b16 %v5912_v51 }
 0x556   : > { %v6801_v3 = vpop.permute.xlu2 %6800  ;;  %v7006_v27 = vsel %vm18956_vm5, %v6974_v62, %v6683_v54  ;;  %v15659_v52 = vrot.slane %v6210_v23, 1  ;;  %v15672_v62 = vpop.f32.mrf.mxu3  ;;  %v6226_v54 = vsel %vm18958_vm3, %v15575_v59, 0  ;;  %vm18967_vm5 = vcmask 261120  }
 0x557   : > { %v5849_v55 = vadd.f32 %v14929_v24, %v5813_v19  ;;  %v6193_v24 = vsel %vm18958_vm3, %v15501_v49, 0  ;;  %v7038_v25 = vsel %vm18959_vm4, %v7006_v27, %v15554_v7  ;;  %vm18969_vm4 = vmmov %vm18962_vm6 }
 0x558   : > { %v6615_v7 = vsel %vm18962_vm6, %v15580_v18, %v15659_v52  ;;  %vm18974_vm6 = vcmask 457728  }
 0x559   : > { %v15642_v61 = vmax.f32 %v5849_v55, 0.0  ;;  %6476 = vrot.lane.b32.xlu0 %v6445_v11, %s18492_s30 }
 0x55b   : > { %v5913_v38 = vpack.c.bf16 %v15642_v61, %v15642_v61  ;;  %v6799_v6 = vpop.permute.xlu0 %6798  ;;  %6524 = vrot.lane.b32.xlu1 %v6193_v24, %s17821_s1 }
 0x55c   : > { %6564 = vrot.lane.b32.xlu2 %v15613_v4, %s18478_s9  ;;  %v7070_v58 = vsel %vm18960_vm13, %v7038_v25, %v6799_v6  ;;  %v6362_v25 = vshrl.u32 %v15575_v59, 16  ;;  %vm18971_vm13 = vsmask.f32 7424 }
 0x55d   : > { %v5986_v42 = vunpack.c.l.b16 %v5913_v38  ;;  %v6387_v43 = vpop.permute.xlu1 %6386  ;;  %9396 = vmatmul.msk.bf16.gmra.mxu3 %vm18961_vm12, %v7070_v58 }
 0x55e   : > { %v15662_v36 = vpop.permute.xlu2 %6516  ;;  %v6841_v19 = vsel %vm18963_vm1, %v6156_v15, %v6387_v43  ;;  %v15700_v41 = vpop.f32.mrf.mxu3  ;;  %vm18975_vm1 = vcmask 523264  }
 0x55f   : > { %v6002_v35 = vpack.c.b16 %v5986_v42, %v5985_v32  ;;  %v6880_v8 = vsel %vm18964_vm8, %v6841_v19, %v15577_v31  ;;  %v6364_v32 = vor.u32 %v6362_v25, %v15601_v53  ;;  %vm18976_vm8 = vcmask 588800  }
 0x561   : > { %v6123_v29 = vshrl.u32 %v6002_v35, 16  ;;  %6646 = vrot.lane.b32.xlu0 %v6615_v7, %s18159_s7  ;;  %v6126_v27 = vshll.u32 %v6002_v35, 16 }
 0x563   : > { %v6125_v55 = vrot.slane %v6123_v29, 7  ;;  %v6515_v11 = vpop.permute.xlu0 %6514  ;;  %6694 = vrot.lane.b32.xlu1 %v6226_v54, %s18170_s29  ;;  %v18972_v29 = vld [vmem:[#allocation46_spill] sm:$0xff] }
 0x564   : > { %v6912_v18 = vsel %vm18965_vm14, %v6880_v8, %v6515_v11  ;;  %vm18973_vm12 = vnez %v18972_v29 }
 0x565   : > { %v6128_v37 = vor.u32 %v6126_v27, %v6125_v55  ;;  %v6555_v51 = vpop.permute.xlu1 %6554  ;;  %v18977_v27 = vld [vmem:[#allocation19_spill] sm:$0xff] }
 0x566   : > { %v15681_v23 = vpop.permute.xlu2 %6686  ;;  %v6944_v38 = vsel %vm18967_vm5, %v6912_v18, %v6555_v51  ;;  %vm18978_vm14 = vnez %v18977_v27  ;;  %v15720_v18 = vpop.f32.mrf.mxu3  ;;  %vm18980_vm5 = vmmov %vm18969_vm4 }
 0x567   : > { %v15685_v24 = vsel %vm18966_vm2, %v15551_v57, %v6128_v37  ;;  %v6976_v35 = vsel %vm18968_vm0, %v6944_v38, %v15607_v47  ;;  %v6178_v47 = vsel %vm18973_vm12, %v15575_v59, 0  ;;  %v15714_v11 = vsel %vm18978_vm14, %v6125_v55, 0  ;;  %vm18989_vm14 = vmmov %vm18980_vm5 }
 0x568   : > { %v6243_v6 = vsel %vm18951_vm7, %v15685_v24, 0  ;;  %v6366_v31 = vshll.u32 %v15685_v24, 16  ;;  %vm18970_vm7 = vcmask 392192   ;;  %v6446_v54 = vrot.slane %v6178_v47, 1 }
 0x569   : > { %v6779_v58 = vrot.slane %v6243_v6, 1  ;;  %vm18979_vm2 = vnez %v18096_v10  ;;  %v6530_v51 = vshrl.u32 %v15685_v24, 16  ;;  %v6534_v38 = vshll.u32 %v15714_v11, 16 }
 0x56a   : > { %v6368_v42 = vrot.slane %v6366_v31, 1  ;;  %v6194_v37 = vsel %vm18979_vm2, %v15575_v59, 0  ;;  %v6157_v55 = vsel %vm18885_vm15, %v15069_v12, 0  ;;  %v6211_v25 = vsel %vm18973_vm12, %v15685_v24, 0 }
 0x56b   : > { %v6685_v43 = vpop.permute.xlu0 %6684  ;;  %6398 = vrot.lane.b32.xlu1 %v15613_v4, %s18489_s28  ;;  %v6780_v57 = vsel %vm18969_vm4, %v15609_v30, %v6779_v58  ;;  %vm18981_vm0 = vcmask 64512   ;;  %vm18982_vm4 = vcmask 130048   ;;  %v6227_v26 = vsel %vm18979_vm2, %v15685_v24, 0 }
 0x56c   : > { %v7008_v15 = vsel %vm18970_vm7, %v6976_v35, %v6685_v43  ;;  %6810 = vrot.lane.b32.xlu0 %v6780_v57, %s18486_s27  ;;  %v6369_v7 = vsel %vm18971_vm13, %v6364_v32, %v6368_v42  ;;  %v6532_v32 = vor.u32 %v6530_v51, %v6368_v42  ;;  %v6536_v43 = vrot.slane %v6534_v38, 1  ;;  %vm18983_vm7 = vmmov %vm18971_vm13 }
 0x56d   : > { %v6721_v53 = vpop.permute.xlu1 %6720  ;;  %6730 = vrot.lane.b32.xlu2 %v6369_v7, %s18385_s0  ;;  %vm18984_vm15 = vnez %v18129_v45  ;;  %vm18985_vm13 = vcmask 195584  }
 0x56e   : > { %v7040_v4 = vsel %vm18974_vm6, %v7008_v15, %v6721_v53  ;;  %v6391_v30 = vpop.permute.xlu2 %6390  ;;  %v6537_v15 = vsel %vm18983_vm7, %v6532_v32, %v6536_v43  ;;  %v6179_v12 = vsel %vm18984_vm15, %v15685_v24, 0  ;;  %vm18986_vm6 = vmmov %vm18980_vm5  ;;  %v15751_v27 = vpop.f32.mrf.mxu3  ;;  %vm18994_vm7 = vcmask 588800  }
 0x56f   : > { %v7072_v19 = vsel %vm18975_vm1, %v7040_v4, %v6801_v3  ;;  %v6447_v3 = vsel %vm18980_vm5, %v15630_v44, %v6446_v54  ;;  %v6616_v44 = vrot.slane %v6211_v25, 1  ;;  %vm18987_vm1 = vcmask 261120  }
 0x570   : > { %9397 = vmatmul.msk.bf16.gmra.mxu3 %vm18976_vm8, %v7072_v19  ;;  %vm18988_vm8 = vcmask 326656   ;;  %vm18990_vm5 = vcmask 392192  }
 0x571   : > { %v6617_v47 = vsel %vm18986_vm6, %v15659_v52, %v6616_v44 }
 0x573   : > { %v6389_v8 = vpop.permute.xlu0 %6388  ;;  %6566 = vrot.lane.b32.xlu1 %v6369_v7, %s18478_s9 }
 0x574   : > { %6526 = vrot.lane.b32.xlu0 %v6194_v37, %s17821_s1  ;;  %v6844_v31 = vsel %vm18981_vm0, %v6157_v55, %v6389_v8  ;;  %v6448_v8 = vrot.slane %v6179_v12, 1  ;;  %v6244_v37 = vsel %vm18973_vm12, %v15714_v11, 0  ;;  %vm18991_vm0 = vcmask 457728  }
 0x575   : > { %v6469_v6 = vpop.permute.xlu1 %6468  ;;  %6478 = vrot.lane.b32.xlu2 %v6447_v3, %s18492_s30  ;;  %v6781_v51 = vrot.slane %v6244_v37, 1  ;;  %vm18993_vm12 = vcmask 523264  }
 0x576   : > { %v6882_v35 = vsel %vm18982_vm4, %v6844_v31, %v6469_v6  ;;  %v6559_v57 = vpop.permute.xlu2 %6558  ;;  %vm18992_vm4 = vmmov %vm18986_vm6  ;;  %v15768_v31 = vpop.f32.mrf.mxu3  ;;  %vm18997_vm6 = vcmask 64512  }
 0x577   : > { %v6914_v42 = vsel %vm18985_vm13, %v6882_v35, %v15662_v36  ;;  %v6449_v36 = vsel %vm18989_vm14, %v6446_v54, %v6448_v8  ;;  %v6782_v25 = vsel %vm18992_vm4, %v6779_v58, %v6781_v51  ;;  %v6212_v54 = vsel %vm18984_vm15, %v15714_v11, 0  ;;  %vm18995_vm13 = vmmov %vm18992_vm4 }
 0x578   : > { %v6618_v32 = vrot.slane %v6212_v54, 1  ;;  %v6158_v58 = vsel %vm18906_vm11, %v15139_v40, 0  ;;  %vm18996_vm15 = vnez %v18133_v1  ;;  %vm18999_vm11 = vcmask 195584  }
 0x579   : > { %v6195_v45 = vsel %vm18996_vm15, %v15685_v24, 0  ;;  %vm19001_vm14 = vsmask.f32 7424 }
 0x57a   : > { %v6619_v35 = vsel %vm18995_vm13, %v6616_v44, %v6618_v32  ;;  %v6700_v44 = vshrl.u32 %v15714_v11, 16  ;;  %vm19007_vm13 = vcmask 588800  }
 0x57b   : > { %v6557_v53 = vpop.permute.xlu0 %6556  ;;  %6732 = vrot.lane.b32.xlu1 %v6537_v15, %s18385_s0 }
 0x57c   : > { %6696 = vrot.lane.b32.xlu0 %v6227_v26, %s18170_s29  ;;  %v6946_v4 = vsel %vm18987_vm1, %v6914_v42, %v6557_v53  ;;  %vm18998_vm1 = vcmask 130048  }
 0x57d   : > { %v6639_v19 = vpop.permute.xlu1 %6638  ;;  %6648 = vrot.lane.b32.xlu2 %v6617_v47, %s18159_s7  ;;  %v6702_v47 = vor.u32 %v6700_v44, %v6536_v43  ;;  %v6228_v43 = vsel %vm18996_vm15, %v15714_v11, 0  ;;  %v6159_v11 = vsel %vm18336_vm9, %v15239_v17, 0 }
 0x57e   : > { %v6978_v3 = vsel %vm18988_vm8, %v6946_v4, %v6639_v19  ;;  %v6725_v55 = vpop.permute.xlu2 %6724  ;;  %v15785_v4 = vpop.f32.mrf.mxu3  ;;  %vm19000_vm8 = vmmov %vm18992_vm4  ;;  %vm19004_vm4 = vcmask 392192  }
 0x57f   : > { %v7010_v52 = vsel %vm18990_vm5, %v6978_v3, %v15681_v23  ;;  %v6783_v63 = vsel %vm19000_vm8, %v6781_v51, %v10069_v60  ;;  %v6703_v24 = vsel %vm19001_vm14, %v6702_v47, %v10069_v60  ;;  %vm19002_vm5 = vcmask 261120   ;;  %vm19010_vm9 = vmmov %vm19004_vm4 }
 0x580   : > { %vm19008_vm8 = vmmov %vm19002_vm5  ;;  %v6160_v47 = vsel %vm18939_vm10, %v15337_v48, 0 }
 0x583   : > { %v6723_v38 = vpop.permute.xlu0 %6722  ;;  %6480 = vrot.lane.b32.xlu1 %v6449_v36, %s18492_s30 }
 0x584   : > { %v7042_v6 = vsel %vm18991_vm0, %v7010_v52, %v6723_v38  ;;  %6400 = vrot.lane.b32.xlu0 %v6369_v7, %s18489_s28  ;;  %v6847_v7 = vsel %vm18997_vm6, %v6158_v58, %v6391_v30  ;;  %vm19003_vm0 = vcmask 326656   ;;  %s19245_s28 = smov 80  }
 0x585   : > { %v6803_v29 = vpop.permute.xlu1 %6802  ;;  %6812 = vrot.lane.b32.xlu2 %v6782_v25, %s18486_s27  ;;  %vm19009_vm14 = vmmov %vm19003_vm0 }
 0x586   : > { %v7074_v23 = vsel %vm18993_vm12, %v7042_v6, %v6803_v29  ;;  %v6473_v12 = vpop.permute.xlu2 %6472  ;;  %vm19005_vm12 = vcmask 457728  }
 0x587   : > { %9398 = vmatmul.msk.bf16.gmra.mxu3 %vm18994_vm7, %v7074_v23  ;;  %vm19006_vm7 = vcmask 523264  }
 0x58a   : > { %v15800_v37 = vpop.f32.mrf.mxu3 }
 0x58b   : > { %v6471_v53 = vpop.permute.xlu0 %6470  ;;  %6650 = vrot.lane.b32.xlu1 %v6619_v35, %s18159_s7 }
 0x58c   : > { %6568 = vrot.lane.b32.xlu0 %v6537_v15, %s18478_s9  ;;  %v6884_v42 = vsel %vm18998_vm1, %v6847_v7, %v6471_v53 }
 0x58d   : > { %v6519_v26 = vpop.permute.xlu1 %6518  ;;  %6528 = vrot.lane.b32.xlu2 %v6195_v45, %s17821_s1  ;;  %s9804_s1 = smov 112  }
 0x58e   : > { %v6916_v40 = vsel %vm18999_vm11, %v6884_v42, %v6519_v26  ;;  %v6643_v3 = vpop.permute.xlu2 %6642 }
 0x58f   : > { %v6948_v30 = vsel %vm19002_vm5, %v6916_v40, %v6559_v57  ;;  %vm19011_vm5 = vmmov %vm19005_vm12 }
 0x590   : > { %vm19020_vm10 = vmmov %vm19011_vm5 }
 0x592   : > { %v15810_v25 = vpop.f32.mrf.mxu3 }
 0x593   : > { %v6641_v15 = vpop.permute.xlu0 %6640  ;;  %6814 = vrot.lane.b32.xlu1 %v6783_v63, %s18486_s27 }
 0x594   : > { %6734 = vrot.lane.b32.xlu0 %v6703_v24, %s18385_s0  ;;  %v6980_v19 = vsel %vm19003_vm0, %v6948_v30, %v6641_v15  ;;  %vm19012_vm0 = vmmov %vm19006_vm7  ;;  %s782_s0 = sand.u32 1, %s9774_s3  }
 0x595   : > { %v6689_v8 = vpop.permute.xlu1 %6688  ;;  %6698 = vrot.lane.b32.xlu2 %v6228_v43, %s18170_s29  ;;  %s783_s26 = scalar_lea.vmem [#allocation2], %s782_s0  ;;  %s9180_s6 = scalar_lea.sflag [#allocation3], %s782_s0 }
 0x596   : > { %v7012_v36 = vsel %vm19004_vm4, %v6980_v19, %v6689_v8  ;;  %v6807_v29 = vpop.permute.xlu2 %6806  ;;  %vm19013_vm4 = vmmov %vm19007_vm13  ;;  %s9190_s7 = sshll.u32 %s783_s26, 4  ;;  %s9191_s7 = int_to_ptr.vmem [resolvable:$true] %s9190_s7 }
 0x597   : > { %v7044_v38 = vsel %vm19005_vm12, %v7012_v36, %v6725_v55  ;;  %vm19014_vm12 = vmmov %vm18997_vm6 }
 0x59b   : > { %v6805_v51 = vpop.permute.xlu0 %6804 }
 0x59c   : > { %v7076_v57 = vsel %vm19006_vm7, %v7044_v38, %v6805_v51  ;;  %vm19015_vm7 = vmmov %vm18998_vm1 }
 0x59d   : > { %v6393_v52 = vpop.permute.xlu1 %6392  ;;  %9399 = vmatmul.msk.bf16.gmra.mxu3 %vm19007_vm13, %v7076_v57  ;;  %vm19016_vm13 = vmmov %vm18999_vm11 }
 0x59e   : > { %v6850_v6 = vsel %vm18997_vm6, %v6159_v11, %v6393_v52  ;;  %v6523_v14 = vpop.permute.xlu2 %6522  ;;  %vm19017_vm6 = vmmov %vm19008_vm8 }
 0x59f   : > { %v6886_v23 = vsel %vm18998_vm1, %v6850_v6, %v6473_v12  ;;  %vm19018_vm1 = vmmov %vm19009_vm14 }
 0x5a0   : > { %v15815_v53 = vpop.f32.mrf.mxu3 }
 0x5a3   : > { %v6521_v54 = vpop.permute.xlu0 %6520 }
 0x5a4   : > { %v6918_v32 = vsel %vm18999_vm11, %v6886_v23, %v6521_v54  ;;  %vm19019_vm11 = vmmov %vm19010_vm9 }
 0x5a5   : > { %v6561_v55 = vpop.permute.xlu1 %6560 }
 0x5a6   : > { %v6950_v35 = vsel %vm19008_vm8, %v6918_v32, %v6561_v55  ;;  %v6693_v63 = vpop.permute.xlu2 %6692  ;;  %vm19021_vm8 = vmmov %vm19012_vm0  ;;  %v6161_v32 = vsel %vm18958_vm3, %v15404_v2, 0 }
 0x5a7   : > { %v6982_v45 = vsel %vm19009_vm14, %v6950_v35, %v6643_v3  ;;  %vm19022_vm14 = vmmov %vm19013_vm4 }
 0x5a8   : > { %v15822_v42 = vpop.f32.mrf.mxu3  ;;  %vm19029_vm3 = vmmov %vm19020_vm10 }
 0x5ab   : > { %v6691_v58 = vpop.permute.xlu0 %6690 }
 0x5ac   : > { %v7014_v17 = vsel %vm19010_vm9, %v6982_v45, %v6691_v58  ;;  %vm19023_vm9 = vmmov %vm19014_vm12 }
 0x5ad   : > { %v6727_v7 = vpop.permute.xlu1 %6726 }
 0x5ae   : > { %v7046_v26 = vsel %vm19011_vm5, %v7014_v17, %v6727_v7  ;;  %v6397_v36 = vpop.permute.xlu2 %6396  ;;  %vm19024_vm5 = vmmov %vm19015_vm7 }
 0x5af   : > { %v7078_v44 = vsel %vm19012_vm0, %v7046_v26, %v6807_v29  ;;  %v6856_v55 = vsel %vm19023_vm9, %v6161_v32, %v6397_v36  ;;  %vm19025_vm0 = vmmov %vm19016_vm13 }
 0x5b0   : > { %9400 = vmatmul.msk.bf16.gmra.mxu3 %vm19013_vm4, %v7078_v44  ;;  %vm19026_vm4 = vmmov %vm19017_vm6 }
 0x5b3   : > { %v6395_v12 = vpop.permute.xlu0 %6394  ;;  %v7183_v43 = vpop.f32.mrf.mxu3 }
 0x5b4   : > { %v6853_v15 = vsel %vm19014_vm12, %v6160_v47, %v6395_v12  ;;  %vm19027_vm12 = vmmov %vm19018_vm1 }
 0x5b5   : > { %v6475_v40 = vpop.permute.xlu1 %6474 }
 0x5b6   : > { %v6888_v24 = vsel %vm19015_vm7, %v6853_v15, %v6475_v40  ;;  %v6565_v6 = vpop.permute.xlu2 %6564  ;;  %vm19028_vm7 = vmmov %vm19019_vm11 }
 0x5b7   : > { %v6920_v19 = vsel %vm19016_vm13, %v6888_v24, %v6523_v14  ;;  %vm19030_vm13 = vmmov %vm19021_vm8  ;;  %v6162_v24 = vsel %vm18979_vm2, %v15501_v49, 0 }
 0x5b8   : > { %vm19037_vm2 = vmmov %vm19028_vm7 }
 0x5bb   : > { %v6563_v30 = vpop.permute.xlu0 %6562  ;;  %v7185_v52 = vpop.f32.mrf.mxu3 }
 0x5bc   : > { %v6952_v8 = vsel %vm19017_vm6, %v6920_v19, %v6563_v30  ;;  %vm19031_vm6 = vmmov %vm19022_vm14 }
 0x5bd   : > { %v6645_v3 = vpop.permute.xlu1 %6644 }
 0x5be   : > { %v6984_v51 = vsel %vm19018_vm1, %v6952_v8, %v6645_v3  ;;  %vm19032_vm1 = vmmov %vm19023_vm9 }
 0x5bf   : > { %v7016_v33 = vsel %vm19019_vm11, %v6984_v51, %v6693_v63  ;;  %vm19033_vm11 = vmmov %vm19024_vm5 }
 0x5c0   : > { %vm19038_vm9 = vmmov %vm19029_vm3 }
 0x5c3   : > { %v6729_v38 = vpop.permute.xlu0 %6728 }
 0x5c4   : > { %v7048_v48 = vsel %vm19020_vm10, %v7016_v33, %v6729_v38  ;;  %vm19034_vm10 = vmmov %vm19025_vm0 }
 0x5c5   : > { %v6809_v57 = vpop.permute.xlu1 %6808 }
 0x5c6   : > { %v7080_v11 = vsel %vm19021_vm8, %v7048_v48, %v6809_v57  ;;  %vm19035_vm8 = vmmov %vm19026_vm4 }
 0x5c7   : > { %9401 = vmatmul.msk.bf16.gmra.mxu3 %vm19022_vm14, %v7080_v11  ;;  %v6731_v58 = vpop.permute.xlu2 %6730  ;;  %vm19036_vm14 = vmmov %vm19027_vm12 }
 0x5ca   : > { %v7188_v23 = vpop.f32.mrf.mxu3 }
 0x5cb   : > { %v6477_v29 = vpop.permute.xlu0 %6476 }
 0x5cc   : > { %v6890_v35 = vsel %vm19024_vm5, %v6856_v55, %v6477_v29  ;;  %vm19039_vm5 = vmmov %vm19030_vm13  ;;  %v6163_v55 = vsel %vm18996_vm15, %v15575_v59, 0 }
 0x5cd   : > { %v6525_v54 = vpop.permute.xlu1 %6524  ;;  %vm19045_vm15 = vmmov %vm19036_vm14 }
 0x5ce   : > { %v6922_v45 = vsel %vm19025_vm0, %v6890_v35, %v6525_v54  ;;  %vm19040_vm0 = vmmov %vm19031_vm6 }
 0x5cf   : > { %v6954_v7 = vsel %vm19026_vm4, %v6922_v45, %v6565_v6  ;;  %v6479_v47 = vpop.permute.xlu2 %6478  ;;  %vm19041_vm4 = vmmov %vm19032_vm1 }
 0x5d2   : > { %v7190_v26 = vpop.f32.mrf.mxu3 }
 0x5d3   : > { %v6647_v14 = vpop.permute.xlu0 %6646 }
 0x5d4   : > { %v6986_v44 = vsel %vm19027_vm12, %v6954_v7, %v6647_v14  ;;  %vm19042_vm12 = vmmov %vm19033_vm11  ;;  %v19054_v7 = vld [vmem:[#allocation49_spill] sm:$0xff] }
 0x5d5   : > { %v6695_v17 = vpop.permute.xlu1 %6694 }
 0x5d6   : > { %v7018_v12 = vsel %vm19028_vm7, %v6986_v44, %v6695_v17  ;;  %vm19043_vm7 = vmmov %vm19034_vm10  ;;  %v19056_v44 = vld [vmem:[#allocation47_spill] sm:$0xff] }
 0x5d7   : > { %v7050_v2 = vsel %vm19029_vm3, %v7018_v12, %v6731_v58  ;;  %v6649_v8 = vpop.permute.xlu2 %6648  ;;  %vm19044_vm3 = vmmov %vm19035_vm8 }
 0x5dd   : > { %v6399_v40 = vpop.permute.xlu1 %6398 }
 0x5de   : > { %v6811_v39 = vpop.permute.xlu0 %6810  ;;  %v6859_v30 = vsel %vm19032_vm1, %v6162_v24, %v6399_v40  ;;  %vm19049_vm1 = vmmov %vm19039_vm5  ;;  %v19059_v40 = vld [vmem:[#allocation37_spill] sm:$0xff]  ;;  %v19063_v24 = vld [vmem:[#allocation28_spill] sm:$0xff] }
 0x5df   : > { %v7082_v63 = vsel %vm19030_vm13, %v7050_v2, %v6811_v39  ;;  %v6892_v36 = vsel %vm19033_vm11, %v6859_v30, %v6479_v47  ;;  %v6813_v11 = vpop.permute.xlu2 %6812  ;;  %vm19046_vm13 = vmmov %vm19037_vm2  ;;  %v19058_v47 = vld [vmem:[#allocation45_spill] sm:$0xff]  ;;  %v19060_v39 = vld [vmem:[#allocation35_spill] sm:$0xff] }
 0x5e0   : > { %v7193_v15 = vpop.f32.mrf.mxu3  ;;  %9402 = vmatmul.msk.bf16.gmra.mxu3 %vm19031_vm6, %v7082_v63  ;;  %vm19047_vm6 = vmmov %vm19038_vm9  ;;  %v19061_v2 = vld [vmem:[#allocation33_spill] sm:$0xff]  ;;  %v19064_v30 = vld [vmem:[#allocation26_spill] sm:$0xff] }
 0x5e1   : > { %vm19050_vm11 = vmmov %vm19040_vm0 }
 0x5e5   : > { %v6567_v19 = vpop.permute.xlu1 %6566 }
 0x5e6   : > { %v6527_v3 = vpop.permute.xlu0 %6526 }
 0x5e7   : > { %v6924_v51 = vsel %vm19034_vm10, %v6892_v36, %v6527_v3 }
 0x5e8   : > { %v7195_v38 = vpop.f32.mrf.mxu3  ;;  %v6956_v33 = vsel %vm19035_vm8, %v6924_v51, %v6567_v19  ;;  %v19065_v19 = vld [vmem:[#allocation27_spill] sm:$0xff] }
 0x5e9   : > { %7238 = vmatpush.msrb.mxu0 %v7195_v38  ;;  %v6988_v10 = vsel %vm19036_vm14, %v6956_v33, %v6649_v8 }
 0x5eb   : > { %7239 = vmatpush.msrb.mxu0 %v7193_v15  ;;  %v19062_v15 = vld [vmem:[#allocation31_spill] sm:$0xff] }
 0x5ed   : > { %v6733_v48 = vpop.permute.xlu1 %6732  ;;  %7240 = vmatpush.msrb.mxu0 %v7190_v26  ;;  %v19055_v26 = vld [vmem:[#allocation48_spill] sm:$0xff] }
 0x5ee   : > { %v6697_v57 = vpop.permute.xlu0 %6696 }
 0x5ef   : > { %v7020_v49 = vsel %vm19037_vm2, %v6988_v10, %v6697_v57  ;;  %7241 = vmatpush.msrb.mxu0 %v7188_v23 }
 0x5f0   : > { %v7052_v6 = vsel %vm19038_vm9, %v7020_v49, %v6733_v48 }
 0x5f1   : > { %7242 = vmatpush.msrb.mxu0 %v7185_v52  ;;  %v7084_v29 = vsel %vm19039_vm5, %v7052_v6, %v6813_v11  ;;  %v6529_v52 = vpop.permute.xlu2 %6528 }
 0x5f2   : > { %9403 = vmatmul.msk.bf16.gmra.mxu3 %vm19040_vm0, %v7084_v29  ;;  %v5762_v29 = vld [vmem:[%s17378_s20] sm:$0xff] }
 0x5f3   : > { %7243 = vmatpush.msrb.mxu0 %v7183_v43  ;;  %v7198_v17 = vpop.f32.mrf.mxu3 }
 0x5f5   : > { %v6481_v54 = vpop.permute.xlu1 %6480  ;;  %7244 = vmatpush.msrb.mxu0 %v15822_v42 }
 0x5f6   : > { %v6401_v32 = vpop.permute.xlu0 %6400 }
 0x5f7   : > { %7245 = vmatpush.msrb.mxu0 %v15815_v53  ;;  %v6862_v23 = vsel %vm19041_vm4, %v6163_v55, %v6401_v32  ;;  %v5764_v32 = vld [vmem:[%s17378_s20 + $0x10] sm:$0xff]  ;;  %v5766_v55 = vld [vmem:[%s17378_s20 + $0x20] sm:$0xff] }
 0x5f8   : > { %v6894_v35 = vsel %vm19042_vm12, %v6862_v23, %v6481_v54  ;;  %v5768_v23 = vld [vmem:[%s17378_s20 + $0x30] sm:$0xff] }
 0x5f9   : > { %7246 = vmatpush.msrb.mxu0 %v15810_v25  ;;  %v6926_v58 = vsel %vm19043_vm7, %v6894_v35, %v6529_v52  ;;  %v6699_v25 = vpop.permute.xlu2 %6698  ;;  %v5763_v52 = vld [vmem:[%s17378_s20 + $0x8] sm:$0xff]  ;;  %v5770_v35 = vld [vmem:[%s17378_s20 + $0x40] sm:$0xff] }
 0x5fb   : > { %7247 = vmatpush.msrb.mxu0 %v15800_v37  ;;  %v7200_v12 = vpop.f32.mrf.mxu3 }
 0x5fd   : > { %v6651_v43 = vpop.permute.xlu1 %6650  ;;  %7248 = vmatpush.msrb.mxu0 %v15785_v4 }
 0x5fe   : > { %v6569_v42 = vpop.permute.xlu0 %6568 }
 0x5ff   : > { %7249 = vmatpush.msrb.mxu0 %v15768_v31  ;;  %v6958_v1 = vsel %vm19044_vm3, %v6926_v58, %v6569_v42  ;;  %v19048_v31 = vld [vmem:[#allocation21_spill] sm:$0xff]  ;;  %v15966_v58 = vld [vmem:[%s19069_s11] ss:$0 sm:$0xff] }
 0x600   : > { %v6990_v59 = vsel %vm19045_vm15, %v6958_v1, %v6651_v43  ;;  %v5765_v43 = vld [vmem:[%s17378_s20 + $0x18] sm:$0xff]  ;;  %v5772_v42 = vld [vmem:[%s17378_s20 + $0x50] sm:$0xff] }
 0x601   : > { %7250 = vmatpush.msrb.mxu0 %v15751_v27  ;;  %v7022_v53 = vsel %vm19046_vm13, %v6990_v59, %v6699_v25  ;;  %v19051_v27 = vld [vmem:[#allocation51_spill] sm:$0xff]  ;;  %v19070_v1 = vld [vmem:[#allocation14_spill] sm:$0xff] }
 0x602   : > { %v7444_v59 = vand.u32 7, %v19070_v1 }
 0x603   : > { %7251 = vmatpush.msrb.mxu0 %v15720_v18  ;;  %v19052_v18 = vld [vmem:[#allocation20_spill] sm:$0xff] }
 0x604   : > { %vm7520_vm8 = vcmp.lt.s32.totalorder %v7444_v59, 7  ;;  %vm16005_vm3 = vcmp.gt.s32.totalorder %v7444_v59, 0 }
 0x605   : > { %7252 = vmatpush.msrb.mxu0 %v15700_v41  ;;  %v6815_v4 = vpop.permute.xlu1 %6814  ;;  %v19053_v41 = vld [vmem:[#allocation50_spill] sm:$0xff]  ;;  %vm7528_vm2 = vmpackc.low %vm7520_vm8, %vm7520_vm8  ;;  %vm17727_vm8 = vsmask.f32 4352 }
 0x606   : > { %v6735_v37 = vpop.permute.xlu0 %6734  ;;  %vm7460_vm15 = vmpackc.low %vm16005_vm3, %vm16005_vm3 }
 0x607   : > { %v7054_v45 = vsel %vm19047_vm6, %v7022_v53, %v6735_v37  ;;  %7253 = vmatpush.msrb.mxu0 %v15672_v62  ;;  %v19057_v62 = vld [vmem:[#allocation44_spill] sm:$0xff] }
 0x608   : > { %v7086_v14 = vsel %vm19049_vm1, %v7054_v45, %v6815_v4  ;;  %7254 = vmatmul.f32.vlgmr.msrb.gmra.mxu0 %v5762_v29  ;;  %v15973_v4 = vld [vmem:[%s17370_s12] ss:$0 sm:$0xff] }
 0x609   : > { %8069 = vmatpush.msra.mxu0 %v19048_v31  ;;  %9404 = vmatmul.msk.bf16.gmra.mxu3 %vm19050_vm11, %v7086_v14  ;;  %v19071_v31 = vld [vmem:[#allocation17_spill] sm:$0xff] }
 0x60a   : > { %v7203_v63 = vpop.f32.mrf.mxu3  ;;  %v7445_v14 = vand.u32 7, %v19071_v31 }
 0x60b   : > { %8070 = vmatpush.msra.mxu0 %v19051_v27  ;;  %v19072_v27 = vld [vmem:[#allocation15_spill] sm:$0xff] }
 0x60c   : > { %vm15978_vm9 = vcmp.lt.s32.totalorder %v7445_v14, 7  ;;  %vm16014_vm13 = vcmp.gt.s32.totalorder %v7445_v14, 0 }
 0x60d   : > { %8071 = vmatpush.msra.mxu0 %v19052_v18  ;;  %v7446_v18 = vand.u32 7, %v19072_v27  ;;  %vm7529_vm0 = vmpackc.low %vm15978_vm9, %vm15978_vm9 }
 0x60e   : > { %vm7461_vm6 = vmpackc.low %vm16014_vm13, %vm16014_vm13 }
 0x60f   : > { %8072 = vmatpush.msra.mxu0 %v19053_v41  ;;  %vm15982_vm5 = vcmp.lt.s32.totalorder %v7446_v18, 7  ;;  %vm16031_vm1 = vcmp.gt.s32.totalorder %v7446_v18, 0 }
 0x610   : > { %7257 = vmatmul.f32.gmra.mxu0 %v5764_v32  ;;  %vm7530_vm12 = vmpackc.low %vm15982_vm5, %vm15982_vm5 }
 0x611   : > { %8073 = vmatpush.msra.mxu0 %v19054_v7 }
 0x612   : > { %v7205_v8 = vpop.f32.mrf.mxu3 }
 0x613   : > { %8074 = vmatpush.msra.mxu0 %v19055_v26 }
 0x615   : > { %8075 = vmatpush.msra.mxu0 %v19056_v44 }
 0x617   : > { %8076 = vmatpush.msra.mxu0 %v19057_v62  ;;  %v19077_v62 = vmov 0  }
 0x618   : > { %7260 = vmatmul.f32.gmra.mxu0 %v5766_v55 }
 0x619   : > { %8077 = vmatpush.msra.mxu0 %v19058_v47  ;;  %v7536_v47 = vsel %vm7528_vm2, 65537, %v19077_v62  ;;  %vm19092_vm2 = vcmask 1040384  }
 0x61b   : > { %8078 = vmatpush.msra.mxu0 %v19059_v40 }
 0x61d   : > { %8079 = vmatpush.msra.mxu0 %v19060_v39 }
 0x61f   : > { %8080 = vmatpush.msra.mxu0 %v19061_v2 }
 0x620   : > { %v7208_v3 = vpop.f32.mrf.mxu3  ;;  %7263 = vmatmul.f32.gmra.mxu0 %v5768_v23 }
 0x621   : > { %8081 = vmatpush.msra.mxu0 %v19062_v15  ;;  %v7544_v15 = vunpack.c.l.b16 %v7536_v47 }
 0x623   : > { %8082 = vmatpush.msra.mxu0 %v19063_v24 }
 0x625   : > { %8083 = vmatpush.msra.mxu0 %v19064_v30 }
 0x627   : > { %8084 = vmatpush.msra.mxu0 %v19065_v19  ;;  %v7537_v19 = vsel %vm7529_vm0, 65537, %v19077_v62 }
 0x628   : > { %v7210_v36 = vpop.f32.mrf.mxu3  ;;  %7266 = vmatmul.f32.gmra.mxu0 %v5770_v35 }
 0x630   : > { %7269 = vmatmul.f32.gmra.mxu0 %v5772_v42 }
 0x633   : > { %v7213_v51 = vpop.f32.mrf.mxu3 }
 0x63b   : > { %v7215_v38 = vpop.f32.mrf.mxu3 }
 0x64a   : > { %v7218_v33 = vpop.f32.mrf.mxu3 }
 0x652   : > { %v7220_v48 = vpop.f32.mrf.mxu3 }
 0x663   : > { %v7223_v57 = vpop.f32.mrf.mxu3 }
 0x66b   : > { %v7225_v10 = vpop.f32.mrf.mxu3 }
 0x675   : > { %v7228_v49 = vpop.f32.mrf.mxu3 }
 0x67d   : > { %v7230_v11 = vpop.f32.mrf.mxu3 }
 0x68c   : > { %v7233_v6 = vpop.f32.mrf.mxu3 }
 0x694   : > { %v7235_v54 = vpop.f32.mrf.mxu3 }
 0x695   : > { %7279 = vmatpush.msrb.mxu1 %v7235_v54 }
 0x697   : > { %7280 = vmatpush.msrb.mxu1 %v7233_v6 }
 0x699   : > { %7281 = vmatpush.msrb.mxu1 %v7230_v11 }
 0x69b   : > { %7282 = vmatpush.msrb.mxu1 %v7228_v49  ;;  %v7545_v49 = vunpack.c.l.b16 %v7537_v19 }
 0x69d   : > { %7283 = vmatpush.msrb.mxu1 %v7225_v10 }
 0x69f   : > { %7284 = vmatpush.msrb.mxu1 %v7223_v57 }
 0x6a1   : > { %7285 = vmatpush.msrb.mxu1 %v7220_v48 }
 0x6a3   : > { %7286 = vmatpush.msrb.mxu1 %v7218_v33 }
 0x6a5   : > { %7287 = vmatpush.msrb.mxu1 %v7215_v38 }
 0x6a7   : > { %7288 = vmatpush.msrb.mxu1 %v7213_v51 }
 0x6a9   : > { %7289 = vmatpush.msrb.mxu1 %v7210_v36 }
 0x6ab   : > { %7290 = vmatpush.msrb.mxu1 %v7208_v3 }
 0x6ad   : > { %7291 = vmatpush.msrb.mxu1 %v7205_v8  ;;  %v7538_v8 = vsel %vm7530_vm12, 65537, %v19077_v62 }
 0x6ae   : > { %v7546_v11 = vunpack.c.l.b16 %v7538_v8 }
 0x6af   : > { %7292 = vmatpush.msrb.mxu1 %v7203_v63 }
 0x6b1   : > { %7293 = vmatpush.msrb.mxu1 %v7200_v12 }
 0x6b3   : > { %7294 = vmatpush.msrb.mxu1 %v7198_v17 }
 0x6b4   : > { %7295 = vmatmul.f32.vlgmr.msrb.gmra.mxu1 %v5763_v52 }
 0x6b5   : > { %8110 = vmatpush.msra.mxu1 %v15642_v61 }
 0x6b7   : > { %8111 = vmatpush.msra.mxu1 %v15632_v22  ;;  %v5774_v22 = vld [vmem:[%s17378_s20 + $0x60] sm:$0xff] }
 0x6b8   : > { %7272 = vmatmul.f32.gmra.mxu0 %v5774_v22 }
 0x6b9   : > { %8112 = vmatpush.msra.mxu1 %v15505_v0  ;;  %v5767_v0 = vld [vmem:[%s17378_s20 + $0x28] sm:$0xff] }
 0x6bb   : > { %8113 = vmatpush.msra.mxu1 %v15484_v5  ;;  %v19068_v5 = vld [vmem:[#allocation12_spill] sm:$0xff] }
 0x6bc   : > { %7298 = vmatmul.f32.gmra.mxu1 %v5765_v43  ;;  %v7443_v61 = vand.u32 7, %v19068_v5 }
 0x6bd   : > { %8114 = vmatpush.msra.mxu1 %v15411_v46 }
 0x6be   : > { %vm7519_vm10 = vcmp.lt.s32.totalorder %v7443_v61, 7  ;;  %vm15991_vm4 = vcmp.gt.s32.totalorder %v7443_v61, 0 }
 0x6bf   : > { %8115 = vmatpush.msra.mxu1 %v15395_v9  ;;  %v5776_v9 = vld [vmem:[%s17378_s20 + $0x70] sm:$0xff]  ;;  %vm7527_vm14 = vmpackc.low %vm7519_vm10, %vm7519_vm10 }
 0x6c0   : > { %7275 = vmatmul.f32.gmra.mxu0 %v5776_v9  ;;  %v7535_v12 = vsel %vm7527_vm14, 65537, %v19077_v62  ;;  %vm7459_vm7 = vmpackc.low %vm15991_vm4, %vm15991_vm4 }
 0x6c1   : > { %8116 = vmatpush.msra.mxu1 %v15317_v13  ;;  %v5769_v13 = vld [vmem:[%s17378_s20 + $0x38] sm:$0xff]  ;;  %v7543_v63 = vunpack.c.l.b16 %v7535_v12  ;;  %v7467_v48 = vsel %vm7459_vm7, 65537, %v19077_v62  ;;  %vm7462_vm14 = vmpackc.low %vm16031_vm1, %vm16031_vm1 }
 0x6c3   : > { %8117 = vmatpush.msra.mxu1 %v15303_v50  ;;  %v7255_v50 = vpop.f32.mrf.mxu0  ;;  %v7551_v33 = vpack.c.b16 %v7544_v15, %v7543_v63  ;;  %v19096_v63 = vld [vmem:[#allocation13_spill] sm:$0xff] }
 0x6c4   : > { %7301 = vmatmul.f32.gmra.mxu1 %v5767_v0 }
 0x6c5   : > { %8118 = vmatpush.msra.mxu1 %v15243_v56  ;;  %v19066_v56 = vld [vmem:[#allocation54_spill] sm:$0xff] }
 0x6c7   : > { %8119 = vmatpush.msra.mxu1 %v15222_v20  ;;  %v19067_v20 = vld [vmem:[#allocation52_spill] sm:$0xff] }
 0x6c8   : > { %8085 = vmatmul.f32.vlgmr.msra.gmra.mxu0 %v5762_v29 }
 0x6c9   : > { %8120 = vmatpush.msra.mxu1 %v15146_v16  ;;  %v5771_v16 = vld [vmem:[%s17378_s20 + $0x48] sm:$0xff] }
 0x6cb   : > { %8121 = vmatpush.msra.mxu1 %v15130_v21  ;;  %v5773_v21 = vld [vmem:[%s17378_s20 + $0x58] sm:$0xff]  ;;  %v7258_v46 = vpop.f32.mrf.mxu0 }
 0x6cc   : > { %7304 = vmatmul.f32.gmra.mxu1 %v5769_v13 }
 0x6cd   : > { %8122 = vmatpush.msra.mxu1 %v15051_v28  ;;  %v5777_v28 = vld [vmem:[%s17378_s20 + $0x78] sm:$0xff] }
 0x6cf   : > { %8123 = vmatpush.msra.mxu1 %v15032_v34  ;;  %v5775_v34 = vld [vmem:[%s17378_s20 + $0x68] sm:$0xff] }
 0x6d0   : > { %8088 = vmatmul.f32.gmra.mxu0 %v5764_v32 }
 0x6d1   : > { %8124 = vmatpush.msra.mxu1 %v19066_v56 }
 0x6d3   : > { %8125 = vmatpush.msra.mxu1 %v19067_v20  ;;  %v7261_v45 = vpop.f32.mrf.mxu0  ;;  %v19085_v20 = vld [vmem:[#allocation16_spill] sm:$0xff] }
 0x6d4   : > { %7307 = vmatmul.f32.gmra.mxu1 %v5771_v16 }
 0x6d8   : > { %8091 = vmatmul.f32.gmra.mxu0 %v5766_v55  ;;  %v7555_v55 = vrot.slane %v7551_v33, 7 }
 0x6db   : > { %v7264_v30 = vpop.f32.mrf.mxu0 }
 0x6dc   : > { %7310 = vmatmul.f32.gmra.mxu1 %v5773_v21 }
 0x6e0   : > { %8094 = vmatmul.f32.gmra.mxu0 %v5768_v23  ;;  %v7468_v23 = vsel %vm7460_vm15, 65537, %v19077_v62  ;;  %vm19103_vm15 = vcmask 1044480  }
 0x6e1   : > { %vm19104_vm13 = vmmov %vm19103_vm15 }
 0x6e4   : > { %7313 = vmatmul.f32.gmra.mxu1 %v5775_v34 }
 0x6e8   : > { %8097 = vmatmul.f32.gmra.mxu0 %v5770_v35  ;;  %v7647_v35 = vrot.slane %v7551_v33, 3 }
 0x6ea   : > { %v7654_v59 = vunpack.c.l.b16 %v7647_v35  ;;  %v7655_v27 = vunpack.c.h.b16 %v7647_v35 }
 0x6ec   : > { %7316 = vmatmul.f32.gmra.mxu1 %v5777_v28  ;;  %vm16077_vm7 = vcmp.ne.s32.totalorder %v7655_v27, %v19096_v63 }
 0x6f0   : > { %8100 = vmatmul.f32.gmra.mxu0 %v5772_v42  ;;  %v16019_v42 = vpack.c.b16 %v7546_v11, %v7545_v49 }
 0x6f2   : > { %v7648_v14 = vrot.slane %v16019_v42, 3 }
 0x6f4   : > { %8126 = vmatmul.f32.vlgmr.msra.gmra.mxu1 %v5763_v52  ;;  %v7475_v52 = vunpack.c.l.b16 %v7467_v48 }
 0x6f6   : > { %v16027_v61 = vunpack.i.l.s16 %v7475_v52 }
 0x6f8   : > { %8103 = vmatmul.f32.gmra.mxu0 %v5774_v22  ;;  %v19084_v22 = vld [vmem:[#allocation23_spill] sm:$0xff] }
 0x6fc   : > { %8129 = vmatmul.f32.gmra.mxu1 %v5765_v43 }
 0x700   : > { %8106 = vmatmul.f32.gmra.mxu0 %v5776_v9 }
 0x704   : > { %8132 = vmatmul.f32.gmra.mxu1 %v5767_v0 }
 0x70c   : > { %8135 = vmatmul.f32.gmra.mxu1 %v5769_v13  ;;  %v7447_v13 = vand.u32 7, %v19084_v22 }
 0x70e   : > { %vm16036_vm11 = vcmp.lt.s32.totalorder %v7447_v13, 7 }
 0x70f   : > { %vm7531_vm5 = vmpackc.low %vm16036_vm11, %vm16036_vm11  ;;  %vm7612_vm11 = vcmp.ne.s32.totalorder %v16027_v61, %v19096_v63 }
 0x714   : > { %8138 = vmatmul.f32.gmra.mxu1 %v5771_v16  ;;  %v7476_v16 = vunpack.c.l.b16 %v7468_v23 }
 0x716   : > { %v16054_v40 = vunpack.i.l.s16 %v7476_v16 }
 0x718   : > { %vm7492_vm1 = vcmp.ne.s32.totalorder %v16054_v40, %v19096_v63 }
 0x71c   : > { %8141 = vmatmul.f32.gmra.mxu1 %v5773_v21  ;;  %v7448_v21 = vand.u32 7, %v19085_v20 }
 0x71e   : > { %vm16043_vm10 = vcmp.lt.s32.totalorder %v7448_v21, 7 }
 0x71f   : > { %vm7532_vm3 = vmpackc.low %vm16043_vm10, %vm16043_vm10 }
 0x724   : > { %8144 = vmatmul.f32.gmra.mxu1 %v5775_v34 }
 0x72c   : > { %8147 = vmatmul.f32.gmra.mxu1 %v5777_v28  ;;  %v7267_v28 = vpop.f32.mrf.mxu0 }
 0x731   : > { %v7296_v25 = vpop.f32.mrf.mxu1 }
 0x732   : > { %v7297_v37 = vadd.f32 %v7296_v25, %v7255_v50  ;;  %v7562_v50 = vunpack.c.l.b16 %v7555_v55 }
 0x734   : > { %v7324_v53 = vmul.f32 %v15966_v58, %v7297_v37  ;;  %v7556_v37 = vrot.slane %v16019_v42, 7 }
 0x736   : > { %v7336_v17 = vadd.f32 %v15973_v4, %v7324_v53  ;;  %v7469_v53 = vsel %vm7461_vm6, 65537, %v19077_v62  ;;  %v7557_v47 = vsel %vm19092_vm2, %v7555_v55, %v7556_v37  ;;  %vm16091_vm6 = vmand %vm19104_vm13, %vm17727_vm8  ;;  %vm16097_vm2 = vcmp.gt.s32.totalorder %v7447_v13, 0 }
 0x737   : > { %v7477_v18 = vunpack.c.l.b16 %v7469_v53  ;;  %v7569_v33 = vunpack.c.l.b16 %v7557_v47 }
 0x738   : > { %v7344_v39 = vmax.f32 %v7336_v17, 0.0 }
 0x739   : > { %v7299_v41 = vpop.f32.mrf.mxu1  ;;  %v16095_v48 = vunpack.i.l.s16 %v7477_v18 }
 0x73a   : > { %v7300_v44 = vadd.f32 %v7299_v41, %v7258_v46  ;;  %v7352_v36 = vpack.c.bf16 %v7344_v39, %v7344_v39  ;;  %v7563_v46 = vunpack.c.h.b16 %v7555_v55  ;;  %v19093_v39 = vld [vmem:[#allocation18_spill] sm:$0xff]  ;;  %v7570_v55 = vunpack.c.h.b16 %v7557_v47 }
 0x73b   : > { %vm7491_vm9 = vcmp.ne.s32.totalorder %v16027_v61, %v19093_v39  ;;  %vm16062_vm0 = vcmp.ne.s32.totalorder %v7562_v50, %v19093_v39  ;;  %vm16072_vm12 = vcmp.ne.s32.totalorder %v7654_v59, %v19093_v39  ;;  %v9612_v50 = vld [vmem:[%s17371_s13 + $0x40] sm:$0xff]  ;;  %v19117_v59 = vmov 0 }
 0x73c   : > { %v7325_v2 = vmul.f32 %v15966_v58, %v7300_v44  ;;  %v7386_v6 = vunpack.c.l.b16 %v7352_v36  ;;  %vm16067_vm4 = vcmp.ne.s32.totalorder %v7563_v46, %v19096_v63  ;;  %v7649_v36 = vsel %vm19103_vm15, %v7647_v35, %v7648_v14  ;;  %8047 = vmatpush.bf16.msrb.mxu3 %v9612_v50 }
 0x73d   : > { %vm16118_vm10 = vmpackc.low %vm16067_vm4, %vm16062_vm0  ;;  %v7661_v23 = vunpack.c.l.b16 %v7649_v36  ;;  %v7662_v22 = vunpack.c.h.b16 %v7649_v36  ;;  %vm16140_vm0 = vcmp.ne.s32.totalorder %v7569_v33, %v19093_v39  ;;  %vm7619_vm15 = vcmp.ne.s32.totalorder %v16095_v48, %v19096_v63 }
 0x73e   : > { %v7337_v24 = vadd.f32 %v15973_v4, %v7325_v2  ;;  %vm16147_vm4 = vmpackc.low %vm7612_vm11, %vm7491_vm9  ;;  %vm16159_vm13 = vcmp.ne.s32.totalorder %v7570_v55, %v19096_v63 }
 0x73f   : > { %vm16189_vm11 = vcmp.ne.s32.totalorder %v7662_v22, %v19096_v63 }
 0x740   : > { %v7345_v51 = vmax.f32 %v7337_v24, 0.0  ;;  %v19099_v24 = vmov 0 }
 0x741   : > { %v7302_v38 = vpop.f32.mrf.mxu1  ;;  %v19100_v24 = vsel %vm16072_vm12, 4294967295, %v19099_v24 }
 0x742   : > { %v7353_v57 = vpack.c.bf16 %v7345_v51, %v7345_v51  ;;  %v7303_v10 = vadd.f32 %v7302_v38, %v7261_v45 }
 0x744   : > { %v7387_v29 = vunpack.c.l.b16 %v7353_v57  ;;  %v7326_v54 = vmul.f32 %v15966_v58, %v7303_v10  ;;  %v7470_v10 = vsel %vm7462_vm14, 65537, %v19077_v62  ;;  %vm7463_vm14 = vmpackc.low %vm16097_vm2, %vm16097_vm2  ;;  %vm16164_vm2 = vcmp.ne.s32.totalorder %v7661_v23, %v19093_v39 }
 0x745   : > { %v19118_v59 = vsel %vm16164_vm2, 4294967295, %v19117_v59  ;;  %v7471_v53 = vsel %vm7463_vm14, 65537, %v19077_v62  ;;  %vm16204_vm14 = vmpackc.low %vm16159_vm13, %vm16140_vm0  ;;  %vm19131_vm13 = vcmask 1046528  }
 0x746   : > { %v7394_v43 = vpack.c.b16 %v7387_v29, %v7386_v6  ;;  %v7338_v0 = vadd.f32 %v15973_v4, %v7326_v54  ;;  %v7539_v6 = vsel %vm7531_vm5, 65537, %v19077_v62  ;;  %v7540_v29 = vsel %vm7532_vm3, 65537, %v19077_v62  ;;  %v7270_v54 = vpop.f32.mrf.mxu0  ;;  %vm17726_vm5 = vmpackc.low %vm16077_vm7, %vm16072_vm12 }
 0x747   : > { %v7547_v13 = vunpack.c.l.b16 %v7539_v6  ;;  %vm7618_vm3 = vcmp.ne.s32.totalorder %v16054_v40, %v19093_v39  ;;  %v7479_v15 = vunpack.c.l.b16 %v7471_v53  ;;  %vm16235_vm0 = vmpackc.low %vm7492_vm1, %vm7491_vm9  ;;  %vm19129_vm1 = vcmask 1040384  }
 0x748   : > { %v7400_v9 = vshrl.u32 %v7394_v43, 16  ;;  %v7403_v56 = vshll.u32 %v7394_v43, 16  ;;  %v7346_v31 = vmax.f32 %v7338_v0, 0.0  ;;  %vm17728_vm9 = vmpackc.low %vm16189_vm11, %vm16164_vm2 }
 0x749   : > { %v7305_v34 = vpop.f32.mrf.mxu1 }
 0x74a   : > { %v7306_v25 = vadd.f32 %v7305_v34, %v7264_v30  ;;  %v7402_v41 = vrot.slane %v7400_v9, 3  ;;  %v7405_v7 = vrot.slane %v7403_v56, 4  ;;  %v19101_v30 = vmov 0  ;;  %v19128_v34 = vld [vmem:[#allocation22_spill] sm:$0xff] }
 0x74b   : > { %v19102_v30 = vsel %vm16077_vm7, 4294967295, %v19101_v30  ;;  %v7354_v8 = vpack.c.bf16 %v7346_v31, %v7346_v31  ;;  %v7548_v9 = vunpack.c.l.b16 %v7540_v29  ;;  %v7478_v56 = vunpack.c.l.b16 %v7470_v10 }
 0x74c   : > { %v7327_v26 = vmul.f32 %v15966_v58, %v7306_v25  ;;  %v16084_v19 = vor.u32 %v7405_v7, %v7402_v41  ;;  %v19123_v29 = vmov 0  ;;  %v7450_v40 = vand.u32 7, %v19128_v34 }
 0x74d   : > { %v7388_v35 = vunpack.c.l.b16 %v7354_v8  ;;  %v16186_v18 = vpack.c.b16 %v7548_v9, %v7547_v13  ;;  %v16239_v13 = vunpack.i.l.s16 %v7479_v15  ;;  %v19127_v9 = vld [vmem:[#allocation24_spill] sm:$0xff] }
 0x74e   : > { %v7339_v12 = vadd.f32 %v15973_v4, %v7327_v26  ;;  %v16129_v52 = vsel %vm16091_vm6, 0, %v16084_v19  ;;  %v7273_v6 = vpop.f32.mrf.mxu0 }
 0x74f   : > { %v7705_v25 = vshll.u32 %v16129_v52, 16  ;;  %v7597_v17 = vsel %vm16118_vm10, %v16129_v52, 0  ;;  %v16180_v7 = vsel %vm17726_vm5, %v16129_v52, 0  ;;  %v7642_v26 = vsel %vm16147_vm4, %v16129_v52, 0  ;;  %vm16215_vm5 = vmpackc.low %vm7619_vm15, %vm7618_vm3 }
 0x750   : > { %v7347_v3 = vmax.f32 %v7339_v12, 0.0  ;;  %v7703_v44 = vshrl.u32 %v16129_v52, 16  ;;  %v7751_v8 = vrot.slane %v7597_v17, 1  ;;  %v19124_v29 = vsel %vm16215_vm5, 4294967295, %v19123_v29 }
 0x751   : > { %v7308_v38 = vpop.f32.mrf.mxu1  ;;  %v7707_v36 = vrot.slane %v7705_v25, 1  ;;  %v7558_v55 = vrot.slane %v16186_v18, 7  ;;  %vm19130_vm15 = vcmask 1044480   ;;  %vm19154_vm2 = vcmp.ne.s32.totalorder %v16239_v13, %v19096_v63 }
 0x752   : > { %v7355_v49 = vpack.c.bf16 %v7347_v3, %v7347_v3  ;;  %v7309_v11 = vadd.f32 %v7308_v38, %v7267_v28  ;;  %v19119_v3 = vmov 0  ;;  %v16195_v38 = vunpack.i.l.s16 %v7478_v56 }
 0x753   : > { %v19120_v3 = vsel %vm16189_vm11, 4294967295, %v19119_v3  ;;  %v16220_v23 = vrot.slane %v7703_v44, 4  ;;  %v7449_v56 = vand.u32 7, %v19127_v9  ;;  %v7708_v61 = vor.u32 %v7707_v36, %v7703_v44 }
 0x754   : > { %v7389_v43 = vunpack.c.l.b16 %v7355_v49  ;;  %v7328_v0 = vmul.f32 %v15966_v58, %v7309_v11  ;;  %v7827_v11 = vrot.slane %v16180_v7, 5  ;;  %vm19153_vm7 = vcmp.ne.s32.totalorder %v16195_v38, %v19093_v39 }
 0x755   : > { %vm16275_vm3 = vcmp.lt.s32.totalorder %v7449_v56, 7  ;;  %vm16382_vm11 = vmpackc.low %vm19154_vm2, %vm19153_vm7  ;;  %vm16404_vm7 = vcmp.gt.s32.totalorder %v7448_v21, 0 }
 0x756   : > { %v7395_v16 = vpack.c.b16 %v7389_v43, %v7388_v35  ;;  %v7340_v27 = vadd.f32 %v15973_v4, %v7328_v0  ;;  %v7650_v35 = vrot.slane %v16186_v18, 3 }
 0x758   : > { %v7408_v45 = vshrl.u32 %v7395_v16, 16  ;;  %v7411_v31 = vshll.u32 %v7395_v16, 16  ;;  %v7348_v57 = vmax.f32 %v7340_v27, 0.0 }
 0x759   : > { %v7311_v41 = vpop.f32.mrf.mxu1 }
 0x75a   : > { %v7410_v12 = vrot.slane %v7408_v45, 3  ;;  %v7413_v47 = vrot.slane %v7411_v31, 4  ;;  %v7312_v2 = vadd.f32 %v7311_v41, %v7270_v54  ;;  %v7774_v54 = vrot.slane %v7642_v26, 4 }
 0x75b   : > { %v7356_v50 = vpack.c.bf16 %v7348_v57, %v7348_v57  ;;  %v7559_v41 = vsel %vm19129_vm1, %v7556_v37, %v7558_v55  ;;  %v7651_v26 = vsel %vm19130_vm15, %v7648_v14, %v7650_v35  ;;  %vm16294_vm1 = vcmp.lt.s32.totalorder %v7450_v40, 7 }
 0x75c   : > { %v16197_v33 = vor.u32 %v7413_v47, %v7410_v12  ;;  %v7329_v10 = vmul.f32 %v15966_v58, %v7312_v2  ;;  %vm19136_vm15 = vsmask.f32 7424  ;;  %v19144_v2 = vmov 0 }
 0x75e   : > { %v16226_v43 = vsel %vm17727_vm8, %v16084_v19, %v16197_v33  ;;  %v7341_v0 = vadd.f32 %v15973_v4, %v7329_v10  ;;  %v7576_v10 = vunpack.c.l.b16 %v7559_v41 }
 0x75f   : > { %v7598_v19 = vsel %vm16204_vm14, %v16226_v43, 0  ;;  %v7694_v16 = vsel %vm16235_vm0, %v16226_v43, 0  ;;  %v7643_v45 = vsel %vm16215_vm5, %v16226_v43, 0  ;;  %v7710_v27 = vshll.u32 %v16226_v43, 16 }
 0x760   : > { %v7349_v46 = vmax.f32 %v7341_v0, 0.0  ;;  %v16249_v53 = vrot.slane %v7598_v19, 1  ;;  %7848 = vrot.lane.b32.xlu1 %v7694_v16, %s17749_s2  ;;  %v7714_v17 = vshrl.u32 %v16226_v43, 16  ;;  %v16286_v42 = vsel %vm17728_vm9, %v16226_v43, 0 }
 0x761   : > { %v7314_v31 = vpop.f32.mrf.mxu1  ;;  %v16288_v37 = vrot.slane %v7643_v45, 4  ;;  %v16290_v14 = vrot.slane %v7710_v27, 1  ;;  %v7577_v0 = vunpack.c.h.b16 %v7559_v41  ;;  %v7796_v16 = vrot.slane %v7710_v27, 5 }
 0x762   : > { %v7357_v44 = vpack.c.bf16 %v7349_v46, %v7349_v46  ;;  %v7315_v12 = vadd.f32 %v7314_v31, %v7273_v6  ;;  %v7753_v47 = vsel %vm19131_vm13, %v7751_v8, %v16249_v53  ;;  %v7390_v8 = vunpack.c.l.b16 %v7356_v50 }
 0x763   : > { %7760 = vrot.lane.b32.xlu0 %v7753_v47, %s18478_s9  ;;  %v7713_v6 = vsel %vm19136_vm15, %v7708_v61, %v16290_v14  ;;  %v7795_v19 = vrot.slane %v7714_v17, 4  ;;  %v7828_v45 = vrot.slane %v16286_v42, 5  ;;  %v7793_v50 = vrot.slane %v7705_v25, 5  ;;  %vm7534_vm15 = vmpackc.low %vm16294_vm1, %vm16294_vm1  ;;  %v7276_v61 = vpop.f32.mrf.mxu0 }
 0x764   : > { %v7391_v36 = vunpack.c.l.b16 %v7357_v44  ;;  %v7330_v57 = vmul.f32 %v15966_v58, %v7315_v12  ;;  %7738 = vrot.lane.b32.xlu2 %v7713_v6, %s18492_s30  ;;  %v7668_v31 = vunpack.c.l.b16 %v7651_v26  ;;  %vm19137_vm9 = vcmask 1043456   ;;  %vm19142_vm1 = vmpackc.low %vm16275_vm3, %vm16275_vm3 }
 0x765   : > { %v7776_v27 = vsel %vm19137_vm9, %v7774_v54, %v16288_v37  ;;  %v7669_v41 = vunpack.c.h.b16 %v7651_v26  ;;  %vm16322_vm12 = vcmp.ne.s32.totalorder %v7576_v10, %v19093_v39  ;;  %vm16327_vm9 = vcmp.ne.s32.totalorder %v7577_v0, %v19096_v63 }
 0x766   : > { %v7396_v46 = vpack.c.b16 %v7391_v36, %v7390_v8  ;;  %v7342_v25 = vadd.f32 %v15973_v4, %v7330_v57  ;;  %v16331_v26 = vor.u32 %v7796_v16, %v7795_v19  ;;  %v7541_v8 = vsel %vm19142_vm1, 65537, %v19077_v62 }
 0x767   : > { %v7542_v36 = vsel %vm7534_vm15, 65537, %v19077_v62  ;;  %vm19143_vm13 = vcmask 1042432   ;;  %v7794_v19 = vor.u32 %v7793_v50, %v16220_v23  ;;  %vm16348_vm8 = vcmp.ne.s32.totalorder %v7668_v31, %v19093_v39 }
 0x768   : > { %v7417_v44 = vshrl.u32 %v7396_v46, 16  ;;  %v7420_v12 = vshll.u32 %v7396_v46, 16  ;;  %7783 = vrot.lane.b32.xlu1 %v7776_v27, %s18170_s29  ;;  %v7829_v0 = vsel %vm19143_vm13, %v7827_v11, %v7828_v45  ;;  %v19145_v2 = vsel %vm16348_vm8, 4294967295, %v19144_v2  ;;  %vm16364_vm13 = vmpackc.low %vm16327_vm9, %vm16322_vm12 }
 0x769   : > { %v7317_v15 = vpop.f32.mrf.mxu1  ;;  %vm16353_vm3 = vcmp.ne.s32.totalorder %v7669_v41, %v19096_v63  ;;  %v19146_v16 = vmov 0  ;;  %v7350_v7 = vmax.f32 %v7342_v25, 0.0  ;;  %v19148_v23 = vmov 0 }
 0x76a   : > { %v7419_v57 = vrot.slane %v7417_v44, 3  ;;  %v7422_v10 = vrot.slane %v7420_v12, 4  ;;  %v7318_v6 = vadd.f32 %v7317_v15, %v7276_v61  ;;  %v19147_v16 = vsel %vm16353_vm3, 4294967295, %v19146_v16  ;;  %vm17733_vm9 = vmpackc.low %vm16353_vm3, %vm16348_vm8 }
 0x76b   : > { %7836 = vrot.lane.b32.xlu0 %v7829_v0, %s17747_s4  ;;  %v19149_v23 = vsel %vm16364_vm13, 4294967295, %v19148_v23  ;;  %vm16370_vm15 = vcmp.gt.s32.totalorder %v7449_v56, 0  ;;  %vm19152_vm1 = vsmask.f32 3328  ;;  %v7549_v61 = vunpack.c.l.b16 %v7541_v8 }
 0x76c   : > { %v16357_v46 = vor.u32 %v7422_v10, %v7419_v57  ;;  %v7331_v11 = vmul.f32 %v15966_v58, %v7318_v6  ;;  %v7798_v31 = vsel %vm19152_vm1, %v7794_v19, %v16331_v26  ;;  %v19155_v58 = vmov 0  ;;  %vm7465_vm2 = vmpackc.low %vm16370_vm15, %vm16370_vm15 }
 0x76d   : > { %v19156_v58 = vsel %vm16382_vm11, 4294967295, %v19155_v58  ;;  %v7550_v27 = vunpack.c.l.b16 %v7542_v36  ;;  %vm19157_vm12 = vsmask.f32 4352  ;;  %7813 = vrot.lane.b32.xlu2 %v7798_v31, %s18486_s27  ;;  %v7716_v20 = vor.u32 %v7714_v17, %v16290_v14  ;;  %vm7464_vm1 = vmpackc.low %vm16404_vm7, %vm16404_vm7 }
 0x76e   : > { %v16389_v9 = vsel %vm19157_vm12, %v16197_v33, %v16357_v46  ;;  %v7343_v56 = vadd.f32 %v15973_v4, %v7331_v11  ;;  %v7358_v4 = vpack.c.bf16 %v7350_v7, %v7350_v7  ;;  %vm19160_vm15 = vcmask 1046528  }
 0x76f   : > { %v7718_v41 = vshll.u32 %v16389_v9, 16  ;;  %v7599_v44 = vsel %vm16364_vm13, %v16389_v9, 0  ;;  %v7722_v12 = vshrl.u32 %v16389_v9, 16  ;;  %v7644_v15 = vsel %vm16382_vm11, %v16389_v9, 0 }
 0x770   : > { %v7351_v25 = vmax.f32 %v7343_v56, 0.0  ;;  %v16411_v47 = vrot.slane %v7599_v44, 1  ;;  %v16419_v54 = vrot.slane %v7644_v15, 4  ;;  %v7554_v8 = vpack.c.b16 %v7550_v27, %v7549_v61 }
 0x771   : > { %v7720_v21 = vrot.slane %v7718_v41, 1  ;;  %v16430_v10 = vsel %vm17733_vm9, %v16389_v9, 0  ;;  %v7473_v17 = vsel %vm7465_vm2, 65537, %v19077_v62  ;;  %vm19161_vm12 = vsmask.f32 7424 }
 0x772   : > { %v7359_v36 = vpack.c.bf16 %v7351_v25, %v7351_v25  ;;  %v7755_v57 = vsel %vm19160_vm15, %v16249_v53, %v16411_v47  ;;  %v7799_v53 = vrot.slane %v7722_v12, 4  ;;  %v7800_v6 = vrot.slane %v7718_v41, 5 }
 0x773   : > { %v7721_v14 = vsel %vm19161_vm12, %v7716_v20, %v7720_v21  ;;  %7762 = vrot.lane.b32.xlu1 %v7755_v57, %s18478_s9  ;;  %vm19162_vm15 = vcmask 1043456   ;;  %v7392_v19 = vunpack.c.l.b16 %v7358_v4  ;;  %v7698_v11 = vsel %vm16118_vm10, %v16226_v43, 0 }
 0x774   : > { %v7778_v0 = vsel %vm19162_vm15, %v16288_v37, %v16419_v54  ;;  %v7393_v7 = vunpack.c.l.b16 %v7359_v36  ;;  %7740 = vrot.lane.b32.xlu0 %v7721_v14, %s18492_s30  ;;  %v7472_v50 = vsel %vm7464_vm1, 65537, %v19077_v62  ;;  %v16448_v31 = vrot.slane %v7554_v8, 7 }
 0x775   : > { %v7830_v27 = vrot.slane %v16430_v10, 5  ;;  %7785 = vrot.lane.b32.xlu2 %v7778_v0, %s18170_s29  ;;  %v7481_v56 = vunpack.c.l.b16 %v7473_v17  ;;  %v7699_v37 = vsel %vm16204_vm14, %v16389_v9, 0  ;;  %v16455_v41 = vor.u32 %v7800_v6, %v7799_v53 }
 0x776   : > { %v7397_v61 = vpack.c.b16 %v7393_v7, %v7392_v19  ;;  %v7870_v44 = vrot.slane %v7698_v11, 1  ;;  %v16457_v33 = vrot.slane %v7699_v37, 1  ;;  %v7480_v15 = vunpack.c.l.b16 %v7472_v50 }
 0x777   : > { %vm19163_vm7 = vcmask 1040384   ;;  %vm19164_vm2 = vcmask 1046528   ;;  %vm19165_vm1 = vcmask 1042432   ;;  %v16470_v6 = vunpack.i.l.s16 %v7481_v56 }
 0x778   : > { %v7426_v4 = vshrl.u32 %v7397_v61, 16  ;;  %v7429_v25 = vshll.u32 %v7397_v61, 16  ;;  %v7561_v20 = vsel %vm19163_vm7, %v7558_v55, %v16448_v31  ;;  %v7872_v36 = vsel %vm19164_vm2, %v7870_v44, %v16457_v33 }
 0x779   : > { %v7831_v53 = vsel %vm19165_vm1, %v7828_v45, %v7830_v27  ;;  %vm19166_vm12 = vcmask 130048   ;;  %vm19167_vm15 = vsmask.f32 3328  ;;  %v16478_v19 = vunpack.i.l.s16 %v7480_v15 }
 0x77a   : > { %v7428_v57 = vrot.slane %v7426_v4, 3  ;;  %v7431_v17 = vrot.slane %v7429_v25, 4  ;;  %9459 = vmatmul.msk.bf16.vlgmr.msrb.gmra.mxu3 %vm19166_vm12, %v7872_v36  ;;  %v7802_v0 = vsel %vm19167_vm15, %v16331_v26, %v16455_v41  ;;  %v7583_v7 = vunpack.c.l.b16 %v7561_v20 }
 0x77b   : > { %7838 = vrot.lane.b32.xlu1 %v7831_v53, %s17747_s4  ;;  %v7584_v11 = vunpack.c.h.b16 %v7561_v20  ;;  %vm16482_vm7 = vcmp.gt.s32.totalorder %v7450_v40, 0  ;;  %v16486_v45 = vrot.slane %v7554_v8, 3  ;;  %vm19170_vm2 = vsmask.f32 4352 }
 0x77c   : > { %v7432_v55 = vor.u32 %v7431_v17, %v7428_v57  ;;  %7815 = vrot.lane.b32.xlu0 %v7802_v0, %s18486_s27  ;;  %vm7632_vm1 = vcmp.ne.s32.totalorder %v16478_v19, %v19093_v39  ;;  %vm7633_vm12 = vcmp.ne.s32.totalorder %v16470_v6, %v19096_v63  ;;  %vm7587_vm9 = vcmp.ne.s32.totalorder %v7583_v7, %v19093_v39  ;;  %vm7466_vm8 = vmpackc.low %vm16482_vm7, %vm16482_vm7 }
 0x77d   : > { %7858 = vrot.lane.b32.xlu2 %v7721_v14, %s9804_s1  ;;  %vm16508_vm3 = vmpackc.low %vm7633_vm12, %vm7632_vm1  ;;  %v19171_v14 = vmov 0  ;;  %vm7499_vm11 = vcmp.ne.s32.totalorder %v16195_v38, %v19096_v63  ;;  %vm19173_vm15 = vcmask 1044480   ;;  %vm19174_vm5 = vsmask.f32 7424 }
 0x77e   : > { %v16490_v26 = vsel %vm19170_vm2, %v16357_v46, %v7432_v55  ;;  %vm7588_vm2 = vcmp.ne.s32.totalorder %v7584_v11, %v19096_v63  ;;  %v7724_v46 = vor.u32 %v7722_v12, %v7720_v21  ;;  %v19172_v14 = vsel %vm16508_vm3, 4294967295, %v19171_v14 }
 0x77f   : > { %v7726_v34 = vshll.u32 %v16490_v26, 16  ;;  %v7730_v40 = vshrl.u32 %v16490_v26, 16  ;;  %v7653_v50 = vsel %vm19173_vm15, %v7650_v35, %v16486_v45  ;;  %vm16519_vm7 = vmpackc.low %vm7588_vm2, %vm7587_vm9  ;;  %v7474_v12 = vsel %vm7466_vm8, 65537, %v19077_v62 }
 0x780   : > { %v7645_v18 = vsel %vm16508_vm3, %v16490_v26, 0  ;;  %vm19177_vm1 = vcmp.ne.s32.totalorder %v16095_v48, %v19093_v39  ;;  %v7675_v35 = vunpack.c.l.b16 %v7653_v50  ;;  %v7676_v21 = vunpack.c.h.b16 %v7653_v50 }
 0x781   : > { %v7728_v8 = vrot.slane %v7726_v34, 1  ;;  %v7803_v56 = vrot.slane %v7730_v40, 4  ;;  %v7804_v37 = vrot.slane %v7726_v34, 5  ;;  %v7600_v25 = vsel %vm16519_vm7, %v16490_v26, 0 }
 0x782   : > { %v7482_v15 = vunpack.c.l.b16 %v7474_v12  ;;  %v7779_v20 = vrot.slane %v7645_v18, 4  ;;  %v7700_v48 = vsel %vm16364_vm13, %v16490_v26, 0  ;;  %vm16549_vm8 = vcmp.ne.s32.totalorder %v7675_v35, %v19093_v39 }
 0x783   : > { %v7729_v61 = vsel %vm19174_vm5, %v7724_v46, %v7728_v8  ;;  %vm16532_vm5 = vmpackc.low %vm7499_vm11, %vm19177_vm1  ;;  %v16543_v36 = vor.u32 %v7804_v37, %v7803_v56  ;;  %v19180_v57 = vmov 0  ;;  %vm16554_vm11 = vcmp.ne.s32.totalorder %v7676_v21, %v19096_v63  ;;  %v9611_v56 = vld [vmem:[%s17371_s13 + $0x38] sm:$0xff] }
 0x784   : > { %7860 = vrot.lane.b32.xlu0 %v7729_v61, %s9804_s1  ;;  %7742 = vrot.lane.b32.xlu1 %v7729_v61, %s18492_s30  ;;  %v7695_v4 = vsel %vm16532_vm5, %v16389_v9, 0  ;;  %v19181_v57 = vsel %vm16549_vm8, 4294967295, %v19180_v57  ;;  %v19182_v17 = vmov 0  ;;  %v7873_v53 = vrot.slane %v7700_v48, 1  ;;  %vm19193_vm3 = vmpackc.low %vm16554_vm11, %vm16549_vm8 }
 0x785   : > { %7850 = vrot.lane.b32.xlu2 %v7695_v4, %s17749_s2  ;;  %v19183_v17 = vsel %vm16554_vm11, 4294967295, %v19182_v17  ;;  %v7590_v0 = vunpack.c.l.b16 %v16448_v31  ;;  %v7591_v7 = vunpack.c.h.b16 %v16448_v31  ;;  %v7756_v11 = vrot.slane %v7600_v25, 1  ;;  %8011 = vmatpush.bf16.msrb.mxu2 %v9611_v56 }
 0x786   : > { %v16562_v42 = vsel %vm16091_vm6, %v7432_v55, 0  ;;  %v9412_v34 = vunpack.i.l.s16 %v7482_v15  ;;  %vm19184_vm9 = vcmask 1046528   ;;  %vm19185_vm12 = vcmask 1043456  }
 0x787   : > { %v7874_v46 = vsel %vm19184_vm9, %v16457_v33, %v7873_v53  ;;  %v7780_v50 = vsel %vm19185_vm12, %v16419_v54, %v7779_v20  ;;  %vm19186_vm15 = vsmask.f32 3328  ;;  %vm19187_vm1 = vcmask 130048  }
 0x788   : > { %v7806_v61 = vsel %vm19186_vm15, %v16455_v41, %v16543_v36  ;;  %v7734_v31 = vshll.u32 %v16562_v42, 16  ;;  %vm16580_vm9 = vcmp.ne.s32.totalorder %v7590_v0, %v19093_v39  ;;  %v19188_v54 = vmov 0 }
 0x789   : > { %v19189_v54 = vsel %vm16580_vm9, 4294967295, %v19188_v54  ;;  %vm16585_vm12 = vcmp.ne.s32.totalorder %v7591_v7, %v19096_v63  ;;  %v19190_v41 = vmov 0  ;;  %vm19192_vm15 = vcmask 1046528  }
 0x78a   : > { %9460 = vmatmul.msk.bf16.gmra.mxu3 %vm19187_vm1, %v7874_v46  ;;  %v19191_v41 = vsel %vm16585_vm12, 4294967295, %v19190_v41  ;;  %v7757_v33 = vsel %vm19192_vm15, %v16411_v47, %v7756_v11  ;;  %vm7639_vm2 = vcmp.ne.s32.totalorder %v9412_v34, %v19093_v39  ;;  %v7692_v55 = vsel %vm19193_vm3, %v16490_v26, 0  ;;  %vm17743_vm13 = vmpackc.low %vm16585_vm12, %vm16580_vm9 }
 0x78b   : > { %vm7505_vm15 = vcmp.ne.s32.totalorder %v16239_v13, %v19093_v39  ;;  %vm7506_vm1 = vcmp.ne.s32.totalorder %v16478_v19, %v19096_v63  ;;  %v7732_v47 = vor.u32 %v7730_v40, %v7728_v8  ;;  %v7736_v37 = vrot.slane %v7734_v31, 1  ;;  %v9610_v13 = vld [vmem:[%s17371_s13 + $0x30] sm:$0xff] }
 0x78c   : > { %7787 = vrot.lane.b32.xlu0 %v7780_v50, %s18170_s29  ;;  %7817 = vrot.lane.b32.xlu1 %v7806_v61, %s18486_s27  ;;  %vm19194_vm3 = vcmp.ne.s32.totalorder %v9412_v34, %v19096_v63  ;;  %v19195_v12 = vmov 0  ;;  %v7832_v18 = vrot.slane %v7692_v55, 5  ;;  %vm16620_vm11 = vmpackc.low %vm7506_vm1, %vm7505_vm15  ;;  %v7682_v40 = vunpack.c.l.b16 %v16486_v45 }
 0x78d   : > { %7764 = vrot.lane.b32.xlu2 %v7757_v33, %s18478_s9  ;;  %vm16613_vm8 = vmpackc.low %vm19194_vm3, %vm7639_vm2  ;;  %v7683_v8 = vunpack.c.h.b16 %v16486_v45  ;;  %v7696_v35 = vsel %vm16620_vm11, %v16490_v26, 0  ;;  %vm19199_vm2 = vsmask.f32 7424  ;;  %v7701_v4 = vsel %vm16519_vm7, %v16562_v42, 0  ;;  %8012 = vmatpush.bf16.msrb.mxu2 %v9610_v13  ;;  %v9609_v13 = vld [vmem:[%s17371_s13 + $0x28] sm:$0xff] }
 0x78e   : > { %v19196_v12 = vsel %vm16613_vm8, 4294967295, %v19195_v12  ;;  %v7737_v21 = vsel %vm19199_vm2, %v7732_v47, %v7736_v37  ;;  %v7601_v45 = vsel %vm17743_vm13, %v16562_v42, 0  ;;  %v7646_v25 = vsel %vm16613_vm8, %v16562_v42, 0 }
 0x78f   : > { %vm19200_vm1 = vcmask 1042432   ;;  %vm16648_vm15 = vcmp.ne.s32.totalorder %v7682_v40, %v19093_v39  ;;  %v19201_v48 = vmov 0  ;;  %vm16653_vm3 = vcmp.ne.s32.totalorder %v7683_v8, %v19096_v63 }
 0x790   : > { %v7833_v15 = vsel %vm19200_vm1, %v7830_v27, %v7832_v18  ;;  %v19202_v48 = vsel %vm16648_vm15, 4294967295, %v19201_v48  ;;  %v19203_v0 = vmov 0  ;;  %v7875_v7 = vrot.slane %v7701_v4, 1  ;;  %vm17746_vm2 = vmpackc.low %vm16653_vm3, %vm16648_vm15  ;;  %v9604_v4 = vld [vmem:[%s17371_s13] sm:$0xff] }
 0x791   : > { %v19204_v0 = vsel %vm16653_vm3, 4294967295, %v19203_v0  ;;  %v7758_v46 = vrot.slane %v7601_v45, 1  ;;  %v7781_v50 = vrot.slane %v7646_v25, 4  ;;  %v7807_v10 = vshrl.u32 %v16562_v42, 16  ;;  %8013 = vmatpush.bf16.msrb.mxu2 %v9609_v13 }
 0x792   : > { %vm19205_vm1 = vcmask 1046528   ;;  %vm19207_vm9 = vcmask 1043456   ;;  %vm19208_vm12 = vcmask 130048   ;;  %v7693_v55 = vsel %vm17746_vm2, %v16562_v42, 0 }
 0x793   : > { %v7876_v27 = vsel %vm19205_vm1, %v7873_v53, %v7875_v7  ;;  %vm19206_vm13 = vmmov %vm19205_vm1  ;;  %v7782_v33 = vsel %vm19207_vm9, %v7779_v20, %v7781_v50  ;;  %vm7512_vm1 = vcmp.ne.s32.totalorder %v16470_v6, %v19093_v39  ;;  %v7809_v53 = vrot.slane %v7807_v10, 4 }
 0x794   : > { %7852 = vrot.lane.b32.xlu0 %v7696_v35, %s17749_s2  ;;  %7862 = vrot.lane.b32.xlu1 %v7737_v21, %s9804_s1  ;;  %v7759_v61 = vsel %vm19206_vm13, %v7756_v11, %v7758_v46  ;;  %v7810_v11 = vrot.slane %v7734_v31, 5  ;;  %v7834_v20 = vrot.slane %v7693_v55, 5  ;;  %vm19209_vm13 = vcmp.ne.s32.totalorder %v9412_v34, %v19096_v63  ;;  %v9608_v34 = vld [vmem:[%s17371_s13 + $0x20] sm:$0xff]  ;;  %v9607_v35 = vld [vmem:[%s17371_s13 + $0x18] sm:$0xff] }
 0x795   : > { %7840 = vrot.lane.b32.xlu2 %v7833_v15, %s17747_s4  ;;  %vm16680_vm9 = vmpackc.low %vm19209_vm13, %vm7512_vm1  ;;  %vm19213_vm1 = vsmask.f32 3328  ;;  %8014 = vmatpush.bf16.msrb.mxu2 %v9608_v34  ;;  %vm19214_vm13 = vcmask 1046528   ;;  %vm19216_vm2 = vsmask.f32 7424  ;;  %v7515_v46 = vsel %vm16235_vm0, %v16129_v52, 0 }
 0x796   : > { %v7811_v47 = vor.u32 %v7810_v11, %v7809_v53  ;;  %v7697_v6 = vsel %vm16680_vm9, %v16562_v42, 0  ;;  %v7877_v8 = vsel %vm19214_vm13, %v7875_v7, %v10069_v60  ;;  %vm19219_vm13 = vcmask 392192  }
 0x797   : > { %vm19220_vm15 = vcmask 523264   ;;  %vm7923_vm3 = vcmask 785408   ;;  %vm7932_vm8 = vcmask 916480  }
 0x798   : > { %v7812_v31 = vsel %vm19213_vm1, %v16543_v36, %v7811_v47  ;;  %v9606_v36 = vld [vmem:[%s17371_s13 + $0x10] sm:$0xff]  ;;  %vm19218_vm1 = vcmask 261120  }
 0x799   : > { %8015 = vmatpush.bf16.msrb.mxu2 %v9607_v35 }
 0x79a   : > { %9461 = vmatmul.msk.bf16.gmra.mxu3 %vm19208_vm12, %v7876_v27  ;;  %vm19212_vm12 = vcmask 1042432  }
 0x79b   : > { %v7835_v40 = vsel %vm19212_vm12, %v7832_v18, %v7834_v20  ;;  %v7856_v18 = vor.u32 %v7807_v10, %v7736_v37  ;;  %vm19215_vm12 = vcmask 130048   ;;  %v9605_v37 = vld [vmem:[%s17371_s13 + $0x8] sm:$0xff] }
 0x79c   : > { %7766 = vrot.lane.b32.xlu0 %v7759_v61, %s18478_s9  ;;  %7789 = vrot.lane.b32.xlu1 %v7782_v33, %s18170_s29 }
 0x79d   : > { %7744 = vrot.lane.b32.xlu2 %v7737_v21, %s18492_s30  ;;  %v7857_v42 = vsel %vm19216_vm2, %v7856_v18, %v10069_v60  ;;  %8016 = vmatpush.bf16.msrb.mxu2 %v9606_v36  ;;  %vm19217_vm2 = vmmov %vm19215_vm12 }
 0x7a1   : > { %8017 = vmatpush.bf16.msrb.mxu2 %v9605_v37 }
 0x7a4   : > { %7842 = vrot.lane.b32.xlu0 %v7835_v40, %s17747_s4  ;;  %7854 = vrot.lane.b32.xlu1 %v7697_v6, %s17749_s2  ;;  %v7516_v6 = vsel %vm16532_vm5, %v16226_v43, 0 }
 0x7a5   : > { %7819 = vrot.lane.b32.xlu2 %v7812_v31, %s18486_s27  ;;  %8018 = vmatpush.bf16.msrb.mxu2 %v9604_v4 }
 0x7aa   : > { %9462 = vmatmul.msk.bf16.gmra.mxu3 %vm19215_vm12, %v7877_v8  ;;  %vm7914_vm12 = vcmask 654336  }
 0x7ad   : > { %7864 = vrot.lane.b32.xlu2 %v7857_v42, %s9804_s1 }
 0x7be   : > { %v7739_v21 = vpop.permute.xlu2 %7738 }
 0x7bf   : > { %v7880_v50 = vsel %vm19217_vm2, %v7515_v46, %v7739_v21 }
 0x7c7   : > { %v7814_v45 = vpop.permute.xlu2 %7813 }
 0x7cf   : > { %v7786_v25 = vpop.permute.xlu2 %7785 }
 0x7d2   : > { %v7849_v15 = vpop.permute.xlu1 %7848 }
 0x7d5   : > { %v7761_v7 = vpop.permute.xlu0 %7760 }
 0x7d6   : > { %v7891_v10 = vsel %vm19218_vm1, %v7880_v50, %v7761_v7  ;;  %v7517_v7 = vsel %vm16620_vm11, %v16389_v9, 0 }
 0x7d7   : > { %v7859_v33 = vpop.permute.xlu2 %7858 }
 0x7da   : > { %v7784_v27 = vpop.permute.xlu1 %7783 }
 0x7db   : > { %v7899_v61 = vsel %vm19219_vm13, %v7891_v10, %v7784_v27 }
 0x7dc   : > { %v7907_v55 = vsel %vm19220_vm15, %v7899_v61, %v7814_v45  ;;  %vm19221_vm15 = vmmov %vm19218_vm1 }
 0x7dd   : > { %v7837_v53 = vpop.permute.xlu0 %7836  ;;  %vm19222_vm1 = vmmov %vm19219_vm13  ;;  %vm19223_vm13 = vcmask 523264  }
 0x7de   : > { %v7916_v11 = vsel %vm7914_vm12, %v7907_v55, %v7837_v53 }
 0x7df   : > { %v7925_v20 = vsel %vm7923_vm3, %v7916_v11, %v7849_v15  ;;  %v7851_v13 = vpop.permute.xlu2 %7850 }
 0x7e0   : > { %v7934_v52 = vsel %vm7932_vm8, %v7925_v20, %v7859_v33 }
 0x7e1   : > { %8019 = vmatmul.bf16.vlgmr.msrb.gmra.mxu2 %v7934_v52 }
 0x7e5   : > { %v7763_v47 = vpop.permute.xlu1 %7762 }
 0x7e6   : > { %v7741_v40 = vpop.permute.xlu0 %7740 }
 0x7e7   : > { %v7883_v34 = vsel %vm19217_vm2, %v7516_v6, %v7741_v40  ;;  %v7765_v35 = vpop.permute.xlu2 %7764 }
 0x7e8   : > { %v7893_v31 = vsel %vm19221_vm15, %v7883_v34, %v7763_v47  ;;  %v7518_v47 = vsel %vm16680_vm9, %v16490_v26, 0  ;;  %v8086_v26 = vpop.f32.mrf.mxu0 }
 0x7e9   : > { %v7901_v42 = vsel %vm19222_vm1, %v7893_v31, %v7786_v25 }
 0x7ed   : > { %v7839_v18 = vpop.permute.xlu1 %7838 }
 0x7ee   : > { %v7816_v8 = vpop.permute.xlu0 %7815 }
 0x7ef   : > { %v7909_v36 = vsel %vm19223_vm13, %v7901_v42, %v7816_v8  ;;  %v7841_v43 = vpop.permute.xlu2 %7840 }
 0x7f0   : > { %v7918_v37 = vsel %vm7914_vm12, %v7909_v36, %v7839_v18 }
 0x7f1   : > { %v7927_v21 = vsel %vm7923_vm3, %v7918_v37, %v7851_v13 }
 0x7f6   : > { %v7861_v4 = vpop.permute.xlu0 %7860  ;;  %v7743_v45 = vpop.permute.xlu1 %7742 }
 0x7f7   : > { %v7937_v15 = vsel %vm7932_vm8, %v7927_v21, %v7861_v4  ;;  %v7886_v46 = vsel %vm19217_vm2, %v7517_v7, %v7743_v45  ;;  %v7745_v33 = vpop.permute.xlu2 %7744  ;;  %v8127_v4 = vpop.f32.mrf.mxu1 }
 0x7f8   : > { %8024 = vmatmul.bf16.gmra.mxu2 %v7937_v15  ;;  %v7895_v10 = vsel %vm19221_vm15, %v7886_v46, %v7765_v35  ;;  %v7889_v6 = vsel %vm19217_vm2, %v7518_v47, %v7745_v33  ;;  %v8089_v15 = vpop.f32.mrf.mxu0  ;;  %vm19224_vm2 = vcmask 64512   ;;  %v16761_v33 = vld [vmem:[%s17372_s14] ss:$0 sm:$0xff] }
 0x7f9   : > { %v16768_v47 = vld [vmem:[%s17373_s15] ss:$0 sm:$0xff] }
 0x7fd   : > { %v8049_v45 = vpop.f32.mrf.mxu3 }
 0x7fe   : > { %v7788_v25 = vpop.permute.xlu0 %7787  ;;  %v7818_v50 = vpop.permute.xlu1 %7817 }
 0x7ff   : > { %v7903_v27 = vsel %vm19222_vm1, %v7895_v10, %v7788_v25  ;;  %v7820_v9 = vpop.permute.xlu2 %7819  ;;  %v8130_v46 = vpop.f32.mrf.mxu1 }
 0x800   : > { %v7911_v61 = vsel %vm19223_vm13, %v7903_v27, %v7818_v50  ;;  %v8131_v10 = vadd.f32 %v8130_v46, %v8089_v15 }
 0x801   : > { %v7920_v55 = vsel %vm7914_vm12, %v7911_v61, %v7841_v43  ;;  %v8128_v43 = vadd.f32 %v8127_v4, %v8086_v26 }
 0x803   : > { %v8151_v50 = vsel %vm19224_vm2, %v8128_v43, 0.0 }
 0x805   : > { %v8051_v27 = vpop.f32.mrf.mxu3 }
 0x806   : > { %v7853_v53 = vpop.permute.xlu0 %7852  ;;  %v7863_v11 = vpop.permute.xlu1 %7862 }
 0x807   : > { %v7929_v20 = vsel %vm7923_vm3, %v7920_v55, %v7853_v53  ;;  %v7865_v37 = vpop.permute.xlu2 %7864  ;;  %v8092_v55 = vpop.f32.mrf.mxu0 }
 0x808   : > { %v7940_v52 = vsel %vm7932_vm8, %v7929_v20, %v7863_v11  ;;  %v8133_v20 = vpop.f32.mrf.mxu1 }
 0x809   : > { %8029 = vmatmul.bf16.gmra.mxu2 %v7940_v52 }
 0x80e   : > { %v7767_v13 = vpop.permute.xlu0 %7766  ;;  %v7790_v40 = vpop.permute.xlu1 %7789 }
 0x80f   : > { %v7897_v34 = vsel %vm19221_vm15, %v7889_v6, %v7767_v13  ;;  %vm19225_vm15 = vmmov %vm19224_vm2 }
 0x810   : > { %v7905_v31 = vsel %vm19222_vm1, %v7897_v34, %v7790_v40  ;;  %v8152_v53 = vsel %vm19225_vm15, %v8131_v10, 0.0  ;;  %vm19226_vm1 = vmmov %vm19224_vm2 }
 0x811   : > { %v7913_v18 = vsel %vm19223_vm13, %v7905_v31, %v7820_v9  ;;  %v8054_v31 = vpop.f32.mrf.mxu3  ;;  %vm19227_vm13 = vmmov %vm19226_vm1 }
 0x812   : > { %vm19228_vm2 = vmmov %vm19226_vm1 }
 0x813   : > { %vm19229_vm15 = vmmov %vm19226_vm1 }
 0x816   : > { %v7843_v8 = vpop.permute.xlu0 %7842  ;;  %v7855_v42 = vpop.permute.xlu1 %7854 }
 0x817   : > { %v7922_v35 = vsel %vm7914_vm12, %v7913_v18, %v7843_v8  ;;  %v8095_v8 = vpop.f32.mrf.mxu0 }
 0x818   : > { %v7931_v36 = vsel %vm7923_vm3, %v7922_v35, %v7855_v42  ;;  %v8136_v42 = vpop.f32.mrf.mxu1 }
 0x819   : > { %v7943_v21 = vsel %vm7932_vm8, %v7931_v36, %v7865_v37  ;;  %v8134_v36 = vadd.f32 %v8133_v20, %v8092_v55  ;;  %v8056_v43 = vpop.f32.mrf.mxu3 }
 0x81a   : > { %8034 = vmatmul.bf16.gmra.mxu2 %v7943_v21 }
 0x81b   : > { %v8153_v26 = vsel %vm19226_vm1, %v8134_v36, 0.0  ;;  %vm19230_vm1 = vsmask.f32 4352 }
 0x864   : > { %v8020_v7 = vpop.f32.mrf.mxu2 }
 0x865   : > { %v8050_v25 = vadd.f32 %v8049_v45, %v8020_v7 }
 0x867   : > { %v8159_v61 = vadd.f32 %v8151_v50, %v8050_v25  ;;  %v8137_v25 = vadd.f32 %v8136_v42, %v8095_v8  ;;  %v8098_v50 = vpop.f32.mrf.mxu0 }
 0x869   : > { %v8173_v9 = vmul.f32 %v16761_v33, %v8159_v61  ;;  %v8154_v55 = vsel %vm19227_vm13, %v8137_v25, 0.0  ;;  %vm19233_vm13 = vmmov %vm19228_vm2 }
 0x86b   : > { %v8185_v6 = vadd.f32 %v16768_v47, %v8173_v9 }
 0x86c   : > { %v8022_v11 = vpop.f32.mrf.mxu2 }
 0x86d   : > { %v8052_v52 = vadd.f32 %v8051_v27, %v8022_v11  ;;  %v16775_v35 = vmax.f32 %v8185_v6, 0.0  ;;  %v8139_v27 = vpop.f32.mrf.mxu1 }
 0x86f   : > { %v8160_v13 = vadd.f32 %v8152_v53, %v8052_v52  ;;  %v8201_v21 = vpack.c.bf16 %v16775_v35, %v16775_v35  ;;  %v8101_v36 = vpop.f32.mrf.mxu0 }
 0x871   : > { %v8174_v40 = vmul.f32 %v16761_v33, %v8160_v13  ;;  %v8235_v46 = vunpack.c.l.b16 %v8201_v21 }
 0x873   : > { %v8186_v34 = vadd.f32 %v16768_v47, %v8174_v40  ;;  %v8059_v40 = vpop.f32.mrf.mxu3 }
 0x875   : > { %v16773_v18 = vmax.f32 %v8186_v34, 0.0  ;;  %v8142_v21 = vpop.f32.mrf.mxu1 }
 0x877   : > { %v8202_v37 = vpack.c.bf16 %v16773_v18, %v16773_v18 }
 0x879   : > { %v8236_v15 = vunpack.c.l.b16 %v8202_v37 }
 0x87b   : > { %v8025_v4 = vpop.f32.mrf.mxu2  ;;  %v8243_v61 = vpack.c.b16 %v8236_v15, %v8235_v46 }
 0x87c   : > { %v8055_v45 = vadd.f32 %v8054_v31, %v8025_v4  ;;  %v8140_v31 = vadd.f32 %v8139_v27, %v8098_v50  ;;  %v8143_v27 = vadd.f32 %v8142_v21, %v8101_v36 }
 0x87d   : > { %v8248_v52 = vshrl.u32 %v8243_v61, 16  ;;  %v8251_v9 = vshll.u32 %v8243_v61, 16 }
 0x87e   : > { %v8161_v7 = vadd.f32 %v8153_v26, %v8055_v45  ;;  %v8155_v45 = vsel %vm19228_vm2, %v8140_v31, 0.0  ;;  %vm19234_vm2 = vcmask 1046528  }
 0x87f   : > { %v8250_v8 = vrot.slane %v8248_v52, 3  ;;  %v8253_v42 = vrot.slane %v8251_v9, 4 }
 0x880   : > { %v8175_v10 = vmul.f32 %v16761_v33, %v8161_v7 }
 0x882   : > { %v8187_v11 = vadd.f32 %v16768_v47, %v8175_v10 }
 0x883   : > { %v8027_v53 = vpop.f32.mrf.mxu2 }
 0x884   : > { %v8057_v20 = vadd.f32 %v8056_v43, %v8027_v53  ;;  %v16785_v6 = vmax.f32 %v8187_v11, 0.0  ;;  %v8254_v43 = vor.u32 %v8253_v42, %v8250_v8 }
 0x886   : > { %v8162_v13 = vadd.f32 %v8154_v55, %v8057_v20  ;;  %v8203_v26 = vpack.c.bf16 %v16785_v6, %v16785_v6  ;;  %v8061_v55 = vpop.f32.mrf.mxu3  ;;  %v16799_v53 = vsel %vm16091_vm6, 0, %v8254_v43  ;;  %v8104_v20 = vpop.f32.mrf.mxu0 }
 0x887   : > { %v8319_v31 = vshll.u32 %v16799_v53, 16 }
 0x888   : > { %v8176_v34 = vmul.f32 %v16761_v33, %v8162_v13  ;;  %v8237_v50 = vunpack.c.l.b16 %v8203_v26  ;;  %v8156_v13 = vsel %vm19229_vm15, %v8143_v27, 0.0  ;;  %v8293_v26 = vsel %vm16118_vm10, %v16799_v53, 0 }
 0x889   : > { %v8317_v27 = vshrl.u32 %v16799_v53, 16  ;;  %vm19235_vm15 = vnez %v19120_v3 }
 0x88a   : > { %v8188_v37 = vadd.f32 %v16768_v47, %v8176_v34  ;;  %v8145_v34 = vpop.f32.mrf.mxu1 }
 0x88c   : > { %v16791_v4 = vmax.f32 %v8188_v37, 0.0  ;;  %v8030_v15 = vpop.f32.mrf.mxu2 }
 0x88d   : > { %v8060_v7 = vadd.f32 %v8059_v40, %v8030_v15  ;;  %v8321_v15 = vrot.slane %v8319_v31, 1 }
 0x88e   : > { %v8204_v46 = vpack.c.bf16 %v16791_v4, %v16791_v4 }
 0x88f   : > { %v8163_v25 = vadd.f32 %v8155_v45, %v8060_v7 }
 0x890   : > { %v8238_v10 = vunpack.c.l.b16 %v8204_v46 }
 0x891   : > { %v8177_v61 = vmul.f32 %v16761_v33, %v8163_v25  ;;  %v8146_v25 = vadd.f32 %v8145_v34, %v8104_v20  ;;  %v9621_v34 = vld [vmem:[%s17374_s16 + $0x40] sm:$0xff] }
 0x892   : > { %v8244_v11 = vpack.c.b16 %v8238_v10, %v8237_v50  ;;  %v8365_v10 = vrot.slane %v8293_v26, 1  ;;  %8655 = vmatpush.bf16.msra.mxu3 %v9621_v34  ;;  %v8404_v34 = vrot.slane %v8317_v27, 4 }
 0x893   : > { %v8189_v8 = vadd.f32 %v16768_v47, %v8177_v61  ;;  %v8298_v61 = vsel %vm16147_vm4, %v16799_v53, 0  ;;  %vm19232_vm4 = vnez %v19124_v29 }
 0x894   : > { %v8256_v52 = vshrl.u32 %v8244_v11, 16  ;;  %v8259_v9 = vshll.u32 %v8244_v11, 16  ;;  %v8032_v40 = vpop.f32.mrf.mxu2  ;;  %v8387_v3 = vrot.slane %v8298_v61, 4 }
 0x895   : > { %v8062_v42 = vadd.f32 %v8061_v55, %v8032_v40  ;;  %v16809_v7 = vmax.f32 %v8189_v8, 0.0 }
 0x896   : > { %v8258_v36 = vrot.slane %v8256_v52, 3  ;;  %v8261_v37 = vrot.slane %v8259_v9, 4  ;;  %v8064_v52 = vpop.f32.mrf.mxu3 }
 0x897   : > { %v8164_v21 = vadd.f32 %v8156_v13, %v8062_v42  ;;  %v8322_v13 = vor.u32 %v8321_v15, %v8317_v27  ;;  %v8205_v8 = vpack.c.bf16 %v16809_v7, %v16809_v7  ;;  %v8107_v15 = vpop.f32.mrf.mxu0 }
 0x898   : > { %v16807_v45 = vor.u32 %v8261_v37, %v8258_v36  ;;  %v8157_v36 = vsel %vm19233_vm13, %v8146_v25, 0.0  ;;  %vm19238_vm13 = vsmask.f32 7424 }
 0x899   : > { %v8178_v46 = vmul.f32 %v16761_v33, %v8164_v21 }
 0x89a   : > { %v16814_v50 = vsel %vm19230_vm1, %v8254_v43, %v16807_v45  ;;  %vm19236_vm1 = vnez %v19118_v59 }
 0x89b   : > { %v8190_v55 = vadd.f32 %v16768_v47, %v8178_v46  ;;  %v8308_v11 = vsel %vm16235_vm0, %v16814_v50, 0  ;;  %v8294_v20 = vsel %vm16204_vm14, %v16814_v50, 0  ;;  %v8324_v43 = vshll.u32 %v16814_v50, 16  ;;  %v8148_v46 = vpop.f32.mrf.mxu1 }
 0x89c   : > { %8459 = vrot.lane.b32.xlu2 %v8308_v11, %s19231_s25  ;;  %v16829_v9 = vrot.slane %v8294_v20, 1  ;;  %v8299_v28 = vsel %vm19232_vm4, %v16814_v50, 0  ;;  %v17757_v40 = vshrl.u32 %v16814_v50, 16  ;;  %vm19237_vm4 = vmpackc.low %vm19235_vm15, %vm19236_vm1  ;;  %vm19240_vm15 = vnez %v19100_v24 }
 0x89d   : > { %v16840_v42 = vmax.f32 %v8190_v55, 0.0  ;;  %v8035_v37 = vpop.f32.mrf.mxu2  ;;  %v8326_v21 = vrot.slane %v8324_v43, 1  ;;  %v8388_v11 = vrot.slane %v8299_v28, 4  ;;  %v16851_v20 = vsel %vm19237_vm4, %v16814_v50, 0 }
 0x89e   : > { %v8065_v26 = vadd.f32 %v8064_v52, %v8035_v37  ;;  %v8367_v29 = vsel %vm19234_vm2, %v8365_v10, %v16829_v9  ;;  %v8407_v10 = vrot.slane %v17757_v40, 4  ;;  %v8408_v52 = vrot.slane %v8324_v43, 5 }
 0x89f   : > { %v8206_v25 = vpack.c.bf16 %v16840_v42, %v16840_v42  ;;  %8374 = vrot.lane.b32.xlu1 %v8367_v29, %s18478_s9  ;;  %v8327_v55 = vsel %vm19238_vm13, %v8322_v13, %v8326_v21  ;;  %vm19239_vm2 = vnez %v19102_v30  ;;  %v8239_v37 = vunpack.c.l.b16 %v8205_v8  ;;  %v8066_v8 = vpop.f32.mrf.mxu3 }
 0x8a0   : > { %v8165_v28 = vadd.f32 %v8157_v36, %v8065_v26  ;;  %8352 = vrot.lane.b32.xlu0 %v8327_v55, %s18492_s30  ;;  %vm19241_vm1 = vmpackc.low %vm19239_vm2, %vm19240_vm15  ;;  %v8149_v63 = vadd.f32 %v8148_v46, %v8107_v15  ;;  %v8405_v13 = vrot.slane %v8319_v31, 5  ;;  %v8439_v43 = vrot.slane %v16851_v20, 5 }
 0x8a1   : > { %v8303_v59 = vsel %vm19241_vm1, %v16799_v53, 0  ;;  %v8240_v29 = vunpack.c.l.b16 %v8206_v25  ;;  %vm19242_vm4 = vcmask 1043456   ;;  %v8409_v61 = vor.u32 %v8408_v52, %v8407_v10 }
 0x8a2   : > { %v8179_v39 = vmul.f32 %v16761_v33, %v8165_v28  ;;  %v8389_v26 = vsel %vm19242_vm4, %v8387_v3, %v8388_v11  ;;  %v8438_v30 = vrot.slane %v8303_v59, 5  ;;  %vm19243_vm13 = vcmask 64512  }
 0x8a3   : > { %v8245_v36 = vpack.c.b16 %v8240_v29, %v8239_v37  ;;  %v8158_v40 = vsel %vm19243_vm13, %v8149_v63, 0.0  ;;  %v8406_v25 = vor.u32 %v8405_v13, %v8404_v34  ;;  %vm19244_vm2 = vcmask 1042432  }
 0x8a4   : > { %8396 = vrot.lane.b32.xlu2 %v8389_v26, %s18170_s29  ;;  %v8191_v31 = vadd.f32 %v16768_v47, %v8179_v39  ;;  %v8440_v46 = vsel %vm19244_vm2, %v8438_v30, %v8439_v43  ;;  %vm19246_vm15 = vsmask.f32 3328  ;;  %v8312_v63 = vsel %vm16118_vm10, %v16814_v50, 0 }
 0x8a5   : > { %v8265_v55 = vshrl.u32 %v8245_v36, 16  ;;  %v8268_v24 = vshll.u32 %v8245_v36, 16  ;;  %v8037_v27 = vpop.f32.mrf.mxu2  ;;  %v8410_v10 = vsel %vm19246_vm15, %v8406_v25, %v8409_v61  ;;  %vm19247_vm1 = vsmask.f32 4352 }
 0x8a6   : > { %v8067_v15 = vadd.f32 %v8066_v8, %v8037_v27  ;;  %v16881_v39 = vmax.f32 %v8191_v31, 0.0  ;;  %v8481_v29 = vrot.slane %v8312_v63, 1  ;;  %vm19248_vm4 = vnez %v19156_v58 }
 0x8a7   : > { %v8267_v28 = vrot.slane %v8265_v55, 3  ;;  %v8270_v3 = vrot.slane %v8268_v24, 4  ;;  %8447 = vrot.lane.b32.xlu1 %v8440_v46, %s19245_s28  ;;  %vm19249_vm10 = vnez %v19149_v23  ;;  %v19250_v49 = vshrl.u32 %v16814_v50, 16 }
 0x8a8   : > { %v8166_v52 = vadd.f32 %v8158_v40, %v8067_v15  ;;  %8425 = vrot.lane.b32.xlu0 %v8410_v10, %s18486_s27  ;;  %vm19252_vm13 = vcmask 1043456   ;;  %vm19254_vm15 = vcmask 130048  }
 0x8a9   : > { %v8271_v59 = vor.u32 %v8270_v3, %v8267_v28  ;;  %v8330_v24 = vor.u32 %v19250_v49, %v8326_v21 }
 0x8aa   : > { %v8180_v34 = vmul.f32 %v16761_v33, %v8166_v52 }
 0x8ab   : > { %v16886_v37 = vsel %vm19247_vm1, %v16807_v45, %v8271_v59  ;;  %vm19255_vm1 = vsmask.f32 7424 }
 0x8ac   : > { %v8192_v13 = vadd.f32 %v16768_v47, %v8180_v34  ;;  %v8313_v40 = vsel %vm16204_vm14, %v16886_v37, 0  ;;  %v8300_v32 = vsel %vm19248_vm4, %v16886_v37, 0  ;;  %v8295_v36 = vsel %vm19249_vm10, %v16886_v37, 0 }
 0x8ad   : > { %v8482_v33 = vrot.slane %v8313_v40, 1  ;;  %v8390_v26 = vrot.slane %v8300_v32, 4  ;;  %v8368_v30 = vrot.slane %v8295_v36, 1  ;;  %v8332_v45 = vshll.u32 %v16886_v37, 16 }
 0x8ae   : > { %v8207_v47 = vpack.c.bf16 %v16881_v39, %v16881_v39  ;;  %v16901_v55 = vmax.f32 %v8192_v13, 0.0  ;;  %v8336_v58 = vshrl.u32 %v16886_v37, 16  ;;  %vm19251_vm14 = vcmask 1046528  }
 0x8af   : > { %v8483_v27 = vsel %vm19251_vm14, %v8481_v29, %v8482_v33  ;;  %v8391_v8 = vsel %vm19252_vm13, %v8388_v11, %v8390_v26  ;;  %vm19253_vm2 = vmmov %vm19251_vm14  ;;  %v8334_v31 = vrot.slane %v8332_v45, 1  ;;  %vm19256_vm4 = vnez %v19147_v16 }
 0x8b0   : > { %v8369_v25 = vsel %vm19253_vm2, %v16829_v9, %v8368_v30  ;;  %v8208_v15 = vpack.c.bf16 %v16901_v55, %v16901_v55  ;;  %9499 = vmatmul.msk.bf16.vlgmr.msra.gmra.mxu3 %vm19254_vm15, %v8483_v27  ;;  %8398 = vrot.lane.b32.xlu0 %v8391_v8, %s18170_s29  ;;  %vm19257_vm14 = vnez %v19145_v2  ;;  %v8411_v9 = vrot.slane %v8336_v58, 4 }
 0x8b1   : > { %8376 = vrot.lane.b32.xlu2 %v8369_v25, %s18478_s9  ;;  %v8335_v21 = vsel %vm19255_vm1, %v8330_v24, %v8334_v31  ;;  %vm19258_vm13 = vmpackc.low %vm19256_vm4, %vm19257_vm14  ;;  %v8412_v46 = vrot.slane %v8332_v45, 5  ;;  %v8241_v28 = vunpack.c.l.b16 %v8207_v47  ;;  %vm19259_vm2 = vcmask 1042432  }
 0x8b2   : > { %v8305_v11 = vsel %vm19258_vm13, %v16886_v37, 0  ;;  %v8242_v3 = vunpack.c.l.b16 %v8208_v15  ;;  %8354 = vrot.lane.b32.xlu1 %v8335_v21, %s18492_s30  ;;  %vm19260_vm15 = vsmask.f32 3328  ;;  %vm19261_vm1 = vsmask.f32 4352 }
 0x8b3   : > { %v8441_v52 = vrot.slane %v8305_v11, 5  ;;  %v8413_v63 = vor.u32 %v8412_v46, %v8411_v9  ;;  %vm19262_vm4 = vcmask 1046528   ;;  %vm19264_vm14 = vsmask.f32 7424 }
 0x8b4   : > { %v8246_v10 = vpack.c.b16 %v8242_v3, %v8241_v28  ;;  %vm19265_vm13 = vnez %v19172_v14 }
 0x8b5   : > { %v8442_v2 = vsel %vm19259_vm2, %v8439_v43, %v8441_v52  ;;  %v8414_v16 = vsel %vm19260_vm15, %v8409_v61, %v8413_v63  ;;  %v8309_v43 = vsel %vm16532_vm5, %v16886_v37, 0  ;;  %v8338_v61 = vor.u32 %v8336_v58, %v8334_v31  ;;  %vm19266_vm2 = vmmov %vm19262_vm4 }
 0x8b6   : > { %v8274_v34 = vshrl.u32 %v8246_v10, 16  ;;  %v8277_v29 = vshll.u32 %v8246_v10, 16  ;;  %vm19267_vm15 = vnez %v19183_v17 }
 0x8b8   : > { %v8276_v13 = vrot.slane %v8274_v34, 3  ;;  %v8279_v40 = vrot.slane %v8277_v29, 4  ;;  %8469 = vrot.lane.b32.xlu0 %v8335_v21, %s9804_s1 }
 0x8b9   : > { %8449 = vrot.lane.b32.xlu2 %v8442_v2, %s19245_s28 }
 0x8ba   : > { %v8280_v32 = vor.u32 %v8279_v40, %v8276_v13  ;;  %8427 = vrot.lane.b32.xlu1 %v8414_v16, %s18486_s27 }
 0x8bc   : > { %v16931_v36 = vsel %vm19261_vm1, %v8271_v59, %v8280_v32  ;;  %v8288_v21 = vsel %vm16091_vm6, %v8280_v32, 0  ;;  %vm19268_vm1 = vnez %v19181_v57  ;;  %vm19272_vm6 = vcmask 1042432  }
 0x8bd   : > { %v8314_v45 = vsel %vm19249_vm10, %v16931_v36, 0  ;;  %v8340_v47 = vshll.u32 %v16931_v36, 16  ;;  %v8344_v20 = vshrl.u32 %v16931_v36, 16  ;;  %v8296_v23 = vsel %vm16519_vm7, %v16931_v36, 0 }
 0x8be   : > { %v8484_v49 = vrot.slane %v8314_v45, 1  ;;  %vm19263_vm10 = vcmask 130048   ;;  %v8301_v58 = vsel %vm19265_vm13, %v16931_v36, 0  ;;  %v8370_v31 = vrot.slane %v8296_v23, 1  ;;  %vm19273_vm13 = vmmov %vm19266_vm2  ;;  %v9616_v23 = vld [vmem:[%s17374_s16 + $0x18] sm:$0xff] }
 0x8bf   : > { %v8342_v24 = vrot.slane %v8340_v47, 1  ;;  %v8415_v8 = vrot.slane %v8344_v20, 4  ;;  %v8416_v25 = vrot.slane %v8340_v47, 5  ;;  %v8392_v15 = vrot.slane %v8301_v58, 4 }
 0x8c0   : > { %8461 = vrot.lane.b32.xlu0 %v8309_v43, %s19231_s25  ;;  %v8485_v59 = vsel %vm19262_vm4, %v8482_v33, %v8484_v49  ;;  %v8371_v11 = vsel %vm19266_vm2, %v8368_v30, %v8370_v31  ;;  %vm19269_vm4 = vmpackc.low %vm19267_vm15, %vm19268_vm1  ;;  %v8315_v28 = vsel %vm16519_vm7, %v8288_v21, 0  ;;  %v8348_v30 = vshll.u32 %v8288_v21, 16 }
 0x8c1   : > { %9500 = vmatmul.msk.bf16.gmra.mxu3 %vm19263_vm10, %v8485_v59  ;;  %v8343_v27 = vsel %vm19264_vm14, %v8338_v61, %v8342_v24  ;;  %v8417_v33 = vor.u32 %v8416_v25, %v8415_v8  ;;  %v8306_v9 = vsel %vm19269_vm4, %v16931_v36, 0  ;;  %vm19270_vm10 = vsmask.f32 3328  ;;  %v9620_v61 = vld [vmem:[%s17374_s16 + $0x38] sm:$0xff]  ;;  %v9618_v59 = vld [vmem:[%s17374_s16 + $0x28] sm:$0xff]  ;;  %v9613_v25 = vld [vmem:[%s17374_s16] sm:$0xff] }
 0x8c2   : > { %8356 = vrot.lane.b32.xlu2 %v8343_v27, %s18492_s30  ;;  %8471 = vrot.lane.b32.xlu1 %v8343_v27, %s9804_s1  ;;  %vm19271_vm14 = vcmask 1043456   ;;  %v8443_v51 = vrot.slane %v8306_v9, 5  ;;  %v8486_v3 = vrot.slane %v8315_v28, 1  ;;  %v8346_v10 = vor.u32 %v8344_v20, %v8342_v24  ;;  %v9619_v24 = vld [vmem:[%s17374_s16 + $0x30] sm:$0xff]  ;;  %v9614_v8 = vld [vmem:[%s17374_s16 + $0x8] sm:$0xff] }
 0x8c3   : > { %v8418_v14 = vsel %vm19270_vm10, %v8413_v63, %v8417_v33  ;;  %v8393_v46 = vsel %vm19271_vm14, %v8390_v26, %v8392_v15  ;;  %v8350_v57 = vrot.slane %v8348_v30, 1  ;;  %vm19274_vm2 = vcmask 130048   ;;  %8619 = vmatpush.bf16.msra.mxu2 %v9620_v61  ;;  %v9615_v27 = vld [vmem:[%s17374_s16 + $0x10] sm:$0xff] }
 0x8c4   : > { %v8444_v17 = vsel %vm19272_vm6, %v8441_v52, %v8443_v51  ;;  %v8487_v63 = vsel %vm19273_vm13, %v8484_v49, %v8486_v3  ;;  %vm19275_vm15 = vsmask.f32 7424  ;;  %v8310_v26 = vsel %vm16620_vm11, %v16931_v36, 0  ;;  %vm19280_vm6 = vmmov %vm19273_vm13 }
 0x8c5   : > { %v8351_v44 = vsel %vm19275_vm15, %v8346_v10, %v8350_v57  ;;  %vm19276_vm7 = vnez %v19196_v12  ;;  %vm19277_vm1 = vnez %v19191_v41  ;;  %vm19278_vm4 = vnez %v19189_v54 }
 0x8c6   : > { %v8302_v52 = vsel %vm19276_vm7, %v8288_v21, 0  ;;  %vm19279_vm10 = vmpackc.low %vm19277_vm1, %vm19278_vm4  ;;  %v8419_v29 = vshrl.u32 %v8288_v21, 16  ;;  %v8422_v16 = vrot.slane %v8348_v30, 5  ;;  %vm19281_vm13 = vnez %v19204_v0 }
 0x8c7   : > { %v8297_v34 = vsel %vm19279_vm10, %v8288_v21, 0  ;;  %v8394_v13 = vrot.slane %v8302_v52, 4  ;;  %vm19284_vm7 = vsmask.f32 3328  ;;  %vm19285_vm1 = vmmov %vm19280_vm6  ;;  %vm19286_vm4 = vcmask 130048   ;;  %8620 = vmatpush.bf16.msra.mxu2 %v9619_v24 }
 0x8c8   : > { %8378 = vrot.lane.b32.xlu0 %v8371_v11, %s18478_s9  ;;  %v8372_v40 = vrot.slane %v8297_v34, 1  ;;  %v8421_v2 = vrot.slane %v8419_v29, 4  ;;  %v8488_v20 = vsel %vm19285_vm1, %v8486_v3, %v10069_v60  ;;  %v8311_v49 = vsel %vm16680_vm9, %v8288_v21, 0 }
 0x8c9   : > { %v8395_v32 = vsel %vm19271_vm14, %v8392_v15, %v8394_v13  ;;  %vm19287_vm10 = vcmask 1042432   ;;  %vm19288_vm14 = vsmask.f32 7424  ;;  %v8289_v11 = vsel %vm16235_vm0, %v16799_v53, 0  ;;  %vm19293_vm0 = vmmov %vm19286_vm4 }
 0x8ca   : > { %8429 = vrot.lane.b32.xlu2 %v8418_v14, %s18486_s27  ;;  %8400 = vrot.lane.b32.xlu1 %v8393_v46, %s18170_s29  ;;  %v8373_v45 = vsel %vm19280_vm6, %v8370_v31, %v8372_v40  ;;  %v8423_v41 = vor.u32 %v8422_v16, %v8421_v2  ;;  %vm19289_vm6 = vmmov %vm19286_vm4  ;;  %v8290_v53 = vsel %vm16532_vm5, %v16814_v50, 0 }
 0x8cb   : > { %8621 = vmatpush.bf16.msra.mxu2 %v9618_v59  ;;  %vm19297_vm5 = vmmov %vm19293_vm0 }
 0x8cc   : > { %v8424_v47 = vsel %vm19284_vm7, %v8417_v33, %v8423_v41  ;;  %v8291_v41 = vsel %vm16620_vm11, %v16886_v37, 0  ;;  %v8292_v37 = vsel %vm16680_vm9, %v16931_v36, 0  ;;  %vm19301_vm11 = vmmov %vm19293_vm0 }
 0x8d0   : > { %8451 = vrot.lane.b32.xlu0 %v8444_v17, %s19245_s28 }
 0x8d1   : > { %9501 = vmatmul.msk.bf16.gmra.mxu3 %vm19274_vm2, %v8487_v63  ;;  %vm19282_vm2 = vnez %v19202_v48  ;;  %v8467_v48 = vor.u32 %v8419_v29, %v8350_v57 }
 0x8d2   : > { %8473 = vrot.lane.b32.xlu2 %v8351_v44, %s9804_s1  ;;  %8463 = vrot.lane.b32.xlu1 %v8310_v26, %s19231_s25  ;;  %vm19283_vm15 = vmpackc.low %vm19281_vm13, %vm19282_vm2  ;;  %vm19290_vm13 = vcmask 261120   ;;  %vm19291_vm2 = vcmask 392192  }
 0x8d3   : > { %v8307_v54 = vsel %vm19283_vm15, %v8288_v21, 0  ;;  %v8468_v43 = vsel %vm19288_vm14, %v8467_v48, %v10069_v60  ;;  %v9617_v60 = vld [vmem:[%s17374_s16 + $0x20] sm:$0xff]  ;;  %vm19292_vm15 = vcmask 523264   ;;  %vm19294_vm7 = vmmov %vm19290_vm13 }
 0x8d4   : > { %v8445_v12 = vrot.slane %v8307_v54, 5  ;;  %8622 = vmatpush.bf16.msra.mxu2 %v9617_v60  ;;  %vm19295_vm1 = vmmov %vm19291_vm2 }
 0x8d5   : > { %vm19299_vm14 = vmmov %vm19295_vm1 }
 0x8d6   : > { %v8446_v0 = vsel %vm19287_vm10, %v8443_v51, %v8445_v12  ;;  %vm19298_vm10 = vmmov %vm19294_vm7 }
 0x8d8   : > { %8358 = vrot.lane.b32.xlu0 %v8351_v44, %s18492_s30  ;;  %8623 = vmatpush.bf16.msra.mxu2 %v9616_v23 }
 0x8da   : > { %8402 = vrot.lane.b32.xlu2 %v8395_v32, %s18170_s29  ;;  %8380 = vrot.lane.b32.xlu1 %v8373_v45, %s18478_s9 }
 0x8dc   : > { %8624 = vmatpush.bf16.msra.mxu2 %v9615_v27 }
 0x8e0   : > { %8431 = vrot.lane.b32.xlu0 %v8424_v47, %s18486_s27  ;;  %8625 = vmatpush.bf16.msra.mxu2 %v9614_v8 }
 0x8e1   : > { %9502 = vmatmul.msk.bf16.gmra.mxu3 %vm19286_vm4, %v8488_v20  ;;  %vm19296_vm4 = vmmov %vm19292_vm15 }
 0x8e2   : > { %8465 = vrot.lane.b32.xlu2 %v8311_v49, %s19231_s25  ;;  %8453 = vrot.lane.b32.xlu1 %v8446_v0, %s19245_s28  ;;  %vm19306_vm9 = vmmov %vm19296_vm4  ;;  %s19343_s28 = sld [smem:[#allocation87_spill]] }
 0x8e4   : > { %8626 = vmatpush.bf16.msra.mxu2 %v9613_v25 }
 0x8e8   : > { %8475 = vrot.lane.b32.xlu0 %v8468_v43, %s9804_s1  ;;  %s19344_s29 = smov %s19343_s28  ;;  %s9188_s30 = scalar_lea.hbm %s19343_s28, %s9961_s8 }
 0x8e9   : > { %s9740_s1 = scalar_lea.hbm %s19344_s29, 2 }
 0x8f6   : > { %v8460_v58 = vpop.permute.xlu2 %8459 }
 0x8fe   : > { %v8397_v15 = vpop.permute.xlu2 %8396 }
 0x90b   : > { %v8377_v46 = vpop.permute.xlu2 %8376 }
 0x911   : > { %v8375_v31 = vpop.permute.xlu1 %8374 }
 0x912   : > { %v8353_v33 = vpop.permute.xlu0 %8352 }
 0x913   : > { %v8491_v14 = vsel %vm19289_vm6, %v8289_v11, %v8353_v33  ;;  %v8450_v57 = vpop.permute.xlu2 %8449  ;;  %vm19300_vm6 = vmmov %vm19296_vm4 }
 0x914   : > { %v8502_v28 = vsel %vm19290_vm13, %v8491_v14, %v8375_v31  ;;  %vm19302_vm13 = vmmov %vm19294_vm7 }
 0x915   : > { %v8510_v30 = vsel %vm19291_vm2, %v8502_v28, %v8397_v15  ;;  %vm19303_vm2 = vmmov %vm19295_vm1 }
 0x919   : > { %v8448_v9 = vpop.permute.xlu1 %8447 }
 0x91a   : > { %v8426_v21 = vpop.permute.xlu0 %8425 }
 0x91b   : > { %v8518_v3 = vsel %vm19292_vm15, %v8510_v30, %v8426_v21  ;;  %vm19304_vm15 = vmmov %vm19296_vm4 }
 0x91c   : > { %v8526_v17 = vsel %vm7914_vm12, %v8518_v3, %v8448_v9  ;;  %v8357_v29 = vpop.permute.xlu2 %8356 }
 0x91d   : > { %v8534_v63 = vsel %vm7923_vm3, %v8526_v17, %v8460_v58  ;;  %v8497_v47 = vsel %vm19297_vm5, %v8291_v41, %v8357_v29 }
 0x922   : > { %v8399_v51 = vpop.permute.xlu0 %8398 }
 0x924   : > { %v8355_v10 = vpop.permute.xlu1 %8354  ;;  %v8430_v38 = vpop.permute.xlu2 %8429 }
 0x925   : > { %v8494_v52 = vsel %vm19293_vm0, %v8290_v53, %v8355_v10  ;;  %vm19308_vm0 = vmmov %vm19296_vm4 }
 0x926   : > { %v8504_v34 = vsel %vm19294_vm7, %v8494_v52, %v8377_v46 }
 0x927   : > { %v8512_v40 = vsel %vm19295_vm1, %v8504_v34, %v8399_v51 }
 0x92a   : > { %v8470_v44 = vpop.permute.xlu0 %8469 }
 0x92b   : > { %v8542_v22 = vsel %vm7932_vm8, %v8534_v63, %v8470_v44 }
 0x92c   : > { %v8428_v26 = vpop.permute.xlu1 %8427  ;;  %8627 = vmatmul.bf16.vlgmr.msra.gmra.mxu2 %v8542_v22  ;;  %v8474_v61 = vpop.permute.xlu2 %8473 }
 0x92d   : > { %v8520_v2 = vsel %vm19296_vm4, %v8512_v40, %v8428_v26 }
 0x92e   : > { %v8528_v32 = vsel %vm7914_vm12, %v8520_v2, %v8450_v57 }
 0x932   : > { %v8462_v13 = vpop.permute.xlu0 %8461 }
 0x933   : > { %v8536_v45 = vsel %vm7923_vm3, %v8528_v32, %v8462_v13  ;;  %v8657_v14 = vpop.f32.mrf.mxu3 }
 0x934   : > { %v8472_v16 = vpop.permute.xlu1 %8471  ;;  %v8403_v8 = vpop.permute.xlu2 %8402 }
 0x935   : > { %v8545_v50 = vsel %vm7932_vm8, %v8536_v45, %v8472_v16 }
 0x93a   : > { %v8379_v54 = vpop.permute.xlu0 %8378 }
 0x93b   : > { %v8506_v20 = vsel %vm19298_vm10, %v8497_v47, %v8379_v54  ;;  %v8659_v46 = vpop.f32.mrf.mxu3 }
 0x93c   : > { %8632 = vmatmul.bf16.gmra.mxu2 %v8545_v50  ;;  %v8401_v12 = vpop.permute.xlu1 %8400  ;;  %v8466_v11 = vpop.permute.xlu2 %8465  ;;  %v8168_v50 = vld [vmem:[%s17379_s21 + $0x8] sm:$0xff] }
 0x93d   : > { %v8514_v49 = vsel %vm19299_vm14, %v8506_v20, %v8401_v12 }
 0x93e   : > { %v8522_v48 = vsel %vm19300_vm6, %v8514_v49, %v8430_v38  ;;  %v8167_v38 = vld [vmem:[%s17379_s21] sm:$0xff] }
 0x942   : > { %v8452_v0 = vpop.permute.xlu0 %8451 }
 0x943   : > { %v8530_v24 = vsel %vm7914_vm12, %v8522_v48, %v8452_v0 }
 0x944   : > { %v8464_v43 = vpop.permute.xlu1 %8463  ;;  %v8662_v30 = vpop.f32.mrf.mxu3 }
 0x945   : > { %v8538_v59 = vsel %vm7923_vm3, %v8530_v24, %v8464_v43 }
 0x946   : > { %v8548_v19 = vsel %vm7932_vm8, %v8538_v59, %v8474_v61  ;;  %v9639_v59 = vld [vmem:[%s17377_s19 + $0x88] sm:$0xff] }
 0x947   : > { %9090 = vmatpush.bf16.msrb.mxu3 %v9639_v59 }
 0x94a   : > { %v8359_v60 = vpop.permute.xlu0 %8358 }
 0x94b   : > { %v8500_v27 = vsel %vm19301_vm11, %v8292_v37, %v8359_v60 }
 0x94c   : > { %v8381_v23 = vpop.permute.xlu1 %8380  ;;  %8637 = vmatmul.bf16.gmra.mxu2 %v8548_v19  ;;  %v8664_v10 = vpop.f32.mrf.mxu3 }
 0x94d   : > { %v8508_v25 = vsel %vm19302_vm13, %v8500_v27, %v8381_v23  ;;  %v9637_v23 = vld [vmem:[%s17377_s19 + $0x78] sm:$0xff] }
 0x94e   : > { %v8516_v31 = vsel %vm19303_vm2, %v8508_v25, %v8403_v8  ;;  %9070 = vmatpush.bf16.msrb.mxu2 %v9637_v23 }
 0x952   : > { %v8432_v58 = vpop.permute.xlu0 %8431 }
 0x953   : > { %v8524_v33 = vsel %vm19304_vm15, %v8516_v31, %v8432_v58  ;;  %v9636_v31 = vld [vmem:[%s17377_s19 + $0x70] sm:$0xff]  ;;  %vm8772_vm15 = vsmask.f32 2304 }
 0x954   : > { %v8454_v15 = vpop.permute.xlu1 %8453  ;;  %v8667_v63 = vpop.f32.mrf.mxu3  ;;  %9071 = vmatpush.bf16.msrb.mxu2 %v9636_v31 }
 0x955   : > { %v8532_v21 = vsel %vm7914_vm12, %v8524_v33, %v8454_v15  ;;  %vm19307_vm12 = vmmov %vm19296_vm4  ;;  %v9628_v33 = vld [vmem:[%s17377_s19 + $0x30] sm:$0xff] }
 0x956   : > { %v8540_v56 = vsel %vm7923_vm3, %v8532_v21, %v8466_v11 }
 0x95a   : > { %v8476_v9 = vpop.permute.xlu0 %8475 }
 0x95b   : > { %v8551_v36 = vsel %vm7932_vm8, %v8540_v56, %v8476_v9  ;;  %vm19305_vm8 = vmmov %vm19296_vm4  ;;  %v9638_v56 = vld [vmem:[%s17377_s19 + $0x80] sm:$0xff] }
 0x95c   : > { %8642 = vmatmul.bf16.gmra.mxu2 %v8551_v36  ;;  %v8669_v22 = vpop.f32.mrf.mxu3  ;;  %9091 = vmatpush.bf16.msrb.mxu3 %v9638_v56 }
 0x964   : > { %v8672_v26 = vpop.f32.mrf.mxu3 }
 0x96c   : > { %v8674_v34 = vpop.f32.mrf.mxu3 }
 0x9af   : > { %v8628_v28 = vpop.f32.mrf.mxu2 }
 0x9b0   : > { %v8658_v51 = vadd.f32 %v8657_v14, %v8628_v28  ;;  %v19309_v14 = vld [vmem:[#allocation18_spill] sm:$0xff] }
 0x9b7   : > { %v8630_v3 = vpop.f32.mrf.mxu2 }
 0x9b8   : > { %v8660_v54 = vadd.f32 %v8659_v46, %v8630_v3  ;;  %v19310_v46 = vld [vmem:[#allocation13_spill] sm:$0xff] }
 0x9b9   : > { %v9627_v3 = vld [vmem:[%s17377_s19 + $0x28] sm:$0xff] }
 0x9bf   : > { %v8633_v17 = vpop.f32.mrf.mxu2 }
 0x9c0   : > { %v8663_v45 = vadd.f32 %v8662_v30, %v8633_v17  ;;  %v9635_v30 = vld [vmem:[%s17377_s19 + $0x68] sm:$0xff] }
 0x9c1   : > { %9072 = vmatpush.bf16.msrb.mxu2 %v9635_v30 }
 0x9c7   : > { %v8635_v57 = vpop.f32.mrf.mxu2 }
 0x9c8   : > { %v8665_v32 = vadd.f32 %v8664_v10, %v8635_v57  ;;  %v9624_v57 = vld [vmem:[%s17377_s19 + $0x10] sm:$0xff] }
 0x9cf   : > { %v8638_v44 = vpop.f32.mrf.mxu2 }
 0x9d0   : > { %v8668_v16 = vadd.f32 %v8667_v63, %v8638_v44 }
 0x9d7   : > { %v8640_v53 = vpop.f32.mrf.mxu2 }
 0x9d8   : > { %v8670_v2 = vadd.f32 %v8669_v22, %v8640_v53 }
 0x9df   : > { %v8643_v52 = vpop.f32.mrf.mxu2 }
 0x9e0   : > { %v8673_v40 = vadd.f32 %v8672_v26, %v8643_v52 }
 0x9e7   : > { %v8645_v29 = vpop.f32.mrf.mxu2 }
 0x9e8   : > { %v8675_v13 = vadd.f32 %v8674_v34, %v8645_v29  ;;  %v9634_v29 = vld [vmem:[%s17377_s19 + $0x60] sm:$0xff] }
 0x9e9   : > { %9073 = vmatpush.bf16.msrb.mxu2 %v9634_v29 }
 0x9ea   : > { %8691 = vmatpush.msrb.mxu0 %v8675_v13  ;;  %v9626_v13 = vld [vmem:[%s17377_s19 + $0x20] sm:$0xff] }
 0x9ec   : > { %8692 = vmatpush.msrb.mxu0 %v8673_v40 }
 0x9ee   : > { %8693 = vmatpush.msrb.mxu0 %v8670_v2  ;;  %v9623_v2 = vld [vmem:[%s17377_s19 + $0x8] sm:$0xff] }
 0x9f0   : > { %8694 = vmatpush.msrb.mxu0 %v8668_v16 }
 0x9f2   : > { %8695 = vmatpush.msrb.mxu0 %v8665_v32 }
 0x9f4   : > { %8696 = vmatpush.msrb.mxu0 %v8663_v45 }
 0x9f6   : > { %8697 = vmatpush.msrb.mxu0 %v8660_v54 }
 0x9f8   : > { %8698 = vmatpush.msrb.mxu0 %v8658_v51 }
 0x9f9   : > { %9503 = vmatmul.msk.f32.vlgmr.msrb.gmra.mxu0 %vm19305_vm8, %v8167_v38 }
 0x9fa   : > { %9106 = vmatpush.msra.mxu0 %v16901_v55 }
 0x9fc   : > { %9107 = vmatpush.msra.mxu0 %v16881_v39 }
 0x9fe   : > { %9108 = vmatpush.msra.mxu0 %v16840_v42  ;;  %v8777_v42 = vand.u32 3, %v19070_v1 }
 0xa00   : > { %9109 = vmatpush.msra.mxu0 %v16809_v7  ;;  %v8776_v7 = vand.u32 3, %v19068_v5  ;;  %vm8796_vm1 = vcmp.lt.s32.totalorder %v8777_v42, 3  ;;  %vm8779_vm14 = vcmp.gt.s32.totalorder %v8777_v42, 0 }
 0xa01   : > { %9504 = vmatmul.msk.f32.gmra.mxu0 %vm19306_vm9, %v8168_v50  ;;  %vm8798_vm5 = vmpackc.low %vm8796_vm1, %vm8796_vm1 }
 0xa02   : > { %9110 = vmatpush.msra.mxu0 %v16791_v4  ;;  %v9710_v4 = vld [vmem:[%s17375_s17] ss:$0 sm:$0xff]  ;;  %vm8795_vm7 = vcmp.lt.s32.totalorder %v8776_v7, 3  ;;  %v8800_v5 = vsel %vm8798_vm5, 65537, %v19077_v62  ;;  %vm8778_vm10 = vcmp.gt.s32.totalorder %v8776_v7, 0  ;;  %vm8781_vm11 = vmpackc.low %vm8779_vm14, %vm8779_vm14 }
 0xa03   : > { %vm8797_vm4 = vmpackc.low %vm8795_vm7, %vm8795_vm7  ;;  %v8802_v41 = vunpack.c.l.b16 %v8800_v5  ;;  %v8783_v47 = vsel %vm8781_vm11, 65537, %v19077_v62 }
 0xa04   : > { %9111 = vmatpush.msra.mxu0 %v16785_v6  ;;  %v8799_v39 = vsel %vm8797_vm4, 65537, %v19077_v62  ;;  %vm8780_vm6 = vmpackc.low %vm8778_vm10, %vm8778_vm10  ;;  %v8785_v61 = vunpack.c.l.b16 %v8783_v47 }
 0xa05   : > { %v8801_v55 = vunpack.c.l.b16 %v8799_v39  ;;  %v8782_v12 = vsel %vm8780_vm6, 65537, %v19077_v62  ;;  %v9629_v62 = vld [vmem:[%s17377_s19 + $0x38] sm:$0xff] }
 0xa06   : > { %9112 = vmatpush.msra.mxu0 %v16773_v18  ;;  %v8784_v43 = vunpack.c.l.b16 %v8782_v12  ;;  %v17114_v25 = vunpack.i.l.s16 %v8785_v61  ;;  %9056 = vmatpush.bf16.msrb.mxu1 %v9629_v62 }
 0xa07   : > { %v8803_v48 = vpack.c.b16 %v8802_v41, %v8801_v55 }
 0xa08   : > { %9113 = vmatpush.msra.mxu0 %v16775_v35  ;;  %v9711_v35 = vld [vmem:[%s17376_s18] ss:$0 sm:$0xff]  ;;  %v8786_v27 = vpack.c.b16 %v8785_v61, %v8784_v43  ;;  %v17112_v8 = vunpack.i.l.s16 %v8784_v43  ;;  %vm8792_vm2 = vcmp.ne.s32.totalorder %v17114_v25, %v19310_v46  ;;  %vm8847_vm5 = vcmp.ne.s32.totalorder %v17114_v25, %v19309_v14  ;;  %v9632_v43 = vld [vmem:[%s17377_s19 + $0x50] sm:$0xff] }
 0xa09   : > { %9584 = vmatmul.msk.f32.vlgmr.msra.gmra.mxu0 %vm19307_vm12, %v8167_v38  ;;  %v8824_v37 = vrot.slane %v8803_v48, 5  ;;  %v8804_v28 = vrot.slane %v8803_v48, 7  ;;  %v8852_v22 = vrot.slane %v8803_v48, 3  ;;  %v9633_v38 = vld [vmem:[%s17377_s19 + $0x58] sm:$0xff] }
 0xa0a   : > { %v8814_v36 = vrot.slane %v8786_v27, 6  ;;  %vm8791_vm13 = vcmp.ne.s32.totalorder %v17112_v8, %v19309_v14  ;;  %9057 = vmatpush.bf16.msrb.mxu1 %v9628_v33  ;;  %vm8841_vm4 = vcmp.ne.s32.totalorder %v17112_v8, %v19310_v46  ;;  %9074 = vmatpush.bf16.msrb.mxu2 %v9633_v38 }
 0xa0b   : > { %v8825_v11 = vunpack.c.l.b16 %v8824_v37  ;;  %v8826_v9 = vunpack.c.h.b16 %v8824_v37  ;;  %vm17142_vm9 = vmpackc.low %vm8792_vm2, %vm8791_vm13  ;;  %v8805_v44 = vunpack.c.l.b16 %v8804_v28  ;;  %v8806_v34 = vunpack.c.h.b16 %v8804_v28 }
 0xa0c   : > { %v8815_v63 = vunpack.c.l.b16 %v8814_v36  ;;  %v8816_v52 = vunpack.c.h.b16 %v8814_v36  ;;  %v8853_v16 = vunpack.c.l.b16 %v8852_v22  ;;  %v8854_v32 = vunpack.c.h.b16 %v8852_v22 }
 0xa0d   : > { %vm8829_vm8 = vcmp.ne.s32.totalorder %v8825_v11, %v19309_v14  ;;  %vm8830_vm12 = vcmp.ne.s32.totalorder %v8826_v9, %v19310_v46  ;;  %vm8809_vm14 = vcmp.ne.s32.totalorder %v8805_v44, %v19309_v14  ;;  %vm8810_vm11 = vcmp.ne.s32.totalorder %v8806_v34, %v19310_v46 }
 0xa0e   : > { %9058 = vmatpush.bf16.msrb.mxu1 %v9627_v3  ;;  %vm17156_vm1 = vmpackc.low %vm8830_vm12, %vm8829_vm8  ;;  %vm8819_vm10 = vcmp.ne.s32.totalorder %v8815_v63, %v19309_v14  ;;  %vm8820_vm6 = vcmp.ne.s32.totalorder %v8816_v52, %v19310_v46  ;;  %vm8857_vm12 = vcmp.ne.s32.totalorder %v8853_v16, %v19309_v14  ;;  %9075 = vmatpush.bf16.msrb.mxu2 %v9632_v43  ;;  %v9622_v16 = vld [vmem:[%s17377_s19] sm:$0xff] }
 0xa0f   : > { %vm17204_vm8 = vmpackc.low %vm8792_vm2, %vm8847_vm5  ;;  %vm19327_vm5 = vsmask.f32 3328  ;;  %v9712_v43 = vld [vmem:[%s17380_s22] ss:$0 sm:$0xff] }
 0xa10   : > { %vm17227_vm2 = vmpackc.low %vm8810_vm11, %vm8809_vm14  ;;  %vm19329_vm14 = vsmask.f32 7424  ;;  %vm19331_vm11 = vcmask 261120  }
 0xa11   : > { %9585 = vmatmul.msk.f32.gmra.mxu0 %vm19308_vm0, %v8168_v50  ;;  %vm19313_vm0 = vcmask 1042432  }
 0xa12   : > { %vm8773_vm7 = vmand %vm19313_vm0, %vm8772_vm15  ;;  %9059 = vmatpush.bf16.msrb.mxu1 %v9626_v13  ;;  %vm8858_vm0 = vcmp.ne.s32.totalorder %v8854_v32, %v19310_v46 }
 0xa13   : > { %vm17194_vm15 = vmpackc.low %vm8841_vm4, %vm8791_vm13  ;;  %vm19320_vm13 = vcmask 1044480  }
 0xa14   : > { %vm17244_vm4 = vmpackc.low %vm8858_vm0, %vm8857_vm12  ;;  %vm19335_vm12 = vcmask 523264  }
 0xa76   : > { %v8700_v6 = vpop.f32.mrf.mxu0 }
 0xa77   : > { %v8710_v18 = vmul.f32 %v9710_v4, %v8700_v6  ;;  %v9625_v6 = vld [vmem:[%s17377_s19 + $0x18] sm:$0xff] }
 0xa78   : > { %9060 = vmatpush.bf16.msrb.mxu1 %v9625_v6 }
 0xa79   : > { %v8716_v1 = vadd.f32 %v9711_v35, %v8710_v18 }
 0xa7b   : > { %v8718_v49 = vmax.f32 %v8716_v1, 0.0 }
 0xa7c   : > { %9061 = vmatpush.bf16.msrb.mxu1 %v9624_v57 }
 0xa7d   : > { %v8720_v60 = vpack.c.bf16 %v8718_v49, %v8718_v49 }
 0xa7e   : > { %v8703_v20 = vpop.f32.mrf.mxu0 }
 0xa7f   : > { %v8711_v0 = vmul.f32 %v9710_v4, %v8703_v20  ;;  %v8760_v15 = vunpack.c.l.b16 %v8720_v60 }
 0xa80   : > { %9062 = vmatpush.bf16.msrb.mxu1 %v9623_v2 }
 0xa81   : > { %v8717_v24 = vadd.f32 %v9711_v35, %v8711_v0 }
 0xa83   : > { %v8719_v19 = vmax.f32 %v8717_v24, 0.0 }
 0xa84   : > { %9063 = vmatpush.bf16.msrb.mxu1 %v9622_v16 }
 0xa85   : > { %v8721_v58 = vpack.c.bf16 %v8719_v19, %v8719_v19 }
 0xa87   : > { %v8761_v21 = vunpack.c.l.b16 %v8721_v58 }
 0xa89   : > { %v8762_v51 = vpack.c.b16 %v8761_v21, %v8760_v15  ;;  %v9631_v15 = vld [vmem:[%s17377_s19 + $0x48] sm:$0xff] }
 0xa8a   : > { %9076 = vmatpush.bf16.msrb.mxu2 %v9631_v15 }
 0xa8b   : > { %v8764_v10 = vshrl.u32 %v8762_v51, 16  ;;  %v8767_v17 = vshll.u32 %v8762_v51, 16 }
 0xa8d   : > { %v8766_v53 = vrot.slane %v8764_v10, 5  ;;  %v8769_v26 = vrot.slane %v8767_v17, 6 }
 0xa8f   : > { %v8770_v40 = vor.u32 %v8769_v26, %v8766_v53 }
 0xa91   : > { %v17166_v45 = vsel %vm8773_vm7, 0, %v8770_v40  ;;  %v17168_v54 = vsel %vm8773_vm7, %v8770_v40, 0  ;;  %vm17215_vm7 = vmpackc.low %vm8820_vm6, %vm8819_vm10  ;;  %vm19328_vm10 = vcmask 1043456   ;;  %vm19330_vm6 = vcmask 1042432   ;;  %v9630_v40 = vld [vmem:[%s17377_s19 + $0x40] sm:$0xff] }
 0xa92   : > { %v8832_v50 = vsel %vm17156_vm1, %v17166_v45, 0  ;;  %v8833_v7 = vsel %vm17156_vm1, %v17168_v54, 0  ;;  %v8863_v42 = vshrl.u32 %v17166_v45, 16  ;;  %v8865_v4 = vshll.u32 %v17166_v45, 16  ;;  %9077 = vmatpush.bf16.msrb.mxu2 %v9630_v40 }
 0xa93   : > { %v8903_v18 = vrot.slane %v8832_v50, 3  ;;  %v8904_v35 = vrot.slane %v8833_v7, 3  ;;  %v8870_v39 = vshll.u32 %v17168_v54, 16  ;;  %v8895_v5 = vshrl.u32 %v17168_v54, 16 }
 0xa94   : > { %v8915_v55 = vrot.slane %v8863_v42, 4  ;;  %v8916_v41 = vrot.slane %v8865_v4, 5  ;;  %v8867_v0 = vrot.slane %v8865_v4, 1  ;;  %v8850_v60 = vsel %vm17194_vm15, %v17166_v45, 0 }
 0xa95   : > { %v8905_v47 = vsel %vm19320_vm13, %v8903_v18, %v8904_v35  ;;  %v8918_v20 = vrot.slane %v8895_v5, 4  ;;  %v8919_v49 = vrot.slane %v8870_v39, 5  ;;  %v8851_v19 = vsel %vm17204_vm8, %v17168_v54, 0  ;;  %vm19337_vm13 = vmmov %vm19335_vm12 }
 0xa96   : > { %8906 = vrot.lane.b32.xlu1 %v8905_v47, %s18478_s9  ;;  %v8917_v61 = vor.u32 %v8916_v41, %v8915_v55  ;;  %vm8891_vm1 = vsmask.f32 5376  ;;  %v8872_v37 = vrot.slane %v8870_v39, 1  ;;  %v8822_v23 = vsel %vm17215_vm7, %v17166_v45, 0 }
 0xa97   : > { %v8920_v59 = vor.u32 %v8919_v49, %v8918_v20  ;;  %v8910_v62 = vrot.slane %v8850_v60, 4  ;;  %v8911_v27 = vrot.slane %v8851_v19, 4  ;;  %v8868_v58 = vor.u32 %v8867_v0, %v8863_v42  ;;  %v9152_v49 = vld [vmem:[%s17382_s24 + $0x18] sm:$0xff]  ;;  %v9151_v0 = vld [vmem:[%s17382_s24 + $0x10] sm:$0xff]  ;;  %v9149_v19 = vld [vmem:[%s17382_s24] sm:$0xff] }
 0xa98   : > { %v8823_v31 = vsel %vm17215_vm7, %v17168_v54, 0  ;;  %v8812_v33 = vsel %vm17227_vm2, %v17166_v45, 0  ;;  %v8813_v11 = vsel %vm17227_vm2, %v17168_v54, 0  ;;  %v8892_v9 = vrot.slane %v8863_v42, 2  ;;  %9169 = vmatpush.msra.mxu1 %v9152_v49 }
 0xa99   : > { %v8921_v25 = vsel %vm19327_vm5, %v8917_v61, %v8920_v59  ;;  %v8912_v21 = vsel %vm19328_vm10, %v8910_v62, %v8911_v27  ;;  %v8893_v56 = vrot.slane %v8865_v4, 3  ;;  %v8897_v36 = vrot.slane %v8895_v5, 2  ;;  %v9115_v5 = vpop.f32.mrf.mxu0  ;;  %v9150_v61 = vld [vmem:[%s17382_s24 + $0x8] sm:$0xff] }
 0xa9a   : > { %8922 = vrot.lane.b32.xlu0 %v8921_v25, %s19231_s25  ;;  %8913 = vrot.lane.b32.xlu2 %v8912_v21, %s18486_s27  ;;  %v8898_v14 = vrot.slane %v8870_v39, 3  ;;  %v8860_v46 = vsel %vm17244_vm4, %v17166_v45, 0  ;;  %v8861_v28 = vsel %vm17244_vm4, %v17168_v54, 0  ;;  %v8886_v51 = vrot.slane %v8822_v23, 2  ;;  %v9713_v23 = vld [vmem:[%s17381_s23] ss:$0 sm:$0xff] }
 0xa9b   : > { %v8894_v30 = vor.u32 %v8893_v56, %v8892_v9  ;;  %v8926_v3 = vrot.slane %v8860_v46, 5  ;;  %v8927_v10 = vrot.slane %v8861_v28, 5  ;;  %v8873_v17 = vsel %vm19329_vm14, %v8868_v58, %v8872_v37  ;;  %9170 = vmatpush.msra.mxu1 %v9151_v0 }
 0xa9c   : > { %v8887_v63 = vrot.slane %v8823_v31, 2  ;;  %v8899_v44 = vor.u32 %v8898_v14, %v8897_v36  ;;  %v8794_v22 = vsel %vm17142_vm9, %v17166_v45, 0  ;;  %v8878_v53 = vrot.slane %v8812_v33, 1  ;;  %vm19334_vm9 = vmmov %vm19331_vm11 }
 0xa9d   : > { %v8879_v26 = vrot.slane %v8813_v11, 1  ;;  %v8928_v52 = vsel %vm19330_vm6, %v8926_v3, %v8927_v10  ;;  %vm19332_vm15 = vcmask 1045504   ;;  %vm19333_vm8 = vcmask 1046528   ;;  %vm19336_vm0 = vmmov %vm19334_vm9  ;;  %9171 = vmatpush.msra.mxu1 %v9150_v61 }
 0xa9e   : > { %8874 = vrot.lane.b32.xlu1 %v8873_v17, %s18478_s9  ;;  %v8900_v34 = vsel %vm8891_vm1, %v8894_v30, %v8899_v44  ;;  %9583 = vmatmul.msk.bf16.vlgmr.msrb.gmra.mxu3 %vm19331_vm11, %v8928_v52  ;;  %v8888_v29 = vsel %vm19332_vm15, %v8886_v51, %v8887_v63  ;;  %vm19338_vm7 = vcmask 130048   ;;  %vm19340_vm2 = vmmov %vm19336_vm0  ;;  %s19345_s9 = sld [smem:[#allocation86_spill]]  ;;  %vm9177_vm5 = vcmask 73728  }
 0xa9f   : > { %v8880_v13 = vsel %vm19333_vm8, %v8878_v53, %v8879_v26  ;;  %v9121_v47 = vsel %vm19338_vm7, %v9115_v5, 0.0  ;;  %9172 = vmatpush.msra.mxu1 %v9149_v19  ;;  %vm19341_vm1 = vmmov %vm19336_vm0 }
 0xaa0   : > { %vm19342_vm4 = vmmov %vm19336_vm0 }
 0xaa1   : > { %v9118_v24 = vpop.f32.mrf.mxu0 }
 0xaa2   : > { %8889 = vrot.lane.b32.xlu0 %v8888_v29, %s19231_s25  ;;  %8881 = vrot.lane.b32.xlu2 %v8880_v13, %s18486_s27  ;;  %s9192_s25 = sshll.u32 %s9188_s30, 4  ;;  %s9193_s25 = int_to_ptr.hbm [resolvable:$true] %s9192_s25 }
 0xaa3   : > { %s9734_s10 = sshra.s32 %s9193_s25, 4  ;;  %s9735_s10 = int_to_ptr.hbm [resolvable:$true] %s9734_s10 }
 0xaa4   : > { %v9153_v17 = vld [vmem:[%s19345_s9] sm:$0x1]  ;;  %s9736_s11 = scalar_lea.hbm %s9735_s10, 1  ;;  %p9741_p0 = scmp.lt.s32.totalorder %s9735_s10, %s19344_s29 }
 0xaa5   : > { %p9737_p11 = scmp.ne.s32.totalorder %s9735_s10, %s9736_s11  ;;  %p9742_p1 = scmp.lt.s32.totalorder %s9740_s1, %s9736_s11 }
 0xaa7   : > { %p9738_p12 = pnand %p9737_p11, %p9978_p5  ;;  %p9743_p2 = por %p9742_p1, %p9741_p0 }
 0xaa9   : > { %p9739_p13 = pneg %p9738_p12 }
 0xaab   : > { %p9744_p3 = pnand %p9743_p2, %p9739_p13 }
 0xaf4   : > { %v8914_v32 = vpop.permute.xlu2 %8913 }
 0xafc   : > { %v8882_v6 = vpop.permute.xlu2 %8881 }
 0xb08   : > { %v8907_v45 = vpop.permute.xlu1 %8906 }
 0xb09   : > { %v8939_v54 = vsel %vm19334_vm9, %v8900_v34, %v8907_v45 }
 0xb0a   : > { %v8941_v38 = vsel %vm19335_vm12, %v8939_v54, %v8914_v32 }
 0xb0c   : > { %v8923_v50 = vpop.permute.xlu0 %8922 }
 0xb0d   : > { %v8943_v7 = vsel %vm7923_vm3, %v8941_v38, %v8923_v50 }
 0xb0e   : > { %9078 = vmatmul.bf16.vlgmr.msrb.gmra.mxu2 %v8943_v7 }
 0xb10   : > { %v8875_v42 = vpop.permute.xlu1 %8874 }
 0xb11   : > { %v8931_v4 = vsel %vm19336_vm0, %v8794_v22, %v8875_v42 }
 0xb12   : > { %v8933_v18 = vsel %vm19337_vm13, %v8931_v4, %v8882_v6 }
 0xb14   : > { %v8890_v35 = vpop.permute.xlu0 %8889 }
 0xb15   : > { %v8935_v39 = vsel %vm7923_vm3, %v8933_v18, %v8890_v35  ;;  %vm19339_vm3 = vmmov %vm19338_vm7 }
 0xb16   : > { %9064 = vmatmul.bf16.vlgmr.msrb.gmra.mxu1 %v8935_v39  ;;  %v9122_v8 = vsel %vm19339_vm3, %v9118_v24, 0.0 }
 0xb21   : > { %v9093_v41 = vpop.f32.mrf.mxu3 }
 0xb29   : > { %v9095_v27 = vpop.f32.mrf.mxu3 }
 0xb91   : > { %v9079_v1 = vpop.f32.mrf.mxu2 }
 0xb93   : > { %v9065_v55 = vpop.f32.mrf.mxu1 }
 0xb94   : > { %v9080_v12 = vadd.f32 %v9079_v1, %v9065_v55 }
 0xb96   : > { %v9094_v20 = vadd.f32 %v9093_v41, %v9080_v12 }
 0xb98   : > { %v9123_v48 = vadd.f32 %v9121_v47, %v9094_v20 }
 0xb99   : > { %v9081_v60 = vpop.f32.mrf.mxu2 }
 0xb9a   : > { %v9129_v37 = vmul.f32 %v9712_v43, %v9123_v48 }
 0xb9b   : > { %v9067_v59 = vpop.f32.mrf.mxu1 }
 0xb9c   : > { %v9082_v62 = vadd.f32 %v9081_v60, %v9067_v59  ;;  %v9135_v58 = vadd.f32 %v9713_v23, %v9129_v37 }
 0xb9e   : > { %v9096_v25 = vadd.f32 %v9095_v27, %v9082_v62  ;;  %v9137_v15 = vmax.f32 %v9135_v58, 0.0 }
 0xba0   : > { %v9124_v31 = vadd.f32 %v9122_v8, %v9096_v25  ;;  %v9139_v9 = vsel %vm19340_vm2, %v9137_v15, 0.0 }
 0xba2   : > { %v9130_v33 = vmul.f32 %v9712_v43, %v9124_v31 }
 0xba4   : > { %v9136_v21 = vadd.f32 %v9713_v23, %v9130_v33 }
 0xba6   : > { %v9138_v11 = vmax.f32 %v9136_v21, 0.0 }
 0xba8   : > { %v9140_v56 = vsel %vm19341_vm1, %v9138_v11, 0.0 }
 0xba9   : > { %v9141_v36 = vadd.f32 %v9140_v56, %v9139_v9 }
 0xbab   : > { %v9142_v14 = vrot.slane %v9141_v36, 4 }
 0xbad   : > { %v9143_v46 = vadd.f32 %v9142_v14, %v9141_v36 }
 0xbaf   : > { %v9144_v28 = vrot.slane %v9143_v46, 2 }
 0xbb1   : > { %v9145_v51 = vadd.f32 %v9144_v28, %v9143_v46 }
 0xbb3   : > { %v9146_v30 = vrot.slane %v9145_v51, 1 }
 0xbb5   : > { %v9147_v3 = vadd.f32 %v9146_v30, %v9145_v51 }
 0xbb7   : > { %v9148_v10 = vmul.f32 0.0625, %v9147_v3 }
 0xbb9   : > { %9586 = vmatmul.msk.f32.vlgmr.msra.gmra.mxu1 %vm19342_vm4, %v9148_v10 }
 0xc36   : > { %v9174_v63 = vpop.f32.mrf.mxu1 }
 0xc37   : > { %v9175_v44 = vadd.f32 %v9174_v63, %v9153_v17 }
 0xc39   : > { %9178 = vst.msk [vmem:[%s783_s26] sm:$0x1] %vm9177_vm5, %v9175_v44 }
 0xc3a   : > { %9747 = shalt.err (!%p9744_p3)
}
 0xc3b   : > { %9640 = dma.vmem_to_hbm [thread:$0]  (%p9978_p5), %s9191_s7, 16, %s9193_s25, %s9180_s6  }
 0xc3c PF: > { %s19347_s0 = sld [smem:[#allocation7_spill]] }
 0xc3d   : > { %s19348_s5 = sld [smem:[#allocation5_spill]] }
 0xc42   : > { %p9646_p4 = scmp.ge.s32.totalorder %s19347_s0, 2 }
 0xc43   : > { %s9204_s9 = sand.u32 1, %s19348_s5  }
 0xc44   : > { %p9643_p7 = pnand %p9646_p4, %p9982_p6  ;;  %s9205_s26 = scalar_lea.sflag [#allocation3], %s9204_s9 }
 0xc46   : > { %p9644_p8 = pneg %p9643_p7 }
 0xc48   : > { %9765 = dma.done.wait (%p9644_p8), %s9205_s26, 16  }
 0xc49   : > { %9767 = vsyncadd (%p9644_p8), %s9205_s26, 4294967280  ;;  %s19350_s28 = sld [smem:[#allocation8_spill]]  ;;  %s19353_s27 = smov %s9774_s3 }
 0xc4a   : > { %s19351_s11 = sld [smem:[#allocation6_spill]] }
 0xc4b   : > { %s19352_s7 = sld [smem:[#allocation9_spill]] }
 0xc4f   : > { %p36_p9 = scmp.ge.s32.totalorder %s19350_s28, 4  }
 0xc50   : > { %s19354_s3 = smov %s19351_s11 }
 0xc51   :  { %38 = sbr.rel (!%p36_p9) target bundleno = 18 (0x12), region = 159 }
 0xc56   :  { %9210 = vsyncpa [#allocation3], 1 }
 0xc57   :  { %9212 = vsyncpa [#allocation3 + $0x1], 1 }

</bundles_post_ra>
